<compile_context>
chip_gen: v7x
topology: tpu7x:2x2x1
jax: 0.10.0
libtpu: 0.0.40
codegen_flags: <defaults>
</compile_context>

<pallas_src>
import math

import numpy as np
import jax
import jax.numpy as jnp
from jax.experimental import pallas as pl
from jax.experimental.pallas import tpu as pltpu

# ----------------------------- hyper-params (hp) -----------------------------
VOCAB = 32
ENC_HIDDEN = 32
DEC_HIDDEN = 32
ENC_LAYERS = 2
DEC_LAYERS = 2
N_HEADS = 2
D_K = 16
D_V = 16
FFT_FILTER = 64
FFT_KERNEL = (9, 1)
VAR_FILTER = 32
VAR_KERNEL = 3
N_BINS = 16
N_MEL = 16
POSTNET_DIM = 32
POSTNET_KERNEL = 5
POSTNET_LAYERS = 5
MAX_SRC_LEN = 64
MAX_MEL_LEN = 32
VOCODER = "griffin_lim"  # not 'WORLD' -> mel path

_PARALLEL = pltpu.CompilerParams(dimension_semantics=("parallel",))

_FFT_KEYS = ("wq", "bq", "wk", "bk", "wv", "bv", "wfc", "bfc",
             "ln1g", "ln1b", "w1", "b1", "w2", "b2", "ln2g", "ln2b")
_VP_KEYS = ("w1", "b1", "g1", "bb1", "w2", "b2", "g2", "bb2", "wo", "bo")


def _fs(arr):
    """Full-array BlockSpec (weights / biases shared across the batch grid)."""
    nd = arr.ndim
    return pl.BlockSpec(arr.shape, lambda b, _nd=nd: (0,) * _nd)


# ----------------------------- in-kernel building blocks ----------------------
def _layer_norm(v, g, b, eps=1e-5):
    mu = jnp.mean(v, axis=-1, keepdims=True)
    var = jnp.mean(jnp.square(v - mu), axis=-1, keepdims=True)
    return (v - mu) * jax.lax.rsqrt(var + eps) * g + b


def _conv1d_same(x, w, b, kernel):
    """'same'-padded 1D conv as a single im2col matmul.

    x: (S, Cin); w: (kernel*Cin, Cout) in tap-major order; b: (1, Cout)."""
    S, cin = x.shape
    pad = (kernel - 1) // 2
    zp = jnp.zeros((pad, cin), jnp.float32)
    xp = jnp.concatenate([zp, x, zp], axis=0)                     # (S+K-1, Cin)
    cols = jnp.concatenate([xp[k:k + S, :] for k in range(kernel)], axis=-1)
    return jnp.dot(cols, w, preferred_element_type=jnp.float32) + b


def _fft_layer_body(x, attn_bias, keep, l, refs, n_heads, conv_k):
    """One FFT block (MHA + FC + res + LN + mask + conv9/relu/conv1 + res + LN + mask).

    refs are layer-stacked weight Refs indexed at layer l."""
    (wq, bq, wk, bk, wv, bv, wfc, bfc,
     ln1g, ln1b, w1, b1, w2, b2, ln2g, ln2b) = refs
    S, H = x.shape

    attn = jnp.zeros((S, H), jnp.float32)
    for h in range(n_heads):
        # 1/sqrt(d_k) is pre-folded into wq/bq at init.
        q = jnp.dot(x, wq[l, h], preferred_element_type=jnp.float32) + bq[l, h]
        kk = jnp.dot(x, wk[l, h], preferred_element_type=jnp.float32) + bk[l, h]
        v = jnp.dot(x, wv[l, h], preferred_element_type=jnp.float32) + bv[l, h]
        s = jax.lax.dot_general(q, kk, (((1,), (1,)), ((), ())),
                                preferred_element_type=jnp.float32)
        s = s + attn_bias                                   # additive -1e9 key mask
        s = s - jnp.max(s, axis=-1, keepdims=True)
        e = jnp.exp(s)
        p = e * pl.reciprocal(jnp.sum(e, axis=-1, keepdims=True), approx=True)
        ctx = jnp.dot(p, v, preferred_element_type=jnp.float32)
        attn = attn + jnp.dot(ctx, wfc[l, h], preferred_element_type=jnp.float32)

    y = _layer_norm(attn + bfc[l] + x, ln1g[l], ln1b[l]) * keep

    # position-wise FFN: conv(k=9, same) -> relu -> conv(k=1)
    a = jnp.maximum(_conv1d_same(y, w1[l], b1[l], conv_k), 0.0)
    z = jnp.dot(a, w2[l], preferred_element_type=jnp.float32) + b2[l]
    return _layer_norm(z + y, ln2g[l], ln2b[l]) * keep


def _var_predictor_body(x, keep, w1, b1, g1, bb1, w2, b2, g2, bb2, wo, bo, conv_k):
    y = jnp.maximum(_conv1d_same(x, w1, b1, conv_k), 0.0)
    y = _layer_norm(y, g1, bb1)
    y = jnp.maximum(_conv1d_same(y, w2, b2, conv_k), 0.0)
    y = _layer_norm(y, g2, bb2)
    out = jnp.dot(y, wo, preferred_element_type=jnp.float32) + bo
    return out * keep


# ----------------------------- kernel 1: encoder + duration -------------------
def _make_encoder_kernel(n_layers, n_heads, fft_k, var_k):
    def kernel(x_ref, bias_ref, keep_ref,
               wq, bq, wk, bk, wv, bv, wfc, bfc, ln1g, ln1b,
               w1, b1, w2, b2, ln2g, ln2b,
               dw1, db1, dg1, dbb1, dw2, db2, dg2, dbb2, dwo, dbo,
               enc_ref, dur_ref):
        x = x_ref[0]                  # (S, H)
        bias = bias_ref[0]            # (1, S) additive key mask
        keep = keep_ref[0]            # (S, 1) 0.0 on padded steps
        fft_refs = (wq, bq, wk, bk, wv, bv, wfc, bfc, ln1g, ln1b,
                    w1, b1, w2, b2, ln2g, ln2b)
        for l in range(n_layers):
            x = _fft_layer_body(x, bias, keep, l, fft_refs, n_heads, fft_k)
        enc_ref[0] = x
        dur_ref[0] = _var_predictor_body(
            x, keep, dw1[...], db1[...], dg1[...], dbb1[...],
            dw2[...], db2[...], dg2[...], dbb2[...], dwo[...], dbo[...], var_k)
    return kernel


def fused_encoder(x, attn_bias, keep, stack, dur):
    B, S, H = x.shape
    args = (x, attn_bias, keep) + tuple(stack[k] for k in _FFT_KEYS) + \
           tuple(dur[k] for k in _VP_KEYS)
    in_specs = [pl.BlockSpec((1, S, H), lambda b: (b, 0, 0)),
                pl.BlockSpec((1, 1, S), lambda b: (b, 0, 0)),
                pl.BlockSpec((1, S, 1), lambda b: (b, 0, 0))] + \
               [_fs(a) for a in args[3:]]
    return pl.pallas_call(
        _make_encoder_kernel(ENC_LAYERS, N_HEADS, FFT_KERNEL[0], VAR_KERNEL),
        grid=(B,),
        out_shape=(jax.ShapeDtypeStruct((B, S, H), jnp.float32),
                   jax.ShapeDtypeStruct((B, S, 1), jnp.float32)),
        in_specs=in_specs,
        out_specs=(pl.BlockSpec((1, S, H), lambda b: (b, 0, 0)),
                   pl.BlockSpec((1, S, 1), lambda b: (b, 0, 0))),
        compiler_params=_PARALLEL,
    )(*args)


# ----------------------------- kernel 2: pitch + energy (merged) --------------
def _make_pitch_energy_kernel(var_k):
    def kernel(x_ref, keep_ref, w1, b1, g1, bb1, w2, b2, g2, bb2, wo, bo, o_ref):
        x = x_ref[0]
        keep = keep_ref[0]
        outs = [_var_predictor_body(x, keep, w1[p], b1[p], g1[p], bb1[p],
                                    w2[p], b2[p], g2[p], bb2[p],
                                    wo[p], bo[p], var_k)
                for p in range(2)]                      # p=0 pitch, p=1 energy
        o_ref[0] = jnp.concatenate(outs, axis=-1)       # (T, 2) lane-packed
    return kernel


def fused_pitch_energy(x, keep, pe):
    B, T, H = x.shape
    args = (x, keep) + tuple(pe[k] for k in _VP_KEYS)
    in_specs = [pl.BlockSpec((1, T, H), lambda b: (b, 0, 0)),
                pl.BlockSpec((1, T, 1), lambda b: (b, 0, 0))] + \
               [_fs(a) for a in args[2:]]
    return pl.pallas_call(
        _make_pitch_energy_kernel(VAR_KERNEL),
        grid=(B,),
        out_shape=jax.ShapeDtypeStruct((B, T, 2), jnp.float32),
        in_specs=in_specs,
        out_specs=pl.BlockSpec((1, T, 2), lambda b: (b, 0, 0)),
        compiler_params=_PARALLEL,
    )(*args)


# ----------------------------- kernel 3: decoder + mel_linear + PostNet -------
def _make_decoder_kernel(n_layers, n_heads, fft_k, post_k, post_layers, n_mel, pdim):
    bn_scale = 1.0 / math.sqrt(1.0 + 1e-5)   # BN eval mode, running stats (0, 1)

    def kernel(x_ref, bias_ref, keep_ref,
               wq, bq, wk, bk, wv, bv, wfc, bfc, ln1g, ln1b,
               w1, b1, w2, b2, ln2g, ln2b,
               wm, bm, pW, pb, pg, pbb,
               mel_ref, post_ref):
        x = x_ref[0]
        bias = bias_ref[0]
        keep = keep_ref[0]
        fft_refs = (wq, bq, wk, bk, wv, bv, wfc, bfc, ln1g, ln1b,
                    w1, b1, w2, b2, ln2g, ln2b)
        for l in range(n_layers):
            x = _fft_layer_body(x, bias, keep, l, fft_refs, n_heads, fft_k)

        # mel_linear (weight zero-padded to pdim columns at init -> no in-kernel pad)
        mel32 = jnp.dot(x, wm[...], preferred_element_type=jnp.float32) + bm[...]
        mel_ref[0] = mel32[:, :n_mel]

        cur = mel32
        for i in range(post_layers):
            acc = _conv1d_same(cur, pW[i], pb[i], post_k)
            acc = acc * (pg[i] * bn_scale) + pbb[i]      # BN(eval) folded affine
            if i < post_layers - 1:
                acc = jnp.tanh(acc)
            cur = acc
        post_ref[0] = mel32[:, :n_mel] + cur[:, :n_mel]
    return kernel


def fused_decoder_mel_postnet(x, attn_bias, keep, stack, mel_lin, post):
    B, T, H = x.shape
    args = (x, attn_bias, keep) + tuple(stack[k] for k in _FFT_KEYS) + \
           (mel_lin["w"], mel_lin["b"], post["W"], post["b"], post["g"], post["bb"])
    in_specs = [pl.BlockSpec((1, T, H), lambda b: (b, 0, 0)),
                pl.BlockSpec((1, 1, T), lambda b: (b, 0, 0)),
                pl.BlockSpec((1, T, 1), lambda b: (b, 0, 0))] + \
               [_fs(a) for a in args[3:]]
    return pl.pallas_call(
        _make_decoder_kernel(DEC_LAYERS, N_HEADS, FFT_KERNEL[0],
                             POSTNET_KERNEL, POSTNET_LAYERS, N_MEL, POSTNET_DIM),
        grid=(B,),
        out_shape=(jax.ShapeDtypeStruct((B, T, N_MEL), jnp.float32),
                   jax.ShapeDtypeStruct((B, T, N_MEL), jnp.float32)),
        in_specs=in_specs,
        out_specs=(pl.BlockSpec((1, T, N_MEL), lambda b: (b, 0, 0)),
                   pl.BlockSpec((1, T, N_MEL), lambda b: (b, 0, 0))),
        compiler_params=_PARALLEL,
    )(*args)


# ----------------------------- glue helpers -----------------------------------
def sinusoid_table(n_pos, d):
    pos = np.arange(n_pos)[:, None].astype(np.float64)
    i = np.arange(d)[None, :].astype(np.float64)
    angle = pos / np.power(10000.0, 2.0 * (i // 2) / d)
    tab = np.zeros((n_pos, d))
    tab[:, 0::2] = np.sin(angle[:, 0::2])
    tab[:, 1::2] = np.cos(angle[:, 1::2])
    return jnp.asarray(tab, jnp.float32)


def get_mask_from_lengths(lengths, max_len):
    ids = jnp.arange(max_len)
    return ids[None, :] >= lengths[:, None]   # True = padding


def length_regulator(x, durations, max_len):
    """x: (B,S,H); durations: (B,S) int32 -> (B,max_len,H), mel_len (B,)."""
    # TODO(synk): data-dependent repeat_interleave has no static-shape Pallas
    # equivalent; implemented as a plain-JAX gather capped at max_len.
    B, S, H = x.shape
    cum = jnp.cumsum(durations, axis=1)
    total = cum[:, -1]
    frames = jnp.arange(max_len)
    idx = jnp.sum(cum[:, None, :] <= frames[None, :, None], axis=-1)
    idx = jnp.minimum(idx, S - 1)
    expanded = jnp.take_along_axis(x, idx[..., None], axis=1)
    valid = (frames[None, :] < total[:, None]).astype(x.dtype)
    expanded = expanded * valid[..., None]
    mel_len = jnp.minimum(total, max_len).astype(jnp.int32)
    return expanded, mel_len


# ----------------------------- forward pass -----------------------------------
def fastspeech2_forward(params, src_seq, src_len, max_src_len, max_mel_len):
    src_mask = get_mask_from_lengths(src_len, max_src_len)          # True = pad
    src_pad_f = src_mask.astype(jnp.float32)
    src_bias = (-1e9) * src_pad_f[:, None, :]                       # (B,1,S)
    src_keep = (1.0 - src_pad_f)[:, :, None]                        # (B,S,1)

    B, S = src_seq.shape
    x = params["src_emb"][src_seq] + params["enc_pos"][:S][None, :, :]

    # kernel 1: full encoder FFT stack + duration predictor (1 launch)
    enc_out, log_d = fused_encoder(x, src_bias, src_keep,
                                   params["enc_stack"], params["dur_pred"])
    log_d = log_d[..., 0]

    d_round = jnp.clip(jnp.round(jnp.exp(log_d) - 1.0), 0.0, None)
    d_round = (d_round * (1.0 - src_pad_f)).astype(jnp.int32)
    x_exp, mel_len = length_regulator(enc_out, d_round, max_mel_len)
    mel_mask = get_mask_from_lengths(mel_len, max_mel_len)
    mel_pad_f = mel_mask.astype(jnp.float32)
    mel_keep = (1.0 - mel_pad_f)[:, :, None]
    mel_bias = (-1e9) * mel_pad_f[:, None, :]

    # kernel 2: merged pitch + energy predictors (1 launch, lane-packed output)
    pe = fused_pitch_energy(x_exp, mel_keep, params["pe_pred"])
    p_pred, e_pred = pe[..., 0], pe[..., 1]
    # TODO(synk): verify jnp.digitize edge semantics vs torch.bucketize on exact bin edges.
    p_emb = params["pitch_emb"][jnp.digitize(p_pred, params["pitch_bins"])]
    e_emb = params["energy_emb"][jnp.digitize(e_pred, params["energy_bins"])]
    va_out = x_exp + p_emb + e_emb

    # kernel 3: decoder FFT stack + mel_linear + PostNet (1 launch)
    dec_in = va_out + params["dec_pos"][:max_mel_len][None, :, :]
    mel_output, mel_output_postnet = fused_decoder_mel_postnet(
        dec_in, mel_bias, mel_keep, params["dec_stack"],
        params["mel_linear"], params["postnet"])

    return (mel_output, mel_output_postnet, log_d, p_pred, e_pred,
            src_mask, mel_mask, mel_len)


# ----------------------------- parameter init ---------------------------------
def init_params(key):
    keys = iter(jax.random.split(key, 1024))

    def rnd(shape, scale=0.02):
        return jax.random.normal(next(keys), shape, jnp.float32) * scale

    q_scale = 1.0 / math.sqrt(D_K)

    def fft_layer(d_model):
        return {
            "wq": rnd((N_HEADS, d_model, D_K)) * q_scale,   # 1/sqrt(d_k) folded in
            "bq": jnp.zeros((N_HEADS, 1, D_K), jnp.float32),
            "wk": rnd((N_HEADS, d_model, D_K)),
            "bk": jnp.zeros((N_HEADS, 1, D_K), jnp.float32),
            "wv": rnd((N_HEADS, d_model, D_V)),
            "bv": jnp.zeros((N_HEADS, 1, D_V), jnp.float32),
            "wfc": rnd((N_HEADS, D_V, d_model)),
            "bfc": jnp.zeros((1, d_model), jnp.float32),
            "ln1g": jnp.ones((1, d_model), jnp.float32),
            "ln1b": jnp.zeros((1, d_model), jnp.float32),
            "w1": rnd((FFT_KERNEL[0] * d_model, FFT_FILTER)),   # im2col (K*Cin, Cout)
            "b1": jnp.zeros((1, FFT_FILTER), jnp.float32),
            "w2": rnd((FFT_FILTER, d_model)),                   # kernel-1 conv
            "b2": jnp.zeros((1, d_model), jnp.float32),
            "ln2g": jnp.ones((1, d_model), jnp.float32),
            "ln2b": jnp.zeros((1, d_model), jnp.float32),
        }

    def stack_layers(layers):
        return {k: jnp.stack([lyr[k] for lyr in layers], axis=0) for k in layers[0]}

    def var_pred(h):
        return {"w1": rnd((VAR_KERNEL * h, VAR_FILTER)),        # im2col (K*Cin, Cout)
                "b1": jnp.zeros((1, VAR_FILTER), jnp.float32),
                "g1": jnp.ones((1, VAR_FILTER), jnp.float32),
                "bb1": jnp.zeros((1, VAR_FILTER), jnp.float32),
                "w2": rnd((VAR_KERNEL * VAR_FILTER, VAR_FILTER)),
                "b2": jnp.zeros((1, VAR_FILTER), jnp.float32),
                "g2": jnp.ones((1, VAR_FILTER), jnp.float32),
                "bb2": jnp.zeros((1, VAR_FILTER), jnp.float32),
                "wo": rnd((VAR_FILTER, 1)),
                "bo": jnp.zeros((1, 1), jnp.float32)}

    src_emb = rnd((VOCAB, ENC_HIDDEN)).at[0].set(0.0)   # padding_idx = 0

    # mel_linear weight zero-padded to POSTNET_DIM output columns (exact)
    wm = jnp.pad(rnd((DEC_HIDDEN, N_MEL)), ((0, 0), (0, POSTNET_DIM - N_MEL)))
    bm = jnp.zeros((1, POSTNET_DIM), jnp.float32)

    # PostNet: channel-padded to POSTNET_DIM, im2col-reshaped, layer-stacked.
    Ws = []
    cin = N_MEL
    for i in range(POSTNET_LAYERS):
        cout = N_MEL if i == POSTNET_LAYERS - 1 else POSTNET_DIM
        w = rnd((POSTNET_KERNEL, cin, cout))
        w = jnp.pad(w, ((0, 0), (0, POSTNET_DIM - cin), (0, POSTNET_DIM - cout)))
        Ws.append(w.reshape(POSTNET_KERNEL * POSTNET_DIM, POSTNET_DIM))
        cin = cout
    postnet = {
        "W": jnp.stack(Ws, axis=0),                                  # (L, K*32, 32)
        "b": jnp.zeros((POSTNET_LAYERS, 1, POSTNET_DIM), jnp.float32),
        "g": jnp.ones((POSTNET_LAYERS, 1, POSTNET_DIM), jnp.float32),
        "bb": jnp.zeros((POSTNET_LAYERS, 1, POSTNET_DIM), jnp.float32),
    }

    params = {
        "src_emb": src_emb,
        "enc_pos": sinusoid_table(MAX_SRC_LEN, ENC_HIDDEN),
        "dec_pos": sinusoid_table(MAX_MEL_LEN, DEC_HIDDEN),
        "enc_stack": stack_layers([fft_layer(ENC_HIDDEN) for _ in range(ENC_LAYERS)]),
        "dec_stack": stack_layers([fft_layer(DEC_HIDDEN) for _ in range(DEC_LAYERS)]),
        "encoder_linear": {"w": rnd((ENC_HIDDEN, DEC_HIDDEN)),   # defined, unused in fwd (as in ref)
                           "b": jnp.zeros((1, DEC_HIDDEN), jnp.float32)},
        "dur_pred": var_pred(ENC_HIDDEN),
        "pe_pred": stack_layers([var_pred(ENC_HIDDEN),           # index 0 = pitch
                                 var_pred(ENC_HIDDEN)]),         # index 1 = energy
        "pitch_emb": rnd((N_BINS, ENC_HIDDEN)),
        "energy_emb": rnd((N_BINS, ENC_HIDDEN)),
        "pitch_bins": jnp.linspace(-1.0, 1.0, N_BINS - 1),
        "energy_bins": jnp.linspace(-1.0, 1.0, N_BINS - 1),
        "mel_linear": {"w": wm, "b": bm},
        "postnet": postnet,
    }
    return params


# ----------------------------- main --------------------------------------------
if __name__ == "__main__":
    key = jax.random.PRNGKey(0)
    pkey, dkey = jax.random.split(key)
    params = init_params(pkey)

    B, S = 2, 8
    src_len = jnp.array([8, 6], jnp.int32)
    src_seq = jax.random.randint(dkey, (B, S), 1, VOCAB, dtype=jnp.int32)
    ids = jnp.arange(S)
    src_seq = jnp.where(ids[None, :] < src_len[:, None], src_seq, 0)  # pad id = 0

    fwd = jax.jit(fastspeech2_forward,
                  static_argnames=("max_src_len", "max_mel_len"))
    outs = fwd(params, src_seq, src_len,
               max_src_len=S, max_mel_len=MAX_MEL_LEN)
    jax.block_until_ready(outs)

    mel, mel_post, d_pred, p_pred, e_pred, src_mask, mel_mask, mel_len = outs
    assert mel.shape == (B, MAX_MEL_LEN, N_MEL)
    assert mel_post.shape == (B, MAX_MEL_LEN, N_MEL)
    assert d_pred.shape == (B, S) and p_pred.shape == (B, MAX_MEL_LEN)
    assert e_pred.shape == (B, MAX_MEL_LEN)
    assert bool(jnp.all(jnp.isfinite(mel_post)))
    print("KERNEL_OK")
</pallas_src>

<mosaic_0001>
module attributes {stable_mosaic.version = 11 : i64} {
  func.func @kernel(%arg0: i32, %arg1: memref<1x8x32xf32, #tpu.memory_space<vmem>>, %arg2: memref<1x1x8xf32, #tpu.memory_space<vmem>>, %arg3: memref<1x8x1xf32, #tpu.memory_space<vmem>>, %arg4: memref<2x2x32x16xf32, #tpu.memory_space<vmem>>, %arg5: memref<2x2x1x16xf32, #tpu.memory_space<vmem>>, %arg6: memref<2x2x32x16xf32, #tpu.memory_space<vmem>>, %arg7: memref<2x2x1x16xf32, #tpu.memory_space<vmem>>, %arg8: memref<2x2x32x16xf32, #tpu.memory_space<vmem>>, %arg9: memref<2x2x1x16xf32, #tpu.memory_space<vmem>>, %arg10: memref<2x2x16x32xf32, #tpu.memory_space<vmem>>, %arg11: memref<2x1x32xf32, #tpu.memory_space<vmem>>, %arg12: memref<2x1x32xf32, #tpu.memory_space<vmem>>, %arg13: memref<2x1x32xf32, #tpu.memory_space<vmem>>, %arg14: memref<2x288x64xf32, #tpu.memory_space<vmem>>, %arg15: memref<2x1x64xf32, #tpu.memory_space<vmem>>, %arg16: memref<2x64x32xf32, #tpu.memory_space<vmem>>, %arg17: memref<2x1x32xf32, #tpu.memory_space<vmem>>, %arg18: memref<2x1x32xf32, #tpu.memory_space<vmem>>, %arg19: memref<2x1x32xf32, #tpu.memory_space<vmem>>, %arg20: memref<96x32xf32, #tpu.memory_space<vmem>>, %arg21: memref<1x32xf32, #tpu.memory_space<vmem>>, %arg22: memref<1x32xf32, #tpu.memory_space<vmem>>, %arg23: memref<1x32xf32, #tpu.memory_space<vmem>>, %arg24: memref<96x32xf32, #tpu.memory_space<vmem>>, %arg25: memref<1x32xf32, #tpu.memory_space<vmem>>, %arg26: memref<1x32xf32, #tpu.memory_space<vmem>>, %arg27: memref<1x32xf32, #tpu.memory_space<vmem>>, %arg28: memref<32x1xf32, #tpu.memory_space<vmem>>, %arg29: memref<1x1xf32, #tpu.memory_space<vmem>>, %arg30: memref<1x8x32xf32, #tpu.memory_space<vmem>>, %arg31: memref<1x8x1xf32, #tpu.memory_space<vmem>>) attributes {dimension_semantics = [#tpu.dimension_semantics<parallel>], iteration_bounds = array<i64: 2>, scalar_prefetch = 0 : i64, scratch_operands = 0 : i64, tpu.core_type = #tpu.core_type<tc>, window_params = [{transform_indices = @transform_0, window_bounds = array<i64: 1, 8, 32>}, {transform_indices = @transform_1, window_bounds = array<i64: 1, 1, 8>}, {transform_indices = @transform_2, window_bounds = array<i64: 1, 8, 1>}, {pipeline_mode = #tpu.pipeline_mode<synchronous>, transform_indices = @transform_3, window_bounds = array<i64: 2, 2, 32, 16>}, {pipeline_mode = #tpu.pipeline_mode<synchronous>, transform_indices = @transform_4, window_bounds = array<i64: 2, 2, 1, 16>}, {pipeline_mode = #tpu.pipeline_mode<synchronous>, transform_indices = @transform_5, window_bounds = array<i64: 2, 2, 32, 16>}, {pipeline_mode = #tpu.pipeline_mode<synchronous>, transform_indices = @transform_6, window_bounds = array<i64: 2, 2, 1, 16>}, {pipeline_mode = #tpu.pipeline_mode<synchronous>, transform_indices = @transform_7, window_bounds = array<i64: 2, 2, 32, 16>}, {pipeline_mode = #tpu.pipeline_mode<synchronous>, transform_indices = @transform_8, window_bounds = array<i64: 2, 2, 1, 16>}, {pipeline_mode = #tpu.pipeline_mode<synchronous>, transform_indices = @transform_9, window_bounds = array<i64: 2, 2, 16, 32>}, {pipeline_mode = #tpu.pipeline_mode<synchronous>, transform_indices = @transform_10, window_bounds = array<i64: 2, 1, 32>}, {pipeline_mode = #tpu.pipeline_mode<synchronous>, transform_indices = @transform_11, window_bounds = array<i64: 2, 1, 32>}, {pipeline_mode = #tpu.pipeline_mode<synchronous>, transform_indices = @transform_12, window_bounds = array<i64: 2, 1, 32>}, {pipeline_mode = #tpu.pipeline_mode<synchronous>, transform_indices = @transform_13, window_bounds = array<i64: 2, 288, 64>}, {pipeline_mode = #tpu.pipeline_mode<synchronous>, transform_indices = @transform_14, window_bounds = array<i64: 2, 1, 64>}, {pipeline_mode = #tpu.pipeline_mode<synchronous>, transform_indices = @transform_15, window_bounds = array<i64: 2, 64, 32>}, {pipeline_mode = #tpu.pipeline_mode<synchronous>, transform_indices = @transform_16, window_bounds = array<i64: 2, 1, 32>}, {pipeline_mode = #tpu.pipeline_mode<synchronous>, transform_indices = @transform_17, window_bounds = array<i64: 2, 1, 32>}, {pipeline_mode = #tpu.pipeline_mode<synchronous>, transform_indices = @transform_18, window_bounds = array<i64: 2, 1, 32>}, {pipeline_mode = #tpu.pipeline_mode<synchronous>, transform_indices = @transform_19, window_bounds = array<i64: 96, 32>}, {pipeline_mode = #tpu.pipeline_mode<synchronous>, transform_indices = @transform_20, window_bounds = array<i64: 1, 32>}, {pipeline_mode = #tpu.pipeline_mode<synchronous>, transform_indices = @transform_21, window_bounds = array<i64: 1, 32>}, {pipeline_mode = #tpu.pipeline_mode<synchronous>, transform_indices = @transform_22, window_bounds = array<i64: 1, 32>}, {pipeline_mode = #tpu.pipeline_mode<synchronous>, transform_indices = @transform_23, window_bounds = array<i64: 96, 32>}, {pipeline_mode = #tpu.pipeline_mode<synchronous>, transform_indices = @transform_24, window_bounds = array<i64: 1, 32>}, {pipeline_mode = #tpu.pipeline_mode<synchronous>, transform_indices = @transform_25, window_bounds = array<i64: 1, 32>}, {pipeline_mode = #tpu.pipeline_mode<synchronous>, transform_indices = @transform_26, window_bounds = array<i64: 1, 32>}, {pipeline_mode = #tpu.pipeline_mode<synchronous>, transform_indices = @transform_27, window_bounds = array<i64: 32, 1>}, {pipeline_mode = #tpu.pipeline_mode<synchronous>, transform_indices = @transform_28, window_bounds = array<i64: 1, 1>}, {transform_indices = @transform_29, window_bounds = array<i64: 1, 8, 32>}, {transform_indices = @transform_30, window_bounds = array<i64: 1, 8, 1>}]} {
    %c0 = arith.constant 0 : index
    %c0_0 = arith.constant 0 : index
    %c0_1 = arith.constant 0 : index
    %0 = vector.load %arg1[%c0, %c0_0, %c0_1] : memref<1x8x32xf32, #tpu.memory_space<vmem>>, vector<1x8x32xf32>
    %1 = vector.shape_cast %0 : vector<1x8x32xf32> to vector<8x32xf32>
    %c0_2 = arith.constant 0 : index
    %c0_3 = arith.constant 0 : index
    %c0_4 = arith.constant 0 : index
    %2 = vector.load %arg2[%c0_2, %c0_3, %c0_4] : memref<1x1x8xf32, #tpu.memory_space<vmem>>, vector<1x1x8xf32>
    %3 = vector.shape_cast %2 : vector<1x1x8xf32> to vector<1x8xf32>
    %c0_5 = arith.constant 0 : index
    %c0_6 = arith.constant 0 : index
    %c0_7 = arith.constant 0 : index
    %4 = vector.load %arg3[%c0_5, %c0_6, %c0_7] : memref<1x8x1xf32, #tpu.memory_space<vmem>>, vector<1x8x1xf32>
    %5 = vector.shape_cast %4 : vector<1x8x1xf32> to vector<8x1xf32>
    %cst = arith.constant 0.000000e+00 : f32
    %6 = vector.broadcast %cst : f32 to vector<8x32xf32>
    %c0_8 = arith.constant 0 : index
    %c0_9 = arith.constant 0 : index
    %c0_10 = arith.constant 0 : index
    %c0_11 = arith.constant 0 : index
    %7 = vector.load %arg4[%c0_8, %c0_9, %c0_10, %c0_11] : memref<2x2x32x16xf32, #tpu.memory_space<vmem>>, vector<1x1x32x16xf32>
    %8 = vector.shape_cast %7 : vector<1x1x32x16xf32> to vector<32x16xf32>
    %cst_12 = arith.constant dense<0.000000e+00> : vector<8x16xf32>
    %9 = tpu.matmul %1, %8, %cst_12 {dimension_numbers = #tpu.dot_dimension_numbers<[1], [0], [0], [1], [0, 0, 1, 1], [], []>} : vector<8x32xf32>, vector<32x16xf32>, vector<8x16xf32> -> vector<8x16xf32>
    %c0_13 = arith.constant 0 : index
    %c0_14 = arith.constant 0 : index
    %c0_15 = arith.constant 0 : index
    %c0_16 = arith.constant 0 : index
    %10 = vector.load %arg5[%c0_13, %c0_14, %c0_15, %c0_16] : memref<2x2x1x16xf32, #tpu.memory_space<vmem>>, vector<1x1x1x16xf32>
    %11 = vector.shape_cast %10 : vector<1x1x1x16xf32> to vector<1x16xf32>
    %12 = vector.broadcast %11 : vector<1x16xf32> to vector<8x16xf32>
    %13 = arith.addf %9, %12 : vector<8x16xf32>
    %c0_17 = arith.constant 0 : index
    %c0_18 = arith.constant 0 : index
    %c0_19 = arith.constant 0 : index
    %c0_20 = arith.constant 0 : index
    %14 = vector.load %arg6[%c0_17, %c0_18, %c0_19, %c0_20] : memref<2x2x32x16xf32, #tpu.memory_space<vmem>>, vector<1x1x32x16xf32>
    %15 = vector.shape_cast %14 : vector<1x1x32x16xf32> to vector<32x16xf32>
    %cst_21 = arith.constant dense<0.000000e+00> : vector<8x16xf32>
    %16 = tpu.matmul %1, %15, %cst_21 {dimension_numbers = #tpu.dot_dimension_numbers<[1], [0], [0], [1], [0, 0, 1, 1], [], []>} : vector<8x32xf32>, vector<32x16xf32>, vector<8x16xf32> -> vector<8x16xf32>
    %c0_22 = arith.constant 0 : index
    %c0_23 = arith.constant 0 : index
    %c0_24 = arith.constant 0 : index
    %c0_25 = arith.constant 0 : index
    %17 = vector.load %arg7[%c0_22, %c0_23, %c0_24, %c0_25] : memref<2x2x1x16xf32, #tpu.memory_space<vmem>>, vector<1x1x1x16xf32>
    %18 = vector.shape_cast %17 : vector<1x1x1x16xf32> to vector<1x16xf32>
    %19 = vector.broadcast %18 : vector<1x16xf32> to vector<8x16xf32>
    %20 = arith.addf %16, %19 : vector<8x16xf32>
    %c0_26 = arith.constant 0 : index
    %c0_27 = arith.constant 0 : index
    %c0_28 = arith.constant 0 : index
    %c0_29 = arith.constant 0 : index
    %21 = vector.load %arg8[%c0_26, %c0_27, %c0_28, %c0_29] : memref<2x2x32x16xf32, #tpu.memory_space<vmem>>, vector<1x1x32x16xf32>
    %22 = vector.shape_cast %21 : vector<1x1x32x16xf32> to vector<32x16xf32>
    %cst_30 = arith.constant dense<0.000000e+00> : vector<8x16xf32>
    %23 = tpu.matmul %1, %22, %cst_30 {dimension_numbers = #tpu.dot_dimension_numbers<[1], [0], [0], [1], [0, 0, 1, 1], [], []>} : vector<8x32xf32>, vector<32x16xf32>, vector<8x16xf32> -> vector<8x16xf32>
    %c0_31 = arith.constant 0 : index
    %c0_32 = arith.constant 0 : index
    %c0_33 = arith.constant 0 : index
    %c0_34 = arith.constant 0 : index
    %24 = vector.load %arg9[%c0_31, %c0_32, %c0_33, %c0_34] : memref<2x2x1x16xf32, #tpu.memory_space<vmem>>, vector<1x1x1x16xf32>
    %25 = vector.shape_cast %24 : vector<1x1x1x16xf32> to vector<1x16xf32>
    %26 = vector.broadcast %25 : vector<1x16xf32> to vector<8x16xf32>
    %27 = arith.addf %23, %26 : vector<8x16xf32>
    %cst_35 = arith.constant dense<0.000000e+00> : vector<8x8xf32>
    %28 = tpu.matmul %13, %20, %cst_35 {dimension_numbers = #tpu.dot_dimension_numbers<[1], [1], [0], [0], [0, 0, 1, 0], [], []>} : vector<8x16xf32>, vector<8x16xf32>, vector<8x8xf32> -> vector<8x8xf32>
    %29 = vector.broadcast %3 : vector<1x8xf32> to vector<8x8xf32>
    %30 = arith.addf %28, %29 : vector<8x8xf32>
    %cst_36 = arith.constant dense<0xFF800000> : vector<8xf32>
    %31 = vector.multi_reduction <maximumf>, %30, %cst_36 [1] : vector<8x8xf32> to vector<8xf32>
    %32 = vector.shape_cast %31 : vector<8xf32> to vector<8x1xf32>
    %33 = vector.broadcast %32 : vector<8x1xf32> to vector<8x8xf32>
    %34 = arith.subf %30, %33 : vector<8x8xf32>
    %35 = math.exp %34 : vector<8x8xf32>
    %cst_37 = arith.constant dense<0.000000e+00> : vector<8xf32>
    %36 = vector.multi_reduction <add>, %35, %cst_37 [1] : vector<8x8xf32> to vector<8xf32>
    %37 = vector.shape_cast %36 : vector<8xf32> to vector<8x1xf32>
    %38 = tpu.reciprocal %37 {approx = true} : vector<8x1xf32> -> vector<8x1xf32>
    %39 = vector.broadcast %38 : vector<8x1xf32> to vector<8x8xf32>
    %40 = arith.mulf %35, %39 : vector<8x8xf32>
    %cst_38 = arith.constant dense<0.000000e+00> : vector<8x16xf32>
    %41 = tpu.matmul %40, %27, %cst_38 {dimension_numbers = #tpu.dot_dimension_numbers<[1], [0], [0], [1], [0, 0, 1, 1], [], []>} : vector<8x8xf32>, vector<8x16xf32>, vector<8x16xf32> -> vector<8x16xf32>
    %c0_39 = arith.constant 0 : index
    %c0_40 = arith.constant 0 : index
    %c0_41 = arith.constant 0 : index
    %c0_42 = arith.constant 0 : index
    %42 = vector.load %arg10[%c0_39, %c0_40, %c0_41, %c0_42] : memref<2x2x16x32xf32, #tpu.memory_space<vmem>>, vector<1x1x16x32xf32>
    %43 = vector.shape_cast %42 : vector<1x1x16x32xf32> to vector<16x32xf32>
    %cst_43 = arith.constant dense<0.000000e+00> : vector<8x32xf32>
    %44 = tpu.matmul %41, %43, %cst_43 {dimension_numbers = #tpu.dot_dimension_numbers<[1], [0], [0], [1], [0, 0, 1, 1], [], []>} : vector<8x16xf32>, vector<16x32xf32>, vector<8x32xf32> -> vector<8x32xf32>
    %45 = arith.addf %6, %44 : vector<8x32xf32>
    %c0_44 = arith.constant 0 : index
    %c1 = arith.constant 1 : index
    %c0_45 = arith.constant 0 : index
    %c0_46 = arith.constant 0 : index
    %46 = vector.load %arg4[%c0_44, %c1, %c0_45, %c0_46] : memref<2x2x32x16xf32, #tpu.memory_space<vmem>>, vector<1x1x32x16xf32>
    %47 = vector.shape_cast %46 : vector<1x1x32x16xf32> to vector<32x16xf32>
    %cst_47 = arith.constant dense<0.000000e+00> : vector<8x16xf32>
    %48 = tpu.matmul %1, %47, %cst_47 {dimension_numbers = #tpu.dot_dimension_numbers<[1], [0], [0], [1], [0, 0, 1, 1], [], []>} : vector<8x32xf32>, vector<32x16xf32>, vector<8x16xf32> -> vector<8x16xf32>
    %c0_48 = arith.constant 0 : index
    %c1_49 = arith.constant 1 : index
    %c0_50 = arith.constant 0 : index
    %c0_51 = arith.constant 0 : index
    %49 = vector.load %arg5[%c0_48, %c1_49, %c0_50, %c0_51] : memref<2x2x1x16xf32, #tpu.memory_space<vmem>>, vector<1x1x1x16xf32>
    %50 = vector.shape_cast %49 : vector<1x1x1x16xf32> to vector<1x16xf32>
    %51 = vector.broadcast %50 : vector<1x16xf32> to vector<8x16xf32>
    %52 = arith.addf %48, %51 : vector<8x16xf32>
    %c0_52 = arith.constant 0 : index
    %c1_53 = arith.constant 1 : index
    %c0_54 = arith.constant 0 : index
    %c0_55 = arith.constant 0 : index
    %53 = vector.load %arg6[%c0_52, %c1_53, %c0_54, %c0_55] : memref<2x2x32x16xf32, #tpu.memory_space<vmem>>, vector<1x1x32x16xf32>
    %54 = vector.shape_cast %53 : vector<1x1x32x16xf32> to vector<32x16xf32>
    %cst_56 = arith.constant dense<0.000000e+00> : vector<8x16xf32>
    %55 = tpu.matmul %1, %54, %cst_56 {dimension_numbers = #tpu.dot_dimension_numbers<[1], [0], [0], [1], [0, 0, 1, 1], [], []>} : vector<8x32xf32>, vector<32x16xf32>, vector<8x16xf32> -> vector<8x16xf32>
    %c0_57 = arith.constant 0 : index
    %c1_58 = arith.constant 1 : index
    %c0_59 = arith.constant 0 : index
    %c0_60 = arith.constant 0 : index
    %56 = vector.load %arg7[%c0_57, %c1_58, %c0_59, %c0_60] : memref<2x2x1x16xf32, #tpu.memory_space<vmem>>, vector<1x1x1x16xf32>
    %57 = vector.shape_cast %56 : vector<1x1x1x16xf32> to vector<1x16xf32>
    %58 = vector.broadcast %57 : vector<1x16xf32> to vector<8x16xf32>
    %59 = arith.addf %55, %58 : vector<8x16xf32>
    %c0_61 = arith.constant 0 : index
    %c1_62 = arith.constant 1 : index
    %c0_63 = arith.constant 0 : index
    %c0_64 = arith.constant 0 : index
    %60 = vector.load %arg8[%c0_61, %c1_62, %c0_63, %c0_64] : memref<2x2x32x16xf32, #tpu.memory_space<vmem>>, vector<1x1x32x16xf32>
    %61 = vector.shape_cast %60 : vector<1x1x32x16xf32> to vector<32x16xf32>
    %cst_65 = arith.constant dense<0.000000e+00> : vector<8x16xf32>
    %62 = tpu.matmul %1, %61, %cst_65 {dimension_numbers = #tpu.dot_dimension_numbers<[1], [0], [0], [1], [0, 0, 1, 1], [], []>} : vector<8x32xf32>, vector<32x16xf32>, vector<8x16xf32> -> vector<8x16xf32>
    %c0_66 = arith.constant 0 : index
    %c1_67 = arith.constant 1 : index
    %c0_68 = arith.constant 0 : index
    %c0_69 = arith.constant 0 : index
    %63 = vector.load %arg9[%c0_66, %c1_67, %c0_68, %c0_69] : memref<2x2x1x16xf32, #tpu.memory_space<vmem>>, vector<1x1x1x16xf32>
    %64 = vector.shape_cast %63 : vector<1x1x1x16xf32> to vector<1x16xf32>
    %65 = vector.broadcast %64 : vector<1x16xf32> to vector<8x16xf32>
    %66 = arith.addf %62, %65 : vector<8x16xf32>
    %cst_70 = arith.constant dense<0.000000e+00> : vector<8x8xf32>
    %67 = tpu.matmul %52, %59, %cst_70 {dimension_numbers = #tpu.dot_dimension_numbers<[1], [1], [0], [0], [0, 0, 1, 0], [], []>} : vector<8x16xf32>, vector<8x16xf32>, vector<8x8xf32> -> vector<8x8xf32>
    %68 = vector.broadcast %3 : vector<1x8xf32> to vector<8x8xf32>
    %69 = arith.addf %67, %68 : vector<8x8xf32>
    %cst_71 = arith.constant dense<0xFF800000> : vector<8xf32>
    %70 = vector.multi_reduction <maximumf>, %69, %cst_71 [1] : vector<8x8xf32> to vector<8xf32>
    %71 = vector.shape_cast %70 : vector<8xf32> to vector<8x1xf32>
    %72 = vector.broadcast %71 : vector<8x1xf32> to vector<8x8xf32>
    %73 = arith.subf %69, %72 : vector<8x8xf32>
    %74 = math.exp %73 : vector<8x8xf32>
    %cst_72 = arith.constant dense<0.000000e+00> : vector<8xf32>
    %75 = vector.multi_reduction <add>, %74, %cst_72 [1] : vector<8x8xf32> to vector<8xf32>
    %76 = vector.shape_cast %75 : vector<8xf32> to vector<8x1xf32>
    %77 = tpu.reciprocal %76 {approx = true} : vector<8x1xf32> -> vector<8x1xf32>
    %78 = vector.broadcast %77 : vector<8x1xf32> to vector<8x8xf32>
    %79 = arith.mulf %74, %78 : vector<8x8xf32>
    %cst_73 = arith.constant dense<0.000000e+00> : vector<8x16xf32>
    %80 = tpu.matmul %79, %66, %cst_73 {dimension_numbers = #tpu.dot_dimension_numbers<[1], [0], [0], [1], [0, 0, 1, 1], [], []>} : vector<8x8xf32>, vector<8x16xf32>, vector<8x16xf32> -> vector<8x16xf32>
    %c0_74 = arith.constant 0 : index
    %c1_75 = arith.constant 1 : index
    %c0_76 = arith.constant 0 : index
    %c0_77 = arith.constant 0 : index
    %81 = vector.load %arg10[%c0_74, %c1_75, %c0_76, %c0_77] : memref<2x2x16x32xf32, #tpu.memory_space<vmem>>, vector<1x1x16x32xf32>
    %82 = vector.shape_cast %81 : vector<1x1x16x32xf32> to vector<16x32xf32>
    %cst_78 = arith.constant dense<0.000000e+00> : vector<8x32xf32>
    %83 = tpu.matmul %80, %82, %cst_78 {dimension_numbers = #tpu.dot_dimension_numbers<[1], [0], [0], [1], [0, 0, 1, 1], [], []>} : vector<8x16xf32>, vector<16x32xf32>, vector<8x32xf32> -> vector<8x32xf32>
    %84 = arith.addf %45, %83 : vector<8x32xf32>
    %c0_79 = arith.constant 0 : index
    %c0_80 = arith.constant 0 : index
    %c0_81 = arith.constant 0 : index
    %85 = vector.load %arg11[%c0_79, %c0_80, %c0_81] : memref<2x1x32xf32, #tpu.memory_space<vmem>>, vector<1x1x32xf32>
    %86 = vector.shape_cast %85 : vector<1x1x32xf32> to vector<1x32xf32>
    %87 = vector.broadcast %86 : vector<1x32xf32> to vector<8x32xf32>
    %88 = arith.addf %84, %87 : vector<8x32xf32>
    %89 = arith.addf %88, %1 : vector<8x32xf32>
    %c0_82 = arith.constant 0 : index
    %c0_83 = arith.constant 0 : index
    %c0_84 = arith.constant 0 : index
    %90 = vector.load %arg12[%c0_82, %c0_83, %c0_84] : memref<2x1x32xf32, #tpu.memory_space<vmem>>, vector<1x1x32xf32>
    %91 = vector.shape_cast %90 : vector<1x1x32xf32> to vector<1x32xf32>
    %c0_85 = arith.constant 0 : index
    %c0_86 = arith.constant 0 : index
    %c0_87 = arith.constant 0 : index
    %92 = vector.load %arg13[%c0_85, %c0_86, %c0_87] : memref<2x1x32xf32, #tpu.memory_space<vmem>>, vector<1x1x32xf32>
    %93 = vector.shape_cast %92 : vector<1x1x32xf32> to vector<1x32xf32>
    %cst_88 = arith.constant dense<0.000000e+00> : vector<8xf32>
    %94 = vector.multi_reduction <add>, %89, %cst_88 [1] : vector<8x32xf32> to vector<8xf32>
    %95 = vector.shape_cast %94 : vector<8xf32> to vector<8x1xf32>
    %cst_89 = arith.constant 3.200000e+01 : f32
    %96 = vector.broadcast %cst_89 : f32 to vector<8x1xf32>
    %97 = arith.divf %95, %96 : vector<8x1xf32>
    %98 = vector.broadcast %97 : vector<8x1xf32> to vector<8x32xf32>
    %99 = arith.subf %89, %98 : vector<8x32xf32>
    %100 = arith.mulf %99, %99 : vector<8x32xf32>
    %cst_90 = arith.constant dense<0.000000e+00> : vector<8xf32>
    %101 = vector.multi_reduction <add>, %100, %cst_90 [1] : vector<8x32xf32> to vector<8xf32>
    %102 = vector.shape_cast %101 : vector<8xf32> to vector<8x1xf32>
    %cst_91 = arith.constant 3.200000e+01 : f32
    %103 = vector.broadcast %cst_91 : f32 to vector<8x1xf32>
    %104 = arith.divf %102, %103 : vector<8x1xf32>
    %105 = vector.broadcast %97 : vector<8x1xf32> to vector<8x32xf32>
    %106 = arith.subf %89, %105 : vector<8x32xf32>
    %cst_92 = arith.constant 9.99999974E-6 : f32
    %107 = vector.broadcast %cst_92 : f32 to vector<8x1xf32>
    %108 = arith.addf %104, %107 : vector<8x1xf32>
    %109 = math.rsqrt %108 : vector<8x1xf32>
    %110 = vector.broadcast %109 : vector<8x1xf32> to vector<8x32xf32>
    %111 = arith.mulf %106, %110 : vector<8x32xf32>
    %112 = vector.broadcast %91 : vector<1x32xf32> to vector<8x32xf32>
    %113 = arith.mulf %111, %112 : vector<8x32xf32>
    %114 = vector.broadcast %93 : vector<1x32xf32> to vector<8x32xf32>
    %115 = arith.addf %113, %114 : vector<8x32xf32>
    %116 = vector.broadcast %5 : vector<8x1xf32> to vector<8x32xf32>
    %117 = arith.mulf %115, %116 : vector<8x32xf32>
    %c0_93 = arith.constant 0 : index
    %c0_94 = arith.constant 0 : index
    %c0_95 = arith.constant 0 : index
    %118 = vector.load %arg14[%c0_93, %c0_94, %c0_95] : memref<2x288x64xf32, #tpu.memory_space<vmem>>, vector<1x288x64xf32>
    %119 = vector.shape_cast %118 : vector<1x288x64xf32> to vector<288x64xf32>
    %c0_96 = arith.constant 0 : index
    %c0_97 = arith.constant 0 : index
    %c0_98 = arith.constant 0 : index
    %120 = vector.load %arg15[%c0_96, %c0_97, %c0_98] : memref<2x1x64xf32, #tpu.memory_space<vmem>>, vector<1x1x64xf32>
    %121 = vector.shape_cast %120 : vector<1x1x64xf32> to vector<1x64xf32>
    %cst_99 = arith.constant 0.000000e+00 : f32
    %122 = vector.broadcast %cst_99 : f32 to vector<4x32xf32>
    %123 = tpu.concatenate %122, %117, %122 in 0 : vector<4x32xf32>, vector<8x32xf32>, vector<4x32xf32> -> vector<16x32xf32>
    %124 = vector.extract_strided_slice %123 {offsets = [0, 0], sizes = [8, 32], strides = [1, 1]} : vector<16x32xf32> to vector<8x32xf32>
    %125 = vector.extract_strided_slice %123 {offsets = [1, 0], sizes = [8, 32], strides = [1, 1]} : vector<16x32xf32> to vector<8x32xf32>
    %126 = vector.extract_strided_slice %123 {offsets = [2, 0], sizes = [8, 32], strides = [1, 1]} : vector<16x32xf32> to vector<8x32xf32>
    %127 = vector.extract_strided_slice %123 {offsets = [3, 0], sizes = [8, 32], strides = [1, 1]} : vector<16x32xf32> to vector<8x32xf32>
    %128 = vector.extract_strided_slice %123 {offsets = [4, 0], sizes = [8, 32], strides = [1, 1]} : vector<16x32xf32> to vector<8x32xf32>
    %129 = vector.extract_strided_slice %123 {offsets = [5, 0], sizes = [8, 32], strides = [1, 1]} : vector<16x32xf32> to vector<8x32xf32>
    %130 = vector.extract_strided_slice %123 {offsets = [6, 0], sizes = [8, 32], strides = [1, 1]} : vector<16x32xf32> to vector<8x32xf32>
    %131 = vector.extract_strided_slice %123 {offsets = [7, 0], sizes = [8, 32], strides = [1, 1]} : vector<16x32xf32> to vector<8x32xf32>
    %132 = vector.extract_strided_slice %123 {offsets = [8, 0], sizes = [8, 32], strides = [1, 1]} : vector<16x32xf32> to vector<8x32xf32>
    %133 = tpu.concatenate %124, %125, %126, %127, %128, %129, %130, %131, %132 in 1 : vector<8x32xf32>, vector<8x32xf32>, vector<8x32xf32>, vector<8x32xf32>, vector<8x32xf32>, vector<8x32xf32>, vector<8x32xf32>, vector<8x32xf32>, vector<8x32xf32> -> vector<8x288xf32>
    %cst_100 = arith.constant dense<0.000000e+00> : vector<8x64xf32>
    %134 = tpu.matmul %133, %119, %cst_100 {dimension_numbers = #tpu.dot_dimension_numbers<[1], [0], [0], [1], [0, 0, 1, 1], [], []>} : vector<8x288xf32>, vector<288x64xf32>, vector<8x64xf32> -> vector<8x64xf32>
    %135 = vector.broadcast %121 : vector<1x64xf32> to vector<8x64xf32>
    %136 = arith.addf %134, %135 : vector<8x64xf32>
    %cst_101 = arith.constant 0.000000e+00 : f32
    %137 = vector.broadcast %cst_101 : f32 to vector<8x64xf32>
    %138 = arith.maximumf %136, %137 : vector<8x64xf32>
    %c0_102 = arith.constant 0 : index
    %c0_103 = arith.constant 0 : index
    %c0_104 = arith.constant 0 : index
    %139 = vector.load %arg16[%c0_102, %c0_103, %c0_104] : memref<2x64x32xf32, #tpu.memory_space<vmem>>, vector<1x64x32xf32>
    %140 = vector.shape_cast %139 : vector<1x64x32xf32> to vector<64x32xf32>
    %cst_105 = arith.constant dense<0.000000e+00> : vector<8x32xf32>
    %141 = tpu.matmul %138, %140, %cst_105 {dimension_numbers = #tpu.dot_dimension_numbers<[1], [0], [0], [1], [0, 0, 1, 1], [], []>} : vector<8x64xf32>, vector<64x32xf32>, vector<8x32xf32> -> vector<8x32xf32>
    %c0_106 = arith.constant 0 : index
    %c0_107 = arith.constant 0 : index
    %c0_108 = arith.constant 0 : index
    %142 = vector.load %arg17[%c0_106, %c0_107, %c0_108] : memref<2x1x32xf32, #tpu.memory_space<vmem>>, vector<1x1x32xf32>
    %143 = vector.shape_cast %142 : vector<1x1x32xf32> to vector<1x32xf32>
    %144 = vector.broadcast %143 : vector<1x32xf32> to vector<8x32xf32>
    %145 = arith.addf %141, %144 : vector<8x32xf32>
    %146 = arith.addf %145, %117 : vector<8x32xf32>
    %c0_109 = arith.constant 0 : index
    %c0_110 = arith.constant 0 : index
    %c0_111 = arith.constant 0 : index
    %147 = vector.load %arg18[%c0_109, %c0_110, %c0_111] : memref<2x1x32xf32, #tpu.memory_space<vmem>>, vector<1x1x32xf32>
    %148 = vector.shape_cast %147 : vector<1x1x32xf32> to vector<1x32xf32>
    %c0_112 = arith.constant 0 : index
    %c0_113 = arith.constant 0 : index
    %c0_114 = arith.constant 0 : index
    %149 = vector.load %arg19[%c0_112, %c0_113, %c0_114] : memref<2x1x32xf32, #tpu.memory_space<vmem>>, vector<1x1x32xf32>
    %150 = vector.shape_cast %149 : vector<1x1x32xf32> to vector<1x32xf32>
    %cst_115 = arith.constant dense<0.000000e+00> : vector<8xf32>
    %151 = vector.multi_reduction <add>, %146, %cst_115 [1] : vector<8x32xf32> to vector<8xf32>
    %152 = vector.shape_cast %151 : vector<8xf32> to vector<8x1xf32>
    %cst_116 = arith.constant 3.200000e+01 : f32
    %153 = vector.broadcast %cst_116 : f32 to vector<8x1xf32>
    %154 = arith.divf %152, %153 : vector<8x1xf32>
    %155 = vector.broadcast %154 : vector<8x1xf32> to vector<8x32xf32>
    %156 = arith.subf %146, %155 : vector<8x32xf32>
    %157 = arith.mulf %156, %156 : vector<8x32xf32>
    %cst_117 = arith.constant dense<0.000000e+00> : vector<8xf32>
    %158 = vector.multi_reduction <add>, %157, %cst_117 [1] : vector<8x32xf32> to vector<8xf32>
    %159 = vector.shape_cast %158 : vector<8xf32> to vector<8x1xf32>
    %cst_118 = arith.constant 3.200000e+01 : f32
    %160 = vector.broadcast %cst_118 : f32 to vector<8x1xf32>
    %161 = arith.divf %159, %160 : vector<8x1xf32>
    %162 = vector.broadcast %154 : vector<8x1xf32> to vector<8x32xf32>
    %163 = arith.subf %146, %162 : vector<8x32xf32>
    %cst_119 = arith.constant 9.99999974E-6 : f32
    %164 = vector.broadcast %cst_119 : f32 to vector<8x1xf32>
    %165 = arith.addf %161, %164 : vector<8x1xf32>
    %166 = math.rsqrt %165 : vector<8x1xf32>
    %167 = vector.broadcast %166 : vector<8x1xf32> to vector<8x32xf32>
    %168 = arith.mulf %163, %167 : vector<8x32xf32>
    %169 = vector.broadcast %148 : vector<1x32xf32> to vector<8x32xf32>
    %170 = arith.mulf %168, %169 : vector<8x32xf32>
    %171 = vector.broadcast %150 : vector<1x32xf32> to vector<8x32xf32>
    %172 = arith.addf %170, %171 : vector<8x32xf32>
    %173 = vector.broadcast %5 : vector<8x1xf32> to vector<8x32xf32>
    %174 = arith.mulf %172, %173 : vector<8x32xf32>
    %cst_120 = arith.constant 0.000000e+00 : f32
    %175 = vector.broadcast %cst_120 : f32 to vector<8x32xf32>
    %c1_121 = arith.constant 1 : index
    %c0_122 = arith.constant 0 : index
    %c0_123 = arith.constant 0 : index
    %c0_124 = arith.constant 0 : index
    %176 = vector.load %arg4[%c1_121, %c0_122, %c0_123, %c0_124] : memref<2x2x32x16xf32, #tpu.memory_space<vmem>>, vector<1x1x32x16xf32>
    %177 = vector.shape_cast %176 : vector<1x1x32x16xf32> to vector<32x16xf32>
    %cst_125 = arith.constant dense<0.000000e+00> : vector<8x16xf32>
    %178 = tpu.matmul %174, %177, %cst_125 {dimension_numbers = #tpu.dot_dimension_numbers<[1], [0], [0], [1], [0, 0, 1, 1], [], []>} : vector<8x32xf32>, vector<32x16xf32>, vector<8x16xf32> -> vector<8x16xf32>
    %c1_126 = arith.constant 1 : index
    %c0_127 = arith.constant 0 : index
    %c0_128 = arith.constant 0 : index
    %c0_129 = arith.constant 0 : index
    %179 = vector.load %arg5[%c1_126, %c0_127, %c0_128, %c0_129] : memref<2x2x1x16xf32, #tpu.memory_space<vmem>>, vector<1x1x1x16xf32>
    %180 = vector.shape_cast %179 : vector<1x1x1x16xf32> to vector<1x16xf32>
    %181 = vector.broadcast %180 : vector<1x16xf32> to vector<8x16xf32>
    %182 = arith.addf %178, %181 : vector<8x16xf32>
    %c1_130 = arith.constant 1 : index
    %c0_131 = arith.constant 0 : index
    %c0_132 = arith.constant 0 : index
    %c0_133 = arith.constant 0 : index
    %183 = vector.load %arg6[%c1_130, %c0_131, %c0_132, %c0_133] : memref<2x2x32x16xf32, #tpu.memory_space<vmem>>, vector<1x1x32x16xf32>
    %184 = vector.shape_cast %183 : vector<1x1x32x16xf32> to vector<32x16xf32>
    %cst_134 = arith.constant dense<0.000000e+00> : vector<8x16xf32>
    %185 = tpu.matmul %174, %184, %cst_134 {dimension_numbers = #tpu.dot_dimension_numbers<[1], [0], [0], [1], [0, 0, 1, 1], [], []>} : vector<8x32xf32>, vector<32x16xf32>, vector<8x16xf32> -> vector<8x16xf32>
    %c1_135 = arith.constant 1 : index
    %c0_136 = arith.constant 0 : index
    %c0_137 = arith.constant 0 : index
    %c0_138 = arith.constant 0 : index
    %186 = vector.load %arg7[%c1_135, %c0_136, %c0_137, %c0_138] : memref<2x2x1x16xf32, #tpu.memory_space<vmem>>, vector<1x1x1x16xf32>
    %187 = vector.shape_cast %186 : vector<1x1x1x16xf32> to vector<1x16xf32>
    %188 = vector.broadcast %187 : vector<1x16xf32> to vector<8x16xf32>
    %189 = arith.addf %185, %188 : vector<8x16xf32>
    %c1_139 = arith.constant 1 : index
    %c0_140 = arith.constant 0 : index
    %c0_141 = arith.constant 0 : index
    %c0_142 = arith.constant 0 : index
    %190 = vector.load %arg8[%c1_139, %c0_140, %c0_141, %c0_142] : memref<2x2x32x16xf32, #tpu.memory_space<vmem>>, vector<1x1x32x16xf32>
    %191 = vector.shape_cast %190 : vector<1x1x32x16xf32> to vector<32x16xf32>
    %cst_143 = arith.constant dense<0.000000e+00> : vector<8x16xf32>
    %192 = tpu.matmul %174, %191, %cst_143 {dimension_numbers = #tpu.dot_dimension_numbers<[1], [0], [0], [1], [0, 0, 1, 1], [], []>} : vector<8x32xf32>, vector<32x16xf32>, vector<8x16xf32> -> vector<8x16xf32>
    %c1_144 = arith.constant 1 : index
    %c0_145 = arith.constant 0 : index
    %c0_146 = arith.constant 0 : index
    %c0_147 = arith.constant 0 : index
    %193 = vector.load %arg9[%c1_144, %c0_145, %c0_146, %c0_147] : memref<2x2x1x16xf32, #tpu.memory_space<vmem>>, vector<1x1x1x16xf32>
    %194 = vector.shape_cast %193 : vector<1x1x1x16xf32> to vector<1x16xf32>
    %195 = vector.broadcast %194 : vector<1x16xf32> to vector<8x16xf32>
    %196 = arith.addf %192, %195 : vector<8x16xf32>
    %cst_148 = arith.constant dense<0.000000e+00> : vector<8x8xf32>
    %197 = tpu.matmul %182, %189, %cst_148 {dimension_numbers = #tpu.dot_dimension_numbers<[1], [1], [0], [0], [0, 0, 1, 0], [], []>} : vector<8x16xf32>, vector<8x16xf32>, vector<8x8xf32> -> vector<8x8xf32>
    %198 = vector.broadcast %3 : vector<1x8xf32> to vector<8x8xf32>
    %199 = arith.addf %197, %198 : vector<8x8xf32>
    %cst_149 = arith.constant dense<0xFF800000> : vector<8xf32>
    %200 = vector.multi_reduction <maximumf>, %199, %cst_149 [1] : vector<8x8xf32> to vector<8xf32>
    %201 = vector.shape_cast %200 : vector<8xf32> to vector<8x1xf32>
    %202 = vector.broadcast %201 : vector<8x1xf32> to vector<8x8xf32>
    %203 = arith.subf %199, %202 : vector<8x8xf32>
    %204 = math.exp %203 : vector<8x8xf32>
    %cst_150 = arith.constant dense<0.000000e+00> : vector<8xf32>
    %205 = vector.multi_reduction <add>, %204, %cst_150 [1] : vector<8x8xf32> to vector<8xf32>
    %206 = vector.shape_cast %205 : vector<8xf32> to vector<8x1xf32>
    %207 = tpu.reciprocal %206 {approx = true} : vector<8x1xf32> -> vector<8x1xf32>
    %208 = vector.broadcast %207 : vector<8x1xf32> to vector<8x8xf32>
    %209 = arith.mulf %204, %208 : vector<8x8xf32>
    %cst_151 = arith.constant dense<0.000000e+00> : vector<8x16xf32>
    %210 = tpu.matmul %209, %196, %cst_151 {dimension_numbers = #tpu.dot_dimension_numbers<[1], [0], [0], [1], [0, 0, 1, 1], [], []>} : vector<8x8xf32>, vector<8x16xf32>, vector<8x16xf32> -> vector<8x16xf32>
    %c1_152 = arith.constant 1 : index
    %c0_153 = arith.constant 0 : index
    %c0_154 = arith.constant 0 : index
    %c0_155 = arith.constant 0 : index
    %211 = vector.load %arg10[%c1_152, %c0_153, %c0_154, %c0_155] : memref<2x2x16x32xf32, #tpu.memory_space<vmem>>, vector<1x1x16x32xf32>
    %212 = vector.shape_cast %211 : vector<1x1x16x32xf32> to vector<16x32xf32>
    %cst_156 = arith.constant dense<0.000000e+00> : vector<8x32xf32>
    %213 = tpu.matmul %210, %212, %cst_156 {dimension_numbers = #tpu.dot_dimension_numbers<[1], [0], [0], [1], [0, 0, 1, 1], [], []>} : vector<8x16xf32>, vector<16x32xf32>, vector<8x32xf32> -> vector<8x32xf32>
    %214 = arith.addf %175, %213 : vector<8x32xf32>
    %c1_157 = arith.constant 1 : index
    %c1_158 = arith.constant 1 : index
    %c0_159 = arith.constant 0 : index
    %c0_160 = arith.constant 0 : index
    %215 = vector.load %arg4[%c1_157, %c1_158, %c0_159, %c0_160] : memref<2x2x32x16xf32, #tpu.memory_space<vmem>>, vector<1x1x32x16xf32>
    %216 = vector.shape_cast %215 : vector<1x1x32x16xf32> to vector<32x16xf32>
    %cst_161 = arith.constant dense<0.000000e+00> : vector<8x16xf32>
    %217 = tpu.matmul %174, %216, %cst_161 {dimension_numbers = #tpu.dot_dimension_numbers<[1], [0], [0], [1], [0, 0, 1, 1], [], []>} : vector<8x32xf32>, vector<32x16xf32>, vector<8x16xf32> -> vector<8x16xf32>
    %c1_162 = arith.constant 1 : index
    %c1_163 = arith.constant 1 : index
    %c0_164 = arith.constant 0 : index
    %c0_165 = arith.constant 0 : index
    %218 = vector.load %arg5[%c1_162, %c1_163, %c0_164, %c0_165] : memref<2x2x1x16xf32, #tpu.memory_space<vmem>>, vector<1x1x1x16xf32>
    %219 = vector.shape_cast %218 : vector<1x1x1x16xf32> to vector<1x16xf32>
    %220 = vector.broadcast %219 : vector<1x16xf32> to vector<8x16xf32>
    %221 = arith.addf %217, %220 : vector<8x16xf32>
    %c1_166 = arith.constant 1 : index
    %c1_167 = arith.constant 1 : index
    %c0_168 = arith.constant 0 : index
    %c0_169 = arith.constant 0 : index
    %222 = vector.load %arg6[%c1_166, %c1_167, %c0_168, %c0_169] : memref<2x2x32x16xf32, #tpu.memory_space<vmem>>, vector<1x1x32x16xf32>
    %223 = vector.shape_cast %222 : vector<1x1x32x16xf32> to vector<32x16xf32>
    %cst_170 = arith.constant dense<0.000000e+00> : vector<8x16xf32>
    %224 = tpu.matmul %174, %223, %cst_170 {dimension_numbers = #tpu.dot_dimension_numbers<[1], [0], [0], [1], [0, 0, 1, 1], [], []>} : vector<8x32xf32>, vector<32x16xf32>, vector<8x16xf32> -> vector<8x16xf32>
    %c1_171 = arith.constant 1 : index
    %c1_172 = arith.constant 1 : index
    %c0_173 = arith.constant 0 : index
    %c0_174 = arith.constant 0 : index
    %225 = vector.load %arg7[%c1_171, %c1_172, %c0_173, %c0_174] : memref<2x2x1x16xf32, #tpu.memory_space<vmem>>, vector<1x1x1x16xf32>
    %226 = vector.shape_cast %225 : vector<1x1x1x16xf32> to vector<1x16xf32>
    %227 = vector.broadcast %226 : vector<1x16xf32> to vector<8x16xf32>
    %228 = arith.addf %224, %227 : vector<8x16xf32>
    %c1_175 = arith.constant 1 : index
    %c1_176 = arith.constant 1 : index
    %c0_177 = arith.constant 0 : index
    %c0_178 = arith.constant 0 : index
    %229 = vector.load %arg8[%c1_175, %c1_176, %c0_177, %c0_178] : memref<2x2x32x16xf32, #tpu.memory_space<vmem>>, vector<1x1x32x16xf32>
    %230 = vector.shape_cast %229 : vector<1x1x32x16xf32> to vector<32x16xf32>
    %cst_179 = arith.constant dense<0.000000e+00> : vector<8x16xf32>
    %231 = tpu.matmul %174, %230, %cst_179 {dimension_numbers = #tpu.dot_dimension_numbers<[1], [0], [0], [1], [0, 0, 1, 1], [], []>} : vector<8x32xf32>, vector<32x16xf32>, vector<8x16xf32> -> vector<8x16xf32>
    %c1_180 = arith.constant 1 : index
    %c1_181 = arith.constant 1 : index
    %c0_182 = arith.constant 0 : index
    %c0_183 = arith.constant 0 : index
    %232 = vector.load %arg9[%c1_180, %c1_181, %c0_182, %c0_183] : memref<2x2x1x16xf32, #tpu.memory_space<vmem>>, vector<1x1x1x16xf32>
    %233 = vector.shape_cast %232 : vector<1x1x1x16xf32> to vector<1x16xf32>
    %234 = vector.broadcast %233 : vector<1x16xf32> to vector<8x16xf32>
    %235 = arith.addf %231, %234 : vector<8x16xf32>
    %cst_184 = arith.constant dense<0.000000e+00> : vector<8x8xf32>
    %236 = tpu.matmul %221, %228, %cst_184 {dimension_numbers = #tpu.dot_dimension_numbers<[1], [1], [0], [0], [0, 0, 1, 0], [], []>} : vector<8x16xf32>, vector<8x16xf32>, vector<8x8xf32> -> vector<8x8xf32>
    %237 = vector.broadcast %3 : vector<1x8xf32> to vector<8x8xf32>
    %238 = arith.addf %236, %237 : vector<8x8xf32>
    %cst_185 = arith.constant dense<0xFF800000> : vector<8xf32>
    %239 = vector.multi_reduction <maximumf>, %238, %cst_185 [1] : vector<8x8xf32> to vector<8xf32>
    %240 = vector.shape_cast %239 : vector<8xf32> to vector<8x1xf32>
    %241 = vector.broadcast %240 : vector<8x1xf32> to vector<8x8xf32>
    %242 = arith.subf %238, %241 : vector<8x8xf32>
    %243 = math.exp %242 : vector<8x8xf32>
    %cst_186 = arith.constant dense<0.000000e+00> : vector<8xf32>
    %244 = vector.multi_reduction <add>, %243, %cst_186 [1] : vector<8x8xf32> to vector<8xf32>
    %245 = vector.shape_cast %244 : vector<8xf32> to vector<8x1xf32>
    %246 = tpu.reciprocal %245 {approx = true} : vector<8x1xf32> -> vector<8x1xf32>
    %247 = vector.broadcast %246 : vector<8x1xf32> to vector<8x8xf32>
    %248 = arith.mulf %243, %247 : vector<8x8xf32>
    %cst_187 = arith.constant dense<0.000000e+00> : vector<8x16xf32>
    %249 = tpu.matmul %248, %235, %cst_187 {dimension_numbers = #tpu.dot_dimension_numbers<[1], [0], [0], [1], [0, 0, 1, 1], [], []>} : vector<8x8xf32>, vector<8x16xf32>, vector<8x16xf32> -> vector<8x16xf32>
    %c1_188 = arith.constant 1 : index
    %c1_189 = arith.constant 1 : index
    %c0_190 = arith.constant 0 : index
    %c0_191 = arith.constant 0 : index
    %250 = vector.load %arg10[%c1_188, %c1_189, %c0_190, %c0_191] : memref<2x2x16x32xf32, #tpu.memory_space<vmem>>, vector<1x1x16x32xf32>
    %251 = vector.shape_cast %250 : vector<1x1x16x32xf32> to vector<16x32xf32>
    %cst_192 = arith.constant dense<0.000000e+00> : vector<8x32xf32>
    %252 = tpu.matmul %249, %251, %cst_192 {dimension_numbers = #tpu.dot_dimension_numbers<[1], [0], [0], [1], [0, 0, 1, 1], [], []>} : vector<8x16xf32>, vector<16x32xf32>, vector<8x32xf32> -> vector<8x32xf32>
    %253 = arith.addf %214, %252 : vector<8x32xf32>
    %c1_193 = arith.constant 1 : index
    %c0_194 = arith.constant 0 : index
    %c0_195 = arith.constant 0 : index
    %254 = vector.load %arg11[%c1_193, %c0_194, %c0_195] : memref<2x1x32xf32, #tpu.memory_space<vmem>>, vector<1x1x32xf32>
    %255 = vector.shape_cast %254 : vector<1x1x32xf32> to vector<1x32xf32>
    %256 = vector.broadcast %255 : vector<1x32xf32> to vector<8x32xf32>
    %257 = arith.addf %253, %256 : vector<8x32xf32>
    %258 = arith.addf %257, %174 : vector<8x32xf32>
    %c1_196 = arith.constant 1 : index
    %c0_197 = arith.constant 0 : index
    %c0_198 = arith.constant 0 : index
    %259 = vector.load %arg12[%c1_196, %c0_197, %c0_198] : memref<2x1x32xf32, #tpu.memory_space<vmem>>, vector<1x1x32xf32>
    %260 = vector.shape_cast %259 : vector<1x1x32xf32> to vector<1x32xf32>
    %c1_199 = arith.constant 1 : index
    %c0_200 = arith.constant 0 : index
    %c0_201 = arith.constant 0 : index
    %261 = vector.load %arg13[%c1_199, %c0_200, %c0_201] : memref<2x1x32xf32, #tpu.memory_space<vmem>>, vector<1x1x32xf32>
    %262 = vector.shape_cast %261 : vector<1x1x32xf32> to vector<1x32xf32>
    %cst_202 = arith.constant dense<0.000000e+00> : vector<8xf32>
    %263 = vector.multi_reduction <add>, %258, %cst_202 [1] : vector<8x32xf32> to vector<8xf32>
    %264 = vector.shape_cast %263 : vector<8xf32> to vector<8x1xf32>
    %cst_203 = arith.constant 3.200000e+01 : f32
    %265 = vector.broadcast %cst_203 : f32 to vector<8x1xf32>
    %266 = arith.divf %264, %265 : vector<8x1xf32>
    %267 = vector.broadcast %266 : vector<8x1xf32> to vector<8x32xf32>
    %268 = arith.subf %258, %267 : vector<8x32xf32>
    %269 = arith.mulf %268, %268 : vector<8x32xf32>
    %cst_204 = arith.constant dense<0.000000e+00> : vector<8xf32>
    %270 = vector.multi_reduction <add>, %269, %cst_204 [1] : vector<8x32xf32> to vector<8xf32>
    %271 = vector.shape_cast %270 : vector<8xf32> to vector<8x1xf32>
    %cst_205 = arith.constant 3.200000e+01 : f32
    %272 = vector.broadcast %cst_205 : f32 to vector<8x1xf32>
    %273 = arith.divf %271, %272 : vector<8x1xf32>
    %274 = vector.broadcast %266 : vector<8x1xf32> to vector<8x32xf32>
    %275 = arith.subf %258, %274 : vector<8x32xf32>
    %cst_206 = arith.constant 9.99999974E-6 : f32
    %276 = vector.broadcast %cst_206 : f32 to vector<8x1xf32>
    %277 = arith.addf %273, %276 : vector<8x1xf32>
    %278 = math.rsqrt %277 : vector<8x1xf32>
    %279 = vector.broadcast %278 : vector<8x1xf32> to vector<8x32xf32>
    %280 = arith.mulf %275, %279 : vector<8x32xf32>
    %281 = vector.broadcast %260 : vector<1x32xf32> to vector<8x32xf32>
    %282 = arith.mulf %280, %281 : vector<8x32xf32>
    %283 = vector.broadcast %262 : vector<1x32xf32> to vector<8x32xf32>
    %284 = arith.addf %282, %283 : vector<8x32xf32>
    %285 = vector.broadcast %5 : vector<8x1xf32> to vector<8x32xf32>
    %286 = arith.mulf %284, %285 : vector<8x32xf32>
    %c1_207 = arith.constant 1 : index
    %c0_208 = arith.constant 0 : index
    %c0_209 = arith.constant 0 : index
    %287 = vector.load %arg14[%c1_207, %c0_208, %c0_209] : memref<2x288x64xf32, #tpu.memory_space<vmem>>, vector<1x288x64xf32>
    %288 = vector.shape_cast %287 : vector<1x288x64xf32> to vector<288x64xf32>
    %c1_210 = arith.constant 1 : index
    %c0_211 = arith.constant 0 : index
    %c0_212 = arith.constant 0 : index
    %289 = vector.load %arg15[%c1_210, %c0_211, %c0_212] : memref<2x1x64xf32, #tpu.memory_space<vmem>>, vector<1x1x64xf32>
    %290 = vector.shape_cast %289 : vector<1x1x64xf32> to vector<1x64xf32>
    %cst_213 = arith.constant 0.000000e+00 : f32
    %291 = vector.broadcast %cst_213 : f32 to vector<4x32xf32>
    %292 = tpu.concatenate %291, %286, %291 in 0 : vector<4x32xf32>, vector<8x32xf32>, vector<4x32xf32> -> vector<16x32xf32>
    %293 = vector.extract_strided_slice %292 {offsets = [0, 0], sizes = [8, 32], strides = [1, 1]} : vector<16x32xf32> to vector<8x32xf32>
    %294 = vector.extract_strided_slice %292 {offsets = [1, 0], sizes = [8, 32], strides = [1, 1]} : vector<16x32xf32> to vector<8x32xf32>
    %295 = vector.extract_strided_slice %292 {offsets = [2, 0], sizes = [8, 32], strides = [1, 1]} : vector<16x32xf32> to vector<8x32xf32>
    %296 = vector.extract_strided_slice %292 {offsets = [3, 0], sizes = [8, 32], strides = [1, 1]} : vector<16x32xf32> to vector<8x32xf32>
    %297 = vector.extract_strided_slice %292 {offsets = [4, 0], sizes = [8, 32], strides = [1, 1]} : vector<16x32xf32> to vector<8x32xf32>
    %298 = vector.extract_strided_slice %292 {offsets = [5, 0], sizes = [8, 32], strides = [1, 1]} : vector<16x32xf32> to vector<8x32xf32>
    %299 = vector.extract_strided_slice %292 {offsets = [6, 0], sizes = [8, 32], strides = [1, 1]} : vector<16x32xf32> to vector<8x32xf32>
    %300 = vector.extract_strided_slice %292 {offsets = [7, 0], sizes = [8, 32], strides = [1, 1]} : vector<16x32xf32> to vector<8x32xf32>
    %301 = vector.extract_strided_slice %292 {offsets = [8, 0], sizes = [8, 32], strides = [1, 1]} : vector<16x32xf32> to vector<8x32xf32>
    %302 = tpu.concatenate %293, %294, %295, %296, %297, %298, %299, %300, %301 in 1 : vector<8x32xf32>, vector<8x32xf32>, vector<8x32xf32>, vector<8x32xf32>, vector<8x32xf32>, vector<8x32xf32>, vector<8x32xf32>, vector<8x32xf32>, vector<8x32xf32> -> vector<8x288xf32>
    %cst_214 = arith.constant dense<0.000000e+00> : vector<8x64xf32>
    %303 = tpu.matmul %302, %288, %cst_214 {dimension_numbers = #tpu.dot_dimension_numbers<[1], [0], [0], [1], [0, 0, 1, 1], [], []>} : vector<8x288xf32>, vector<288x64xf32>, vector<8x64xf32> -> vector<8x64xf32>
    %304 = vector.broadcast %290 : vector<1x64xf32> to vector<8x64xf32>
    %305 = arith.addf %303, %304 : vector<8x64xf32>
    %cst_215 = arith.constant 0.000000e+00 : f32
    %306 = vector.broadcast %cst_215 : f32 to vector<8x64xf32>
    %307 = arith.maximumf %305, %306 : vector<8x64xf32>
    %c1_216 = arith.constant 1 : index
    %c0_217 = arith.constant 0 : index
    %c0_218 = arith.constant 0 : index
    %308 = vector.load %arg16[%c1_216, %c0_217, %c0_218] : memref<2x64x32xf32, #tpu.memory_space<vmem>>, vector<1x64x32xf32>
    %309 = vector.shape_cast %308 : vector<1x64x32xf32> to vector<64x32xf32>
    %cst_219 = arith.constant dense<0.000000e+00> : vector<8x32xf32>
    %310 = tpu.matmul %307, %309, %cst_219 {dimension_numbers = #tpu.dot_dimension_numbers<[1], [0], [0], [1], [0, 0, 1, 1], [], []>} : vector<8x64xf32>, vector<64x32xf32>, vector<8x32xf32> -> vector<8x32xf32>
    %c1_220 = arith.constant 1 : index
    %c0_221 = arith.constant 0 : index
    %c0_222 = arith.constant 0 : index
    %311 = vector.load %arg17[%c1_220, %c0_221, %c0_222] : memref<2x1x32xf32, #tpu.memory_space<vmem>>, vector<1x1x32xf32>
    %312 = vector.shape_cast %311 : vector<1x1x32xf32> to vector<1x32xf32>
    %313 = vector.broadcast %312 : vector<1x32xf32> to vector<8x32xf32>
    %314 = arith.addf %310, %313 : vector<8x32xf32>
    %315 = arith.addf %314, %286 : vector<8x32xf32>
    %c1_223 = arith.constant 1 : index
    %c0_224 = arith.constant 0 : index
    %c0_225 = arith.constant 0 : index
    %316 = vector.load %arg18[%c1_223, %c0_224, %c0_225] : memref<2x1x32xf32, #tpu.memory_space<vmem>>, vector<1x1x32xf32>
    %317 = vector.shape_cast %316 : vector<1x1x32xf32> to vector<1x32xf32>
    %c1_226 = arith.constant 1 : index
    %c0_227 = arith.constant 0 : index
    %c0_228 = arith.constant 0 : index
    %318 = vector.load %arg19[%c1_226, %c0_227, %c0_228] : memref<2x1x32xf32, #tpu.memory_space<vmem>>, vector<1x1x32xf32>
    %319 = vector.shape_cast %318 : vector<1x1x32xf32> to vector<1x32xf32>
    %cst_229 = arith.constant dense<0.000000e+00> : vector<8xf32>
    %320 = vector.multi_reduction <add>, %315, %cst_229 [1] : vector<8x32xf32> to vector<8xf32>
    %321 = vector.shape_cast %320 : vector<8xf32> to vector<8x1xf32>
    %cst_230 = arith.constant 3.200000e+01 : f32
    %322 = vector.broadcast %cst_230 : f32 to vector<8x1xf32>
    %323 = arith.divf %321, %322 : vector<8x1xf32>
    %324 = vector.broadcast %323 : vector<8x1xf32> to vector<8x32xf32>
    %325 = arith.subf %315, %324 : vector<8x32xf32>
    %326 = arith.mulf %325, %325 : vector<8x32xf32>
    %cst_231 = arith.constant dense<0.000000e+00> : vector<8xf32>
    %327 = vector.multi_reduction <add>, %326, %cst_231 [1] : vector<8x32xf32> to vector<8xf32>
    %328 = vector.shape_cast %327 : vector<8xf32> to vector<8x1xf32>
    %cst_232 = arith.constant 3.200000e+01 : f32
    %329 = vector.broadcast %cst_232 : f32 to vector<8x1xf32>
    %330 = arith.divf %328, %329 : vector<8x1xf32>
    %331 = vector.broadcast %323 : vector<8x1xf32> to vector<8x32xf32>
    %332 = arith.subf %315, %331 : vector<8x32xf32>
    %cst_233 = arith.constant 9.99999974E-6 : f32
    %333 = vector.broadcast %cst_233 : f32 to vector<8x1xf32>
    %334 = arith.addf %330, %333 : vector<8x1xf32>
    %335 = math.rsqrt %334 : vector<8x1xf32>
    %336 = vector.broadcast %335 : vector<8x1xf32> to vector<8x32xf32>
    %337 = arith.mulf %332, %336 : vector<8x32xf32>
    %338 = vector.broadcast %317 : vector<1x32xf32> to vector<8x32xf32>
    %339 = arith.mulf %337, %338 : vector<8x32xf32>
    %340 = vector.broadcast %319 : vector<1x32xf32> to vector<8x32xf32>
    %341 = arith.addf %339, %340 : vector<8x32xf32>
    %342 = vector.broadcast %5 : vector<8x1xf32> to vector<8x32xf32>
    %343 = arith.mulf %341, %342 : vector<8x32xf32>
    %c0_234 = arith.constant 0 : index
    %c0_235 = arith.constant 0 : index
    %c0_236 = arith.constant 0 : index
    %344 = vector.load %arg30[%c0_234, %c0_235, %c0_236] : memref<1x8x32xf32, #tpu.memory_space<vmem>>, vector<1x8x32xf32>
    %345 = vector.shape_cast %344 : vector<1x8x32xf32> to vector<8x32xf32>
    %346 = vector.shape_cast %343 : vector<8x32xf32> to vector<1x8x32xf32>
    tpu.vector_store %arg30[%c0_234, %c0_235, %c0_236], %346 {strides = array<i32>} : memref<1x8x32xf32, #tpu.memory_space<vmem>>, vector<1x8x32xf32>,
    %c0_237 = arith.constant 0 : index
    %c0_238 = arith.constant 0 : index
    %347 = vector.load %arg20[%c0_237, %c0_238] : memref<96x32xf32, #tpu.memory_space<vmem>>, vector<96x32xf32>
    %c0_239 = arith.constant 0 : index
    %c0_240 = arith.constant 0 : index
    %348 = vector.load %arg21[%c0_239, %c0_240] : memref<1x32xf32, #tpu.memory_space<vmem>>, vector<1x32xf32>
    %c0_241 = arith.constant 0 : index
    %c0_242 = arith.constant 0 : index
    %349 = vector.load %arg22[%c0_241, %c0_242] : memref<1x32xf32, #tpu.memory_space<vmem>>, vector<1x32xf32>
    %c0_243 = arith.constant 0 : index
    %c0_244 = arith.constant 0 : index
    %350 = vector.load %arg23[%c0_243, %c0_244] : memref<1x32xf32, #tpu.memory_space<vmem>>, vector<1x32xf32>
    %c0_245 = arith.constant 0 : index
    %c0_246 = arith.constant 0 : index
    %351 = vector.load %arg24[%c0_245, %c0_246] : memref<96x32xf32, #tpu.memory_space<vmem>>, vector<96x32xf32>
    %c0_247 = arith.constant 0 : index
    %c0_248 = arith.constant 0 : index
    %352 = vector.load %arg25[%c0_247, %c0_248] : memref<1x32xf32, #tpu.memory_space<vmem>>, vector<1x32xf32>
    %c0_249 = arith.constant 0 : index
    %c0_250 = arith.constant 0 : index
    %353 = vector.load %arg26[%c0_249, %c0_250] : memref<1x32xf32, #tpu.memory_space<vmem>>, vector<1x32xf32>
    %c0_251 = arith.constant 0 : index
    %c0_252 = arith.constant 0 : index
    %354 = vector.load %arg27[%c0_251, %c0_252] : memref<1x32xf32, #tpu.memory_space<vmem>>, vector<1x32xf32>
    %c0_253 = arith.constant 0 : index
    %c0_254 = arith.constant 0 : index
    %355 = vector.load %arg28[%c0_253, %c0_254] : memref<32x1xf32, #tpu.memory_space<vmem>>, vector<32x1xf32>
    %c0_255 = arith.constant 0 : index
    %c0_256 = arith.constant 0 : index
    %356 = vector.load %arg29[%c0_255, %c0_256] : memref<1x1xf32, #tpu.memory_space<vmem>>, vector<1x1xf32>
    %cst_257 = arith.constant 0.000000e+00 : f32
    %357 = vector.broadcast %cst_257 : f32 to vector<1x32xf32>
    %358 = tpu.concatenate %357, %343, %357 in 0 : vector<1x32xf32>, vector<8x32xf32>, vector<1x32xf32> -> vector<10x32xf32>
    %359 = vector.extract_strided_slice %358 {offsets = [0, 0], sizes = [8, 32], strides = [1, 1]} : vector<10x32xf32> to vector<8x32xf32>
    %360 = vector.extract_strided_slice %358 {offsets = [1, 0], sizes = [8, 32], strides = [1, 1]} : vector<10x32xf32> to vector<8x32xf32>
    %361 = vector.extract_strided_slice %358 {offsets = [2, 0], sizes = [8, 32], strides = [1, 1]} : vector<10x32xf32> to vector<8x32xf32>
    %362 = tpu.concatenate %359, %360, %361 in 1 : vector<8x32xf32>, vector<8x32xf32>, vector<8x32xf32> -> vector<8x96xf32>
    %cst_258 = arith.constant dense<0.000000e+00> : vector<8x32xf32>
    %363 = tpu.matmul %362, %347, %cst_258 {dimension_numbers = #tpu.dot_dimension_numbers<[1], [0], [0], [1], [0, 0, 1, 1], [], []>} : vector<8x96xf32>, vector<96x32xf32>, vector<8x32xf32> -> vector<8x32xf32>
    %364 = vector.broadcast %348 : vector<1x32xf32> to vector<8x32xf32>
    %365 = arith.addf %363, %364 : vector<8x32xf32>
    %cst_259 = arith.constant 0.000000e+00 : f32
    %366 = vector.broadcast %cst_259 : f32 to vector<8x32xf32>
    %367 = arith.maximumf %365, %366 : vector<8x32xf32>
    %cst_260 = arith.constant dense<0.000000e+00> : vector<8xf32>
    %368 = vector.multi_reduction <add>, %367, %cst_260 [1] : vector<8x32xf32> to vector<8xf32>
    %369 = vector.shape_cast %368 : vector<8xf32> to vector<8x1xf32>
    %cst_261 = arith.constant 3.200000e+01 : f32
    %370 = vector.broadcast %cst_261 : f32 to vector<8x1xf32>
    %371 = arith.divf %369, %370 : vector<8x1xf32>
    %372 = vector.broadcast %371 : vector<8x1xf32> to vector<8x32xf32>
    %373 = arith.subf %367, %372 : vector<8x32xf32>
    %374 = arith.mulf %373, %373 : vector<8x32xf32>
    %cst_262 = arith.constant dense<0.000000e+00> : vector<8xf32>
    %375 = vector.multi_reduction <add>, %374, %cst_262 [1] : vector<8x32xf32> to vector<8xf32>
    %376 = vector.shape_cast %375 : vector<8xf32> to vector<8x1xf32>
    %cst_263 = arith.constant 3.200000e+01 : f32
    %377 = vector.broadcast %cst_263 : f32 to vector<8x1xf32>
    %378 = arith.divf %376, %377 : vector<8x1xf32>
    %379 = vector.broadcast %371 : vector<8x1xf32> to vector<8x32xf32>
    %380 = arith.subf %367, %379 : vector<8x32xf32>
    %cst_264 = arith.constant 9.99999974E-6 : f32
    %381 = vector.broadcast %cst_264 : f32 to vector<8x1xf32>
    %382 = arith.addf %378, %381 : vector<8x1xf32>
    %383 = math.rsqrt %382 : vector<8x1xf32>
    %384 = vector.broadcast %383 : vector<8x1xf32> to vector<8x32xf32>
    %385 = arith.mulf %380, %384 : vector<8x32xf32>
    %386 = vector.broadcast %349 : vector<1x32xf32> to vector<8x32xf32>
    %387 = arith.mulf %385, %386 : vector<8x32xf32>
    %388 = vector.broadcast %350 : vector<1x32xf32> to vector<8x32xf32>
    %389 = arith.addf %387, %388 : vector<8x32xf32>
    %cst_265 = arith.constant 0.000000e+00 : f32
    %390 = vector.broadcast %cst_265 : f32 to vector<1x32xf32>
    %391 = tpu.concatenate %390, %389, %390 in 0 : vector<1x32xf32>, vector<8x32xf32>, vector<1x32xf32> -> vector<10x32xf32>
    %392 = vector.extract_strided_slice %391 {offsets = [0, 0], sizes = [8, 32], strides = [1, 1]} : vector<10x32xf32> to vector<8x32xf32>
    %393 = vector.extract_strided_slice %391 {offsets = [1, 0], sizes = [8, 32], strides = [1, 1]} : vector<10x32xf32> to vector<8x32xf32>
    %394 = vector.extract_strided_slice %391 {offsets = [2, 0], sizes = [8, 32], strides = [1, 1]} : vector<10x32xf32> to vector<8x32xf32>
    %395 = tpu.concatenate %392, %393, %394 in 1 : vector<8x32xf32>, vector<8x32xf32>, vector<8x32xf32> -> vector<8x96xf32>
    %cst_266 = arith.constant dense<0.000000e+00> : vector<8x32xf32>
    %396 = tpu.matmul %395, %351, %cst_266 {dimension_numbers = #tpu.dot_dimension_numbers<[1], [0], [0], [1], [0, 0, 1, 1], [], []>} : vector<8x96xf32>, vector<96x32xf32>, vector<8x32xf32> -> vector<8x32xf32>
    %397 = vector.broadcast %352 : vector<1x32xf32> to vector<8x32xf32>
    %398 = arith.addf %396, %397 : vector<8x32xf32>
    %cst_267 = arith.constant 0.000000e+00 : f32
    %399 = vector.broadcast %cst_267 : f32 to vector<8x32xf32>
    %400 = arith.maximumf %398, %399 : vector<8x32xf32>
    %cst_268 = arith.constant dense<0.000000e+00> : vector<8xf32>
    %401 = vector.multi_reduction <add>, %400, %cst_268 [1] : vector<8x32xf32> to vector<8xf32>
    %402 = vector.shape_cast %401 : vector<8xf32> to vector<8x1xf32>
    %cst_269 = arith.constant 3.200000e+01 : f32
    %403 = vector.broadcast %cst_269 : f32 to vector<8x1xf32>
    %404 = arith.divf %402, %403 : vector<8x1xf32>
    %405 = vector.broadcast %404 : vector<8x1xf32> to vector<8x32xf32>
    %406 = arith.subf %400, %405 : vector<8x32xf32>
    %407 = arith.mulf %406, %406 : vector<8x32xf32>
    %cst_270 = arith.constant dense<0.000000e+00> : vector<8xf32>
    %408 = vector.multi_reduction <add>, %407, %cst_270 [1] : vector<8x32xf32> to vector<8xf32>
    %409 = vector.shape_cast %408 : vector<8xf32> to vector<8x1xf32>
    %cst_271 = arith.constant 3.200000e+01 : f32
    %410 = vector.broadcast %cst_271 : f32 to vector<8x1xf32>
    %411 = arith.divf %409, %410 : vector<8x1xf32>
    %412 = vector.broadcast %404 : vector<8x1xf32> to vector<8x32xf32>
    %413 = arith.subf %400, %412 : vector<8x32xf32>
    %cst_272 = arith.constant 9.99999974E-6 : f32
    %414 = vector.broadcast %cst_272 : f32 to vector<8x1xf32>
    %415 = arith.addf %411, %414 : vector<8x1xf32>
    %416 = math.rsqrt %415 : vector<8x1xf32>
    %417 = vector.broadcast %416 : vector<8x1xf32> to vector<8x32xf32>
    %418 = arith.mulf %413, %417 : vector<8x32xf32>
    %419 = vector.broadcast %353 : vector<1x32xf32> to vector<8x32xf32>
    %420 = arith.mulf %418, %419 : vector<8x32xf32>
    %421 = vector.broadcast %354 : vector<1x32xf32> to vector<8x32xf32>
    %422 = arith.addf %420, %421 : vector<8x32xf32>
    %cst_273 = arith.constant dense<0.000000e+00> : vector<8x1xf32>
    %423 = tpu.matmul %422, %355, %cst_273 {dimension_numbers = #tpu.dot_dimension_numbers<[1], [0], [0], [1], [0, 0, 1, 1], [], []>} : vector<8x32xf32>, vector<32x1xf32>, vector<8x1xf32> -> vector<8x1xf32>
    %424 = vector.broadcast %356 : vector<1x1xf32> to vector<8x1xf32>
    %425 = arith.addf %423, %424 : vector<8x1xf32>
    %426 = arith.mulf %425, %5 : vector<8x1xf32>
    %c0_274 = arith.constant 0 : index
    %c0_275 = arith.constant 0 : index
    %c0_276 = arith.constant 0 : index
    %427 = vector.load %arg31[%c0_274, %c0_275, %c0_276] : memref<1x8x1xf32, #tpu.memory_space<vmem>>, vector<1x8x1xf32>
    %428 = vector.shape_cast %427 : vector<1x8x1xf32> to vector<8x1xf32>
    %429 = vector.shape_cast %426 : vector<8x1xf32> to vector<1x8x1xf32>
    tpu.vector_store %arg31[%c0_274, %c0_275, %c0_276], %429 {strides = array<i32>} : memref<1x8x1xf32, #tpu.memory_space<vmem>>, vector<1x8x1xf32>,
    return
  }
  func.func @transform_0(%arg0: i32) -> (i32, i32, i32) {
    %c0_i32 = arith.constant 0 : i32
    %c0_i32_0 = arith.constant 0 : i32
    %c0_i32_1 = arith.constant 0 : i32
    return %arg0, %c0_i32, %c0_i32_0 : i32, i32, i32
  }
  func.func @transform_1(%arg0: i32) -> (i32, i32, i32) {
    %c0_i32 = arith.constant 0 : i32
    %c0_i32_0 = arith.constant 0 : i32
    %c0_i32_1 = arith.constant 0 : i32
    return %arg0, %c0_i32, %c0_i32_0 : i32, i32, i32
  }
  func.func @transform_2(%arg0: i32) -> (i32, i32, i32) {
    %c0_i32 = arith.constant 0 : i32
    %c0_i32_0 = arith.constant 0 : i32
    %c0_i32_1 = arith.constant 0 : i32
    return %arg0, %c0_i32, %c0_i32_0 : i32, i32, i32
  }
  func.func @transform_3(%arg0: i32) -> (i32, i32, i32, i32) {
    %c0_i32 = arith.constant 0 : i32
    %c0_i32_0 = arith.constant 0 : i32
    %c0_i32_1 = arith.constant 0 : i32
    %c0_i32_2 = arith.constant 0 : i32
    %c0_i32_3 = arith.constant 0 : i32
    return %c0_i32, %c0_i32_0, %c0_i32_1, %c0_i32_2 : i32, i32, i32, i32
  }
  func.func @transform_4(%arg0: i32) -> (i32, i32, i32, i32) {
    %c0_i32 = arith.constant 0 : i32
    %c0_i32_0 = arith.constant 0 : i32
    %c0_i32_1 = arith.constant 0 : i32
    %c0_i32_2 = arith.constant 0 : i32
    %c0_i32_3 = arith.constant 0 : i32
    return %c0_i32, %c0_i32_0, %c0_i32_1, %c0_i32_2 : i32, i32, i32, i32
  }
  func.func @transform_5(%arg0: i32) -> (i32, i32, i32, i32) {
    %c0_i32 = arith.constant 0 : i32
    %c0_i32_0 = arith.constant 0 : i32
    %c0_i32_1 = arith.constant 0 : i32
    %c0_i32_2 = arith.constant 0 : i32
    %c0_i32_3 = arith.constant 0 : i32
    return %c0_i32, %c0_i32_0, %c0_i32_1, %c0_i32_2 : i32, i32, i32, i32
  }
  func.func @transform_6(%arg0: i32) -> (i32, i32, i32, i32) {
    %c0_i32 = arith.constant 0 : i32
    %c0_i32_0 = arith.constant 0 : i32
    %c0_i32_1 = arith.constant 0 : i32
    %c0_i32_2 = arith.constant 0 : i32
    %c0_i32_3 = arith.constant 0 : i32
    return %c0_i32, %c0_i32_0, %c0_i32_1, %c0_i32_2 : i32, i32, i32, i32
  }
  func.func @transform_7(%arg0: i32) -> (i32, i32, i32, i32) {
    %c0_i32 = arith.constant 0 : i32
    %c0_i32_0 = arith.constant 0 : i32
    %c0_i32_1 = arith.constant 0 : i32
    %c0_i32_2 = arith.constant 0 : i32
    %c0_i32_3 = arith.constant 0 : i32
    return %c0_i32, %c0_i32_0, %c0_i32_1, %c0_i32_2 : i32, i32, i32, i32
  }
  func.func @transform_8(%arg0: i32) -> (i32, i32, i32, i32) {
    %c0_i32 = arith.constant 0 : i32
    %c0_i32_0 = arith.constant 0 : i32
    %c0_i32_1 = arith.constant 0 : i32
    %c0_i32_2 = arith.constant 0 : i32
    %c0_i32_3 = arith.constant 0 : i32
    return %c0_i32, %c0_i32_0, %c0_i32_1, %c0_i32_2 : i32, i32, i32, i32
  }
  func.func @transform_9(%arg0: i32) -> (i32, i32, i32, i32) {
    %c0_i32 = arith.constant 0 : i32
    %c0_i32_0 = arith.constant 0 : i32
    %c0_i32_1 = arith.constant 0 : i32
    %c0_i32_2 = arith.constant 0 : i32
    %c0_i32_3 = arith.constant 0 : i32
    return %c0_i32, %c0_i32_0, %c0_i32_1, %c0_i32_2 : i32, i32, i32, i32
  }
  func.func @transform_10(%arg0: i32) -> (i32, i32, i32) {
    %c0_i32 = arith.constant 0 : i32
    %c0_i32_0 = arith.constant 0 : i32
    %c0_i32_1 = arith.constant 0 : i32
    %c0_i32_2 = arith.constant 0 : i32
    return %c0_i32, %c0_i32_0, %c0_i32_1 : i32, i32, i32
  }
  func.func @transform_11(%arg0: i32) -> (i32, i32, i32) {
    %c0_i32 = arith.constant 0 : i32
    %c0_i32_0 = arith.constant 0 : i32
    %c0_i32_1 = arith.constant 0 : i32
    %c0_i32_2 = arith.constant 0 : i32
    return %c0_i32, %c0_i32_0, %c0_i32_1 : i32, i32, i32
  }
  func.func @transform_12(%arg0: i32) -> (i32, i32, i32) {
    %c0_i32 = arith.constant 0 : i32
    %c0_i32_0 = arith.constant 0 : i32
    %c0_i32_1 = arith.constant 0 : i32
    %c0_i32_2 = arith.constant 0 : i32
    return %c0_i32, %c0_i32_0, %c0_i32_1 : i32, i32, i32
  }
  func.func @transform_13(%arg0: i32) -> (i32, i32, i32) {
    %c0_i32 = arith.constant 0 : i32
    %c0_i32_0 = arith.constant 0 : i32
    %c0_i32_1 = arith.constant 0 : i32
    %c0_i32_2 = arith.constant 0 : i32
    return %c0_i32, %c0_i32_0, %c0_i32_1 : i32, i32, i32
  }
  func.func @transform_14(%arg0: i32) -> (i32, i32, i32) {
    %c0_i32 = arith.constant 0 : i32
    %c0_i32_0 = arith.constant 0 : i32
    %c0_i32_1 = arith.constant 0 : i32
    %c0_i32_2 = arith.constant 0 : i32
    return %c0_i32, %c0_i32_0, %c0_i32_1 : i32, i32, i32
  }
  func.func @transform_15(%arg0: i32) -> (i32, i32, i32) {
    %c0_i32 = arith.constant 0 : i32
    %c0_i32_0 = arith.constant 0 : i32
    %c0_i32_1 = arith.constant 0 : i32
    %c0_i32_2 = arith.constant 0 : i32
    return %c0_i32, %c0_i32_0, %c0_i32_1 : i32, i32, i32
  }
  func.func @transform_16(%arg0: i32) -> (i32, i32, i32) {
    %c0_i32 = arith.constant 0 : i32
    %c0_i32_0 = arith.constant 0 : i32
    %c0_i32_1 = arith.constant 0 : i32
    %c0_i32_2 = arith.constant 0 : i32
    return %c0_i32, %c0_i32_0, %c0_i32_1 : i32, i32, i32
  }
  func.func @transform_17(%arg0: i32) -> (i32, i32, i32) {
    %c0_i32 = arith.constant 0 : i32
    %c0_i32_0 = arith.constant 0 : i32
    %c0_i32_1 = arith.constant 0 : i32
    %c0_i32_2 = arith.constant 0 : i32
    return %c0_i32, %c0_i32_0, %c0_i32_1 : i32, i32, i32
  }
  func.func @transform_18(%arg0: i32) -> (i32, i32, i32) {
    %c0_i32 = arith.constant 0 : i32
    %c0_i32_0 = arith.constant 0 : i32
    %c0_i32_1 = arith.constant 0 : i32
    %c0_i32_2 = arith.constant 0 : i32
    return %c0_i32, %c0_i32_0, %c0_i32_1 : i32, i32, i32
  }
  func.func @transform_19(%arg0: i32) -> (i32, i32) {
    %c0_i32 = arith.constant 0 : i32
    %c0_i32_0 = arith.constant 0 : i32
    %c0_i32_1 = arith.constant 0 : i32
    return %c0_i32, %c0_i32_0 : i32, i32
  }
  func.func @transform_20(%arg0: i32) -> (i32, i32) {
    %c0_i32 = arith.constant 0 : i32
    %c0_i32_0 = arith.constant 0 : i32
    %c0_i32_1 = arith.constant 0 : i32
    return %c0_i32, %c0_i32_0 : i32, i32
  }
  func.func @transform_21(%arg0: i32) -> (i32, i32) {
    %c0_i32 = arith.constant 0 : i32
    %c0_i32_0 = arith.constant 0 : i32
    %c0_i32_1 = arith.constant 0 : i32
    return %c0_i32, %c0_i32_0 : i32, i32
  }
  func.func @transform_22(%arg0: i32) -> (i32, i32) {
    %c0_i32 = arith.constant 0 : i32
    %c0_i32_0 = arith.constant 0 : i32
    %c0_i32_1 = arith.constant 0 : i32
    return %c0_i32, %c0_i32_0 : i32, i32
  }
  func.func @transform_23(%arg0: i32) -> (i32, i32) {
    %c0_i32 = arith.constant 0 : i32
    %c0_i32_0 = arith.constant 0 : i32
    %c0_i32_1 = arith.constant 0 : i32
    return %c0_i32, %c0_i32_0 : i32, i32
  }
  func.func @transform_24(%arg0: i32) -> (i32, i32) {
    %c0_i32 = arith.constant 0 : i32
    %c0_i32_0 = arith.constant 0 : i32
    %c0_i32_1 = arith.constant 0 : i32
    return %c0_i32, %c0_i32_0 : i32, i32
  }
  func.func @transform_25(%arg0: i32) -> (i32, i32) {
    %c0_i32 = arith.constant 0 : i32
    %c0_i32_0 = arith.constant 0 : i32
    %c0_i32_1 = arith.constant 0 : i32
    return %c0_i32, %c0_i32_0 : i32, i32
  }
  func.func @transform_26(%arg0: i32) -> (i32, i32) {
    %c0_i32 = arith.constant 0 : i32
    %c0_i32_0 = arith.constant 0 : i32
    %c0_i32_1 = arith.constant 0 : i32
    return %c0_i32, %c0_i32_0 : i32, i32
  }
  func.func @transform_27(%arg0: i32) -> (i32, i32) {
    %c0_i32 = arith.constant 0 : i32
    %c0_i32_0 = arith.constant 0 : i32
    %c0_i32_1 = arith.constant 0 : i32
    return %c0_i32, %c0_i32_0 : i32, i32
  }
  func.func @transform_28(%arg0: i32) -> (i32, i32) {
    %c0_i32 = arith.constant 0 : i32
    %c0_i32_0 = arith.constant 0 : i32
    %c0_i32_1 = arith.constant 0 : i32
    return %c0_i32, %c0_i32_0 : i32, i32
  }
  func.func @transform_29(%arg0: i32) -> (i32, i32, i32) {
    %c0_i32 = arith.constant 0 : i32
    %c0_i32_0 = arith.constant 0 : i32
    %c0_i32_1 = arith.constant 0 : i32
    return %arg0, %c0_i32, %c0_i32_0 : i32, i32, i32
  }
  func.func @transform_30(%arg0: i32) -> (i32, i32, i32) {
    %c0_i32 = arith.constant 0 : i32
    %c0_i32_0 = arith.constant 0 : i32
    %c0_i32_1 = arith.constant 0 : i32
    return %arg0, %c0_i32, %c0_i32_0 : i32, i32, i32
  }
}

module attributes {stable_mosaic.version = 11 : i64} {
  func.func @kernel(%arg0: i32, %arg1: memref<1x32x32xf32, #tpu.memory_space<vmem>>, %arg2: memref<1x32x1xf32, #tpu.memory_space<vmem>>, %arg3: memref<2x96x32xf32, #tpu.memory_space<vmem>>, %arg4: memref<2x1x32xf32, #tpu.memory_space<vmem>>, %arg5: memref<2x1x32xf32, #tpu.memory_space<vmem>>, %arg6: memref<2x1x32xf32, #tpu.memory_space<vmem>>, %arg7: memref<2x96x32xf32, #tpu.memory_space<vmem>>, %arg8: memref<2x1x32xf32, #tpu.memory_space<vmem>>, %arg9: memref<2x1x32xf32, #tpu.memory_space<vmem>>, %arg10: memref<2x1x32xf32, #tpu.memory_space<vmem>>, %arg11: memref<2x32x1xf32, #tpu.memory_space<vmem>>, %arg12: memref<2x1x1xf32, #tpu.memory_space<vmem>>, %arg13: memref<1x32x2xf32, #tpu.memory_space<vmem>>) attributes {dimension_semantics = [#tpu.dimension_semantics<parallel>], iteration_bounds = array<i64: 2>, scalar_prefetch = 0 : i64, scratch_operands = 0 : i64, tpu.core_type = #tpu.core_type<tc>, window_params = [{transform_indices = @transform_0, window_bounds = array<i64: 1, 32, 32>}, {transform_indices = @transform_1, window_bounds = array<i64: 1, 32, 1>}, {pipeline_mode = #tpu.pipeline_mode<synchronous>, transform_indices = @transform_2, window_bounds = array<i64: 2, 96, 32>}, {pipeline_mode = #tpu.pipeline_mode<synchronous>, transform_indices = @transform_3, window_bounds = array<i64: 2, 1, 32>}, {pipeline_mode = #tpu.pipeline_mode<synchronous>, transform_indices = @transform_4, window_bounds = array<i64: 2, 1, 32>}, {pipeline_mode = #tpu.pipeline_mode<synchronous>, transform_indices = @transform_5, window_bounds = array<i64: 2, 1, 32>}, {pipeline_mode = #tpu.pipeline_mode<synchronous>, transform_indices = @transform_6, window_bounds = array<i64: 2, 96, 32>}, {pipeline_mode = #tpu.pipeline_mode<synchronous>, transform_indices = @transform_7, window_bounds = array<i64: 2, 1, 32>}, {pipeline_mode = #tpu.pipeline_mode<synchronous>, transform_indices = @transform_8, window_bounds = array<i64: 2, 1, 32>}, {pipeline_mode = #tpu.pipeline_mode<synchronous>, transform_indices = @transform_9, window_bounds = array<i64: 2, 1, 32>}, {pipeline_mode = #tpu.pipeline_mode<synchronous>, transform_indices = @transform_10, window_bounds = array<i64: 2, 32, 1>}, {pipeline_mode = #tpu.pipeline_mode<synchronous>, transform_indices = @transform_11, window_bounds = array<i64: 2, 1, 1>}, {transform_indices = @transform_12, window_bounds = array<i64: 1, 32, 2>}]} {
    %c0 = arith.constant 0 : index
    %c0_0 = arith.constant 0 : index
    %c0_1 = arith.constant 0 : index
    %0 = vector.load %arg1[%c0, %c0_0, %c0_1] : memref<1x32x32xf32, #tpu.memory_space<vmem>>, vector<1x32x32xf32>
    %1 = vector.shape_cast %0 : vector<1x32x32xf32> to vector<32x32xf32>
    %c0_2 = arith.constant 0 : index
    %c0_3 = arith.constant 0 : index
    %c0_4 = arith.constant 0 : index
    %2 = vector.load %arg2[%c0_2, %c0_3, %c0_4] : memref<1x32x1xf32, #tpu.memory_space<vmem>>, vector<1x32x1xf32>
    %3 = vector.shape_cast %2 : vector<1x32x1xf32> to vector<32x1xf32>
    %c0_5 = arith.constant 0 : index
    %c0_6 = arith.constant 0 : index
    %c0_7 = arith.constant 0 : index
    %4 = vector.load %arg3[%c0_5, %c0_6, %c0_7] : memref<2x96x32xf32, #tpu.memory_space<vmem>>, vector<1x96x32xf32>
    %5 = vector.shape_cast %4 : vector<1x96x32xf32> to vector<96x32xf32>
    %c0_8 = arith.constant 0 : index
    %c0_9 = arith.constant 0 : index
    %c0_10 = arith.constant 0 : index
    %6 = vector.load %arg4[%c0_8, %c0_9, %c0_10] : memref<2x1x32xf32, #tpu.memory_space<vmem>>, vector<1x1x32xf32>
    %7 = vector.shape_cast %6 : vector<1x1x32xf32> to vector<1x32xf32>
    %c0_11 = arith.constant 0 : index
    %c0_12 = arith.constant 0 : index
    %c0_13 = arith.constant 0 : index
    %8 = vector.load %arg5[%c0_11, %c0_12, %c0_13] : memref<2x1x32xf32, #tpu.memory_space<vmem>>, vector<1x1x32xf32>
    %9 = vector.shape_cast %8 : vector<1x1x32xf32> to vector<1x32xf32>
    %c0_14 = arith.constant 0 : index
    %c0_15 = arith.constant 0 : index
    %c0_16 = arith.constant 0 : index
    %10 = vector.load %arg6[%c0_14, %c0_15, %c0_16] : memref<2x1x32xf32, #tpu.memory_space<vmem>>, vector<1x1x32xf32>
    %11 = vector.shape_cast %10 : vector<1x1x32xf32> to vector<1x32xf32>
    %c0_17 = arith.constant 0 : index
    %c0_18 = arith.constant 0 : index
    %c0_19 = arith.constant 0 : index
    %12 = vector.load %arg7[%c0_17, %c0_18, %c0_19] : memref<2x96x32xf32, #tpu.memory_space<vmem>>, vector<1x96x32xf32>
    %13 = vector.shape_cast %12 : vector<1x96x32xf32> to vector<96x32xf32>
    %c0_20 = arith.constant 0 : index
    %c0_21 = arith.constant 0 : index
    %c0_22 = arith.constant 0 : index
    %14 = vector.load %arg8[%c0_20, %c0_21, %c0_22] : memref<2x1x32xf32, #tpu.memory_space<vmem>>, vector<1x1x32xf32>
    %15 = vector.shape_cast %14 : vector<1x1x32xf32> to vector<1x32xf32>
    %c0_23 = arith.constant 0 : index
    %c0_24 = arith.constant 0 : index
    %c0_25 = arith.constant 0 : index
    %16 = vector.load %arg9[%c0_23, %c0_24, %c0_25] : memref<2x1x32xf32, #tpu.memory_space<vmem>>, vector<1x1x32xf32>
    %17 = vector.shape_cast %16 : vector<1x1x32xf32> to vector<1x32xf32>
    %c0_26 = arith.constant 0 : index
    %c0_27 = arith.constant 0 : index
    %c0_28 = arith.constant 0 : index
    %18 = vector.load %arg10[%c0_26, %c0_27, %c0_28] : memref<2x1x32xf32, #tpu.memory_space<vmem>>, vector<1x1x32xf32>
    %19 = vector.shape_cast %18 : vector<1x1x32xf32> to vector<1x32xf32>
    %c0_29 = arith.constant 0 : index
    %c0_30 = arith.constant 0 : index
    %c0_31 = arith.constant 0 : index
    %20 = vector.load %arg11[%c0_29, %c0_30, %c0_31] : memref<2x32x1xf32, #tpu.memory_space<vmem>>, vector<1x32x1xf32>
    %21 = vector.shape_cast %20 : vector<1x32x1xf32> to vector<32x1xf32>
    %c0_32 = arith.constant 0 : index
    %c0_33 = arith.constant 0 : index
    %c0_34 = arith.constant 0 : index
    %22 = vector.load %arg12[%c0_32, %c0_33, %c0_34] : memref<2x1x1xf32, #tpu.memory_space<vmem>>, vector<1x1x1xf32>
    %23 = vector.shape_cast %22 : vector<1x1x1xf32> to vector<1x1xf32>
    %cst = arith.constant 0.000000e+00 : f32
    %24 = vector.broadcast %cst : f32 to vector<1x32xf32>
    %25 = tpu.concatenate %24, %1, %24 in 0 : vector<1x32xf32>, vector<32x32xf32>, vector<1x32xf32> -> vector<34x32xf32>
    %26 = vector.extract_strided_slice %25 {offsets = [0, 0], sizes = [32, 32], strides = [1, 1]} : vector<34x32xf32> to vector<32x32xf32>
    %27 = vector.extract_strided_slice %25 {offsets = [1, 0], sizes = [32, 32], strides = [1, 1]} : vector<34x32xf32> to vector<32x32xf32>
    %28 = vector.extract_strided_slice %25 {offsets = [2, 0], sizes = [32, 32], strides = [1, 1]} : vector<34x32xf32> to vector<32x32xf32>
    %29 = tpu.concatenate %26, %27, %28 in 1 : vector<32x32xf32>, vector<32x32xf32>, vector<32x32xf32> -> vector<32x96xf32>
    %cst_35 = arith.constant dense<0.000000e+00> : vector<32x32xf32>
    %30 = tpu.matmul %29, %5, %cst_35 {dimension_numbers = #tpu.dot_dimension_numbers<[1], [0], [0], [1], [0, 0, 1, 1], [], []>} : vector<32x96xf32>, vector<96x32xf32>, vector<32x32xf32> -> vector<32x32xf32>
    %31 = vector.broadcast %7 : vector<1x32xf32> to vector<32x32xf32>
    %32 = arith.addf %30, %31 : vector<32x32xf32>
    %cst_36 = arith.constant 0.000000e+00 : f32
    %33 = vector.broadcast %cst_36 : f32 to vector<32x32xf32>
    %34 = arith.maximumf %32, %33 : vector<32x32xf32>
    %cst_37 = arith.constant dense<0.000000e+00> : vector<32xf32>
    %35 = vector.multi_reduction <add>, %34, %cst_37 [1] : vector<32x32xf32> to vector<32xf32>
    %36 = vector.shape_cast %35 : vector<32xf32> to vector<32x1xf32>
    %cst_38 = arith.constant 3.200000e+01 : f32
    %37 = vector.broadcast %cst_38 : f32 to vector<32x1xf32>
    %38 = arith.divf %36, %37 : vector<32x1xf32>
    %39 = vector.broadcast %38 : vector<32x1xf32> to vector<32x32xf32>
    %40 = arith.subf %34, %39 : vector<32x32xf32>
    %41 = arith.mulf %40, %40 : vector<32x32xf32>
    %cst_39 = arith.constant dense<0.000000e+00> : vector<32xf32>
    %42 = vector.multi_reduction <add>, %41, %cst_39 [1] : vector<32x32xf32> to vector<32xf32>
    %43 = vector.shape_cast %42 : vector<32xf32> to vector<32x1xf32>
    %cst_40 = arith.constant 3.200000e+01 : f32
    %44 = vector.broadcast %cst_40 : f32 to vector<32x1xf32>
    %45 = arith.divf %43, %44 : vector<32x1xf32>
    %46 = vector.broadcast %38 : vector<32x1xf32> to vector<32x32xf32>
    %47 = arith.subf %34, %46 : vector<32x32xf32>
    %cst_41 = arith.constant 9.99999974E-6 : f32
    %48 = vector.broadcast %cst_41 : f32 to vector<32x1xf32>
    %49 = arith.addf %45, %48 : vector<32x1xf32>
    %50 = math.rsqrt %49 : vector<32x1xf32>
    %51 = vector.broadcast %50 : vector<32x1xf32> to vector<32x32xf32>
    %52 = arith.mulf %47, %51 : vector<32x32xf32>
    %53 = vector.broadcast %9 : vector<1x32xf32> to vector<32x32xf32>
    %54 = arith.mulf %52, %53 : vector<32x32xf32>
    %55 = vector.broadcast %11 : vector<1x32xf32> to vector<32x32xf32>
    %56 = arith.addf %54, %55 : vector<32x32xf32>
    %cst_42 = arith.constant 0.000000e+00 : f32
    %57 = vector.broadcast %cst_42 : f32 to vector<1x32xf32>
    %58 = tpu.concatenate %57, %56, %57 in 0 : vector<1x32xf32>, vector<32x32xf32>, vector<1x32xf32> -> vector<34x32xf32>
    %59 = vector.extract_strided_slice %58 {offsets = [0, 0], sizes = [32, 32], strides = [1, 1]} : vector<34x32xf32> to vector<32x32xf32>
    %60 = vector.extract_strided_slice %58 {offsets = [1, 0], sizes = [32, 32], strides = [1, 1]} : vector<34x32xf32> to vector<32x32xf32>
    %61 = vector.extract_strided_slice %58 {offsets = [2, 0], sizes = [32, 32], strides = [1, 1]} : vector<34x32xf32> to vector<32x32xf32>
    %62 = tpu.concatenate %59, %60, %61 in 1 : vector<32x32xf32>, vector<32x32xf32>, vector<32x32xf32> -> vector<32x96xf32>
    %cst_43 = arith.constant dense<0.000000e+00> : vector<32x32xf32>
    %63 = tpu.matmul %62, %13, %cst_43 {dimension_numbers = #tpu.dot_dimension_numbers<[1], [0], [0], [1], [0, 0, 1, 1], [], []>} : vector<32x96xf32>, vector<96x32xf32>, vector<32x32xf32> -> vector<32x32xf32>
    %64 = vector.broadcast %15 : vector<1x32xf32> to vector<32x32xf32>
    %65 = arith.addf %63, %64 : vector<32x32xf32>
    %cst_44 = arith.constant 0.000000e+00 : f32
    %66 = vector.broadcast %cst_44 : f32 to vector<32x32xf32>
    %67 = arith.maximumf %65, %66 : vector<32x32xf32>
    %cst_45 = arith.constant dense<0.000000e+00> : vector<32xf32>
    %68 = vector.multi_reduction <add>, %67, %cst_45 [1] : vector<32x32xf32> to vector<32xf32>
    %69 = vector.shape_cast %68 : vector<32xf32> to vector<32x1xf32>
    %cst_46 = arith.constant 3.200000e+01 : f32
    %70 = vector.broadcast %cst_46 : f32 to vector<32x1xf32>
    %71 = arith.divf %69, %70 : vector<32x1xf32>
    %72 = vector.broadcast %71 : vector<32x1xf32> to vector<32x32xf32>
    %73 = arith.subf %67, %72 : vector<32x32xf32>
    %74 = arith.mulf %73, %73 : vector<32x32xf32>
    %cst_47 = arith.constant dense<0.000000e+00> : vector<32xf32>
    %75 = vector.multi_reduction <add>, %74, %cst_47 [1] : vector<32x32xf32> to vector<32xf32>
    %76 = vector.shape_cast %75 : vector<32xf32> to vector<32x1xf32>
    %cst_48 = arith.constant 3.200000e+01 : f32
    %77 = vector.broadcast %cst_48 : f32 to vector<32x1xf32>
    %78 = arith.divf %76, %77 : vector<32x1xf32>
    %79 = vector.broadcast %71 : vector<32x1xf32> to vector<32x32xf32>
    %80 = arith.subf %67, %79 : vector<32x32xf32>
    %cst_49 = arith.constant 9.99999974E-6 : f32
    %81 = vector.broadcast %cst_49 : f32 to vector<32x1xf32>
    %82 = arith.addf %78, %81 : vector<32x1xf32>
    %83 = math.rsqrt %82 : vector<32x1xf32>
    %84 = vector.broadcast %83 : vector<32x1xf32> to vector<32x32xf32>
    %85 = arith.mulf %80, %84 : vector<32x32xf32>
    %86 = vector.broadcast %17 : vector<1x32xf32> to vector<32x32xf32>
    %87 = arith.mulf %85, %86 : vector<32x32xf32>
    %88 = vector.broadcast %19 : vector<1x32xf32> to vector<32x32xf32>
    %89 = arith.addf %87, %88 : vector<32x32xf32>
    %cst_50 = arith.constant dense<0.000000e+00> : vector<32x1xf32>
    %90 = tpu.matmul %89, %21, %cst_50 {dimension_numbers = #tpu.dot_dimension_numbers<[1], [0], [0], [1], [0, 0, 1, 1], [], []>} : vector<32x32xf32>, vector<32x1xf32>, vector<32x1xf32> -> vector<32x1xf32>
    %91 = vector.broadcast %23 : vector<1x1xf32> to vector<32x1xf32>
    %92 = arith.addf %90, %91 : vector<32x1xf32>
    %93 = arith.mulf %92, %3 : vector<32x1xf32>
    %c1 = arith.constant 1 : index
    %c0_51 = arith.constant 0 : index
    %c0_52 = arith.constant 0 : index
    %94 = vector.load %arg3[%c1, %c0_51, %c0_52] : memref<2x96x32xf32, #tpu.memory_space<vmem>>, vector<1x96x32xf32>
    %95 = vector.shape_cast %94 : vector<1x96x32xf32> to vector<96x32xf32>
    %c1_53 = arith.constant 1 : index
    %c0_54 = arith.constant 0 : index
    %c0_55 = arith.constant 0 : index
    %96 = vector.load %arg4[%c1_53, %c0_54, %c0_55] : memref<2x1x32xf32, #tpu.memory_space<vmem>>, vector<1x1x32xf32>
    %97 = vector.shape_cast %96 : vector<1x1x32xf32> to vector<1x32xf32>
    %c1_56 = arith.constant 1 : index
    %c0_57 = arith.constant 0 : index
    %c0_58 = arith.constant 0 : index
    %98 = vector.load %arg5[%c1_56, %c0_57, %c0_58] : memref<2x1x32xf32, #tpu.memory_space<vmem>>, vector<1x1x32xf32>
    %99 = vector.shape_cast %98 : vector<1x1x32xf32> to vector<1x32xf32>
    %c1_59 = arith.constant 1 : index
    %c0_60 = arith.constant 0 : index
    %c0_61 = arith.constant 0 : index
    %100 = vector.load %arg6[%c1_59, %c0_60, %c0_61] : memref<2x1x32xf32, #tpu.memory_space<vmem>>, vector<1x1x32xf32>
    %101 = vector.shape_cast %100 : vector<1x1x32xf32> to vector<1x32xf32>
    %c1_62 = arith.constant 1 : index
    %c0_63 = arith.constant 0 : index
    %c0_64 = arith.constant 0 : index
    %102 = vector.load %arg7[%c1_62, %c0_63, %c0_64] : memref<2x96x32xf32, #tpu.memory_space<vmem>>, vector<1x96x32xf32>
    %103 = vector.shape_cast %102 : vector<1x96x32xf32> to vector<96x32xf32>
    %c1_65 = arith.constant 1 : index
    %c0_66 = arith.constant 0 : index
    %c0_67 = arith.constant 0 : index
    %104 = vector.load %arg8[%c1_65, %c0_66, %c0_67] : memref<2x1x32xf32, #tpu.memory_space<vmem>>, vector<1x1x32xf32>
    %105 = vector.shape_cast %104 : vector<1x1x32xf32> to vector<1x32xf32>
    %c1_68 = arith.constant 1 : index
    %c0_69 = arith.constant 0 : index
    %c0_70 = arith.constant 0 : index
    %106 = vector.load %arg9[%c1_68, %c0_69, %c0_70] : memref<2x1x32xf32, #tpu.memory_space<vmem>>, vector<1x1x32xf32>
    %107 = vector.shape_cast %106 : vector<1x1x32xf32> to vector<1x32xf32>
    %c1_71 = arith.constant 1 : index
    %c0_72 = arith.constant 0 : index
    %c0_73 = arith.constant 0 : index
    %108 = vector.load %arg10[%c1_71, %c0_72, %c0_73] : memref<2x1x32xf32, #tpu.memory_space<vmem>>, vector<1x1x32xf32>
    %109 = vector.shape_cast %108 : vector<1x1x32xf32> to vector<1x32xf32>
    %c1_74 = arith.constant 1 : index
    %c0_75 = arith.constant 0 : index
    %c0_76 = arith.constant 0 : index
    %110 = vector.load %arg11[%c1_74, %c0_75, %c0_76] : memref<2x32x1xf32, #tpu.memory_space<vmem>>, vector<1x32x1xf32>
    %111 = vector.shape_cast %110 : vector<1x32x1xf32> to vector<32x1xf32>
    %c1_77 = arith.constant 1 : index
    %c0_78 = arith.constant 0 : index
    %c0_79 = arith.constant 0 : index
    %112 = vector.load %arg12[%c1_77, %c0_78, %c0_79] : memref<2x1x1xf32, #tpu.memory_space<vmem>>, vector<1x1x1xf32>
    %113 = vector.shape_cast %112 : vector<1x1x1xf32> to vector<1x1xf32>
    %cst_80 = arith.constant 0.000000e+00 : f32
    %114 = vector.broadcast %cst_80 : f32 to vector<1x32xf32>
    %115 = tpu.concatenate %114, %1, %114 in 0 : vector<1x32xf32>, vector<32x32xf32>, vector<1x32xf32> -> vector<34x32xf32>
    %116 = vector.extract_strided_slice %115 {offsets = [0, 0], sizes = [32, 32], strides = [1, 1]} : vector<34x32xf32> to vector<32x32xf32>
    %117 = vector.extract_strided_slice %115 {offsets = [1, 0], sizes = [32, 32], strides = [1, 1]} : vector<34x32xf32> to vector<32x32xf32>
    %118 = vector.extract_strided_slice %115 {offsets = [2, 0], sizes = [32, 32], strides = [1, 1]} : vector<34x32xf32> to vector<32x32xf32>
    %119 = tpu.concatenate %116, %117, %118 in 1 : vector<32x32xf32>, vector<32x32xf32>, vector<32x32xf32> -> vector<32x96xf32>
    %cst_81 = arith.constant dense<0.000000e+00> : vector<32x32xf32>
    %120 = tpu.matmul %119, %95, %cst_81 {dimension_numbers = #tpu.dot_dimension_numbers<[1], [0], [0], [1], [0, 0, 1, 1], [], []>} : vector<32x96xf32>, vector<96x32xf32>, vector<32x32xf32> -> vector<32x32xf32>
    %121 = vector.broadcast %97 : vector<1x32xf32> to vector<32x32xf32>
    %122 = arith.addf %120, %121 : vector<32x32xf32>
    %cst_82 = arith.constant 0.000000e+00 : f32
    %123 = vector.broadcast %cst_82 : f32 to vector<32x32xf32>
    %124 = arith.maximumf %122, %123 : vector<32x32xf32>
    %cst_83 = arith.constant dense<0.000000e+00> : vector<32xf32>
    %125 = vector.multi_reduction <add>, %124, %cst_83 [1] : vector<32x32xf32> to vector<32xf32>
    %126 = vector.shape_cast %125 : vector<32xf32> to vector<32x1xf32>
    %cst_84 = arith.constant 3.200000e+01 : f32
    %127 = vector.broadcast %cst_84 : f32 to vector<32x1xf32>
    %128 = arith.divf %126, %127 : vector<32x1xf32>
    %129 = vector.broadcast %128 : vector<32x1xf32> to vector<32x32xf32>
    %130 = arith.subf %124, %129 : vector<32x32xf32>
    %131 = arith.mulf %130, %130 : vector<32x32xf32>
    %cst_85 = arith.constant dense<0.000000e+00> : vector<32xf32>
    %132 = vector.multi_reduction <add>, %131, %cst_85 [1] : vector<32x32xf32> to vector<32xf32>
    %133 = vector.shape_cast %132 : vector<32xf32> to vector<32x1xf32>
    %cst_86 = arith.constant 3.200000e+01 : f32
    %134 = vector.broadcast %cst_86 : f32 to vector<32x1xf32>
    %135 = arith.divf %133, %134 : vector<32x1xf32>
    %136 = vector.broadcast %128 : vector<32x1xf32> to vector<32x32xf32>
    %137 = arith.subf %124, %136 : vector<32x32xf32>
    %cst_87 = arith.constant 9.99999974E-6 : f32
    %138 = vector.broadcast %cst_87 : f32 to vector<32x1xf32>
    %139 = arith.addf %135, %138 : vector<32x1xf32>
    %140 = math.rsqrt %139 : vector<32x1xf32>
    %141 = vector.broadcast %140 : vector<32x1xf32> to vector<32x32xf32>
    %142 = arith.mulf %137, %141 : vector<32x32xf32>
    %143 = vector.broadcast %99 : vector<1x32xf32> to vector<32x32xf32>
    %144 = arith.mulf %142, %143 : vector<32x32xf32>
    %145 = vector.broadcast %101 : vector<1x32xf32> to vector<32x32xf32>
    %146 = arith.addf %144, %145 : vector<32x32xf32>
    %cst_88 = arith.constant 0.000000e+00 : f32
    %147 = vector.broadcast %cst_88 : f32 to vector<1x32xf32>
    %148 = tpu.concatenate %147, %146, %147 in 0 : vector<1x32xf32>, vector<32x32xf32>, vector<1x32xf32> -> vector<34x32xf32>
    %149 = vector.extract_strided_slice %148 {offsets = [0, 0], sizes = [32, 32], strides = [1, 1]} : vector<34x32xf32> to vector<32x32xf32>
    %150 = vector.extract_strided_slice %148 {offsets = [1, 0], sizes = [32, 32], strides = [1, 1]} : vector<34x32xf32> to vector<32x32xf32>
    %151 = vector.extract_strided_slice %148 {offsets = [2, 0], sizes = [32, 32], strides = [1, 1]} : vector<34x32xf32> to vector<32x32xf32>
    %152 = tpu.concatenate %149, %150, %151 in 1 : vector<32x32xf32>, vector<32x32xf32>, vector<32x32xf32> -> vector<32x96xf32>
    %cst_89 = arith.constant dense<0.000000e+00> : vector<32x32xf32>
    %153 = tpu.matmul %152, %103, %cst_89 {dimension_numbers = #tpu.dot_dimension_numbers<[1], [0], [0], [1], [0, 0, 1, 1], [], []>} : vector<32x96xf32>, vector<96x32xf32>, vector<32x32xf32> -> vector<32x32xf32>
    %154 = vector.broadcast %105 : vector<1x32xf32> to vector<32x32xf32>
    %155 = arith.addf %153, %154 : vector<32x32xf32>
    %cst_90 = arith.constant 0.000000e+00 : f32
    %156 = vector.broadcast %cst_90 : f32 to vector<32x32xf32>
    %157 = arith.maximumf %155, %156 : vector<32x32xf32>
    %cst_91 = arith.constant dense<0.000000e+00> : vector<32xf32>
    %158 = vector.multi_reduction <add>, %157, %cst_91 [1] : vector<32x32xf32> to vector<32xf32>
    %159 = vector.shape_cast %158 : vector<32xf32> to vector<32x1xf32>
    %cst_92 = arith.constant 3.200000e+01 : f32
    %160 = vector.broadcast %cst_92 : f32 to vector<32x1xf32>
    %161 = arith.divf %159, %160 : vector<32x1xf32>
    %162 = vector.broadcast %161 : vector<32x1xf32> to vector<32x32xf32>
    %163 = arith.subf %157, %162 : vector<32x32xf32>
    %164 = arith.mulf %163, %163 : vector<32x32xf32>
    %cst_93 = arith.constant dense<0.000000e+00> : vector<32xf32>
    %165 = vector.multi_reduction <add>, %164, %cst_93 [1] : vector<32x32xf32> to vector<32xf32>
    %166 = vector.shape_cast %165 : vector<32xf32> to vector<32x1xf32>
    %cst_94 = arith.constant 3.200000e+01 : f32
    %167 = vector.broadcast %cst_94 : f32 to vector<32x1xf32>
    %168 = arith.divf %166, %167 : vector<32x1xf32>
    %169 = vector.broadcast %161 : vector<32x1xf32> to vector<32x32xf32>
    %170 = arith.subf %157, %169 : vector<32x32xf32>
    %cst_95 = arith.constant 9.99999974E-6 : f32
    %171 = vector.broadcast %cst_95 : f32 to vector<32x1xf32>
    %172 = arith.addf %168, %171 : vector<32x1xf32>
    %173 = math.rsqrt %172 : vector<32x1xf32>
    %174 = vector.broadcast %173 : vector<32x1xf32> to vector<32x32xf32>
    %175 = arith.mulf %170, %174 : vector<32x32xf32>
    %176 = vector.broadcast %107 : vector<1x32xf32> to vector<32x32xf32>
    %177 = arith.mulf %175, %176 : vector<32x32xf32>
    %178 = vector.broadcast %109 : vector<1x32xf32> to vector<32x32xf32>
    %179 = arith.addf %177, %178 : vector<32x32xf32>
    %cst_96 = arith.constant dense<0.000000e+00> : vector<32x1xf32>
    %180 = tpu.matmul %179, %111, %cst_96 {dimension_numbers = #tpu.dot_dimension_numbers<[1], [0], [0], [1], [0, 0, 1, 1], [], []>} : vector<32x32xf32>, vector<32x1xf32>, vector<32x1xf32> -> vector<32x1xf32>
    %181 = vector.broadcast %113 : vector<1x1xf32> to vector<32x1xf32>
    %182 = arith.addf %180, %181 : vector<32x1xf32>
    %183 = arith.mulf %182, %3 : vector<32x1xf32>
    %184 = tpu.concatenate %93, %183 in 1 : vector<32x1xf32>, vector<32x1xf32> -> vector<32x2xf32>
    %c0_97 = arith.constant 0 : index
    %c0_98 = arith.constant 0 : index
    %c0_99 = arith.constant 0 : index
    %185 = vector.load %arg13[%c0_97, %c0_98, %c0_99] : memref<1x32x2xf32, #tpu.memory_space<vmem>>, vector<1x32x2xf32>
    %186 = vector.shape_cast %185 : vector<1x32x2xf32> to vector<32x2xf32>
    %187 = vector.shape_cast %184 : vector<32x2xf32> to vector<1x32x2xf32>
    tpu.vector_store %arg13[%c0_97, %c0_98, %c0_99], %187 {strides = array<i32>} : memref<1x32x2xf32, #tpu.memory_space<vmem>>, vector<1x32x2xf32>,
    return
  }
  func.func @transform_0(%arg0: i32) -> (i32, i32, i32) {
    %c0_i32 = arith.constant 0 : i32
    %c0_i32_0 = arith.constant 0 : i32
    %c0_i32_1 = arith.constant 0 : i32
    return %arg0, %c0_i32, %c0_i32_0 : i32, i32, i32
  }
  func.func @transform_1(%arg0: i32) -> (i32, i32, i32) {
    %c0_i32 = arith.constant 0 : i32
    %c0_i32_0 = arith.constant 0 : i32
    %c0_i32_1 = arith.constant 0 : i32
    return %arg0, %c0_i32, %c0_i32_0 : i32, i32, i32
  }
  func.func @transform_2(%arg0: i32) -> (i32, i32, i32) {
    %c0_i32 = arith.constant 0 : i32
    %c0_i32_0 = arith.constant 0 : i32
    %c0_i32_1 = arith.constant 0 : i32
    %c0_i32_2 = arith.constant 0 : i32
    return %c0_i32, %c0_i32_0, %c0_i32_1 : i32, i32, i32
  }
  func.func @transform_3(%arg0: i32) -> (i32, i32, i32) {
    %c0_i32 = arith.constant 0 : i32
    %c0_i32_0 = arith.constant 0 : i32
    %c0_i32_1 = arith.constant 0 : i32
    %c0_i32_2 = arith.constant 0 : i32
    return %c0_i32, %c0_i32_0, %c0_i32_1 : i32, i32, i32
  }
  func.func @transform_4(%arg0: i32) -> (i32, i32, i32) {
    %c0_i32 = arith.constant 0 : i32
    %c0_i32_0 = arith.constant 0 : i32
    %c0_i32_1 = arith.constant 0 : i32
    %c0_i32_2 = arith.constant 0 : i32
    return %c0_i32, %c0_i32_0, %c0_i32_1 : i32, i32, i32
  }
  func.func @transform_5(%arg0: i32) -> (i32, i32, i32) {
    %c0_i32 = arith.constant 0 : i32
    %c0_i32_0 = arith.constant 0 : i32
    %c0_i32_1 = arith.constant 0 : i32
    %c0_i32_2 = arith.constant 0 : i32
    return %c0_i32, %c0_i32_0, %c0_i32_1 : i32, i32, i32
  }
  func.func @transform_6(%arg0: i32) -> (i32, i32, i32) {
    %c0_i32 = arith.constant 0 : i32
    %c0_i32_0 = arith.constant 0 : i32
    %c0_i32_1 = arith.constant 0 : i32
    %c0_i32_2 = arith.constant 0 : i32
    return %c0_i32, %c0_i32_0, %c0_i32_1 : i32, i32, i32
  }
  func.func @transform_7(%arg0: i32) -> (i32, i32, i32) {
    %c0_i32 = arith.constant 0 : i32
    %c0_i32_0 = arith.constant 0 : i32
    %c0_i32_1 = arith.constant 0 : i32
    %c0_i32_2 = arith.constant 0 : i32
    return %c0_i32, %c0_i32_0, %c0_i32_1 : i32, i32, i32
  }
  func.func @transform_8(%arg0: i32) -> (i32, i32, i32) {
    %c0_i32 = arith.constant 0 : i32
    %c0_i32_0 = arith.constant 0 : i32
    %c0_i32_1 = arith.constant 0 : i32
    %c0_i32_2 = arith.constant 0 : i32
    return %c0_i32, %c0_i32_0, %c0_i32_1 : i32, i32, i32
  }
  func.func @transform_9(%arg0: i32) -> (i32, i32, i32) {
    %c0_i32 = arith.constant 0 : i32
    %c0_i32_0 = arith.constant 0 : i32
    %c0_i32_1 = arith.constant 0 : i32
    %c0_i32_2 = arith.constant 0 : i32
    return %c0_i32, %c0_i32_0, %c0_i32_1 : i32, i32, i32
  }
  func.func @transform_10(%arg0: i32) -> (i32, i32, i32) {
    %c0_i32 = arith.constant 0 : i32
    %c0_i32_0 = arith.constant 0 : i32
    %c0_i32_1 = arith.constant 0 : i32
    %c0_i32_2 = arith.constant 0 : i32
    return %c0_i32, %c0_i32_0, %c0_i32_1 : i32, i32, i32
  }
  func.func @transform_11(%arg0: i32) -> (i32, i32, i32) {
    %c0_i32 = arith.constant 0 : i32
    %c0_i32_0 = arith.constant 0 : i32
    %c0_i32_1 = arith.constant 0 : i32
    %c0_i32_2 = arith.constant 0 : i32
    return %c0_i32, %c0_i32_0, %c0_i32_1 : i32, i32, i32
  }
  func.func @transform_12(%arg0: i32) -> (i32, i32, i32) {
    %c0_i32 = arith.constant 0 : i32
    %c0_i32_0 = arith.constant 0 : i32
    %c0_i32_1 = arith.constant 0 : i32
    return %arg0, %c0_i32, %c0_i32_0 : i32, i32, i32
  }
}

module attributes {stable_mosaic.version = 11 : i64} {
  func.func @kernel(%arg0: i32, %arg1: memref<1x32x32xf32, #tpu.memory_space<vmem>>, %arg2: memref<1x1x32xf32, #tpu.memory_space<vmem>>, %arg3: memref<1x32x1xf32, #tpu.memory_space<vmem>>, %arg4: memref<2x2x32x16xf32, #tpu.memory_space<vmem>>, %arg5: memref<2x2x1x16xf32, #tpu.memory_space<vmem>>, %arg6: memref<2x2x32x16xf32, #tpu.memory_space<vmem>>, %arg7: memref<2x2x1x16xf32, #tpu.memory_space<vmem>>, %arg8: memref<2x2x32x16xf32, #tpu.memory_space<vmem>>, %arg9: memref<2x2x1x16xf32, #tpu.memory_space<vmem>>, %arg10: memref<2x2x16x32xf32, #tpu.memory_space<vmem>>, %arg11: memref<2x1x32xf32, #tpu.memory_space<vmem>>, %arg12: memref<2x1x32xf32, #tpu.memory_space<vmem>>, %arg13: memref<2x1x32xf32, #tpu.memory_space<vmem>>, %arg14: memref<2x288x64xf32, #tpu.memory_space<vmem>>, %arg15: memref<2x1x64xf32, #tpu.memory_space<vmem>>, %arg16: memref<2x64x32xf32, #tpu.memory_space<vmem>>, %arg17: memref<2x1x32xf32, #tpu.memory_space<vmem>>, %arg18: memref<2x1x32xf32, #tpu.memory_space<vmem>>, %arg19: memref<2x1x32xf32, #tpu.memory_space<vmem>>, %arg20: memref<32x32xf32, #tpu.memory_space<vmem>>, %arg21: memref<1x32xf32, #tpu.memory_space<vmem>>, %arg22: memref<5x160x32xf32, #tpu.memory_space<vmem>>, %arg23: memref<5x1x32xf32, #tpu.memory_space<vmem>>, %arg24: memref<5x1x32xf32, #tpu.memory_space<vmem>>, %arg25: memref<5x1x32xf32, #tpu.memory_space<vmem>>, %arg26: memref<1x32x16xf32, #tpu.memory_space<vmem>>, %arg27: memref<1x32x16xf32, #tpu.memory_space<vmem>>) attributes {dimension_semantics = [#tpu.dimension_semantics<parallel>], iteration_bounds = array<i64: 2>, scalar_prefetch = 0 : i64, scratch_operands = 0 : i64, tpu.core_type = #tpu.core_type<tc>, window_params = [{transform_indices = @transform_0, window_bounds = array<i64: 1, 32, 32>}, {transform_indices = @transform_1, window_bounds = array<i64: 1, 1, 32>}, {transform_indices = @transform_2, window_bounds = array<i64: 1, 32, 1>}, {pipeline_mode = #tpu.pipeline_mode<synchronous>, transform_indices = @transform_3, window_bounds = array<i64: 2, 2, 32, 16>}, {pipeline_mode = #tpu.pipeline_mode<synchronous>, transform_indices = @transform_4, window_bounds = array<i64: 2, 2, 1, 16>}, {pipeline_mode = #tpu.pipeline_mode<synchronous>, transform_indices = @transform_5, window_bounds = array<i64: 2, 2, 32, 16>}, {pipeline_mode = #tpu.pipeline_mode<synchronous>, transform_indices = @transform_6, window_bounds = array<i64: 2, 2, 1, 16>}, {pipeline_mode = #tpu.pipeline_mode<synchronous>, transform_indices = @transform_7, window_bounds = array<i64: 2, 2, 32, 16>}, {pipeline_mode = #tpu.pipeline_mode<synchronous>, transform_indices = @transform_8, window_bounds = array<i64: 2, 2, 1, 16>}, {pipeline_mode = #tpu.pipeline_mode<synchronous>, transform_indices = @transform_9, window_bounds = array<i64: 2, 2, 16, 32>}, {pipeline_mode = #tpu.pipeline_mode<synchronous>, transform_indices = @transform_10, window_bounds = array<i64: 2, 1, 32>}, {pipeline_mode = #tpu.pipeline_mode<synchronous>, transform_indices = @transform_11, window_bounds = array<i64: 2, 1, 32>}, {pipeline_mode = #tpu.pipeline_mode<synchronous>, transform_indices = @transform_12, window_bounds = array<i64: 2, 1, 32>}, {pipeline_mode = #tpu.pipeline_mode<synchronous>, transform_indices = @transform_13, window_bounds = array<i64: 2, 288, 64>}, {pipeline_mode = #tpu.pipeline_mode<synchronous>, transform_indices = @transform_14, window_bounds = array<i64: 2, 1, 64>}, {pipeline_mode = #tpu.pipeline_mode<synchronous>, transform_indices = @transform_15, window_bounds = array<i64: 2, 64, 32>}, {pipeline_mode = #tpu.pipeline_mode<synchronous>, transform_indices = @transform_16, window_bounds = array<i64: 2, 1, 32>}, {pipeline_mode = #tpu.pipeline_mode<synchronous>, transform_indices = @transform_17, window_bounds = array<i64: 2, 1, 32>}, {pipeline_mode = #tpu.pipeline_mode<synchronous>, transform_indices = @transform_18, window_bounds = array<i64: 2, 1, 32>}, {pipeline_mode = #tpu.pipeline_mode<synchronous>, transform_indices = @transform_19, window_bounds = array<i64: 32, 32>}, {pipeline_mode = #tpu.pipeline_mode<synchronous>, transform_indices = @transform_20, window_bounds = array<i64: 1, 32>}, {pipeline_mode = #tpu.pipeline_mode<synchronous>, transform_indices = @transform_21, window_bounds = array<i64: 5, 160, 32>}, {pipeline_mode = #tpu.pipeline_mode<synchronous>, transform_indices = @transform_22, window_bounds = array<i64: 5, 1, 32>}, {pipeline_mode = #tpu.pipeline_mode<synchronous>, transform_indices = @transform_23, window_bounds = array<i64: 5, 1, 32>}, {pipeline_mode = #tpu.pipeline_mode<synchronous>, transform_indices = @transform_24, window_bounds = array<i64: 5, 1, 32>}, {transform_indices = @transform_25, window_bounds = array<i64: 1, 32, 16>}, {transform_indices = @transform_26, window_bounds = array<i64: 1, 32, 16>}]} {
    %c0 = arith.constant 0 : index
    %c0_0 = arith.constant 0 : index
    %c0_1 = arith.constant 0 : index
    %0 = vector.load %arg1[%c0, %c0_0, %c0_1] : memref<1x32x32xf32, #tpu.memory_space<vmem>>, vector<1x32x32xf32>
    %1 = vector.shape_cast %0 : vector<1x32x32xf32> to vector<32x32xf32>
    %c0_2 = arith.constant 0 : index
    %c0_3 = arith.constant 0 : index
    %c0_4 = arith.constant 0 : index
    %2 = vector.load %arg2[%c0_2, %c0_3, %c0_4] : memref<1x1x32xf32, #tpu.memory_space<vmem>>, vector<1x1x32xf32>
    %3 = vector.shape_cast %2 : vector<1x1x32xf32> to vector<1x32xf32>
    %c0_5 = arith.constant 0 : index
    %c0_6 = arith.constant 0 : index
    %c0_7 = arith.constant 0 : index
    %4 = vector.load %arg3[%c0_5, %c0_6, %c0_7] : memref<1x32x1xf32, #tpu.memory_space<vmem>>, vector<1x32x1xf32>
    %5 = vector.shape_cast %4 : vector<1x32x1xf32> to vector<32x1xf32>
    %cst = arith.constant 0.000000e+00 : f32
    %6 = vector.broadcast %cst : f32 to vector<32x32xf32>
    %c0_8 = arith.constant 0 : index
    %c0_9 = arith.constant 0 : index
    %c0_10 = arith.constant 0 : index
    %c0_11 = arith.constant 0 : index
    %7 = vector.load %arg4[%c0_8, %c0_9, %c0_10, %c0_11] : memref<2x2x32x16xf32, #tpu.memory_space<vmem>>, vector<1x1x32x16xf32>
    %8 = vector.shape_cast %7 : vector<1x1x32x16xf32> to vector<32x16xf32>
    %cst_12 = arith.constant dense<0.000000e+00> : vector<32x16xf32>
    %9 = tpu.matmul %1, %8, %cst_12 {dimension_numbers = #tpu.dot_dimension_numbers<[1], [0], [0], [1], [0, 0, 1, 1], [], []>} : vector<32x32xf32>, vector<32x16xf32>, vector<32x16xf32> -> vector<32x16xf32>
    %c0_13 = arith.constant 0 : index
    %c0_14 = arith.constant 0 : index
    %c0_15 = arith.constant 0 : index
    %c0_16 = arith.constant 0 : index
    %10 = vector.load %arg5[%c0_13, %c0_14, %c0_15, %c0_16] : memref<2x2x1x16xf32, #tpu.memory_space<vmem>>, vector<1x1x1x16xf32>
    %11 = vector.shape_cast %10 : vector<1x1x1x16xf32> to vector<1x16xf32>
    %12 = vector.broadcast %11 : vector<1x16xf32> to vector<32x16xf32>
    %13 = arith.addf %9, %12 : vector<32x16xf32>
    %c0_17 = arith.constant 0 : index
    %c0_18 = arith.constant 0 : index
    %c0_19 = arith.constant 0 : index
    %c0_20 = arith.constant 0 : index
    %14 = vector.load %arg6[%c0_17, %c0_18, %c0_19, %c0_20] : memref<2x2x32x16xf32, #tpu.memory_space<vmem>>, vector<1x1x32x16xf32>
    %15 = vector.shape_cast %14 : vector<1x1x32x16xf32> to vector<32x16xf32>
    %cst_21 = arith.constant dense<0.000000e+00> : vector<32x16xf32>
    %16 = tpu.matmul %1, %15, %cst_21 {dimension_numbers = #tpu.dot_dimension_numbers<[1], [0], [0], [1], [0, 0, 1, 1], [], []>} : vector<32x32xf32>, vector<32x16xf32>, vector<32x16xf32> -> vector<32x16xf32>
    %c0_22 = arith.constant 0 : index
    %c0_23 = arith.constant 0 : index
    %c0_24 = arith.constant 0 : index
    %c0_25 = arith.constant 0 : index
    %17 = vector.load %arg7[%c0_22, %c0_23, %c0_24, %c0_25] : memref<2x2x1x16xf32, #tpu.memory_space<vmem>>, vector<1x1x1x16xf32>
    %18 = vector.shape_cast %17 : vector<1x1x1x16xf32> to vector<1x16xf32>
    %19 = vector.broadcast %18 : vector<1x16xf32> to vector<32x16xf32>
    %20 = arith.addf %16, %19 : vector<32x16xf32>
    %c0_26 = arith.constant 0 : index
    %c0_27 = arith.constant 0 : index
    %c0_28 = arith.constant 0 : index
    %c0_29 = arith.constant 0 : index
    %21 = vector.load %arg8[%c0_26, %c0_27, %c0_28, %c0_29] : memref<2x2x32x16xf32, #tpu.memory_space<vmem>>, vector<1x1x32x16xf32>
    %22 = vector.shape_cast %21 : vector<1x1x32x16xf32> to vector<32x16xf32>
    %cst_30 = arith.constant dense<0.000000e+00> : vector<32x16xf32>
    %23 = tpu.matmul %1, %22, %cst_30 {dimension_numbers = #tpu.dot_dimension_numbers<[1], [0], [0], [1], [0, 0, 1, 1], [], []>} : vector<32x32xf32>, vector<32x16xf32>, vector<32x16xf32> -> vector<32x16xf32>
    %c0_31 = arith.constant 0 : index
    %c0_32 = arith.constant 0 : index
    %c0_33 = arith.constant 0 : index
    %c0_34 = arith.constant 0 : index
    %24 = vector.load %arg9[%c0_31, %c0_32, %c0_33, %c0_34] : memref<2x2x1x16xf32, #tpu.memory_space<vmem>>, vector<1x1x1x16xf32>
    %25 = vector.shape_cast %24 : vector<1x1x1x16xf32> to vector<1x16xf32>
    %26 = vector.broadcast %25 : vector<1x16xf32> to vector<32x16xf32>
    %27 = arith.addf %23, %26 : vector<32x16xf32>
    %cst_35 = arith.constant dense<0.000000e+00> : vector<32x32xf32>
    %28 = tpu.matmul %13, %20, %cst_35 {dimension_numbers = #tpu.dot_dimension_numbers<[1], [1], [0], [0], [0, 0, 1, 0], [], []>} : vector<32x16xf32>, vector<32x16xf32>, vector<32x32xf32> -> vector<32x32xf32>
    %29 = vector.broadcast %3 : vector<1x32xf32> to vector<32x32xf32>
    %30 = arith.addf %28, %29 : vector<32x32xf32>
    %cst_36 = arith.constant dense<0xFF800000> : vector<32xf32>
    %31 = vector.multi_reduction <maximumf>, %30, %cst_36 [1] : vector<32x32xf32> to vector<32xf32>
    %32 = vector.shape_cast %31 : vector<32xf32> to vector<32x1xf32>
    %33 = vector.broadcast %32 : vector<32x1xf32> to vector<32x32xf32>
    %34 = arith.subf %30, %33 : vector<32x32xf32>
    %35 = math.exp %34 : vector<32x32xf32>
    %cst_37 = arith.constant dense<0.000000e+00> : vector<32xf32>
    %36 = vector.multi_reduction <add>, %35, %cst_37 [1] : vector<32x32xf32> to vector<32xf32>
    %37 = vector.shape_cast %36 : vector<32xf32> to vector<32x1xf32>
    %38 = tpu.reciprocal %37 {approx = true} : vector<32x1xf32> -> vector<32x1xf32>
    %39 = vector.broadcast %38 : vector<32x1xf32> to vector<32x32xf32>
    %40 = arith.mulf %35, %39 : vector<32x32xf32>
    %cst_38 = arith.constant dense<0.000000e+00> : vector<32x16xf32>
    %41 = tpu.matmul %40, %27, %cst_38 {dimension_numbers = #tpu.dot_dimension_numbers<[1], [0], [0], [1], [0, 0, 1, 1], [], []>} : vector<32x32xf32>, vector<32x16xf32>, vector<32x16xf32> -> vector<32x16xf32>
    %c0_39 = arith.constant 0 : index
    %c0_40 = arith.constant 0 : index
    %c0_41 = arith.constant 0 : index
    %c0_42 = arith.constant 0 : index
    %42 = vector.load %arg10[%c0_39, %c0_40, %c0_41, %c0_42] : memref<2x2x16x32xf32, #tpu.memory_space<vmem>>, vector<1x1x16x32xf32>
    %43 = vector.shape_cast %42 : vector<1x1x16x32xf32> to vector<16x32xf32>
    %cst_43 = arith.constant dense<0.000000e+00> : vector<32x32xf32>
    %44 = tpu.matmul %41, %43, %cst_43 {dimension_numbers = #tpu.dot_dimension_numbers<[1], [0], [0], [1], [0, 0, 1, 1], [], []>} : vector<32x16xf32>, vector<16x32xf32>, vector<32x32xf32> -> vector<32x32xf32>
    %45 = arith.addf %6, %44 : vector<32x32xf32>
    %c0_44 = arith.constant 0 : index
    %c1 = arith.constant 1 : index
    %c0_45 = arith.constant 0 : index
    %c0_46 = arith.constant 0 : index
    %46 = vector.load %arg4[%c0_44, %c1, %c0_45, %c0_46] : memref<2x2x32x16xf32, #tpu.memory_space<vmem>>, vector<1x1x32x16xf32>
    %47 = vector.shape_cast %46 : vector<1x1x32x16xf32> to vector<32x16xf32>
    %cst_47 = arith.constant dense<0.000000e+00> : vector<32x16xf32>
    %48 = tpu.matmul %1, %47, %cst_47 {dimension_numbers = #tpu.dot_dimension_numbers<[1], [0], [0], [1], [0, 0, 1, 1], [], []>} : vector<32x32xf32>, vector<32x16xf32>, vector<32x16xf32> -> vector<32x16xf32>
    %c0_48 = arith.constant 0 : index
    %c1_49 = arith.constant 1 : index
    %c0_50 = arith.constant 0 : index
    %c0_51 = arith.constant 0 : index
    %49 = vector.load %arg5[%c0_48, %c1_49, %c0_50, %c0_51] : memref<2x2x1x16xf32, #tpu.memory_space<vmem>>, vector<1x1x1x16xf32>
    %50 = vector.shape_cast %49 : vector<1x1x1x16xf32> to vector<1x16xf32>
    %51 = vector.broadcast %50 : vector<1x16xf32> to vector<32x16xf32>
    %52 = arith.addf %48, %51 : vector<32x16xf32>
    %c0_52 = arith.constant 0 : index
    %c1_53 = arith.constant 1 : index
    %c0_54 = arith.constant 0 : index
    %c0_55 = arith.constant 0 : index
    %53 = vector.load %arg6[%c0_52, %c1_53, %c0_54, %c0_55] : memref<2x2x32x16xf32, #tpu.memory_space<vmem>>, vector<1x1x32x16xf32>
    %54 = vector.shape_cast %53 : vector<1x1x32x16xf32> to vector<32x16xf32>
    %cst_56 = arith.constant dense<0.000000e+00> : vector<32x16xf32>
    %55 = tpu.matmul %1, %54, %cst_56 {dimension_numbers = #tpu.dot_dimension_numbers<[1], [0], [0], [1], [0, 0, 1, 1], [], []>} : vector<32x32xf32>, vector<32x16xf32>, vector<32x16xf32> -> vector<32x16xf32>
    %c0_57 = arith.constant 0 : index
    %c1_58 = arith.constant 1 : index
    %c0_59 = arith.constant 0 : index
    %c0_60 = arith.constant 0 : index
    %56 = vector.load %arg7[%c0_57, %c1_58, %c0_59, %c0_60] : memref<2x2x1x16xf32, #tpu.memory_space<vmem>>, vector<1x1x1x16xf32>
    %57 = vector.shape_cast %56 : vector<1x1x1x16xf32> to vector<1x16xf32>
    %58 = vector.broadcast %57 : vector<1x16xf32> to vector<32x16xf32>
    %59 = arith.addf %55, %58 : vector<32x16xf32>
    %c0_61 = arith.constant 0 : index
    %c1_62 = arith.constant 1 : index
    %c0_63 = arith.constant 0 : index
    %c0_64 = arith.constant 0 : index
    %60 = vector.load %arg8[%c0_61, %c1_62, %c0_63, %c0_64] : memref<2x2x32x16xf32, #tpu.memory_space<vmem>>, vector<1x1x32x16xf32>
    %61 = vector.shape_cast %60 : vector<1x1x32x16xf32> to vector<32x16xf32>
    %cst_65 = arith.constant dense<0.000000e+00> : vector<32x16xf32>
    %62 = tpu.matmul %1, %61, %cst_65 {dimension_numbers = #tpu.dot_dimension_numbers<[1], [0], [0], [1], [0, 0, 1, 1], [], []>} : vector<32x32xf32>, vector<32x16xf32>, vector<32x16xf32> -> vector<32x16xf32>
    %c0_66 = arith.constant 0 : index
    %c1_67 = arith.constant 1 : index
    %c0_68 = arith.constant 0 : index
    %c0_69 = arith.constant 0 : index
    %63 = vector.load %arg9[%c0_66, %c1_67, %c0_68, %c0_69] : memref<2x2x1x16xf32, #tpu.memory_space<vmem>>, vector<1x1x1x16xf32>
    %64 = vector.shape_cast %63 : vector<1x1x1x16xf32> to vector<1x16xf32>
    %65 = vector.broadcast %64 : vector<1x16xf32> to vector<32x16xf32>
    %66 = arith.addf %62, %65 : vector<32x16xf32>
    %cst_70 = arith.constant dense<0.000000e+00> : vector<32x32xf32>
    %67 = tpu.matmul %52, %59, %cst_70 {dimension_numbers = #tpu.dot_dimension_numbers<[1], [1], [0], [0], [0, 0, 1, 0], [], []>} : vector<32x16xf32>, vector<32x16xf32>, vector<32x32xf32> -> vector<32x32xf32>
    %68 = vector.broadcast %3 : vector<1x32xf32> to vector<32x32xf32>
    %69 = arith.addf %67, %68 : vector<32x32xf32>
    %cst_71 = arith.constant dense<0xFF800000> : vector<32xf32>
    %70 = vector.multi_reduction <maximumf>, %69, %cst_71 [1] : vector<32x32xf32> to vector<32xf32>
    %71 = vector.shape_cast %70 : vector<32xf32> to vector<32x1xf32>
    %72 = vector.broadcast %71 : vector<32x1xf32> to vector<32x32xf32>
    %73 = arith.subf %69, %72 : vector<32x32xf32>
    %74 = math.exp %73 : vector<32x32xf32>
    %cst_72 = arith.constant dense<0.000000e+00> : vector<32xf32>
    %75 = vector.multi_reduction <add>, %74, %cst_72 [1] : vector<32x32xf32> to vector<32xf32>
    %76 = vector.shape_cast %75 : vector<32xf32> to vector<32x1xf32>
    %77 = tpu.reciprocal %76 {approx = true} : vector<32x1xf32> -> vector<32x1xf32>
    %78 = vector.broadcast %77 : vector<32x1xf32> to vector<32x32xf32>
    %79 = arith.mulf %74, %78 : vector<32x32xf32>
    %cst_73 = arith.constant dense<0.000000e+00> : vector<32x16xf32>
    %80 = tpu.matmul %79, %66, %cst_73 {dimension_numbers = #tpu.dot_dimension_numbers<[1], [0], [0], [1], [0, 0, 1, 1], [], []>} : vector<32x32xf32>, vector<32x16xf32>, vector<32x16xf32> -> vector<32x16xf32>
    %c0_74 = arith.constant 0 : index
    %c1_75 = arith.constant 1 : index
    %c0_76 = arith.constant 0 : index
    %c0_77 = arith.constant 0 : index
    %81 = vector.load %arg10[%c0_74, %c1_75, %c0_76, %c0_77] : memref<2x2x16x32xf32, #tpu.memory_space<vmem>>, vector<1x1x16x32xf32>
    %82 = vector.shape_cast %81 : vector<1x1x16x32xf32> to vector<16x32xf32>
    %cst_78 = arith.constant dense<0.000000e+00> : vector<32x32xf32>
    %83 = tpu.matmul %80, %82, %cst_78 {dimension_numbers = #tpu.dot_dimension_numbers<[1], [0], [0], [1], [0, 0, 1, 1], [], []>} : vector<32x16xf32>, vector<16x32xf32>, vector<32x32xf32> -> vector<32x32xf32>
    %84 = arith.addf %45, %83 : vector<32x32xf32>
    %c0_79 = arith.constant 0 : index
    %c0_80 = arith.constant 0 : index
    %c0_81 = arith.constant 0 : index
    %85 = vector.load %arg11[%c0_79, %c0_80, %c0_81] : memref<2x1x32xf32, #tpu.memory_space<vmem>>, vector<1x1x32xf32>
    %86 = vector.shape_cast %85 : vector<1x1x32xf32> to vector<1x32xf32>
    %87 = vector.broadcast %86 : vector<1x32xf32> to vector<32x32xf32>
    %88 = arith.addf %84, %87 : vector<32x32xf32>
    %89 = arith.addf %88, %1 : vector<32x32xf32>
    %c0_82 = arith.constant 0 : index
    %c0_83 = arith.constant 0 : index
    %c0_84 = arith.constant 0 : index
    %90 = vector.load %arg12[%c0_82, %c0_83, %c0_84] : memref<2x1x32xf32, #tpu.memory_space<vmem>>, vector<1x1x32xf32>
    %91 = vector.shape_cast %90 : vector<1x1x32xf32> to vector<1x32xf32>
    %c0_85 = arith.constant 0 : index
    %c0_86 = arith.constant 0 : index
    %c0_87 = arith.constant 0 : index
    %92 = vector.load %arg13[%c0_85, %c0_86, %c0_87] : memref<2x1x32xf32, #tpu.memory_space<vmem>>, vector<1x1x32xf32>
    %93 = vector.shape_cast %92 : vector<1x1x32xf32> to vector<1x32xf32>
    %cst_88 = arith.constant dense<0.000000e+00> : vector<32xf32>
    %94 = vector.multi_reduction <add>, %89, %cst_88 [1] : vector<32x32xf32> to vector<32xf32>
    %95 = vector.shape_cast %94 : vector<32xf32> to vector<32x1xf32>
    %cst_89 = arith.constant 3.200000e+01 : f32
    %96 = vector.broadcast %cst_89 : f32 to vector<32x1xf32>
    %97 = arith.divf %95, %96 : vector<32x1xf32>
    %98 = vector.broadcast %97 : vector<32x1xf32> to vector<32x32xf32>
    %99 = arith.subf %89, %98 : vector<32x32xf32>
    %100 = arith.mulf %99, %99 : vector<32x32xf32>
    %cst_90 = arith.constant dense<0.000000e+00> : vector<32xf32>
    %101 = vector.multi_reduction <add>, %100, %cst_90 [1] : vector<32x32xf32> to vector<32xf32>
    %102 = vector.shape_cast %101 : vector<32xf32> to vector<32x1xf32>
    %cst_91 = arith.constant 3.200000e+01 : f32
    %103 = vector.broadcast %cst_91 : f32 to vector<32x1xf32>
    %104 = arith.divf %102, %103 : vector<32x1xf32>
    %105 = vector.broadcast %97 : vector<32x1xf32> to vector<32x32xf32>
    %106 = arith.subf %89, %105 : vector<32x32xf32>
    %cst_92 = arith.constant 9.99999974E-6 : f32
    %107 = vector.broadcast %cst_92 : f32 to vector<32x1xf32>
    %108 = arith.addf %104, %107 : vector<32x1xf32>
    %109 = math.rsqrt %108 : vector<32x1xf32>
    %110 = vector.broadcast %109 : vector<32x1xf32> to vector<32x32xf32>
    %111 = arith.mulf %106, %110 : vector<32x32xf32>
    %112 = vector.broadcast %91 : vector<1x32xf32> to vector<32x32xf32>
    %113 = arith.mulf %111, %112 : vector<32x32xf32>
    %114 = vector.broadcast %93 : vector<1x32xf32> to vector<32x32xf32>
    %115 = arith.addf %113, %114 : vector<32x32xf32>
    %116 = vector.broadcast %5 : vector<32x1xf32> to vector<32x32xf32>
    %117 = arith.mulf %115, %116 : vector<32x32xf32>
    %c0_93 = arith.constant 0 : index
    %c0_94 = arith.constant 0 : index
    %c0_95 = arith.constant 0 : index
    %118 = vector.load %arg14[%c0_93, %c0_94, %c0_95] : memref<2x288x64xf32, #tpu.memory_space<vmem>>, vector<1x288x64xf32>
    %119 = vector.shape_cast %118 : vector<1x288x64xf32> to vector<288x64xf32>
    %c0_96 = arith.constant 0 : index
    %c0_97 = arith.constant 0 : index
    %c0_98 = arith.constant 0 : index
    %120 = vector.load %arg15[%c0_96, %c0_97, %c0_98] : memref<2x1x64xf32, #tpu.memory_space<vmem>>, vector<1x1x64xf32>
    %121 = vector.shape_cast %120 : vector<1x1x64xf32> to vector<1x64xf32>
    %cst_99 = arith.constant 0.000000e+00 : f32
    %122 = vector.broadcast %cst_99 : f32 to vector<4x32xf32>
    %123 = tpu.concatenate %122, %117, %122 in 0 : vector<4x32xf32>, vector<32x32xf32>, vector<4x32xf32> -> vector<40x32xf32>
    %124 = vector.extract_strided_slice %123 {offsets = [0, 0], sizes = [32, 32], strides = [1, 1]} : vector<40x32xf32> to vector<32x32xf32>
    %125 = vector.extract_strided_slice %123 {offsets = [1, 0], sizes = [32, 32], strides = [1, 1]} : vector<40x32xf32> to vector<32x32xf32>
    %126 = vector.extract_strided_slice %123 {offsets = [2, 0], sizes = [32, 32], strides = [1, 1]} : vector<40x32xf32> to vector<32x32xf32>
    %127 = vector.extract_strided_slice %123 {offsets = [3, 0], sizes = [32, 32], strides = [1, 1]} : vector<40x32xf32> to vector<32x32xf32>
    %128 = vector.extract_strided_slice %123 {offsets = [4, 0], sizes = [32, 32], strides = [1, 1]} : vector<40x32xf32> to vector<32x32xf32>
    %129 = vector.extract_strided_slice %123 {offsets = [5, 0], sizes = [32, 32], strides = [1, 1]} : vector<40x32xf32> to vector<32x32xf32>
    %130 = vector.extract_strided_slice %123 {offsets = [6, 0], sizes = [32, 32], strides = [1, 1]} : vector<40x32xf32> to vector<32x32xf32>
    %131 = vector.extract_strided_slice %123 {offsets = [7, 0], sizes = [32, 32], strides = [1, 1]} : vector<40x32xf32> to vector<32x32xf32>
    %132 = vector.extract_strided_slice %123 {offsets = [8, 0], sizes = [32, 32], strides = [1, 1]} : vector<40x32xf32> to vector<32x32xf32>
    %133 = tpu.concatenate %124, %125, %126, %127, %128, %129, %130, %131, %132 in 1 : vector<32x32xf32>, vector<32x32xf32>, vector<32x32xf32>, vector<32x32xf32>, vector<32x32xf32>, vector<32x32xf32>, vector<32x32xf32>, vector<32x32xf32>, vector<32x32xf32> -> vector<32x288xf32>
    %cst_100 = arith.constant dense<0.000000e+00> : vector<32x64xf32>
    %134 = tpu.matmul %133, %119, %cst_100 {dimension_numbers = #tpu.dot_dimension_numbers<[1], [0], [0], [1], [0, 0, 1, 1], [], []>} : vector<32x288xf32>, vector<288x64xf32>, vector<32x64xf32> -> vector<32x64xf32>
    %135 = vector.broadcast %121 : vector<1x64xf32> to vector<32x64xf32>
    %136 = arith.addf %134, %135 : vector<32x64xf32>
    %cst_101 = arith.constant 0.000000e+00 : f32
    %137 = vector.broadcast %cst_101 : f32 to vector<32x64xf32>
    %138 = arith.maximumf %136, %137 : vector<32x64xf32>
    %c0_102 = arith.constant 0 : index
    %c0_103 = arith.constant 0 : index
    %c0_104 = arith.constant 0 : index
    %139 = vector.load %arg16[%c0_102, %c0_103, %c0_104] : memref<2x64x32xf32, #tpu.memory_space<vmem>>, vector<1x64x32xf32>
    %140 = vector.shape_cast %139 : vector<1x64x32xf32> to vector<64x32xf32>
    %cst_105 = arith.constant dense<0.000000e+00> : vector<32x32xf32>
    %141 = tpu.matmul %138, %140, %cst_105 {dimension_numbers = #tpu.dot_dimension_numbers<[1], [0], [0], [1], [0, 0, 1, 1], [], []>} : vector<32x64xf32>, vector<64x32xf32>, vector<32x32xf32> -> vector<32x32xf32>
    %c0_106 = arith.constant 0 : index
    %c0_107 = arith.constant 0 : index
    %c0_108 = arith.constant 0 : index
    %142 = vector.load %arg17[%c0_106, %c0_107, %c0_108] : memref<2x1x32xf32, #tpu.memory_space<vmem>>, vector<1x1x32xf32>
    %143 = vector.shape_cast %142 : vector<1x1x32xf32> to vector<1x32xf32>
    %144 = vector.broadcast %143 : vector<1x32xf32> to vector<32x32xf32>
    %145 = arith.addf %141, %144 : vector<32x32xf32>
    %146 = arith.addf %145, %117 : vector<32x32xf32>
    %c0_109 = arith.constant 0 : index
    %c0_110 = arith.constant 0 : index
    %c0_111 = arith.constant 0 : index
    %147 = vector.load %arg18[%c0_109, %c0_110, %c0_111] : memref<2x1x32xf32, #tpu.memory_space<vmem>>, vector<1x1x32xf32>
    %148 = vector.shape_cast %147 : vector<1x1x32xf32> to vector<1x32xf32>
    %c0_112 = arith.constant 0 : index
    %c0_113 = arith.constant 0 : index
    %c0_114 = arith.constant 0 : index
    %149 = vector.load %arg19[%c0_112, %c0_113, %c0_114] : memref<2x1x32xf32, #tpu.memory_space<vmem>>, vector<1x1x32xf32>
    %150 = vector.shape_cast %149 : vector<1x1x32xf32> to vector<1x32xf32>
    %cst_115 = arith.constant dense<0.000000e+00> : vector<32xf32>
    %151 = vector.multi_reduction <add>, %146, %cst_115 [1] : vector<32x32xf32> to vector<32xf32>
    %152 = vector.shape_cast %151 : vector<32xf32> to vector<32x1xf32>
    %cst_116 = arith.constant 3.200000e+01 : f32
    %153 = vector.broadcast %cst_116 : f32 to vector<32x1xf32>
    %154 = arith.divf %152, %153 : vector<32x1xf32>
    %155 = vector.broadcast %154 : vector<32x1xf32> to vector<32x32xf32>
    %156 = arith.subf %146, %155 : vector<32x32xf32>
    %157 = arith.mulf %156, %156 : vector<32x32xf32>
    %cst_117 = arith.constant dense<0.000000e+00> : vector<32xf32>
    %158 = vector.multi_reduction <add>, %157, %cst_117 [1] : vector<32x32xf32> to vector<32xf32>
    %159 = vector.shape_cast %158 : vector<32xf32> to vector<32x1xf32>
    %cst_118 = arith.constant 3.200000e+01 : f32
    %160 = vector.broadcast %cst_118 : f32 to vector<32x1xf32>
    %161 = arith.divf %159, %160 : vector<32x1xf32>
    %162 = vector.broadcast %154 : vector<32x1xf32> to vector<32x32xf32>
    %163 = arith.subf %146, %162 : vector<32x32xf32>
    %cst_119 = arith.constant 9.99999974E-6 : f32
    %164 = vector.broadcast %cst_119 : f32 to vector<32x1xf32>
    %165 = arith.addf %161, %164 : vector<32x1xf32>
    %166 = math.rsqrt %165 : vector<32x1xf32>
    %167 = vector.broadcast %166 : vector<32x1xf32> to vector<32x32xf32>
    %168 = arith.mulf %163, %167 : vector<32x32xf32>
    %169 = vector.broadcast %148 : vector<1x32xf32> to vector<32x32xf32>
    %170 = arith.mulf %168, %169 : vector<32x32xf32>
    %171 = vector.broadcast %150 : vector<1x32xf32> to vector<32x32xf32>
    %172 = arith.addf %170, %171 : vector<32x32xf32>
    %173 = vector.broadcast %5 : vector<32x1xf32> to vector<32x32xf32>
    %174 = arith.mulf %172, %173 : vector<32x32xf32>
    %cst_120 = arith.constant 0.000000e+00 : f32
    %175 = vector.broadcast %cst_120 : f32 to vector<32x32xf32>
    %c1_121 = arith.constant 1 : index
    %c0_122 = arith.constant 0 : index
    %c0_123 = arith.constant 0 : index
    %c0_124 = arith.constant 0 : index
    %176 = vector.load %arg4[%c1_121, %c0_122, %c0_123, %c0_124] : memref<2x2x32x16xf32, #tpu.memory_space<vmem>>, vector<1x1x32x16xf32>
    %177 = vector.shape_cast %176 : vector<1x1x32x16xf32> to vector<32x16xf32>
    %cst_125 = arith.constant dense<0.000000e+00> : vector<32x16xf32>
    %178 = tpu.matmul %174, %177, %cst_125 {dimension_numbers = #tpu.dot_dimension_numbers<[1], [0], [0], [1], [0, 0, 1, 1], [], []>} : vector<32x32xf32>, vector<32x16xf32>, vector<32x16xf32> -> vector<32x16xf32>
    %c1_126 = arith.constant 1 : index
    %c0_127 = arith.constant 0 : index
    %c0_128 = arith.constant 0 : index
    %c0_129 = arith.constant 0 : index
    %179 = vector.load %arg5[%c1_126, %c0_127, %c0_128, %c0_129] : memref<2x2x1x16xf32, #tpu.memory_space<vmem>>, vector<1x1x1x16xf32>
    %180 = vector.shape_cast %179 : vector<1x1x1x16xf32> to vector<1x16xf32>
    %181 = vector.broadcast %180 : vector<1x16xf32> to vector<32x16xf32>
    %182 = arith.addf %178, %181 : vector<32x16xf32>
    %c1_130 = arith.constant 1 : index
    %c0_131 = arith.constant 0 : index
    %c0_132 = arith.constant 0 : index
    %c0_133 = arith.constant 0 : index
    %183 = vector.load %arg6[%c1_130, %c0_131, %c0_132, %c0_133] : memref<2x2x32x16xf32, #tpu.memory_space<vmem>>, vector<1x1x32x16xf32>
    %184 = vector.shape_cast %183 : vector<1x1x32x16xf32> to vector<32x16xf32>
    %cst_134 = arith.constant dense<0.000000e+00> : vector<32x16xf32>
    %185 = tpu.matmul %174, %184, %cst_134 {dimension_numbers = #tpu.dot_dimension_numbers<[1], [0], [0], [1], [0, 0, 1, 1], [], []>} : vector<32x32xf32>, vector<32x16xf32>, vector<32x16xf32> -> vector<32x16xf32>
    %c1_135 = arith.constant 1 : index
    %c0_136 = arith.constant 0 : index
    %c0_137 = arith.constant 0 : index
    %c0_138 = arith.constant 0 : index
    %186 = vector.load %arg7[%c1_135, %c0_136, %c0_137, %c0_138] : memref<2x2x1x16xf32, #tpu.memory_space<vmem>>, vector<1x1x1x16xf32>
    %187 = vector.shape_cast %186 : vector<1x1x1x16xf32> to vector<1x16xf32>
    %188 = vector.broadcast %187 : vector<1x16xf32> to vector<32x16xf32>
    %189 = arith.addf %185, %188 : vector<32x16xf32>
    %c1_139 = arith.constant 1 : index
    %c0_140 = arith.constant 0 : index
    %c0_141 = arith.constant 0 : index
    %c0_142 = arith.constant 0 : index
    %190 = vector.load %arg8[%c1_139, %c0_140, %c0_141, %c0_142] : memref<2x2x32x16xf32, #tpu.memory_space<vmem>>, vector<1x1x32x16xf32>
    %191 = vector.shape_cast %190 : vector<1x1x32x16xf32> to vector<32x16xf32>
    %cst_143 = arith.constant dense<0.000000e+00> : vector<32x16xf32>
    %192 = tpu.matmul %174, %191, %cst_143 {dimension_numbers = #tpu.dot_dimension_numbers<[1], [0], [0], [1], [0, 0, 1, 1], [], []>} : vector<32x32xf32>, vector<32x16xf32>, vector<32x16xf32> -> vector<32x16xf32>
    %c1_144 = arith.constant 1 : index
    %c0_145 = arith.constant 0 : index
    %c0_146 = arith.constant 0 : index
    %c0_147 = arith.constant 0 : index
    %193 = vector.load %arg9[%c1_144, %c0_145, %c0_146, %c0_147] : memref<2x2x1x16xf32, #tpu.memory_space<vmem>>, vector<1x1x1x16xf32>
    %194 = vector.shape_cast %193 : vector<1x1x1x16xf32> to vector<1x16xf32>
    %195 = vector.broadcast %194 : vector<1x16xf32> to vector<32x16xf32>
    %196 = arith.addf %192, %195 : vector<32x16xf32>
    %cst_148 = arith.constant dense<0.000000e+00> : vector<32x32xf32>
    %197 = tpu.matmul %182, %189, %cst_148 {dimension_numbers = #tpu.dot_dimension_numbers<[1], [1], [0], [0], [0, 0, 1, 0], [], []>} : vector<32x16xf32>, vector<32x16xf32>, vector<32x32xf32> -> vector<32x32xf32>
    %198 = vector.broadcast %3 : vector<1x32xf32> to vector<32x32xf32>
    %199 = arith.addf %197, %198 : vector<32x32xf32>
    %cst_149 = arith.constant dense<0xFF800000> : vector<32xf32>
    %200 = vector.multi_reduction <maximumf>, %199, %cst_149 [1] : vector<32x32xf32> to vector<32xf32>
    %201 = vector.shape_cast %200 : vector<32xf32> to vector<32x1xf32>
    %202 = vector.broadcast %201 : vector<32x1xf32> to vector<32x32xf32>
    %203 = arith.subf %199, %202 : vector<32x32xf32>
    %204 = math.exp %203 : vector<32x32xf32>
    %cst_150 = arith.constant dense<0.000000e+00> : vector<32xf32>
    %205 = vector.multi_reduction <add>, %204, %cst_150 [1] : vector<32x32xf32> to vector<32xf32>
    %206 = vector.shape_cast %205 : vector<32xf32> to vector<32x1xf32>
    %207 = tpu.reciprocal %206 {approx = true} : vector<32x1xf32> -> vector<32x1xf32>
    %208 = vector.broadcast %207 : vector<32x1xf32> to vector<32x32xf32>
    %209 = arith.mulf %204, %208 : vector<32x32xf32>
    %cst_151 = arith.constant dense<0.000000e+00> : vector<32x16xf32>
    %210 = tpu.matmul %209, %196, %cst_151 {dimension_numbers = #tpu.dot_dimension_numbers<[1], [0], [0], [1], [0, 0, 1, 1], [], []>} : vector<32x32xf32>, vector<32x16xf32>, vector<32x16xf32> -> vector<32x16xf32>
    %c1_152 = arith.constant 1 : index
    %c0_153 = arith.constant 0 : index
    %c0_154 = arith.constant 0 : index
    %c0_155 = arith.constant 0 : index
    %211 = vector.load %arg10[%c1_152, %c0_153, %c0_154, %c0_155] : memref<2x2x16x32xf32, #tpu.memory_space<vmem>>, vector<1x1x16x32xf32>
    %212 = vector.shape_cast %211 : vector<1x1x16x32xf32> to vector<16x32xf32>
    %cst_156 = arith.constant dense<0.000000e+00> : vector<32x32xf32>
    %213 = tpu.matmul %210, %212, %cst_156 {dimension_numbers = #tpu.dot_dimension_numbers<[1], [0], [0], [1], [0, 0, 1, 1], [], []>} : vector<32x16xf32>, vector<16x32xf32>, vector<32x32xf32> -> vector<32x32xf32>
    %214 = arith.addf %175, %213 : vector<32x32xf32>
    %c1_157 = arith.constant 1 : index
    %c1_158 = arith.constant 1 : index
    %c0_159 = arith.constant 0 : index
    %c0_160 = arith.constant 0 : index
    %215 = vector.load %arg4[%c1_157, %c1_158, %c0_159, %c0_160] : memref<2x2x32x16xf32, #tpu.memory_space<vmem>>, vector<1x1x32x16xf32>
    %216 = vector.shape_cast %215 : vector<1x1x32x16xf32> to vector<32x16xf32>
    %cst_161 = arith.constant dense<0.000000e+00> : vector<32x16xf32>
    %217 = tpu.matmul %174, %216, %cst_161 {dimension_numbers = #tpu.dot_dimension_numbers<[1], [0], [0], [1], [0, 0, 1, 1], [], []>} : vector<32x32xf32>, vector<32x16xf32>, vector<32x16xf32> -> vector<32x16xf32>
    %c1_162 = arith.constant 1 : index
    %c1_163 = arith.constant 1 : index
    %c0_164 = arith.constant 0 : index
    %c0_165 = arith.constant 0 : index
    %218 = vector.load %arg5[%c1_162, %c1_163, %c0_164, %c0_165] : memref<2x2x1x16xf32, #tpu.memory_space<vmem>>, vector<1x1x1x16xf32>
    %219 = vector.shape_cast %218 : vector<1x1x1x16xf32> to vector<1x16xf32>
    %220 = vector.broadcast %219 : vector<1x16xf32> to vector<32x16xf32>
    %221 = arith.addf %217, %220 : vector<32x16xf32>
    %c1_166 = arith.constant 1 : index
    %c1_167 = arith.constant 1 : index
    %c0_168 = arith.constant 0 : index
    %c0_169 = arith.constant 0 : index
    %222 = vector.load %arg6[%c1_166, %c1_167, %c0_168, %c0_169] : memref<2x2x32x16xf32, #tpu.memory_space<vmem>>, vector<1x1x32x16xf32>
    %223 = vector.shape_cast %222 : vector<1x1x32x16xf32> to vector<32x16xf32>
    %cst_170 = arith.constant dense<0.000000e+00> : vector<32x16xf32>
    %224 = tpu.matmul %174, %223, %cst_170 {dimension_numbers = #tpu.dot_dimension_numbers<[1], [0], [0], [1], [0, 0, 1, 1], [], []>} : vector<32x32xf32>, vector<32x16xf32>, vector<32x16xf32> -> vector<32x16xf32>
    %c1_171 = arith.constant 1 : index
    %c1_172 = arith.constant 1 : index
    %c0_173 = arith.constant 0 : index
    %c0_174 = arith.constant 0 : index
    %225 = vector.load %arg7[%c1_171, %c1_172, %c0_173, %c0_174] : memref<2x2x1x16xf32, #tpu.memory_space<vmem>>, vector<1x1x1x16xf32>
    %226 = vector.shape_cast %225 : vector<1x1x1x16xf32> to vector<1x16xf32>
    %227 = vector.broadcast %226 : vector<1x16xf32> to vector<32x16xf32>
    %228 = arith.addf %224, %227 : vector<32x16xf32>
    %c1_175 = arith.constant 1 : index
    %c1_176 = arith.constant 1 : index
    %c0_177 = arith.constant 0 : index
    %c0_178 = arith.constant 0 : index
    %229 = vector.load %arg8[%c1_175, %c1_176, %c0_177, %c0_178] : memref<2x2x32x16xf32, #tpu.memory_space<vmem>>, vector<1x1x32x16xf32>
    %230 = vector.shape_cast %229 : vector<1x1x32x16xf32> to vector<32x16xf32>
    %cst_179 = arith.constant dense<0.000000e+00> : vector<32x16xf32>
    %231 = tpu.matmul %174, %230, %cst_179 {dimension_numbers = #tpu.dot_dimension_numbers<[1], [0], [0], [1], [0, 0, 1, 1], [], []>} : vector<32x32xf32>, vector<32x16xf32>, vector<32x16xf32> -> vector<32x16xf32>
    %c1_180 = arith.constant 1 : index
    %c1_181 = arith.constant 1 : index
    %c0_182 = arith.constant 0 : index
    %c0_183 = arith.constant 0 : index
    %232 = vector.load %arg9[%c1_180, %c1_181, %c0_182, %c0_183] : memref<2x2x1x16xf32, #tpu.memory_space<vmem>>, vector<1x1x1x16xf32>
    %233 = vector.shape_cast %232 : vector<1x1x1x16xf32> to vector<1x16xf32>
    %234 = vector.broadcast %233 : vector<1x16xf32> to vector<32x16xf32>
    %235 = arith.addf %231, %234 : vector<32x16xf32>
    %cst_184 = arith.constant dense<0.000000e+00> : vector<32x32xf32>
    %236 = tpu.matmul %221, %228, %cst_184 {dimension_numbers = #tpu.dot_dimension_numbers<[1], [1], [0], [0], [0, 0, 1, 0], [], []>} : vector<32x16xf32>, vector<32x16xf32>, vector<32x32xf32> -> vector<32x32xf32>
    %237 = vector.broadcast %3 : vector<1x32xf32> to vector<32x32xf32>
    %238 = arith.addf %236, %237 : vector<32x32xf32>
    %cst_185 = arith.constant dense<0xFF800000> : vector<32xf32>
    %239 = vector.multi_reduction <maximumf>, %238, %cst_185 [1] : vector<32x32xf32> to vector<32xf32>
    %240 = vector.shape_cast %239 : vector<32xf32> to vector<32x1xf32>
    %241 = vector.broadcast %240 : vector<32x1xf32> to vector<32x32xf32>
    %242 = arith.subf %238, %241 : vector<32x32xf32>
    %243 = math.exp %242 : vector<32x32xf32>
    %cst_186 = arith.constant dense<0.000000e+00> : vector<32xf32>
    %244 = vector.multi_reduction <add>, %243, %cst_186 [1] : vector<32x32xf32> to vector<32xf32>
    %245 = vector.shape_cast %244 : vector<32xf32> to vector<32x1xf32>
    %246 = tpu.reciprocal %245 {approx = true} : vector<32x1xf32> -> vector<32x1xf32>
    %247 = vector.broadcast %246 : vector<32x1xf32> to vector<32x32xf32>
    %248 = arith.mulf %243, %247 : vector<32x32xf32>
    %cst_187 = arith.constant dense<0.000000e+00> : vector<32x16xf32>
    %249 = tpu.matmul %248, %235, %cst_187 {dimension_numbers = #tpu.dot_dimension_numbers<[1], [0], [0], [1], [0, 0, 1, 1], [], []>} : vector<32x32xf32>, vector<32x16xf32>, vector<32x16xf32> -> vector<32x16xf32>
    %c1_188 = arith.constant 1 : index
    %c1_189 = arith.constant 1 : index
    %c0_190 = arith.constant 0 : index
    %c0_191 = arith.constant 0 : index
    %250 = vector.load %arg10[%c1_188, %c1_189, %c0_190, %c0_191] : memref<2x2x16x32xf32, #tpu.memory_space<vmem>>, vector<1x1x16x32xf32>
    %251 = vector.shape_cast %250 : vector<1x1x16x32xf32> to vector<16x32xf32>
    %cst_192 = arith.constant dense<0.000000e+00> : vector<32x32xf32>
    %252 = tpu.matmul %249, %251, %cst_192 {dimension_numbers = #tpu.dot_dimension_numbers<[1], [0], [0], [1], [0, 0, 1, 1], [], []>} : vector<32x16xf32>, vector<16x32xf32>, vector<32x32xf32> -> vector<32x32xf32>
    %253 = arith.addf %214, %252 : vector<32x32xf32>
    %c1_193 = arith.constant 1 : index
    %c0_194 = arith.constant 0 : index
    %c0_195 = arith.constant 0 : index
    %254 = vector.load %arg11[%c1_193, %c0_194, %c0_195] : memref<2x1x32xf32, #tpu.memory_space<vmem>>, vector<1x1x32xf32>
    %255 = vector.shape_cast %254 : vector<1x1x32xf32> to vector<1x32xf32>
    %256 = vector.broadcast %255 : vector<1x32xf32> to vector<32x32xf32>
    %257 = arith.addf %253, %256 : vector<32x32xf32>
    %258 = arith.addf %257, %174 : vector<32x32xf32>
    %c1_196 = arith.constant 1 : index
    %c0_197 = arith.constant 0 : index
    %c0_198 = arith.constant 0 : index
    %259 = vector.load %arg12[%c1_196, %c0_197, %c0_198] : memref<2x1x32xf32, #tpu.memory_space<vmem>>, vector<1x1x32xf32>
    %260 = vector.shape_cast %259 : vector<1x1x32xf32> to vector<1x32xf32>
    %c1_199 = arith.constant 1 : index
    %c0_200 = arith.constant 0 : index
    %c0_201 = arith.constant 0 : index
    %261 = vector.load %arg13[%c1_199, %c0_200, %c0_201] : memref<2x1x32xf32, #tpu.memory_space<vmem>>, vector<1x1x32xf32>
    %262 = vector.shape_cast %261 : vector<1x1x32xf32> to vector<1x32xf32>
    %cst_202 = arith.constant dense<0.000000e+00> : vector<32xf32>
    %263 = vector.multi_reduction <add>, %258, %cst_202 [1] : vector<32x32xf32> to vector<32xf32>
    %264 = vector.shape_cast %263 : vector<32xf32> to vector<32x1xf32>
    %cst_203 = arith.constant 3.200000e+01 : f32
    %265 = vector.broadcast %cst_203 : f32 to vector<32x1xf32>
    %266 = arith.divf %264, %265 : vector<32x1xf32>
    %267 = vector.broadcast %266 : vector<32x1xf32> to vector<32x32xf32>
    %268 = arith.subf %258, %267 : vector<32x32xf32>
    %269 = arith.mulf %268, %268 : vector<32x32xf32>
    %cst_204 = arith.constant dense<0.000000e+00> : vector<32xf32>
    %270 = vector.multi_reduction <add>, %269, %cst_204 [1] : vector<32x32xf32> to vector<32xf32>
    %271 = vector.shape_cast %270 : vector<32xf32> to vector<32x1xf32>
    %cst_205 = arith.constant 3.200000e+01 : f32
    %272 = vector.broadcast %cst_205 : f32 to vector<32x1xf32>
    %273 = arith.divf %271, %272 : vector<32x1xf32>
    %274 = vector.broadcast %266 : vector<32x1xf32> to vector<32x32xf32>
    %275 = arith.subf %258, %274 : vector<32x32xf32>
    %cst_206 = arith.constant 9.99999974E-6 : f32
    %276 = vector.broadcast %cst_206 : f32 to vector<32x1xf32>
    %277 = arith.addf %273, %276 : vector<32x1xf32>
    %278 = math.rsqrt %277 : vector<32x1xf32>
    %279 = vector.broadcast %278 : vector<32x1xf32> to vector<32x32xf32>
    %280 = arith.mulf %275, %279 : vector<32x32xf32>
    %281 = vector.broadcast %260 : vector<1x32xf32> to vector<32x32xf32>
    %282 = arith.mulf %280, %281 : vector<32x32xf32>
    %283 = vector.broadcast %262 : vector<1x32xf32> to vector<32x32xf32>
    %284 = arith.addf %282, %283 : vector<32x32xf32>
    %285 = vector.broadcast %5 : vector<32x1xf32> to vector<32x32xf32>
    %286 = arith.mulf %284, %285 : vector<32x32xf32>
    %c1_207 = arith.constant 1 : index
    %c0_208 = arith.constant 0 : index
    %c0_209 = arith.constant 0 : index
    %287 = vector.load %arg14[%c1_207, %c0_208, %c0_209] : memref<2x288x64xf32, #tpu.memory_space<vmem>>, vector<1x288x64xf32>
    %288 = vector.shape_cast %287 : vector<1x288x64xf32> to vector<288x64xf32>
    %c1_210 = arith.constant 1 : index
    %c0_211 = arith.constant 0 : index
    %c0_212 = arith.constant 0 : index
    %289 = vector.load %arg15[%c1_210, %c0_211, %c0_212] : memref<2x1x64xf32, #tpu.memory_space<vmem>>, vector<1x1x64xf32>
    %290 = vector.shape_cast %289 : vector<1x1x64xf32> to vector<1x64xf32>
    %cst_213 = arith.constant 0.000000e+00 : f32
    %291 = vector.broadcast %cst_213 : f32 to vector<4x32xf32>
    %292 = tpu.concatenate %291, %286, %291 in 0 : vector<4x32xf32>, vector<32x32xf32>, vector<4x32xf32> -> vector<40x32xf32>
    %293 = vector.extract_strided_slice %292 {offsets = [0, 0], sizes = [32, 32], strides = [1, 1]} : vector<40x32xf32> to vector<32x32xf32>
    %294 = vector.extract_strided_slice %292 {offsets = [1, 0], sizes = [32, 32], strides = [1, 1]} : vector<40x32xf32> to vector<32x32xf32>
    %295 = vector.extract_strided_slice %292 {offsets = [2, 0], sizes = [32, 32], strides = [1, 1]} : vector<40x32xf32> to vector<32x32xf32>
    %296 = vector.extract_strided_slice %292 {offsets = [3, 0], sizes = [32, 32], strides = [1, 1]} : vector<40x32xf32> to vector<32x32xf32>
    %297 = vector.extract_strided_slice %292 {offsets = [4, 0], sizes = [32, 32], strides = [1, 1]} : vector<40x32xf32> to vector<32x32xf32>
    %298 = vector.extract_strided_slice %292 {offsets = [5, 0], sizes = [32, 32], strides = [1, 1]} : vector<40x32xf32> to vector<32x32xf32>
    %299 = vector.extract_strided_slice %292 {offsets = [6, 0], sizes = [32, 32], strides = [1, 1]} : vector<40x32xf32> to vector<32x32xf32>
    %300 = vector.extract_strided_slice %292 {offsets = [7, 0], sizes = [32, 32], strides = [1, 1]} : vector<40x32xf32> to vector<32x32xf32>
    %301 = vector.extract_strided_slice %292 {offsets = [8, 0], sizes = [32, 32], strides = [1, 1]} : vector<40x32xf32> to vector<32x32xf32>
    %302 = tpu.concatenate %293, %294, %295, %296, %297, %298, %299, %300, %301 in 1 : vector<32x32xf32>, vector<32x32xf32>, vector<32x32xf32>, vector<32x32xf32>, vector<32x32xf32>, vector<32x32xf32>, vector<32x32xf32>, vector<32x32xf32>, vector<32x32xf32> -> vector<32x288xf32>
    %cst_214 = arith.constant dense<0.000000e+00> : vector<32x64xf32>
    %303 = tpu.matmul %302, %288, %cst_214 {dimension_numbers = #tpu.dot_dimension_numbers<[1], [0], [0], [1], [0, 0, 1, 1], [], []>} : vector<32x288xf32>, vector<288x64xf32>, vector<32x64xf32> -> vector<32x64xf32>
    %304 = vector.broadcast %290 : vector<1x64xf32> to vector<32x64xf32>
    %305 = arith.addf %303, %304 : vector<32x64xf32>
    %cst_215 = arith.constant 0.000000e+00 : f32
    %306 = vector.broadcast %cst_215 : f32 to vector<32x64xf32>
    %307 = arith.maximumf %305, %306 : vector<32x64xf32>
    %c1_216 = arith.constant 1 : index
    %c0_217 = arith.constant 0 : index
    %c0_218 = arith.constant 0 : index
    %308 = vector.load %arg16[%c1_216, %c0_217, %c0_218] : memref<2x64x32xf32, #tpu.memory_space<vmem>>, vector<1x64x32xf32>
    %309 = vector.shape_cast %308 : vector<1x64x32xf32> to vector<64x32xf32>
    %cst_219 = arith.constant dense<0.000000e+00> : vector<32x32xf32>
    %310 = tpu.matmul %307, %309, %cst_219 {dimension_numbers = #tpu.dot_dimension_numbers<[1], [0], [0], [1], [0, 0, 1, 1], [], []>} : vector<32x64xf32>, vector<64x32xf32>, vector<32x32xf32> -> vector<32x32xf32>
    %c1_220 = arith.constant 1 : index
    %c0_221 = arith.constant 0 : index
    %c0_222 = arith.constant 0 : index
    %311 = vector.load %arg17[%c1_220, %c0_221, %c0_222] : memref<2x1x32xf32, #tpu.memory_space<vmem>>, vector<1x1x32xf32>
    %312 = vector.shape_cast %311 : vector<1x1x32xf32> to vector<1x32xf32>
    %313 = vector.broadcast %312 : vector<1x32xf32> to vector<32x32xf32>
    %314 = arith.addf %310, %313 : vector<32x32xf32>
    %315 = arith.addf %314, %286 : vector<32x32xf32>
    %c1_223 = arith.constant 1 : index
    %c0_224 = arith.constant 0 : index
    %c0_225 = arith.constant 0 : index
    %316 = vector.load %arg18[%c1_223, %c0_224, %c0_225] : memref<2x1x32xf32, #tpu.memory_space<vmem>>, vector<1x1x32xf32>
    %317 = vector.shape_cast %316 : vector<1x1x32xf32> to vector<1x32xf32>
    %c1_226 = arith.constant 1 : index
    %c0_227 = arith.constant 0 : index
    %c0_228 = arith.constant 0 : index
    %318 = vector.load %arg19[%c1_226, %c0_227, %c0_228] : memref<2x1x32xf32, #tpu.memory_space<vmem>>, vector<1x1x32xf32>
    %319 = vector.shape_cast %318 : vector<1x1x32xf32> to vector<1x32xf32>
    %cst_229 = arith.constant dense<0.000000e+00> : vector<32xf32>
    %320 = vector.multi_reduction <add>, %315, %cst_229 [1] : vector<32x32xf32> to vector<32xf32>
    %321 = vector.shape_cast %320 : vector<32xf32> to vector<32x1xf32>
    %cst_230 = arith.constant 3.200000e+01 : f32
    %322 = vector.broadcast %cst_230 : f32 to vector<32x1xf32>
    %323 = arith.divf %321, %322 : vector<32x1xf32>
    %324 = vector.broadcast %323 : vector<32x1xf32> to vector<32x32xf32>
    %325 = arith.subf %315, %324 : vector<32x32xf32>
    %326 = arith.mulf %325, %325 : vector<32x32xf32>
    %cst_231 = arith.constant dense<0.000000e+00> : vector<32xf32>
    %327 = vector.multi_reduction <add>, %326, %cst_231 [1] : vector<32x32xf32> to vector<32xf32>
    %328 = vector.shape_cast %327 : vector<32xf32> to vector<32x1xf32>
    %cst_232 = arith.constant 3.200000e+01 : f32
    %329 = vector.broadcast %cst_232 : f32 to vector<32x1xf32>
    %330 = arith.divf %328, %329 : vector<32x1xf32>
    %331 = vector.broadcast %323 : vector<32x1xf32> to vector<32x32xf32>
    %332 = arith.subf %315, %331 : vector<32x32xf32>
    %cst_233 = arith.constant 9.99999974E-6 : f32
    %333 = vector.broadcast %cst_233 : f32 to vector<32x1xf32>
    %334 = arith.addf %330, %333 : vector<32x1xf32>
    %335 = math.rsqrt %334 : vector<32x1xf32>
    %336 = vector.broadcast %335 : vector<32x1xf32> to vector<32x32xf32>
    %337 = arith.mulf %332, %336 : vector<32x32xf32>
    %338 = vector.broadcast %317 : vector<1x32xf32> to vector<32x32xf32>
    %339 = arith.mulf %337, %338 : vector<32x32xf32>
    %340 = vector.broadcast %319 : vector<1x32xf32> to vector<32x32xf32>
    %341 = arith.addf %339, %340 : vector<32x32xf32>
    %342 = vector.broadcast %5 : vector<32x1xf32> to vector<32x32xf32>
    %343 = arith.mulf %341, %342 : vector<32x32xf32>
    %c0_234 = arith.constant 0 : index
    %c0_235 = arith.constant 0 : index
    %344 = vector.load %arg20[%c0_234, %c0_235] : memref<32x32xf32, #tpu.memory_space<vmem>>, vector<32x32xf32>
    %cst_236 = arith.constant dense<0.000000e+00> : vector<32x32xf32>
    %345 = tpu.matmul %343, %344, %cst_236 {dimension_numbers = #tpu.dot_dimension_numbers<[1], [0], [0], [1], [0, 0, 1, 1], [], []>} : vector<32x32xf32>, vector<32x32xf32>, vector<32x32xf32> -> vector<32x32xf32>
    %c0_237 = arith.constant 0 : index
    %c0_238 = arith.constant 0 : index
    %346 = vector.load %arg21[%c0_237, %c0_238] : memref<1x32xf32, #tpu.memory_space<vmem>>, vector<1x32xf32>
    %347 = vector.broadcast %346 : vector<1x32xf32> to vector<32x32xf32>
    %348 = arith.addf %345, %347 : vector<32x32xf32>
    %349 = vector.extract_strided_slice %348 {offsets = [0, 0], sizes = [32, 16], strides = [1, 1]} : vector<32x32xf32> to vector<32x16xf32>
    %c0_239 = arith.constant 0 : index
    %c0_240 = arith.constant 0 : index
    %c0_241 = arith.constant 0 : index
    %350 = vector.load %arg26[%c0_239, %c0_240, %c0_241] : memref<1x32x16xf32, #tpu.memory_space<vmem>>, vector<1x32x16xf32>
    %351 = vector.shape_cast %350 : vector<1x32x16xf32> to vector<32x16xf32>
    %352 = vector.shape_cast %349 : vector<32x16xf32> to vector<1x32x16xf32>
    tpu.vector_store %arg26[%c0_239, %c0_240, %c0_241], %352 {strides = array<i32>} : memref<1x32x16xf32, #tpu.memory_space<vmem>>, vector<1x32x16xf32>,
    %c0_242 = arith.constant 0 : index
    %c0_243 = arith.constant 0 : index
    %c0_244 = arith.constant 0 : index
    %353 = vector.load %arg22[%c0_242, %c0_243, %c0_244] : memref<5x160x32xf32, #tpu.memory_space<vmem>>, vector<1x160x32xf32>
    %354 = vector.shape_cast %353 : vector<1x160x32xf32> to vector<160x32xf32>
    %c0_245 = arith.constant 0 : index
    %c0_246 = arith.constant 0 : index
    %c0_247 = arith.constant 0 : index
    %355 = vector.load %arg23[%c0_245, %c0_246, %c0_247] : memref<5x1x32xf32, #tpu.memory_space<vmem>>, vector<1x1x32xf32>
    %356 = vector.shape_cast %355 : vector<1x1x32xf32> to vector<1x32xf32>
    %cst_248 = arith.constant 0.000000e+00 : f32
    %357 = vector.broadcast %cst_248 : f32 to vector<2x32xf32>
    %358 = tpu.concatenate %357, %348, %357 in 0 : vector<2x32xf32>, vector<32x32xf32>, vector<2x32xf32> -> vector<36x32xf32>
    %359 = vector.extract_strided_slice %358 {offsets = [0, 0], sizes = [32, 32], strides = [1, 1]} : vector<36x32xf32> to vector<32x32xf32>
    %360 = vector.extract_strided_slice %358 {offsets = [1, 0], sizes = [32, 32], strides = [1, 1]} : vector<36x32xf32> to vector<32x32xf32>
    %361 = vector.extract_strided_slice %358 {offsets = [2, 0], sizes = [32, 32], strides = [1, 1]} : vector<36x32xf32> to vector<32x32xf32>
    %362 = vector.extract_strided_slice %358 {offsets = [3, 0], sizes = [32, 32], strides = [1, 1]} : vector<36x32xf32> to vector<32x32xf32>
    %363 = vector.extract_strided_slice %358 {offsets = [4, 0], sizes = [32, 32], strides = [1, 1]} : vector<36x32xf32> to vector<32x32xf32>
    %364 = tpu.concatenate %359, %360, %361, %362, %363 in 1 : vector<32x32xf32>, vector<32x32xf32>, vector<32x32xf32>, vector<32x32xf32>, vector<32x32xf32> -> vector<32x160xf32>
    %cst_249 = arith.constant dense<0.000000e+00> : vector<32x32xf32>
    %365 = tpu.matmul %364, %354, %cst_249 {dimension_numbers = #tpu.dot_dimension_numbers<[1], [0], [0], [1], [0, 0, 1, 1], [], []>} : vector<32x160xf32>, vector<160x32xf32>, vector<32x32xf32> -> vector<32x32xf32>
    %366 = vector.broadcast %356 : vector<1x32xf32> to vector<32x32xf32>
    %367 = arith.addf %365, %366 : vector<32x32xf32>
    %c0_250 = arith.constant 0 : index
    %c0_251 = arith.constant 0 : index
    %c0_252 = arith.constant 0 : index
    %368 = vector.load %arg24[%c0_250, %c0_251, %c0_252] : memref<5x1x32xf32, #tpu.memory_space<vmem>>, vector<1x1x32xf32>
    %369 = vector.shape_cast %368 : vector<1x1x32xf32> to vector<1x32xf32>
    %cst_253 = arith.constant 0.999994993 : f32
    %370 = vector.broadcast %cst_253 : f32 to vector<1x32xf32>
    %371 = arith.mulf %369, %370 : vector<1x32xf32>
    %372 = vector.broadcast %371 : vector<1x32xf32> to vector<32x32xf32>
    %373 = arith.mulf %367, %372 : vector<32x32xf32>
    %c0_254 = arith.constant 0 : index
    %c0_255 = arith.constant 0 : index
    %c0_256 = arith.constant 0 : index
    %374 = vector.load %arg25[%c0_254, %c0_255, %c0_256] : memref<5x1x32xf32, #tpu.memory_space<vmem>>, vector<1x1x32xf32>
    %375 = vector.shape_cast %374 : vector<1x1x32xf32> to vector<1x32xf32>
    %376 = vector.broadcast %375 : vector<1x32xf32> to vector<32x32xf32>
    %377 = arith.addf %373, %376 : vector<32x32xf32>
    %378 = math.tanh %377 : vector<32x32xf32>
    %c1_257 = arith.constant 1 : index
    %c0_258 = arith.constant 0 : index
    %c0_259 = arith.constant 0 : index
    %379 = vector.load %arg22[%c1_257, %c0_258, %c0_259] : memref<5x160x32xf32, #tpu.memory_space<vmem>>, vector<1x160x32xf32>
    %380 = vector.shape_cast %379 : vector<1x160x32xf32> to vector<160x32xf32>
    %c1_260 = arith.constant 1 : index
    %c0_261 = arith.constant 0 : index
    %c0_262 = arith.constant 0 : index
    %381 = vector.load %arg23[%c1_260, %c0_261, %c0_262] : memref<5x1x32xf32, #tpu.memory_space<vmem>>, vector<1x1x32xf32>
    %382 = vector.shape_cast %381 : vector<1x1x32xf32> to vector<1x32xf32>
    %cst_263 = arith.constant 0.000000e+00 : f32
    %383 = vector.broadcast %cst_263 : f32 to vector<2x32xf32>
    %384 = tpu.concatenate %383, %378, %383 in 0 : vector<2x32xf32>, vector<32x32xf32>, vector<2x32xf32> -> vector<36x32xf32>
    %385 = vector.extract_strided_slice %384 {offsets = [0, 0], sizes = [32, 32], strides = [1, 1]} : vector<36x32xf32> to vector<32x32xf32>
    %386 = vector.extract_strided_slice %384 {offsets = [1, 0], sizes = [32, 32], strides = [1, 1]} : vector<36x32xf32> to vector<32x32xf32>
    %387 = vector.extract_strided_slice %384 {offsets = [2, 0], sizes = [32, 32], strides = [1, 1]} : vector<36x32xf32> to vector<32x32xf32>
    %388 = vector.extract_strided_slice %384 {offsets = [3, 0], sizes = [32, 32], strides = [1, 1]} : vector<36x32xf32> to vector<32x32xf32>
    %389 = vector.extract_strided_slice %384 {offsets = [4, 0], sizes = [32, 32], strides = [1, 1]} : vector<36x32xf32> to vector<32x32xf32>
    %390 = tpu.concatenate %385, %386, %387, %388, %389 in 1 : vector<32x32xf32>, vector<32x32xf32>, vector<32x32xf32>, vector<32x32xf32>, vector<32x32xf32> -> vector<32x160xf32>
    %cst_264 = arith.constant dense<0.000000e+00> : vector<32x32xf32>
    %391 = tpu.matmul %390, %380, %cst_264 {dimension_numbers = #tpu.dot_dimension_numbers<[1], [0], [0], [1], [0, 0, 1, 1], [], []>} : vector<32x160xf32>, vector<160x32xf32>, vector<32x32xf32> -> vector<32x32xf32>
    %392 = vector.broadcast %382 : vector<1x32xf32> to vector<32x32xf32>
    %393 = arith.addf %391, %392 : vector<32x32xf32>
    %c1_265 = arith.constant 1 : index
    %c0_266 = arith.constant 0 : index
    %c0_267 = arith.constant 0 : index
    %394 = vector.load %arg24[%c1_265, %c0_266, %c0_267] : memref<5x1x32xf32, #tpu.memory_space<vmem>>, vector<1x1x32xf32>
    %395 = vector.shape_cast %394 : vector<1x1x32xf32> to vector<1x32xf32>
    %cst_268 = arith.constant 0.999994993 : f32
    %396 = vector.broadcast %cst_268 : f32 to vector<1x32xf32>
    %397 = arith.mulf %395, %396 : vector<1x32xf32>
    %398 = vector.broadcast %397 : vector<1x32xf32> to vector<32x32xf32>
    %399 = arith.mulf %393, %398 : vector<32x32xf32>
    %c1_269 = arith.constant 1 : index
    %c0_270 = arith.constant 0 : index
    %c0_271 = arith.constant 0 : index
    %400 = vector.load %arg25[%c1_269, %c0_270, %c0_271] : memref<5x1x32xf32, #tpu.memory_space<vmem>>, vector<1x1x32xf32>
    %401 = vector.shape_cast %400 : vector<1x1x32xf32> to vector<1x32xf32>
    %402 = vector.broadcast %401 : vector<1x32xf32> to vector<32x32xf32>
    %403 = arith.addf %399, %402 : vector<32x32xf32>
    %404 = math.tanh %403 : vector<32x32xf32>
    %c2 = arith.constant 2 : index
    %c0_272 = arith.constant 0 : index
    %c0_273 = arith.constant 0 : index
    %405 = vector.load %arg22[%c2, %c0_272, %c0_273] : memref<5x160x32xf32, #tpu.memory_space<vmem>>, vector<1x160x32xf32>
    %406 = vector.shape_cast %405 : vector<1x160x32xf32> to vector<160x32xf32>
    %c2_274 = arith.constant 2 : index
    %c0_275 = arith.constant 0 : index
    %c0_276 = arith.constant 0 : index
    %407 = vector.load %arg23[%c2_274, %c0_275, %c0_276] : memref<5x1x32xf32, #tpu.memory_space<vmem>>, vector<1x1x32xf32>
    %408 = vector.shape_cast %407 : vector<1x1x32xf32> to vector<1x32xf32>
    %cst_277 = arith.constant 0.000000e+00 : f32
    %409 = vector.broadcast %cst_277 : f32 to vector<2x32xf32>
    %410 = tpu.concatenate %409, %404, %409 in 0 : vector<2x32xf32>, vector<32x32xf32>, vector<2x32xf32> -> vector<36x32xf32>
    %411 = vector.extract_strided_slice %410 {offsets = [0, 0], sizes = [32, 32], strides = [1, 1]} : vector<36x32xf32> to vector<32x32xf32>
    %412 = vector.extract_strided_slice %410 {offsets = [1, 0], sizes = [32, 32], strides = [1, 1]} : vector<36x32xf32> to vector<32x32xf32>
    %413 = vector.extract_strided_slice %410 {offsets = [2, 0], sizes = [32, 32], strides = [1, 1]} : vector<36x32xf32> to vector<32x32xf32>
    %414 = vector.extract_strided_slice %410 {offsets = [3, 0], sizes = [32, 32], strides = [1, 1]} : vector<36x32xf32> to vector<32x32xf32>
    %415 = vector.extract_strided_slice %410 {offsets = [4, 0], sizes = [32, 32], strides = [1, 1]} : vector<36x32xf32> to vector<32x32xf32>
    %416 = tpu.concatenate %411, %412, %413, %414, %415 in 1 : vector<32x32xf32>, vector<32x32xf32>, vector<32x32xf32>, vector<32x32xf32>, vector<32x32xf32> -> vector<32x160xf32>
    %cst_278 = arith.constant dense<0.000000e+00> : vector<32x32xf32>
    %417 = tpu.matmul %416, %406, %cst_278 {dimension_numbers = #tpu.dot_dimension_numbers<[1], [0], [0], [1], [0, 0, 1, 1], [], []>} : vector<32x160xf32>, vector<160x32xf32>, vector<32x32xf32> -> vector<32x32xf32>
    %418 = vector.broadcast %408 : vector<1x32xf32> to vector<32x32xf32>
    %419 = arith.addf %417, %418 : vector<32x32xf32>
    %c2_279 = arith.constant 2 : index
    %c0_280 = arith.constant 0 : index
    %c0_281 = arith.constant 0 : index
    %420 = vector.load %arg24[%c2_279, %c0_280, %c0_281] : memref<5x1x32xf32, #tpu.memory_space<vmem>>, vector<1x1x32xf32>
    %421 = vector.shape_cast %420 : vector<1x1x32xf32> to vector<1x32xf32>
    %cst_282 = arith.constant 0.999994993 : f32
    %422 = vector.broadcast %cst_282 : f32 to vector<1x32xf32>
    %423 = arith.mulf %421, %422 : vector<1x32xf32>
    %424 = vector.broadcast %423 : vector<1x32xf32> to vector<32x32xf32>
    %425 = arith.mulf %419, %424 : vector<32x32xf32>
    %c2_283 = arith.constant 2 : index
    %c0_284 = arith.constant 0 : index
    %c0_285 = arith.constant 0 : index
    %426 = vector.load %arg25[%c2_283, %c0_284, %c0_285] : memref<5x1x32xf32, #tpu.memory_space<vmem>>, vector<1x1x32xf32>
    %427 = vector.shape_cast %426 : vector<1x1x32xf32> to vector<1x32xf32>
    %428 = vector.broadcast %427 : vector<1x32xf32> to vector<32x32xf32>
    %429 = arith.addf %425, %428 : vector<32x32xf32>
    %430 = math.tanh %429 : vector<32x32xf32>
    %c3 = arith.constant 3 : index
    %c0_286 = arith.constant 0 : index
    %c0_287 = arith.constant 0 : index
    %431 = vector.load %arg22[%c3, %c0_286, %c0_287] : memref<5x160x32xf32, #tpu.memory_space<vmem>>, vector<1x160x32xf32>
    %432 = vector.shape_cast %431 : vector<1x160x32xf32> to vector<160x32xf32>
    %c3_288 = arith.constant 3 : index
    %c0_289 = arith.constant 0 : index
    %c0_290 = arith.constant 0 : index
    %433 = vector.load %arg23[%c3_288, %c0_289, %c0_290] : memref<5x1x32xf32, #tpu.memory_space<vmem>>, vector<1x1x32xf32>
    %434 = vector.shape_cast %433 : vector<1x1x32xf32> to vector<1x32xf32>
    %cst_291 = arith.constant 0.000000e+00 : f32
    %435 = vector.broadcast %cst_291 : f32 to vector<2x32xf32>
    %436 = tpu.concatenate %435, %430, %435 in 0 : vector<2x32xf32>, vector<32x32xf32>, vector<2x32xf32> -> vector<36x32xf32>
    %437 = vector.extract_strided_slice %436 {offsets = [0, 0], sizes = [32, 32], strides = [1, 1]} : vector<36x32xf32> to vector<32x32xf32>
    %438 = vector.extract_strided_slice %436 {offsets = [1, 0], sizes = [32, 32], strides = [1, 1]} : vector<36x32xf32> to vector<32x32xf32>
    %439 = vector.extract_strided_slice %436 {offsets = [2, 0], sizes = [32, 32], strides = [1, 1]} : vector<36x32xf32> to vector<32x32xf32>
    %440 = vector.extract_strided_slice %436 {offsets = [3, 0], sizes = [32, 32], strides = [1, 1]} : vector<36x32xf32> to vector<32x32xf32>
    %441 = vector.extract_strided_slice %436 {offsets = [4, 0], sizes = [32, 32], strides = [1, 1]} : vector<36x32xf32> to vector<32x32xf32>
    %442 = tpu.concatenate %437, %438, %439, %440, %441 in 1 : vector<32x32xf32>, vector<32x32xf32>, vector<32x32xf32>, vector<32x32xf32>, vector<32x32xf32> -> vector<32x160xf32>
    %cst_292 = arith.constant dense<0.000000e+00> : vector<32x32xf32>
    %443 = tpu.matmul %442, %432, %cst_292 {dimension_numbers = #tpu.dot_dimension_numbers<[1], [0], [0], [1], [0, 0, 1, 1], [], []>} : vector<32x160xf32>, vector<160x32xf32>, vector<32x32xf32> -> vector<32x32xf32>
    %444 = vector.broadcast %434 : vector<1x32xf32> to vector<32x32xf32>
    %445 = arith.addf %443, %444 : vector<32x32xf32>
    %c3_293 = arith.constant 3 : index
    %c0_294 = arith.constant 0 : index
    %c0_295 = arith.constant 0 : index
    %446 = vector.load %arg24[%c3_293, %c0_294, %c0_295] : memref<5x1x32xf32, #tpu.memory_space<vmem>>, vector<1x1x32xf32>
    %447 = vector.shape_cast %446 : vector<1x1x32xf32> to vector<1x32xf32>
    %cst_296 = arith.constant 0.999994993 : f32
    %448 = vector.broadcast %cst_296 : f32 to vector<1x32xf32>
    %449 = arith.mulf %447, %448 : vector<1x32xf32>
    %450 = vector.broadcast %449 : vector<1x32xf32> to vector<32x32xf32>
    %451 = arith.mulf %445, %450 : vector<32x32xf32>
    %c3_297 = arith.constant 3 : index
    %c0_298 = arith.constant 0 : index
    %c0_299 = arith.constant 0 : index
    %452 = vector.load %arg25[%c3_297, %c0_298, %c0_299] : memref<5x1x32xf32, #tpu.memory_space<vmem>>, vector<1x1x32xf32>
    %453 = vector.shape_cast %452 : vector<1x1x32xf32> to vector<1x32xf32>
    %454 = vector.broadcast %453 : vector<1x32xf32> to vector<32x32xf32>
    %455 = arith.addf %451, %454 : vector<32x32xf32>
    %456 = math.tanh %455 : vector<32x32xf32>
    %c4 = arith.constant 4 : index
    %c0_300 = arith.constant 0 : index
    %c0_301 = arith.constant 0 : index
    %457 = vector.load %arg22[%c4, %c0_300, %c0_301] : memref<5x160x32xf32, #tpu.memory_space<vmem>>, vector<1x160x32xf32>
    %458 = vector.shape_cast %457 : vector<1x160x32xf32> to vector<160x32xf32>
    %c4_302 = arith.constant 4 : index
    %c0_303 = arith.constant 0 : index
    %c0_304 = arith.constant 0 : index
    %459 = vector.load %arg23[%c4_302, %c0_303, %c0_304] : memref<5x1x32xf32, #tpu.memory_space<vmem>>, vector<1x1x32xf32>
    %460 = vector.shape_cast %459 : vector<1x1x32xf32> to vector<1x32xf32>
    %cst_305 = arith.constant 0.000000e+00 : f32
    %461 = vector.broadcast %cst_305 : f32 to vector<2x32xf32>
    %462 = tpu.concatenate %461, %456, %461 in 0 : vector<2x32xf32>, vector<32x32xf32>, vector<2x32xf32> -> vector<36x32xf32>
    %463 = vector.extract_strided_slice %462 {offsets = [0, 0], sizes = [32, 32], strides = [1, 1]} : vector<36x32xf32> to vector<32x32xf32>
    %464 = vector.extract_strided_slice %462 {offsets = [1, 0], sizes = [32, 32], strides = [1, 1]} : vector<36x32xf32> to vector<32x32xf32>
    %465 = vector.extract_strided_slice %462 {offsets = [2, 0], sizes = [32, 32], strides = [1, 1]} : vector<36x32xf32> to vector<32x32xf32>
    %466 = vector.extract_strided_slice %462 {offsets = [3, 0], sizes = [32, 32], strides = [1, 1]} : vector<36x32xf32> to vector<32x32xf32>
    %467 = vector.extract_strided_slice %462 {offsets = [4, 0], sizes = [32, 32], strides = [1, 1]} : vector<36x32xf32> to vector<32x32xf32>
    %468 = tpu.concatenate %463, %464, %465, %466, %467 in 1 : vector<32x32xf32>, vector<32x32xf32>, vector<32x32xf32>, vector<32x32xf32>, vector<32x32xf32> -> vector<32x160xf32>
    %cst_306 = arith.constant dense<0.000000e+00> : vector<32x32xf32>
    %469 = tpu.matmul %468, %458, %cst_306 {dimension_numbers = #tpu.dot_dimension_numbers<[1], [0], [0], [1], [0, 0, 1, 1], [], []>} : vector<32x160xf32>, vector<160x32xf32>, vector<32x32xf32> -> vector<32x32xf32>
    %470 = vector.broadcast %460 : vector<1x32xf32> to vector<32x32xf32>
    %471 = arith.addf %469, %470 : vector<32x32xf32>
    %c4_307 = arith.constant 4 : index
    %c0_308 = arith.constant 0 : index
    %c0_309 = arith.constant 0 : index
    %472 = vector.load %arg24[%c4_307, %c0_308, %c0_309] : memref<5x1x32xf32, #tpu.memory_space<vmem>>, vector<1x1x32xf32>
    %473 = vector.shape_cast %472 : vector<1x1x32xf32> to vector<1x32xf32>
    %cst_310 = arith.constant 0.999994993 : f32
    %474 = vector.broadcast %cst_310 : f32 to vector<1x32xf32>
    %475 = arith.mulf %473, %474 : vector<1x32xf32>
    %476 = vector.broadcast %475 : vector<1x32xf32> to vector<32x32xf32>
    %477 = arith.mulf %471, %476 : vector<32x32xf32>
    %c4_311 = arith.constant 4 : index
    %c0_312 = arith.constant 0 : index
    %c0_313 = arith.constant 0 : index
    %478 = vector.load %arg25[%c4_311, %c0_312, %c0_313] : memref<5x1x32xf32, #tpu.memory_space<vmem>>, vector<1x1x32xf32>
    %479 = vector.shape_cast %478 : vector<1x1x32xf32> to vector<1x32xf32>
    %480 = vector.broadcast %479 : vector<1x32xf32> to vector<32x32xf32>
    %481 = arith.addf %477, %480 : vector<32x32xf32>
    %482 = vector.extract_strided_slice %348 {offsets = [0, 0], sizes = [32, 16], strides = [1, 1]} : vector<32x32xf32> to vector<32x16xf32>
    %483 = vector.extract_strided_slice %481 {offsets = [0, 0], sizes = [32, 16], strides = [1, 1]} : vector<32x32xf32> to vector<32x16xf32>
    %484 = arith.addf %482, %483 : vector<32x16xf32>
    %c0_314 = arith.constant 0 : index
    %c0_315 = arith.constant 0 : index
    %c0_316 = arith.constant 0 : index
    %485 = vector.load %arg27[%c0_314, %c0_315, %c0_316] : memref<1x32x16xf32, #tpu.memory_space<vmem>>, vector<1x32x16xf32>
    %486 = vector.shape_cast %485 : vector<1x32x16xf32> to vector<32x16xf32>
    %487 = vector.shape_cast %484 : vector<32x16xf32> to vector<1x32x16xf32>
    tpu.vector_store %arg27[%c0_314, %c0_315, %c0_316], %487 {strides = array<i32>} : memref<1x32x16xf32, #tpu.memory_space<vmem>>, vector<1x32x16xf32>,
    return
  }
  func.func @transform_0(%arg0: i32) -> (i32, i32, i32) {
    %c0_i32 = arith.constant 0 : i32
    %c0_i32_0 = arith.constant 0 : i32
    %c0_i32_1 = arith.constant 0 : i32
    return %arg0, %c0_i32, %c0_i32_0 : i32, i32, i32
  }
  func.func @transform_1(%arg0: i32) -> (i32, i32, i32) {
    %c0_i32 = arith.constant 0 : i32
    %c0_i32_0 = arith.constant 0 : i32
    %c0_i32_1 = arith.constant 0 : i32
    return %arg0, %c0_i32, %c0_i32_0 : i32, i32, i32
  }
  func.func @transform_2(%arg0: i32) -> (i32, i32, i32) {
    %c0_i32 = arith.constant 0 : i32
    %c0_i32_0 = arith.constant 0 : i32
    %c0_i32_1 = arith.constant 0 : i32
    return %arg0, %c0_i32, %c0_i32_0 : i32, i32, i32
  }
  func.func @transform_3(%arg0: i32) -> (i32, i32, i32, i32) {
    %c0_i32 = arith.constant 0 : i32
    %c0_i32_0 = arith.constant 0 : i32
    %c0_i32_1 = arith.constant 0 : i32
    %c0_i32_2 = arith.constant 0 : i32
    %c0_i32_3 = arith.constant 0 : i32
    return %c0_i32, %c0_i32_0, %c0_i32_1, %c0_i32_2 : i32, i32, i32, i32
  }
  func.func @transform_4(%arg0: i32) -> (i32, i32, i32, i32) {
    %c0_i32 = arith.constant 0 : i32
    %c0_i32_0 = arith.constant 0 : i32
    %c0_i32_1 = arith.constant 0 : i32
    %c0_i32_2 = arith.constant 0 : i32
    %c0_i32_3 = arith.constant 0 : i32
    return %c0_i32, %c0_i32_0, %c0_i32_1, %c0_i32_2 : i32, i32, i32, i32
  }
  func.func @transform_5(%arg0: i32) -> (i32, i32, i32, i32) {
    %c0_i32 = arith.constant 0 : i32
    %c0_i32_0 = arith.constant 0 : i32
    %c0_i32_1 = arith.constant 0 : i32
    %c0_i32_2 = arith.constant 0 : i32
    %c0_i32_3 = arith.constant 0 : i32
    return %c0_i32, %c0_i32_0, %c0_i32_1, %c0_i32_2 : i32, i32, i32, i32
  }
  func.func @transform_6(%arg0: i32) -> (i32, i32, i32, i32) {
    %c0_i32 = arith.constant 0 : i32
    %c0_i32_0 = arith.constant 0 : i32
    %c0_i32_1 = arith.constant 0 : i32
    %c0_i32_2 = arith.constant 0 : i32
    %c0_i32_3 = arith.constant 0 : i32
    return %c0_i32, %c0_i32_0, %c0_i32_1, %c0_i32_2 : i32, i32, i32, i32
  }
  func.func @transform_7(%arg0: i32) -> (i32, i32, i32, i32) {
    %c0_i32 = arith.constant 0 : i32
    %c0_i32_0 = arith.constant 0 : i32
    %c0_i32_1 = arith.constant 0 : i32
    %c0_i32_2 = arith.constant 0 : i32
    %c0_i32_3 = arith.constant 0 : i32
    return %c0_i32, %c0_i32_0, %c0_i32_1, %c0_i32_2 : i32, i32, i32, i32
  }
  func.func @transform_8(%arg0: i32) -> (i32, i32, i32, i32) {
    %c0_i32 = arith.constant 0 : i32
    %c0_i32_0 = arith.constant 0 : i32
    %c0_i32_1 = arith.constant 0 : i32
    %c0_i32_2 = arith.constant 0 : i32
    %c0_i32_3 = arith.constant 0 : i32
    return %c0_i32, %c0_i32_0, %c0_i32_1, %c0_i32_2 : i32, i32, i32, i32
  }
  func.func @transform_9(%arg0: i32) -> (i32, i32, i32, i32) {
    %c0_i32 = arith.constant 0 : i32
    %c0_i32_0 = arith.constant 0 : i32
    %c0_i32_1 = arith.constant 0 : i32
    %c0_i32_2 = arith.constant 0 : i32
    %c0_i32_3 = arith.constant 0 : i32
    return %c0_i32, %c0_i32_0, %c0_i32_1, %c0_i32_2 : i32, i32, i32, i32
  }
  func.func @transform_10(%arg0: i32) -> (i32, i32, i32) {
    %c0_i32 = arith.constant 0 : i32
    %c0_i32_0 = arith.constant 0 : i32
    %c0_i32_1 = arith.constant 0 : i32
    %c0_i32_2 = arith.constant 0 : i32
    return %c0_i32, %c0_i32_0, %c0_i32_1 : i32, i32, i32
  }
  func.func @transform_11(%arg0: i32) -> (i32, i32, i32) {
    %c0_i32 = arith.constant 0 : i32
    %c0_i32_0 = arith.constant 0 : i32
    %c0_i32_1 = arith.constant 0 : i32
    %c0_i32_2 = arith.constant 0 : i32
    return %c0_i32, %c0_i32_0, %c0_i32_1 : i32, i32, i32
  }
  func.func @transform_12(%arg0: i32) -> (i32, i32, i32) {
    %c0_i32 = arith.constant 0 : i32
    %c0_i32_0 = arith.constant 0 : i32
    %c0_i32_1 = arith.constant 0 : i32
    %c0_i32_2 = arith.constant 0 : i32
    return %c0_i32, %c0_i32_0, %c0_i32_1 : i32, i32, i32
  }
  func.func @transform_13(%arg0: i32) -> (i32, i32, i32) {
    %c0_i32 = arith.constant 0 : i32
    %c0_i32_0 = arith.constant 0 : i32
    %c0_i32_1 = arith.constant 0 : i32
    %c0_i32_2 = arith.constant 0 : i32
    return %c0_i32, %c0_i32_0, %c0_i32_1 : i32, i32, i32
  }
  func.func @transform_14(%arg0: i32) -> (i32, i32, i32) {
    %c0_i32 = arith.constant 0 : i32
    %c0_i32_0 = arith.constant 0 : i32
    %c0_i32_1 = arith.constant 0 : i32
    %c0_i32_2 = arith.constant 0 : i32
    return %c0_i32, %c0_i32_0, %c0_i32_1 : i32, i32, i32
  }
  func.func @transform_15(%arg0: i32) -> (i32, i32, i32) {
    %c0_i32 = arith.constant 0 : i32
    %c0_i32_0 = arith.constant 0 : i32
    %c0_i32_1 = arith.constant 0 : i32
    %c0_i32_2 = arith.constant 0 : i32
    return %c0_i32, %c0_i32_0, %c0_i32_1 : i32, i32, i32
  }
  func.func @transform_16(%arg0: i32) -> (i32, i32, i32) {
    %c0_i32 = arith.constant 0 : i32
    %c0_i32_0 = arith.constant 0 : i32
    %c0_i32_1 = arith.constant 0 : i32
    %c0_i32_2 = arith.constant 0 : i32
    return %c0_i32, %c0_i32_0, %c0_i32_1 : i32, i32, i32
  }
  func.func @transform_17(%arg0: i32) -> (i32, i32, i32) {
    %c0_i32 = arith.constant 0 : i32
    %c0_i32_0 = arith.constant 0 : i32
    %c0_i32_1 = arith.constant 0 : i32
    %c0_i32_2 = arith.constant 0 : i32
    return %c0_i32, %c0_i32_0, %c0_i32_1 : i32, i32, i32
  }
  func.func @transform_18(%arg0: i32) -> (i32, i32, i32) {
    %c0_i32 = arith.constant 0 : i32
    %c0_i32_0 = arith.constant 0 : i32
    %c0_i32_1 = arith.constant 0 : i32
    %c0_i32_2 = arith.constant 0 : i32
    return %c0_i32, %c0_i32_0, %c0_i32_1 : i32, i32, i32
  }
  func.func @transform_19(%arg0: i32) -> (i32, i32) {
    %c0_i32 = arith.constant 0 : i32
    %c0_i32_0 = arith.constant 0 : i32
    %c0_i32_1 = arith.constant 0 : i32
    return %c0_i32, %c0_i32_0 : i32, i32
  }
  func.func @transform_20(%arg0: i32) -> (i32, i32) {
    %c0_i32 = arith.constant 0 : i32
    %c0_i32_0 = arith.constant 0 : i32
    %c0_i32_1 = arith.constant 0 : i32
    return %c0_i32, %c0_i32_0 : i32, i32
  }
  func.func @transform_21(%arg0: i32) -> (i32, i32, i32) {
    %c0_i32 = arith.constant 0 : i32
    %c0_i32_0 = arith.constant 0 : i32
    %c0_i32_1 = arith.constant 0 : i32
    %c0_i32_2 = arith.constant 0 : i32
    return %c0_i32, %c0_i32_0, %c0_i32_1 : i32, i32, i32
  }
  func.func @transform_22(%arg0: i32) -> (i32, i32, i32) {
    %c0_i32 = arith.constant 0 : i32
    %c0_i32_0 = arith.constant 0 : i32
    %c0_i32_1 = arith.constant 0 : i32
    %c0_i32_2 = arith.constant 0 : i32
    return %c0_i32, %c0_i32_0, %c0_i32_1 : i32, i32, i32
  }
  func.func @transform_23(%arg0: i32) -> (i32, i32, i32) {
    %c0_i32 = arith.constant 0 : i32
    %c0_i32_0 = arith.constant 0 : i32
    %c0_i32_1 = arith.constant 0 : i32
    %c0_i32_2 = arith.constant 0 : i32
    return %c0_i32, %c0_i32_0, %c0_i32_1 : i32, i32, i32
  }
  func.func @transform_24(%arg0: i32) -> (i32, i32, i32) {
    %c0_i32 = arith.constant 0 : i32
    %c0_i32_0 = arith.constant 0 : i32
    %c0_i32_1 = arith.constant 0 : i32
    %c0_i32_2 = arith.constant 0 : i32
    return %c0_i32, %c0_i32_0, %c0_i32_1 : i32, i32, i32
  }
  func.func @transform_25(%arg0: i32) -> (i32, i32, i32) {
    %c0_i32 = arith.constant 0 : i32
    %c0_i32_0 = arith.constant 0 : i32
    %c0_i32_1 = arith.constant 0 : i32
    return %arg0, %c0_i32, %c0_i32_0 : i32, i32, i32
  }
  func.func @transform_26(%arg0: i32) -> (i32, i32, i32) {
    %c0_i32 = arith.constant 0 : i32
    %c0_i32_0 = arith.constant 0 : i32
    %c0_i32_1 = arith.constant 0 : i32
    return %arg0, %c0_i32, %c0_i32_0 : i32, i32, i32
  }
}

</mosaic_0001>

<bundles_post_ra>
// kernel: ne.21
= control target key start
LH: loop header
LB: loop body
LE: loop exit
PB: predicated region body
PF: predicated region fallthrough
CT: control target
= control target key end

     0   :  { %v15_v2 = vmov 0   ;;  %s40_s0 = inlined_call_operand.vmem [shape: f32[2,32], index: 0, kind: input, shape index: {}, may-alias: {0,1}]   ;;  %s41_s1 = inlined_call_operand.vmem [shape: f32[2,32], index: 1, kind: input, shape index: {}, may-alias: {0,1}]   ;;  %s42_s2 = inlined_call_operand.vmem [shape: pred[2,32], index: 2, kind: output, shape index: {}]  }
   0x1   :  { %v3_v0 = vld [vmem:[%s40_s0] sm:$0x3] }
   0x2   :  { %v4_v1 = vld [vmem:[%s41_s1] sm:$0x3] }
   0x3   :  { %vm7_vm0 = vcmp.ne.f32.partialorder %v3_v0, %v4_v1 }
   0x4   :  { %v8_v3 = vsel %vm7_vm0, 1, %v15_v2 }
   0x5   :  { %v10_v4 = vpack.c.b16 %v15_v2, %v8_v3 }
   0x7   :  { %v11_v5 = vpack.c.b8 %v15_v2, %v10_v4 }
   0x9   :  { %13 = vst [vmem:[%s42_s2] sm:$0x1] %v11_v5 }

// kernel: custom-call.10
= control target key start
LH: loop header
LB: loop body
LE: loop exit
PB: predicated region body
PF: predicated region fallthrough
CT: control target
= control target key end

     0   :  { %s6_s0 = inlined_call_operand.vmem [shape: u32[2,32], index: 0, kind: output, shape index: {}]  }

// kernel: squeeze.24
= control target key start
LH: loop header
LB: loop body
LE: loop exit
PB: predicated region body
PF: predicated region fallthrough
CT: control target
= control target key end

     0   :  { %vm7_vm0 = vcmask 261120   ;;  %s39_s0 = inlined_call_operand.vmem [shape: f32[64], index: 0, kind: input, shape index: {}]   ;;  %s40_s1 = inlined_call_operand.vmem [shape: f32[2,32], index: 1, kind: output, shape index: {}]  }
   0x1   :  { %v4_v0 = vld [vmem:[%s39_s0] sm:$0x1]  ;;  %s22_s0 = smov 96  }
   0x2   :  { %5 = vst [vmem:[#allocation1] sm:$0x1] %v4_v0 }
   0x9   :  { %v9_v1 = vld [vmem:[#allocation1] sm:$0x1]  }
   0xa   :  { %v6_v2 = vld [vmem:[#allocation1] sm:$0x1]   ;;  %10 = vrot.lane.b32.xlu0 %v9_v1, %s22_s0 }
   0xb   :  { %8 = vst.msk [vmem:[#allocation0] sm:$0x1] %vm7_vm0, %v6_v2  }
  0x7c   :  { %v11_v3 = vpop.permute.xlu0 %10  }
  0x7d   :  { %14 = vst.msk [vmem:[#allocation0 + $0x1] sm:$0x1] %vm7_vm0, %v11_v3  }
  0x84   :  { %v18_v4 = vld [vmem:[#allocation0] sm:$0x3] }
  0x85   :  { %20 = vst [vmem:[%s40_s1] sm:$0x3] %v18_v4 }

// kernel: fastspeech2_forward.4
= control target key start
LH: loop header
LB: loop body
LE: loop exit
PB: predicated region body
PF: predicated region fallthrough
CT: control target
= control target key end

     0   :  { %s2298_s21 = smov 0   ;;  %s2791_s0 = inlined_call_operand.vmem [shape: f32[2,32,32], index: 0, kind: input, shape index: {}]   ;;  %s2792_s1 = inlined_call_operand.vmem [shape: f32[2,32,1], index: 1, kind: input, shape index: {}]   ;;  %s2793_s2 = inlined_call_operand.vmem [shape: f32[2,96,32], index: 2, kind: input, shape index: {}]   ;;  %s2794_s3 = inlined_call_operand.vmem [shape: f32[2,1,32], index: 3, kind: input, shape index: {}]   ;;  %s2795_s4 = inlined_call_operand.vmem [shape: f32[2,1,32], index: 4, kind: input, shape index: {}]   ;;  %s2796_s5 = inlined_call_operand.vmem [shape: f32[2,1,32], index: 5, kind: input, shape index: {}]   ;;  %s2797_s6 = inlined_call_operand.vmem [shape: f32[2,96,32], index: 6, kind: input, shape index: {}]   ;;  %s2798_s7 = inlined_call_operand.vmem [shape: f32[2,1,32], index: 7, kind: input, shape index: {}]   ;;  %s2799_s8 = inlined_call_operand.vmem [shape: f32[2,1,32], index: 8, kind: input, shape index: {}]   ;;  %s2800_s9 = inlined_call_operand.vmem [shape: f32[2,1,32], index: 9, kind: input, shape index: {}]   ;;  %s2801_s10 = inlined_call_operand.vmem [shape: f32[2,32,1], index: 10, kind: input, shape index: {}]   ;;  %s2802_s11 = inlined_call_operand.vmem [shape: f32[2,1,1], index: 11, kind: input, shape index: {}]   ;;  %s2803_s12 = inlined_call_operand.vmem [shape: f32[2,32,2], index: 12, kind: output, shape index: {}]  }
   0x1 LB: > { %s1750_s22 = sadd.s32 4294967295, %s2228_s21   ;;  %p1754_p0 = scmp.ge.s32.totalorder %s2228_s21, 1  ;;  %s2228_s21 = sphi %s2298_s21, %s22_s21  }
   0x2   : > { %p372_p1 = scmp.lt.s32.totalorder %s2228_s21, 3 }
   0x4   : > { %p373_p2 = pnand %p1754_p0, %p372_p1 }
   0x5   : > { %p419_p3 = scmp.lt.s32.totalorder (!%p373_p2), %s1750_s22, 1  ;;  %v442_v0 = vld [vmem:[%s2793_s2] sm:$0xff] (!%p373_p2)  ;;  %v443_v1 = vld [vmem:[%s2793_s2 + $0x8] sm:$0xff] (!%p373_p2)  ;;  %v444_v2 = vld [vmem:[%s2793_s2 + $0x10] sm:$0xff] (!%p373_p2)  ;;  %vm481_vm0 = vcmask (!%p373_p2), 1040384   ;;  %vm520_vm1 = vcmask (!%p373_p2), 1045504  }
   0x6   : > { %376 = sbr.rel (%p373_p2) target bundleno = 2369 (0x941), region = 68  ;;  %v445_v3 = vld [vmem:[%s2793_s2 + $0x18] sm:$0xff] (!%p373_p2)  ;;  %v2067_v4 = vpack.c.bf16 (!%p373_p2), %v443_v1, %v442_v0  ;;  %v446_v6 = vld [vmem:[%s2793_s2 + $0x20] sm:$0xff] (!%p373_p2)  ;;  %v447_v7 = vld [vmem:[%s2793_s2 + $0x28] sm:$0xff] (!%p373_p2)  ;;  %vm498_vm2 = vcmask (!%p373_p2), 1046528   ;;  %s2230_s30 = smov (!%p373_p2), 64  }
   0x7   : > { %v2071_v5 = vpack.c.bf16 (!%p373_p2), %v445_v3, %v444_v2  ;;  %v448_v8 = vld [vmem:[%s2793_s2 + $0x30] sm:$0xff] (!%p373_p2)  ;;  %v449_v9 = vld [vmem:[%s2793_s2 + $0x38] sm:$0xff] (!%p373_p2)  ;;  %v2075_v13 = vpack.c.bf16 (!%p373_p2), %v447_v7, %v446_v6  ;;  %v450_v33 = vld [vmem:[%s2793_s2 + $0x40] sm:$0xff] (!%p373_p2)  ;;  %s2231_s13 = smov (!%p373_p2), 32   ;;  %vm542_vm3 = vcmask (!%p373_p2), 261120   ;;  %vm547_vm4 = vcmask (!%p373_p2), 523264  }
   0x8   : > { %2068 = vmatprep.subr.bf16.mxu0 (!%p373_p2), %v2067_v4  ;;  %v2079_v22 = vpack.c.bf16 (!%p373_p2), %v449_v9, %v448_v8  ;;  %v451_v34 = vld [vmem:[%s2793_s2 + $0x48] sm:$0xff] (!%p373_p2)  ;;  %v452_v40 = vld [vmem:[%s2793_s2 + $0x50] sm:$0xff] (!%p373_p2)  ;;  %v453_v41 = vld [vmem:[%s2793_s2 + $0x58] sm:$0xff] (!%p373_p2)  ;;  %vm558_vm5 = vcmask (!%p373_p2), 785408   ;;  %vm1673_vm6 = vcmask (!%p373_p2), 7168   ;;  %vm1678_vm7 = vcmask (!%p373_p2), 15360  }
   0x9   : > { %2070 = vmatpush3.bf16.msra.mxu0 (!%p373_p2), %v2067_v4  ;;  %v2083_v39 = vpack.c.bf16 (!%p373_p2), %v451_v34, %v450_v33  ;;  %v2087_v46 = vpack.c.bf16 (!%p373_p2), %v453_v41, %v452_v40  ;;  %v1761_v1 = vld [vmem:[%s2794_s3] ss:$0 sm:$0xff] (!%p373_p2)  ;;  %v459_v40 = vld [vmem:[%s2797_s6 + $0x10] sm:$0xff] (!%p373_p2) }
   0xa   : > { %2072 = vmatprep.subr.bf16.mxu0 (!%p373_p2), %v2071_v5 }
   0xd   : > { %s2805_s22 = smov (!%p419_p3, %s1750_s22), 1  ;;  %2074 = vmatpush3.bf16.msra.mxu0 %v2071_v5 }
   0xe   : > { %s2324_s17 = sshll.u32 %s2805_s22, 5  ;;  %2076 = vmatprep.subr.bf16.mxu0 %v2075_v13 }
   0xf   : > { %s423_s20 = scalar_lea.vmem %s2791_s0, %s2324_s17  ;;  %s428_s19 = scalar_lea.vmem %s2792_s1, %s2324_s17 }
  0x10   : > { %v434_v10 = vld [vmem:[%s423_s20] sm:$0xff]  ;;  %v435_v11 = vld [vmem:[%s423_s20 + $0x8] sm:$0xff]  ;;  %v436_v12 = vld [vmem:[%s423_s20 + $0x10] sm:$0xff]  ;;  %s433_s22 = scalar_lea.vmem %s2803_s12, %s2324_s17 }
  0x11   : > { %v482_v14 = vrot.slane %v434_v10, 7  ;;  %v483_v15 = vrot.slane %v435_v11, 7  ;;  %v485_v16 = vrot.slane %v436_v12, 7  ;;  %v437_v17 = vld [vmem:[%s423_s20 + $0x18] sm:$0xff]  ;;  %2078 = vmatpush3.bf16.msra.mxu0 %v2075_v13  ;;  %s2232_s20 = smov 1  }
  0x12   : > { %v487_v18 = vrot.slane %v437_v17, 7  ;;  %2080 = vmatprep.subr.bf16.mxu0 %v2079_v22 }
  0x13   : > { %v484_v19 = vsel %vm481_vm0, %v482_v14, %v483_v15  ;;  %v494_v20 = vsel %vm481_vm0, 0.0, %v482_v14  ;;  %v2339_v21 = vsel %vm481_vm0, %v483_v15, %v485_v16 }
  0x14   : > { %v521_v23 = vrot.slane %v494_v20, 2  ;;  %v522_v24 = vrot.slane %v484_v19, 2  ;;  %v499_v25 = vrot.slane %v494_v20, 1  ;;  %v500_v26 = vrot.slane %v484_v19, 1 }
  0x15   : > { %v524_v27 = vrot.slane %v2339_v21, 2  ;;  %v502_v28 = vrot.slane %v2339_v21, 1  ;;  %v488_v29 = vsel %vm481_vm0, %v485_v16, %v487_v18  ;;  %v495_v30 = vsel %vm481_vm0, %v487_v18, 0.0  ;;  %2082 = vmatpush3.bf16.msra.mxu0 %v2079_v22 }
  0x16   : > { %v523_v31 = vsel %vm520_vm1, %v521_v23, %v522_v24  ;;  %v501_v32 = vsel %vm498_vm2, %v499_v25, %v500_v26  ;;  %v504_v37 = vrot.slane %v488_v29, 1  ;;  %v506_v38 = vrot.slane %v495_v30, 1  ;;  %2084 = vmatprep.subr.bf16.mxu0 %v2083_v39 }
  0x17   : > { %530 = vrot.lane.b32.xlu1 %v523_v31, %s2230_s30  ;;  %508 = vrot.lane.b32.xlu0 %v501_v32, %s2231_s13  ;;  %v525_v35 = vsel %vm520_vm1, %v522_v24, %v524_v27  ;;  %v503_v36 = vsel %vm498_vm2, %v500_v26, %v502_v28  ;;  %v526_v44 = vrot.slane %v488_v29, 2  ;;  %v528_v45 = vrot.slane %v495_v30, 2 }
  0x18   : > { %v507_v42 = vsel %vm498_vm2, %v504_v37, %v506_v38  ;;  %v505_v43 = vsel %vm498_vm2, %v502_v28, %v504_v37  ;;  %v457_v38 = vld [vmem:[%s2797_s6] sm:$0xff] }
  0x19   : > { %v529_v47 = vsel %vm520_vm1, %v526_v44, %v528_v45  ;;  %v527_v48 = vsel %vm520_vm1, %v524_v27, %v526_v44  ;;  %2086 = vmatpush3.bf16.msra.mxu0 %v2083_v39  ;;  %v458_v39 = vld [vmem:[%s2797_s6 + $0x8] sm:$0xff]  ;;  %v461_v44 = vld [vmem:[%s2797_s6 + $0x20] sm:$0xff] }
  0x1a   : > { %2088 = vmatprep.subr.bf16.mxu0 %v2087_v46  ;;  %v2091_v41 = vpack.c.bf16 %v458_v39, %v457_v38  ;;  %v462_v45 = vld [vmem:[%s2797_s6 + $0x28] sm:$0xff] }
  0x1b   : > { %532 = vrot.lane.b32.xlu1 %v525_v35, %s2230_s30  ;;  %510 = vrot.lane.b32.xlu0 %v503_v36, %s2231_s13 }
  0x1c   : > { %2092 = vmatprep.subr.bf16.mxu1 %v2091_v41 }
  0x1d   : > { %2090 = vmatpush3.bf16.msra.mxu0 %v2087_v46  ;;  %2094 = vmatpush3.bf16.msra.mxu1 %v2091_v41  ;;  %v2099_v46 = vpack.c.bf16 %v462_v45, %v461_v44 }
  0x1f   : > { %514 = vrot.lane.b32.xlu1 %v507_v42, %s2231_s13  ;;  %512 = vrot.lane.b32.xlu0 %v505_v43, %s2231_s13  ;;  %v460_v42 = vld [vmem:[%s2797_s6 + $0x18] sm:$0xff] }
  0x20   : > { %v2095_v43 = vpack.c.bf16 %v460_v42, %v459_v40 }
  0x22   : > { %2096 = vmatprep.subr.bf16.mxu1 %v2095_v43 }
  0x23   : > { %536 = vrot.lane.b32.xlu1 %v529_v47, %s2230_s30  ;;  %534 = vrot.lane.b32.xlu0 %v527_v48, %s2230_s30  ;;  %v463_v47 = vld [vmem:[%s2797_s6 + $0x30] sm:$0xff]  ;;  %v464_v48 = vld [vmem:[%s2797_s6 + $0x38] sm:$0xff] }
  0x24   : > { %2098 = vmatpush3.bf16.msra.mxu1 %v2095_v43 }
  0x25   : > { %2100 = vmatprep.subr.bf16.mxu1 %v2099_v46 }
  0x28   : > { %2102 = vmatpush3.bf16.msra.mxu1 %v2099_v46 }
  0x89   : > { %v531_v49 = vpop.permute.xlu1 %530  ;;  %v509_v50 = vpop.permute.xlu0 %508 }
  0x8a   : > { %v543_v51 = vsel %vm542_vm3, %v494_v20, %v509_v50 }
  0x8b   : > { %v2375_v52 = vsel %vm547_vm4, %v543_v51, %v531_v49  ;;  %v2103_v49 = vpack.c.bf16 %v464_v48, %v463_v47 }
  0x8c   : > { %1943 = vmatprep.mubr.msk.f32.mxu0 %vm558_vm5, %v2375_v52 }
  0x8d   : > { %v533_v53 = vpop.permute.xlu1 %532  ;;  %v511_v54 = vpop.permute.xlu0 %510  ;;  %2104 = vmatprep.subr.bf16.mxu1 %v2103_v49 }
  0x8e   : > { %v544_v55 = vsel %vm542_vm3, %v484_v19, %v511_v54  ;;  %2106 = vmatpush3.bf16.msra.mxu1 %v2103_v49 }
  0x8f   : > { %v2381_v56 = vsel %vm547_vm4, %v544_v55, %v533_v53 }
  0x90   : > { %1944 = vmatmul.mubr.msk.f32.vlgmr.msra.gmra.mrb[0].mxu0 %vm558_vm5, %v2381_v56 }
  0x91   : > { %v515_v57 = vpop.permute.xlu1 %514  ;;  %v513_v58 = vpop.permute.xlu0 %512 }
  0x92   : > { %v546_v59 = vsel %vm542_vm3, %v488_v29, %v515_v57  ;;  %v545_v60 = vsel %vm542_vm3, %v2339_v21, %v513_v58 }
  0x95   : > { %v537_v61 = vpop.permute.xlu1 %536  ;;  %v535_v62 = vpop.permute.xlu0 %534 }
  0x96   : > { %v2389_v63 = vsel %vm547_vm4, %v546_v59, %v537_v61  ;;  %v2392_v0 = vsel %vm547_vm4, %v545_v60, %v535_v62 }
  0x97   : > { %1946 = vmatprep.mubr.msk.f32.mxu0 %vm558_vm5, %v2392_v0 }
  0x98   : > { %1947 = vmatmul.mubr.msk.f32.gmra.mrb[2].mxu0 %vm558_vm5, %v2389_v63 }
 0x163   : > { %v1945_v2 = vpop.f32.mrb[0].mxu0 }
 0x164   : > { %v643_v3 = vadd.f32 %v1945_v2, %v1761_v1  ;;  %v637_v4 = vpop.f32.mrb[1].mxu0  ;;  %v466_v2 = vld [vmem:[%s2797_s6 + $0x48] sm:$0xff] }
 0x165   : > { %v638_v5 = vadd.f32 %v1761_v1, %v637_v4  ;;  %v1766_v4 = vld [vmem:[%s2795_s4] ss:$0 sm:$0xff] }
 0x166   : > { %v657_v6 = vmax.f32 %v643_v3, 0.0 }
 0x167   : > { %v656_v7 = vmax.f32 %v638_v5, 0.0 }
 0x168   : > { %v663_v8 = vsel %vm542_vm3, %v657_v6, 0.0 }
 0x169   : > { %664 = vadd.xlane.f32.xlu1 %v663_v8  ;;  %v660_v9 = vsel %vm542_vm3, %v656_v7, 0.0 }
 0x16a   : > { %661 = vadd.xlane.f32.xlu0 %v660_v9 }
 0x16b   : > { %v1948_v10 = vpop.f32.mrb[2].mxu0 }
 0x16c   : > { %v647_v11 = vpop.f32.mrb[3].mxu0  ;;  %v653_v12 = vadd.f32 %v1948_v10, %v1761_v1  ;;  %v1767_v10 = vld [vmem:[%s2796_s5] ss:$0 sm:$0xff] }
 0x16d   : > { %v648_v13 = vadd.f32 %v1761_v1, %v647_v11  ;;  %v465_v1 = vld [vmem:[%s2797_s6 + $0x40] sm:$0xff] }
 0x16e   : > { %v659_v15 = vmax.f32 %v653_v12, 0.0  ;;  %v2107_v5 = vpack.c.bf16 %v466_v2, %v465_v1  ;;  %v467_v12 = vld [vmem:[%s2797_s6 + $0x50] sm:$0xff]  ;;  %v1783_v1 = vld [vmem:[%s2793_s2 + $0x78] sm:$0xff] }
 0x16f   : > { %v658_v14 = vmax.f32 %v648_v13, 0.0  ;;  %v468_v13 = vld [vmem:[%s2797_s6 + $0x58] sm:$0xff] }
 0x170   : > { %v669_v17 = vsel %vm542_vm3, %v659_v15, 0.0  ;;  %2108 = vmatprep.subr.bf16.mxu1 %v2107_v5 }
 0x171   : > { %v666_v16 = vsel %vm542_vm3, %v658_v14, 0.0  ;;  %2110 = vmatpush3.bf16.msra.mxu1 %v2107_v5 }
 0x172   : > { %667 = vadd.xlane.f32.xlu0 %v666_v16 }
 0x176   : > { %670 = vadd.xlane.f32.xlu0 %v669_v17 }
 0x1f6   : > { %v665_v18 = vpop.xlane.xlu1 %664 }
 0x1f7   : > { %v674_v19 = vmul.f32 0.03125, %v665_v18  ;;  %v662_v20 = vpop.xlane.xlu0 %661 }
 0x1f8   : > { %v673_v21 = vmul.f32 0.03125, %v662_v20  ;;  %v1781_v20 = vld [vmem:[%s2793_s2 + $0x68] sm:$0xff] }
 0x1f9   : > { %v678_v22 = vsub.f32 %v657_v6, %v674_v19  ;;  %v1780_v19 = vld [vmem:[%s2793_s2 + $0x60] sm:$0xff] }
 0x1fa   : > { %v677_v23 = vsub.f32 %v656_v7, %v673_v21 }
 0x1fb   : > { %v682_v24 = vmul.f32 %v678_v22, %v678_v22 }
 0x1fc   : > { %v681_v25 = vmul.f32 %v677_v23, %v677_v23 }
 0x1fd   : > { %v688_v26 = vsel %vm542_vm3, %v682_v24, 0.0 }
 0x1fe   : > { %689 = vadd.xlane.f32.xlu0 %v688_v26  ;;  %v685_v27 = vsel %vm542_vm3, %v681_v25, 0.0 }
 0x1ff   : > { %686 = vadd.xlane.f32.xlu1 %v685_v27  ;;  %v668_v28 = vpop.xlane.xlu0 %667 }
 0x200   : > { %v675_v29 = vmul.f32 0.03125, %v668_v28 }
 0x202   : > { %v2407_v30 = vsub.f32 %v658_v14, %v675_v29 }
 0x203   : > { %v671_v31 = vpop.xlane.xlu0 %670 }
 0x204   : > { %v676_v32 = vmul.f32 0.03125, %v671_v31  ;;  %v683_v33 = vmul.f32 %v2407_v30, %v2407_v30 }
 0x206   : > { %v2411_v34 = vsub.f32 %v659_v15, %v676_v32  ;;  %v691_v35 = vsel %vm542_vm3, %v683_v33, 0.0  ;;  %v2111_v15 = vpack.c.bf16 %v468_v13, %v467_v12  ;;  %v1786_v12 = vld [vmem:[%s2793_s2 + $0x90] sm:$0xff]  ;;  %v1787_v13 = vld [vmem:[%s2793_s2 + $0x98] sm:$0xff] }
 0x207   : > { %692 = vadd.xlane.f32.xlu1 %v691_v35 }
 0x208   : > { %v684_v36 = vmul.f32 %v2411_v34, %v2411_v34  ;;  %2112 = vmatprep.subr.bf16.mxu1 %v2111_v15 }
 0x209   : > { %2114 = vmatpush3.bf16.msra.mxu1 %v2111_v15 }
 0x20a   : > { %v694_v37 = vsel %vm542_vm3, %v684_v36, 0.0 }
 0x20b   : > { %695 = vadd.xlane.f32.xlu0 %v694_v37 }
 0x28b   : > { %v690_v50 = vpop.xlane.xlu0 %689 }
 0x28c   : > { %v698_v51 = vmul.f32 0.03125, %v690_v50  ;;  %v687_v53 = vpop.xlane.xlu1 %686 }
 0x28d   : > { %v697_v54 = vmul.f32 0.03125, %v687_v53 }
 0x28e   : > { %v702_v55 = vadd.f32 1e-05, %v698_v51 }
 0x28f   : > { %v701_v57 = vadd.f32 1e-05, %v697_v54 }
 0x290   : > { %2190 = vrsqrt.f32 %v702_v55 }
 0x291   : > { %2192 = vrsqrt.f32 %v701_v57 }
 0x294   : > { %v693_v58 = vpop.xlane.xlu1 %692 }
 0x295   : > { %v699_v59 = vmul.f32 0.03125, %v693_v58 }
 0x297   : > { %v703_v60 = vadd.f32 1e-05, %v699_v59 }
 0x298   : > { %v696_v61 = vpop.xlane.xlu0 %695 }
 0x299   : > { %2194 = vrsqrt.f32 %v703_v60  ;;  %v700_v62 = vmul.f32 0.03125, %v696_v61 }
 0x29a   : > { %v2191_v3 = vpop.eup %2190 }
 0x29b   : > { %v2193_v6 = vpop.eup %2192  ;;  %v710_v7 = vmul.f32 %v2191_v3, %v678_v22  ;;  %v704_v8 = vadd.f32 1e-05, %v700_v62  ;;  %v2123_v22 = vpack.c.bf16 %v1781_v20, %v1780_v19  ;;  %v1782_v62 = vld [vmem:[%s2793_s2 + $0x70] sm:$0xff]  ;;  %v2135_v20 = vpack.c.bf16 %v1787_v13, %v1786_v12 }
 0x29c   : > { %v709_v9 = vmul.f32 %v2193_v6, %v677_v23  ;;  %v2127_v5 = vpack.c.bf16 %v1783_v1, %v1782_v62 }
 0x29d   : > { %v720_v11 = vmul.f32 %v1766_v4, %v710_v7  ;;  %2196 = vrsqrt.f32 %v704_v8  ;;  %2124 = vmatprep.subr.bf16.mxu1 %v2123_v22  ;;  %v1784_v7 = vld [vmem:[%s2793_s2 + $0x80] sm:$0xff]  ;;  %v1785_v8 = vld [vmem:[%s2793_s2 + $0x88] sm:$0xff] }
 0x29e   : > { %v719_v14 = vmul.f32 %v1766_v4, %v709_v9 }
 0x29f   : > { %v730_v16 = vadd.f32 %v1767_v10, %v720_v11  ;;  %v2131_v11 = vpack.c.bf16 %v1785_v8, %v1784_v7 }
 0x2a0   : > { %v729_v17 = vadd.f32 %v1767_v10, %v719_v14 }
 0x2a1   : > { %v738_v18 = vrot.slane %v730_v16, 7 }
 0x2a2   : > { %v737_v21 = vrot.slane %v729_v17, 7 }
 0x2a3   : > { %v2195_v23 = vpop.eup %2194 }
 0x2a4   : > { %v711_v24 = vmul.f32 %v2195_v23, %v2407_v30  ;;  %v739_v25 = vsel %vm481_vm0, %v737_v21, %v738_v18  ;;  %v749_v26 = vsel %vm481_vm0, 0.0, %v737_v21  ;;  %v1788_v21 = vld [vmem:[%s2793_s2 + $0xa0] sm:$0xff] }
 0x2a5   : > { %v753_v27 = vrot.slane %v749_v26, 1  ;;  %v754_v28 = vrot.slane %v739_v25, 1  ;;  %v774_v33 = vrot.slane %v749_v26, 2  ;;  %v775_v35 = vrot.slane %v739_v25, 2 }
 0x2a6   : > { %v721_v29 = vmul.f32 %v1766_v4, %v711_v24  ;;  %v1790_v24 = vld [vmem:[%s2793_s2 + $0xb0] sm:$0xff] }
 0x2a7   : > { %v2197_v31 = vpop.eup %2196  ;;  %v755_v32 = vsel %vm498_vm2, %v753_v27, %v754_v28  ;;  %v776_v39 = vsel %vm520_vm1, %v774_v33, %v775_v35 }
 0x2a8   : > { %v712_v36 = vmul.f32 %v2197_v31, %v2411_v34  ;;  %762 = vrot.lane.b32.xlu1 %v755_v32, %s2231_s13  ;;  %v731_v37 = vadd.f32 %v1767_v10, %v721_v29  ;;  %v1768_v31 = vld [vmem:[%s2798_s7] ss:$0 sm:$0xff]  ;;  %v1815_v32 = vld [vmem:[%s2794_s3 + $0x1] ss:$0 sm:$0xff] }
 0x2aa   : > { %v740_v38 = vrot.slane %v731_v37, 7  ;;  %v722_v30 = vmul.f32 %v1766_v4, %v712_v36 }
 0x2ac   : > { %783 = vrot.lane.b32.xlu1 %v776_v39, %s2230_s30  ;;  %v741_v40 = vsel %vm481_vm0, %v738_v18, %v740_v38  ;;  %v732_v41 = vadd.f32 %v1767_v10, %v722_v30 }
 0x2ad   : > { %v756_v42 = vrot.slane %v741_v40, 1  ;;  %v777_v43 = vrot.slane %v741_v40, 2 }
 0x2ae   : > { %v742_v44 = vrot.slane %v732_v41, 7 }
 0x2af   : > { %v757_v45 = vsel %vm498_vm2, %v754_v28, %v756_v42  ;;  %v778_v46 = vsel %vm520_vm1, %v775_v35, %v777_v43 }
 0x2b0   : > { %764 = vrot.lane.b32.xlu0 %v757_v45, %s2231_s13  ;;  %785 = vrot.lane.b32.xlu1 %v778_v46, %s2230_s30  ;;  %v743_v34 = vsel %vm481_vm0, %v740_v38, %v742_v44  ;;  %v750_v47 = vsel %vm481_vm0, %v742_v44, 0.0 }
 0x2b1   : > { %v758_v48 = vrot.slane %v743_v34, 1  ;;  %v760_v49 = vrot.slane %v750_v47, 1  ;;  %v779_v53 = vrot.slane %v743_v34, 2  ;;  %v781_v54 = vrot.slane %v750_v47, 2 }
 0x2b3   : > { %v761_v50 = vsel %vm498_vm2, %v758_v48, %v760_v49  ;;  %v759_v51 = vsel %vm498_vm2, %v756_v42, %v758_v48  ;;  %v782_v55 = vsel %vm520_vm1, %v779_v53, %v781_v54  ;;  %v780_v57 = vsel %vm520_vm1, %v777_v43, %v779_v53 }
 0x2b4   : > { %768 = vrot.lane.b32.xlu1 %v761_v50, %s2231_s13  ;;  %766 = vrot.lane.b32.xlu0 %v759_v51, %s2231_s13 }
 0x2b8   : > { %789 = vrot.lane.b32.xlu1 %v782_v55, %s2230_s30  ;;  %787 = vrot.lane.b32.xlu0 %v780_v57, %s2230_s30 }
 0x31a   : > { %v763_v58 = vpop.permute.xlu1 %762 }
 0x31b   : > { %v795_v59 = vsel %vm542_vm3, %v749_v26, %v763_v58 }
 0x31e   : > { %v784_v60 = vpop.permute.xlu1 %783 }
 0x31f   : > { %v799_v61 = vsel %vm547_vm4, %v795_v59, %v784_v60 }
 0x320   : > { %1973 = vmatprep.mubr.msk.f32.mxu1 %vm558_vm5, %v799_v61 }
 0x322   : > { %v786_v2 = vpop.permute.xlu1 %785  ;;  %v765_v3 = vpop.permute.xlu0 %764 }
 0x323   : > { %v796_v4 = vsel %vm542_vm3, %v739_v25, %v765_v3  ;;  %v1791_v25 = vld [vmem:[%s2793_s2 + $0xb8] sm:$0xff] }
 0x324   : > { %v800_v6 = vsel %vm547_vm4, %v796_v4, %v786_v2  ;;  %v2143_v26 = vpack.c.bf16 %v1791_v25, %v1790_v24 }
 0x325   : > { %1974 = vmatmul.mubr.msk.f32.vlgmr.msra.gmra.mrb[0].mxu1 %vm558_vm5, %v800_v6 }
 0x326   : > { %2126 = vmatpush3.bf16.msra.mxu1 %v2123_v22  ;;  %v769_v9 = vpop.permute.xlu1 %768  ;;  %v767_v10 = vpop.permute.xlu0 %766  ;;  %v1789_v22 = vld [vmem:[%s2793_s2 + $0xa8] sm:$0xff] }
 0x327   : > { %2128 = vmatprep.subr.bf16.mxu1 %v2127_v5  ;;  %v798_v14 = vsel %vm542_vm3, %v743_v34, %v769_v9  ;;  %v797_v15 = vsel %vm542_vm3, %v741_v40, %v767_v10  ;;  %v2139_v23 = vpack.c.bf16 %v1789_v22, %v1788_v21 }
 0x32a   : > { %2130 = vmatpush3.bf16.msra.mxu1 %v2127_v5  ;;  %v790_v16 = vpop.permute.xlu1 %789  ;;  %v788_v17 = vpop.permute.xlu0 %787 }
 0x32b   : > { %v802_v18 = vsel %vm547_vm4, %v798_v14, %v790_v16  ;;  %v801_v19 = vsel %vm547_vm4, %v797_v15, %v788_v17  ;;  %2132 = vmatprep.subr.bf16.mxu1 %v2131_v11 }
 0x32c   : > { %1976 = vmatprep.mubr.msk.f32.mxu1 %vm558_vm5, %v801_v19 }
 0x32d   : > { %1977 = vmatmul.mubr.msk.f32.gmra.mrb[2].mxu1 %vm558_vm5, %v802_v18 }
 0x32e   : > { %2134 = vmatpush3.bf16.msra.mxu1 %v2131_v11  ;;  %2017 = vmatprep.mubr.msk.f32.mxu1 %vm558_vm5, %v2375_v52 }
 0x32f   : > { %2136 = vmatprep.subr.bf16.mxu1 %v2135_v20 }
 0x332   : > { %2138 = vmatpush3.bf16.msra.mxu1 %v2135_v20 }
 0x333   : > { %2140 = vmatprep.subr.bf16.mxu1 %v2139_v23 }
 0x336   : > { %2142 = vmatpush3.bf16.msra.mxu1 %v2139_v23 }
 0x337   : > { %2144 = vmatprep.subr.bf16.mxu1 %v2143_v26 }
 0x33a   : > { %2146 = vmatpush3.bf16.msra.mxu1 %v2143_v26 }
 0x33d   : > { %2018 = vmatmul.mubr.msk.f32.vlgmr.msra.gmra.mrb[4].mxu1 %vm558_vm5, %v2381_v56 }
 0x33e   : > { %2020 = vmatprep.mubr.msk.f32.mxu1 %vm558_vm5, %v2392_v0 }
 0x341   : > { %2021 = vmatmul.mubr.msk.f32.gmra.mrb[6].mxu1 %vm558_vm5, %v2389_v63 }
 0x3f8   : > { %v1975_v52 = vpop.f32.mrb[0].mxu1 }
 0x3f9   : > { %v887_v27 = vpop.f32.mrb[1].mxu1  ;;  %v893_v47 = vadd.f32 %v1975_v52, %v1768_v31 }
 0x3fa   : > { %v888_v56 = vadd.f32 %v1768_v31, %v887_v27 }
 0x3fb   : > { %v907_v51 = vmax.f32 %v893_v47, 0.0 }
 0x3fc   : > { %v906_v30 = vmax.f32 %v888_v56, 0.0 }
 0x3fd   : > { %v913_v57 = vsel %vm542_vm3, %v907_v51, 0.0 }
 0x3fe   : > { %v910_v34 = vsel %vm542_vm3, %v906_v30, 0.0 }
 0x400   : > { %v1978_v28 = vpop.f32.mrb[2].mxu1 }
 0x401   : > { %v897_v29 = vpop.f32.mrb[3].mxu1  ;;  %v903_v53 = vadd.f32 %v1978_v28, %v1768_v31 }
 0x402   : > { %v898_v39 = vadd.f32 %v1768_v31, %v897_v29 }
 0x403   : > { %v909_v55 = vmax.f32 %v903_v53, 0.0 }
 0x404   : > { %v908_v46 = vmax.f32 %v898_v39, 0.0 }
 0x405   : > { %v919_v58 = vsel %vm542_vm3, %v909_v55, 0.0 }
 0x406   : > { %v916_v50 = vsel %vm542_vm3, %v908_v46, 0.0 }
 0x410   : > { %v2019_v33 = vpop.f32.mrb[4].mxu1 }
 0x411   : > { %v1212_v35 = vadd.f32 %v2019_v33, %v1815_v32  ;;  %v1206_v36 = vpop.f32.mrb[5].mxu1 }
 0x412   : > { %v1207_v0 = vadd.f32 %v1815_v32, %v1206_v36 }
 0x413   : > { %v1226_v37 = vmax.f32 %v1212_v35, 0.0 }
 0x414   : > { %v1225_v38 = vmax.f32 %v1207_v0, 0.0  ;;  %v2022_v63 = vpop.f32.mrb[6].mxu1  ;;  %v472_v0 = vld [vmem:[%s2801_s10] sm:$0xff] }
 0x415   : > { %v1216_v40 = vpop.f32.mrb[7].mxu1  ;;  %v1232_v41 = vsel %vm542_vm3, %v1226_v37, 0.0  ;;  %v1222_v42 = vadd.f32 %v2022_v63, %v1815_v32  ;;  %v474_v63 = vld [vmem:[%s2801_s10 + $0x10] sm:$0xff] }
 0x416   : > { %v1217_v43 = vadd.f32 %v1815_v32, %v1216_v40  ;;  %1233 = vadd.xlane.f32.xlu1 %v1232_v41  ;;  %v1229_v44 = vsel %vm542_vm3, %v1225_v38, 0.0  ;;  %v1795_v40 = vld [vmem:[%s2797_s6 + $0x60] sm:$0xff]  ;;  %v1796_v41 = vld [vmem:[%s2797_s6 + $0x68] sm:$0xff] }
 0x417   : > { %1230 = vadd.xlane.f32.xlu0 %v1229_v44  ;;  %v1228_v48 = vmax.f32 %v1222_v42, 0.0  ;;  %v2610_v42 = vpack.c.bf16 %v1796_v41, %v1795_v40 }
 0x418   : > { %v1227_v45 = vmax.f32 %v1217_v43, 0.0 }
 0x419   : > { %v1238_v54 = vsel %vm542_vm3, %v1228_v48, 0.0 }
 0x41a   : > { %911 = vadd.xlane.f32.xlu1 %v910_v34  ;;  %v1235_v49 = vsel %vm542_vm3, %v1227_v45, 0.0 }
 0x41b   : > { %1236 = vadd.xlane.f32.xlu0 %v1235_v49 }
 0x41e   : > { %917 = vadd.xlane.f32.xlu1 %v916_v50 }
 0x41f   : > { %1239 = vadd.xlane.f32.xlu0 %v1238_v54 }
 0x423   : > { %914 = vadd.xlane.f32.xlu0 %v913_v57 }
 0x427   : > { %920 = vadd.xlane.f32.xlu0 %v919_v58 }
 0x4a3   : > { %v1234_v59 = vpop.xlane.xlu1 %1233 }
 0x4a4   : > { %v1242_v60 = vmul.f32 0.03125, %v1234_v59  ;;  %v1231_v61 = vpop.xlane.xlu0 %1230 }
 0x4a5   : > { %v1241_v62 = vmul.f32 0.03125, %v1231_v61 }
 0x4a6   : > { %v2552_v1 = vsub.f32 %v1226_v37, %v1242_v60  ;;  %v473_v37 = vld [vmem:[%s2801_s10 + $0x8] sm:$0xff] }
 0x4a7   : > { %v2554_v2 = vsub.f32 %v1225_v38, %v1241_v62  ;;  %v912_v3 = vpop.xlane.xlu1 %911  ;;  %v2115_v38 = vpack.c.bf16 %v473_v37, %v472_v0 }
 0x4a8   : > { %v922_v4 = vmul.f32 0.03125, %v912_v3  ;;  %v1237_v5 = vpop.xlane.xlu0 %1236  ;;  %v1250_v6 = vmul.f32 %v2552_v1, %v2552_v1 }
 0x4a9   : > { %v1243_v7 = vmul.f32 0.03125, %v1237_v5  ;;  %v1249_v8 = vmul.f32 %v2554_v2, %v2554_v2  ;;  %2116 = vmatprep.subr.bf16.mxu0 %v2115_v38 }
 0x4aa   : > { %v1256_v9 = vsel %vm542_vm3, %v1250_v6, 0.0  ;;  %v2561_v10 = vsub.f32 %v906_v30, %v922_v4  ;;  %2118 = vmatpush3.bf16.msra.mxu0 %v2115_v38  ;;  %v475_v30 = vld [vmem:[%s2801_s10 + $0x18] sm:$0xff]  ;;  %v1820_v4 = vld [vmem:[%s2795_s4 + $0x1] ss:$0 sm:$0xff] }
 0x4ab   : > { %v2563_v11 = vsub.f32 %v1227_v45, %v1243_v7  ;;  %1257 = vadd.xlane.f32.xlu0 %v1256_v9  ;;  %v918_v12 = vpop.xlane.xlu1 %917  ;;  %v1253_v13 = vsel %vm542_vm3, %v1249_v8, 0.0  ;;  %v2119_v39 = vpack.c.bf16 %v475_v30, %v474_v63 }
 0x4ac   : > { %v924_v14 = vmul.f32 0.03125, %v918_v12  ;;  %v1240_v15 = vpop.xlane.xlu0 %1239  ;;  %1254 = vadd.xlane.f32.xlu1 %v1253_v13  ;;  %v930_v21 = vmul.f32 %v2561_v10, %v2561_v10  ;;  %v1821_v13 = vld [vmem:[%s2796_s5 + $0x1] ss:$0 sm:$0xff] }
 0x4ad   : > { %v1244_v16 = vmul.f32 0.03125, %v1240_v15  ;;  %v1251_v17 = vmul.f32 %v2563_v11, %v2563_v11  ;;  %2120 = vmatprep.subr.bf16.mxu0 %v2119_v39 }
 0x4ae   : > { %v2568_v18 = vsub.f32 %v908_v46, %v924_v14  ;;  %v934_v52 = vsel %vm542_vm3, %v930_v21, 0.0  ;;  %2122 = vmatpush3.bf16.msra.mxu0 %v2119_v39 }
 0x4af   : > { %v2570_v19 = vsub.f32 %v1228_v48, %v1244_v16  ;;  %v1259_v20 = vsel %vm542_vm3, %v1251_v17, 0.0  ;;  %2148 = vmatprep.subr.bf16.mxu0 %v2610_v42 }
 0x4b0   : > { %v915_v22 = vpop.xlane.xlu0 %914  ;;  %1260 = vadd.xlane.f32.xlu1 %v1259_v20  ;;  %v932_v27 = vmul.f32 %v2568_v18, %v2568_v18 }
 0x4b1   : > { %v923_v23 = vmul.f32 0.03125, %v915_v22  ;;  %v1252_v24 = vmul.f32 %v2570_v19, %v2570_v19 }
 0x4b2   : > { %v940_v56 = vsel %vm542_vm3, %v932_v27, 0.0 }
 0x4b3   : > { %v2577_v25 = vsub.f32 %v907_v51, %v923_v23  ;;  %v1262_v26 = vsel %vm542_vm3, %v1252_v24, 0.0 }
 0x4b4   : > { %1263 = vadd.xlane.f32.xlu0 %v1262_v26  ;;  %v921_v28 = vpop.xlane.xlu0 %920  ;;  %935 = vadd.xlane.f32.xlu1 %v934_v52 }
 0x4b5   : > { %v925_v29 = vmul.f32 0.03125, %v921_v28  ;;  %v931_v31 = vmul.f32 %v2577_v25, %v2577_v25 }
 0x4b7   : > { %v2585_v32 = vsub.f32 %v909_v55, %v925_v29  ;;  %v937_v33 = vsel %vm542_vm3, %v931_v31, 0.0  ;;  %v1773_v31 = vld [vmem:[%s2799_s8] ss:$0 sm:$0xff] }
 0x4b8   : > { %938 = vadd.xlane.f32.xlu0 %v937_v33  ;;  %941 = vadd.xlane.f32.xlu1 %v940_v56 }
 0x4b9   : > { %v933_v35 = vmul.f32 %v2585_v32, %v2585_v32 }
 0x4bb   : > { %v943_v36 = vsel %vm542_vm3, %v933_v35, 0.0 }
 0x4bc   : > { %944 = vadd.xlane.f32.xlu0 %v943_v36 }
 0x538   : > { %v1258_v43 = vpop.xlane.xlu0 %1257 }
 0x539   : > { %v1266_v44 = vmul.f32 0.03125, %v1258_v43  ;;  %v1255_v45 = vpop.xlane.xlu1 %1254 }
 0x53a   : > { %v1265_v46 = vmul.f32 0.03125, %v1255_v45 }
 0x53b   : > { %v1270_v34 = vadd.f32 1e-05, %v1266_v44 }
 0x53c   : > { %v1269_v47 = vadd.f32 1e-05, %v1265_v46 }
 0x53d   : > { %2198 = vrsqrt.f32 %v1270_v34  ;;  %v1261_v48 = vpop.xlane.xlu1 %1260 }
 0x53e   : > { %2200 = vrsqrt.f32 %v1269_v47  ;;  %v1267_v49 = vmul.f32 0.03125, %v1261_v48  ;;  %v1797_v48 = vld [vmem:[%s2797_s6 + $0x70] sm:$0xff] }
 0x540   : > { %v1271_v50 = vadd.f32 1e-05, %v1267_v49 }
 0x541   : > { %v1264_v51 = vpop.xlane.xlu0 %1263  ;;  %v936_v53 = vpop.xlane.xlu1 %935 }
 0x542   : > { %2202 = vrsqrt.f32 %v1271_v50  ;;  %v1268_v54 = vmul.f32 0.03125, %v1264_v51  ;;  %v946_v55 = vmul.f32 0.03125, %v936_v53 }
 0x544   : > { %v1272_v57 = vadd.f32 1e-05, %v1268_v54  ;;  %v950_v58 = vadd.f32 1e-05, %v946_v55 }
 0x545   : > { %v939_v59 = vpop.xlane.xlu0 %938  ;;  %v942_v60 = vpop.xlane.xlu1 %941 }
 0x546   : > { %2204 = vrsqrt.f32 %v1272_v57  ;;  %v947_v61 = vmul.f32 0.03125, %v939_v59  ;;  %v948_v62 = vmul.f32 0.03125, %v942_v60 }
 0x547   : > { %v2199_v3 = vpop.eup %2198  ;;  %2206 = vrsqrt.f32 %v950_v58 }
 0x548   : > { %v2201_v5 = vpop.eup %2200  ;;  %v1278_v6 = vmul.f32 %v2199_v3, %v2552_v1  ;;  %v951_v7 = vadd.f32 1e-05, %v947_v61  ;;  %v952_v8 = vadd.f32 1e-05, %v948_v62  ;;  %v1799_v3 = vld [vmem:[%s2797_s6 + $0x80] sm:$0xff] }
 0x549   : > { %v1277_v9 = vmul.f32 %v2201_v5, %v2554_v2  ;;  %v945_v12 = vpop.xlane.xlu0 %944 }
 0x54a   : > { %v1288_v14 = vmul.f32 %v1820_v4, %v1278_v6  ;;  %2208 = vrsqrt.f32 %v951_v7  ;;  %v949_v15 = vmul.f32 0.03125, %v945_v12  ;;  %v1801_v12 = vld [vmem:[%s2797_s6 + $0x90] sm:$0xff] }
 0x54b   : > { %2210 = vrsqrt.f32 %v952_v8  ;;  %v1287_v16 = vmul.f32 %v1820_v4, %v1277_v9 }
 0x54c   : > { %v2203_v17 = vpop.eup %2202  ;;  %v953_v20 = vadd.f32 1e-05, %v949_v15  ;;  %v1298_v21 = vadd.f32 %v1821_v13, %v1288_v14 }
 0x54d   : > { %v1279_v22 = vmul.f32 %v2203_v17, %v2563_v11  ;;  %v1297_v1 = vadd.f32 %v1821_v13, %v1287_v16  ;;  %v1803_v17 = vld [vmem:[%s2797_s6 + $0xa0] sm:$0xff] }
 0x54e   : > { %2212 = vrsqrt.f32 %v953_v20  ;;  %v1306_v23 = vrot.slane %v1298_v21, 7  ;;  %v1804_v20 = vld [vmem:[%s2797_s6 + $0xa8] sm:$0xff] }
 0x54f   : > { %v1289_v24 = vmul.f32 %v1820_v4, %v1279_v22  ;;  %v1305_v2 = vrot.slane %v1297_v1, 7  ;;  %v2163_v22 = vpack.c.bf16 %v1804_v20, %v1803_v17  ;;  %v1805_v1 = vld [vmem:[%s2797_s6 + $0xb0] sm:$0xff]  ;;  %v1810_v17 = vld [vmem:[%s2801_s10 + $0x20] sm:$0xff]  ;;  %v1811_v20 = vld [vmem:[%s2801_s10 + $0x28] sm:$0xff] }
 0x550   : > { %v2205_v26 = vpop.eup %2204 }
 0x551   : > { %v2207_v52 = vpop.eup %2206  ;;  %v1280_v27 = vmul.f32 %v2205_v26, %v2570_v19  ;;  %v2624_v28 = vsel %vm481_vm0, %v1305_v2, %v1306_v23  ;;  %v2627_v29 = vsel %vm481_vm0, 0.0, %v1305_v2  ;;  %v1299_v11 = vadd.f32 %v1821_v13, %v1289_v24  ;;  %v1774_v19 = vld [vmem:[%s2800_s9] ss:$0 sm:$0xff] }
 0x552   : > { %v1321_v33 = vrot.slane %v2627_v29, 1  ;;  %v1322_v56 = vrot.slane %v2624_v28, 1  ;;  %v958_v35 = vmul.f32 %v2207_v52, %v2561_v10  ;;  %v1342_v30 = vrot.slane %v2627_v29, 2 }
 0x553   : > { %v1290_v36 = vmul.f32 %v1820_v4, %v1280_v27  ;;  %v1308_v0 = vrot.slane %v1299_v11, 7  ;;  %v1343_v39 = vrot.slane %v2624_v28, 2  ;;  %v1800_v4 = vld [vmem:[%s2797_s6 + $0x88] sm:$0xff] }
 0x554   : > { %v2209_v37 = vpop.eup %2208  ;;  %v1323_v38 = vsel %vm498_vm2, %v1321_v33, %v1322_v56  ;;  %v968_v63 = vmul.f32 %v1773_v31, %v958_v35  ;;  %v2155_v9 = vpack.c.bf16 %v1800_v4, %v1799_v3 }
 0x555   : > { %v2211_v40 = vpop.eup %2210  ;;  %v959_v41 = vmul.f32 %v2209_v37, %v2577_v25  ;;  %1330 = vrot.lane.b32.xlu1 %v1323_v38, %s2231_s13  ;;  %v2644_v10 = vsel %vm481_vm0, %v1306_v23, %v1308_v0  ;;  %v1300_v43 = vadd.f32 %v1821_v13, %v1290_v36  ;;  %v1798_v25 = vld [vmem:[%s2797_s6 + $0x78] sm:$0xff]  ;;  %v1344_v50 = vsel %vm520_vm1, %v1342_v30, %v1343_v39 }
 0x556   : > { %v978_v44 = vadd.f32 %v1774_v19, %v968_v63  ;;  %v1324_v45 = vrot.slane %v2644_v10, 1  ;;  %v960_v46 = vmul.f32 %v2211_v40, %v2568_v18  ;;  %v1345_v18 = vrot.slane %v2644_v10, 2  ;;  %v1802_v13 = vld [vmem:[%s2797_s6 + $0x98] sm:$0xff] }
 0x557   : > { %v969_v34 = vmul.f32 %v1773_v31, %v959_v41  ;;  %v1310_v47 = vrot.slane %v1300_v43, 7  ;;  %v2151_v61 = vpack.c.bf16 %v1798_v25, %v1797_v48  ;;  %v2159_v16 = vpack.c.bf16 %v1802_v13, %v1801_v12  ;;  %v1806_v23 = vld [vmem:[%s2797_s6 + $0xb8] sm:$0xff]  ;;  %v1822_v41 = vld [vmem:[%s2798_s7 + $0x1] ss:$0 sm:$0xff] }
 0x558   : > { %v2213_v49 = vpop.eup %2212  ;;  %1987 = vmatprep.mubr.msk.f32.mxu0 %vm542_vm3, %v978_v44  ;;  %v1325_v51 = vsel %vm498_vm2, %v1322_v56, %v1324_v45  ;;  %v970_v53 = vmul.f32 %v1773_v31, %v960_v46  ;;  %v2167_v24 = vpack.c.bf16 %v1806_v23, %v1805_v1  ;;  %v1813_v1 = vld [vmem:[%s2801_s10 + $0x38] sm:$0xff] }
 0x559   : > { %v979_v54 = vadd.f32 %v1774_v19, %v969_v34  ;;  %1351 = vrot.lane.b32.xlu1 %v1344_v50, %s2230_s30  ;;  %1332 = vrot.lane.b32.xlu0 %v1325_v51, %s2231_s13  ;;  %v2661_v55 = vsel %vm481_vm0, %v1308_v0, %v1310_v47  ;;  %v961_v57 = vmul.f32 %v2213_v49, %v2585_v32  ;;  %v1318_v58 = vsel %vm481_vm0, %v1310_v47, 0.0 }
 0x55a   : > { %v980_v59 = vadd.f32 %v1774_v19, %v970_v53  ;;  %v1326_v60 = vrot.slane %v2661_v55, 1  ;;  %v1346_v32 = vsel %vm520_vm1, %v1343_v39, %v1345_v18  ;;  %v1328_v6 = vrot.slane %v1318_v58, 1 }
 0x55b   : > { %1988 = vmatmul.mubr.msk.f32.vlgmr.msra.gmra.mrb[4].mxu0 %vm542_vm3, %v979_v54  ;;  %v971_v62 = vmul.f32 %v1773_v31, %v961_v57  ;;  %v1347_v7 = vrot.slane %v2661_v55, 2  ;;  %v1349_v15 = vrot.slane %v1318_v58, 2 }
 0x55c   : > { %1990 = vmatprep.mubr.msk.f32.mxu0 %vm542_vm3, %v980_v59  ;;  %v1327_v5 = vsel %vm498_vm2, %v1324_v45, %v1326_v60  ;;  %2150 = vmatpush3.bf16.msra.mxu0 %v2610_v42  ;;  %v1329_v14 = vsel %vm498_vm2, %v1326_v60, %v1328_v6 }
 0x55d   : > { %1353 = vrot.lane.b32.xlu1 %v1346_v32, %s2230_s30  ;;  %1334 = vrot.lane.b32.xlu0 %v1327_v5, %s2231_s13  ;;  %v981_v8 = vadd.f32 %v1774_v19, %v971_v62  ;;  %v1348_v42 = vsel %vm520_vm1, %v1345_v18, %v1347_v7  ;;  %v1350_v21 = vsel %vm520_vm1, %v1347_v7, %v1349_v15 }
 0x55e   : > { %2152 = vmatprep.subr.bf16.mxu0 %v2151_v61 }
 0x55f   : > { %1991 = vmatmul.mubr.msk.f32.gmra.mrb[6].mxu0 %vm542_vm3, %v981_v8 }
 0x560   : > { %2154 = vmatpush3.bf16.msra.mxu0 %v2151_v61 }
 0x561   : > { %1336 = vrot.lane.b32.xlu1 %v1329_v14, %s2231_s13  ;;  %1355 = vrot.lane.b32.xlu0 %v1348_v42, %s2230_s30 }
 0x562   : > { %2156 = vmatprep.subr.bf16.mxu0 %v2155_v9 }
 0x564   : > { %2158 = vmatpush3.bf16.msra.mxu0 %v2155_v9 }
 0x565   : > { %1357 = vrot.lane.b32.xlu1 %v1350_v21, %s2230_s30  ;;  %2160 = vmatprep.subr.bf16.mxu0 %v2159_v16  ;;  %v2171_v21 = vpack.c.bf16 %v1811_v20, %v1810_v17 }
 0x567   : > { %2172 = vmatprep.subr.bf16.mxu1 %v2171_v21 }
 0x568   : > { %2162 = vmatpush3.bf16.msra.mxu0 %v2159_v16  ;;  %2174 = vmatpush3.bf16.msra.mxu1 %v2171_v21 }
 0x569   : > { %2164 = vmatprep.subr.bf16.mxu0 %v2163_v22 }
 0x56c   : > { %2166 = vmatpush3.bf16.msra.mxu0 %v2163_v22  ;;  %v1812_v22 = vld [vmem:[%s2801_s10 + $0x30] sm:$0xff] }
 0x56d   : > { %2168 = vmatprep.subr.bf16.mxu0 %v2167_v24  ;;  %v2175_v23 = vpack.c.bf16 %v1813_v1, %v1812_v22 }
 0x56f   : > { %2176 = vmatprep.subr.bf16.mxu1 %v2175_v23 }
 0x570   : > { %2170 = vmatpush3.bf16.msra.mxu0 %v2167_v24  ;;  %2178 = vmatpush3.bf16.msra.mxu1 %v2175_v23 }
 0x5c7   : > { %v1331_v2 = vpop.permute.xlu1 %1330 }
 0x5c8   : > { %v1363_v26 = vsel %vm542_vm3, %v2627_v29, %v1331_v2 }
 0x5cb   : > { %v1333_v52 = vpop.permute.xlu0 %1332  ;;  %v1352_v27 = vpop.permute.xlu1 %1351 }
 0x5cc   : > { %v1367_v31 = vsel %vm547_vm4, %v1363_v26, %v1352_v27  ;;  %v1364_v11 = vsel %vm542_vm3, %v2624_v28, %v1333_v52 }
 0x5cd   : > { %2047 = vmatprep.mubr.msk.f32.mxu0 %vm558_vm5, %v1367_v31 }
 0x5cf   : > { %v1335_v33 = vpop.permute.xlu0 %1334  ;;  %v1354_v56 = vpop.permute.xlu1 %1353 }
 0x5d0   : > { %v1368_v35 = vsel %vm547_vm4, %v1364_v11, %v1354_v56  ;;  %v1365_v36 = vsel %vm542_vm3, %v2644_v10, %v1335_v33 }
 0x5d1   : > { %2048 = vmatmul.mubr.msk.f32.vlgmr.msra.gmra.mrb[8].mxu0 %vm558_vm5, %v1368_v35 }
 0x5d3   : > { %v1356_v19 = vpop.permute.xlu0 %1355  ;;  %v1337_v29 = vpop.permute.xlu1 %1336 }
 0x5d4   : > { %v1369_v0 = vsel %vm547_vm4, %v1365_v36, %v1356_v19  ;;  %v1366_v37 = vsel %vm542_vm3, %v2661_v55, %v1337_v29  ;;  %v1827_v29 = vld [vmem:[%s2799_s8 + $0x1] ss:$0 sm:$0xff] }
 0x5d5   : > { %2050 = vmatprep.mubr.msk.f32.mxu0 %vm558_vm5, %v1369_v0 }
 0x5d7   : > { %v1358_v38 = vpop.permute.xlu1 %1357 }
 0x5d8   : > { %v1370_v28 = vsel %vm547_vm4, %v1366_v37, %v1358_v38 }
 0x5d9   : > { %2051 = vmatmul.mubr.msk.f32.gmra.mrb[10].mxu0 %vm558_vm5, %v1370_v28 }
 0x62e   : > { %v2721_v63 = vpop.f32.mrb[4].mxu0 }
 0x62f   : > { %v2723_v30 = vpop.f32.mrb[5].mxu0 }
 0x632   : > { %v2725_v39 = vpop.f32.mrb[6].mxu0 }
 0x633   : > { %v2727_v40 = vpop.f32.mrb[7].mxu0 }
 0x6a4   : > { %v2049_v10 = vpop.f32.mrb[8].mxu0 }
 0x6a5   : > { %v1461_v43 = vadd.f32 %v2049_v10, %v1822_v41  ;;  %v1455_v44 = vpop.f32.mrb[9].mxu0 }
 0x6a6   : > { %v1456_v45 = vadd.f32 %v1822_v41, %v1455_v44 }
 0x6a7   : > { %v1475_v46 = vmax.f32 %v1461_v43, 0.0 }
 0x6a8   : > { %v1474_v34 = vmax.f32 %v1456_v45, 0.0 }
 0x6a9   : > { %v1481_v47 = vsel %vm542_vm3, %v1475_v46, 0.0 }
 0x6aa   : > { %1482 = vadd.xlane.f32.xlu1 %v1481_v47  ;;  %v1478_v48 = vsel %vm542_vm3, %v1474_v34, 0.0 }
 0x6ab   : > { %1479 = vadd.xlane.f32.xlu0 %v1478_v48 }
 0x6ac   : > { %v2052_v25 = vpop.f32.mrb[10].mxu0 }
 0x6ad   : > { %v1465_v49 = vpop.f32.mrb[11].mxu0  ;;  %v1471_v50 = vadd.f32 %v2052_v25, %v1822_v41 }
 0x6ae   : > { %v1466_v51 = vadd.f32 %v1822_v41, %v1465_v49  ;;  %v1828_v41 = vld [vmem:[%s2800_s9 + $0x1] ss:$0 sm:$0xff] }
 0x6af   : > { %v1477_v18 = vmax.f32 %v1471_v50, 0.0 }
 0x6b0   : > { %v1476_v53 = vmax.f32 %v1466_v51, 0.0 }
 0x6b1   : > { %v1487_v55 = vsel %vm542_vm3, %v1477_v18, 0.0 }
 0x6b2   : > { %v1484_v54 = vsel %vm542_vm3, %v1476_v53, 0.0 }
 0x6b3   : > { %1485 = vadd.xlane.f32.xlu0 %v1484_v54 }
 0x6b7   : > { %1488 = vadd.xlane.f32.xlu0 %v1487_v55 }
 0x737   : > { %v1483_v57 = vpop.xlane.xlu1 %1482 }
 0x738   : > { %v1491_v58 = vmul.f32 0.03125, %v1483_v57  ;;  %v1480_v59 = vpop.xlane.xlu0 %1479  ;;  %v439_v57 = vld [vmem:[%s428_s19 + $0x8] sm:$0xff] }
 0x739   : > { %v1490_v60 = vmul.f32 0.03125, %v1480_v59  ;;  %v438_v59 = vld [vmem:[%s428_s19] sm:$0xff] }
 0x73a   : > { %v1495_v61 = vsub.f32 %v1475_v46, %v1491_v58 }
 0x73b   : > { %v1494_v62 = vsub.f32 %v1474_v34, %v1490_v60 }
 0x73c   : > { %v1499_v3 = vmul.f32 %v1495_v61, %v1495_v61 }
 0x73d   : > { %v1498_v4 = vmul.f32 %v1494_v62, %v1494_v62 }
 0x73e   : > { %v1505_v32 = vsel %vm542_vm3, %v1499_v3, 0.0 }
 0x73f   : > { %1506 = vadd.xlane.f32.xlu0 %v1505_v32  ;;  %v1502_v5 = vsel %vm542_vm3, %v1498_v4, 0.0  ;;  %v440_v32 = vld [vmem:[%s428_s19 + $0x10] sm:$0xff] }
 0x740   : > { %1503 = vadd.xlane.f32.xlu1 %v1502_v5  ;;  %v1486_v6 = vpop.xlane.xlu0 %1485 }
 0x741   : > { %v1492_v7 = vmul.f32 0.03125, %v1486_v6 }
 0x743   : > { %v1496_v8 = vsub.f32 %v1476_v53, %v1492_v7  ;;  %v1829_v53 = vld [vmem:[%s2802_s11 + $0x1] ss:$0 sm:$0xff]  ;;  %v441_v7 = vld [vmem:[%s428_s19 + $0x18] sm:$0xff] }
 0x744   : > { %v1489_v9 = vpop.xlane.xlu0 %1488 }
 0x745   : > { %v1493_v12 = vmul.f32 0.03125, %v1489_v9  ;;  %v1500_v13 = vmul.f32 %v1496_v8, %v1496_v8  ;;  %v1775_v9 = vld [vmem:[%s2802_s11] ss:$0 sm:$0xff] }
 0x747   : > { %v1497_v14 = vsub.f32 %v1477_v18, %v1493_v12  ;;  %v1508_v42 = vsel %vm542_vm3, %v1500_v13, 0.0  ;;  %v1072_v12 = vadd.f32 %v2721_v63, %v1775_v9  ;;  %v1067_v13 = vadd.f32 %v1775_v9, %v2723_v30 }
 0x748   : > { %1509 = vadd.xlane.f32.xlu1 %v1508_v42  ;;  %v1077_v63 = vadd.f32 %v1775_v9, %v2727_v40  ;;  %v1082_v30 = vadd.f32 %v2725_v39, %v1775_v9 }
 0x749   : > { %v1501_v15 = vmul.f32 %v1497_v14, %v1497_v14  ;;  %v1085_v42 = vmul.f32 %v1067_v13, %v438_v59 }
 0x74a   : > { %v1087_v21 = vmul.f32 %v1077_v63, %v440_v32  ;;  %v1088_v23 = vmul.f32 %v1082_v30, %v441_v7 }
 0x74b   : > { %v1511_v16 = vsel %vm542_vm3, %v1501_v15, 0.0 }
 0x74c   : > { %1512 = vadd.xlane.f32.xlu0 %v1511_v16 }
 0x7cc   : > { %v1507_v24 = vpop.xlane.xlu0 %1506 }
 0x7cd   : > { %v1515_v2 = vmul.f32 0.03125, %v1507_v24  ;;  %v1504_v26 = vpop.xlane.xlu1 %1503 }
 0x7ce   : > { %v1514_v52 = vmul.f32 0.03125, %v1504_v26 }
 0x7cf   : > { %v1519_v27 = vadd.f32 1e-05, %v1515_v2 }
 0x7d0   : > { %v1518_v31 = vadd.f32 1e-05, %v1514_v52 }
 0x7d1   : > { %2214 = vrsqrt.f32 %v1519_v27 }
 0x7d2   : > { %2216 = vrsqrt.f32 %v1518_v31 }
 0x7d5   : > { %v1510_v11 = vpop.xlane.xlu1 %1509 }
 0x7d6   : > { %v1516_v33 = vmul.f32 0.03125, %v1510_v11 }
 0x7d8   : > { %v1520_v56 = vadd.f32 1e-05, %v1516_v33 }
 0x7d9   : > { %v1513_v35 = vpop.xlane.xlu0 %1512 }
 0x7da   : > { %2218 = vrsqrt.f32 %v1520_v56  ;;  %v1517_v36 = vmul.f32 0.03125, %v1513_v35 }
 0x7db   : > { %v2215_v19 = vpop.eup %2214 }
 0x7dc   : > { %v2217_v0 = vpop.eup %2216  ;;  %v1527_v37 = vmul.f32 %v2215_v19, %v1495_v61  ;;  %v1521_v38 = vadd.f32 1e-05, %v1517_v36 }
 0x7dd   : > { %v1526_v28 = vmul.f32 %v2217_v0, %v1494_v62 }
 0x7de   : > { %2220 = vrsqrt.f32 %v1521_v38  ;;  %v1537_v10 = vmul.f32 %v1827_v29, %v1527_v37 }
 0x7df   : > { %v1536_v43 = vmul.f32 %v1827_v29, %v1526_v28 }
 0x7e0   : > { %v1547_v45 = vadd.f32 %v1828_v41, %v1537_v10 }
 0x7e1   : > { %v1546_v44 = vadd.f32 %v1828_v41, %v1536_v43 }
 0x7e3   : > { %2061 = vmatprep.mubr.msk.f32.mxu1 %vm542_vm3, %v1546_v44 }
 0x7e4   : > { %v2219_v46 = vpop.eup %2218  ;;  %2062 = vmatmul.mubr.msk.f32.vlgmr.msra.gmra.mrb[8].mxu1 %vm542_vm3, %v1547_v45 }
 0x7e5   : > { %v1528_v34 = vmul.f32 %v2219_v46, %v1496_v8 }
 0x7e7   : > { %v1538_v47 = vmul.f32 %v1827_v29, %v1528_v34 }
 0x7e8   : > { %v2221_v48 = vpop.eup %2220 }
 0x7e9   : > { %v1548_v25 = vadd.f32 %v1828_v41, %v1538_v47  ;;  %v1529_v49 = vmul.f32 %v2221_v48, %v1497_v14  ;;  %v1086_v14 = vmul.f32 %v1072_v12, %v439_v57 }
 0x7eb   : > { %2064 = vmatprep.mubr.msk.f32.mxu1 %vm542_vm3, %v1548_v25  ;;  %v1539_v50 = vmul.f32 %v1827_v29, %v1529_v49 }
 0x7ed   : > { %v1549_v51 = vadd.f32 %v1828_v41, %v1539_v50 }
 0x7ef   : > { %2065 = vmatmul.mubr.msk.f32.gmra.mrb[10].mxu1 %vm542_vm3, %v1549_v51 }
 0x8b7   : > { %v2063_v18 = vpop.f32.mrb[8].mxu1 }
 0x8b8   : > { %v1640_v54 = vadd.f32 %v2063_v18, %v1829_v53  ;;  %v1634_v55 = vpop.f32.mrb[9].mxu1 }
 0x8b9   : > { %v1635_v58 = vadd.f32 %v1829_v53, %v1634_v55 }
 0x8ba   : > { %v1654_v60 = vmul.f32 %v1640_v54, %v439_v57 }
 0x8bb   : > { %v1653_v61 = vmul.f32 %v1635_v58, %v438_v59 }
 0x8bc   : > { %1663 = vrot.lane.b32.xlu0 %v1654_v60, %s2232_s20 }
 0x8bd   : > { %1661 = vrot.lane.b32.xlu1 %v1653_v61, %s2232_s20 }
 0x8c2   : > { %v2066_v62 = vpop.f32.mrb[10].mxu1 }
 0x8c3   : > { %v1644_v3 = vpop.f32.mrb[11].mxu1  ;;  %v1650_v5 = vadd.f32 %v2066_v62, %v1829_v53 }
 0x8c4   : > { %v1645_v4 = vadd.f32 %v1829_v53, %v1644_v3 }
 0x8c5   : > { %v1656_v8 = vmul.f32 %v1650_v5, %v441_v7 }
 0x8c6   : > { %v1655_v6 = vmul.f32 %v1645_v4, %v440_v32 }
 0x8c8   : > { %1665 = vrot.lane.b32.xlu1 %v1655_v6, %s2232_s20 }
 0x8cc   : > { %1667 = vrot.lane.b32.xlu1 %v1656_v8, %s2232_s20 }
 0x92e   : > { %v1664_v15 = vpop.permute.xlu0 %1663 }
 0x92f   : > { %v1675_v16 = vsel %vm1673_vm6, %v1086_v14, %v1664_v15  ;;  %v1662_v17 = vpop.permute.xlu1 %1661 }
 0x930   : > { %1680 = vst.msk [vmem:[%s433_s22 + $0x8] sm:$0xff] %vm1678_vm7, %v1675_v16  ;;  %v1674_v20 = vsel %vm1673_vm6, %v1085_v42, %v1662_v17 }
 0x931   : > { %1679 = vst.msk [vmem:[%s433_s22] sm:$0xff] %vm1678_vm7, %v1674_v20 }
 0x93a   : > { %v1666_v22 = vpop.permute.xlu1 %1665 }
 0x93b   : > { %v1676_v1 = vsel %vm1673_vm6, %v1087_v21, %v1666_v22 }
 0x93c   : > { %1681 = vst.msk [vmem:[%s433_s22 + $0x10] sm:$0xff] %vm1678_vm7, %v1676_v1 }
 0x93e   : > { %v1668_v24 = vpop.permute.xlu1 %1667 }
 0x93f   : > { %v1677_v2 = vsel %vm1673_vm6, %v1088_v23, %v1668_v24 }
 0x940   : > { %1682 = vst.msk [vmem:[%s433_s22 + $0x18] sm:$0xff] %vm1678_vm7, %v1677_v2 }
 0x941 PF: > { %s22_s21 = sadd.s32 1, %s2228_s21  }
 0x942   : > { %p19_p4 = scmp.ge.s32.totalorder %s22_s21, 4  }
 0x944   :  { %21 = sbr.rel (!%p19_p4) target bundleno = 1 (0x1), region = 111 }

// kernel: fastspeech2_forward.3
= control target key start
LH: loop header
LB: loop body
LE: loop exit
PB: predicated region body
PF: predicated region fallthrough
CT: control target
= control target key end

     0   :  { %s5311_s6 = smov 1   ;;  %s5312_s10 = smov 2   ;;  %s6035_s0 = inlined_call_operand.smem [shape: u32[31], index: -1, kind: input, shape index: {}] }
   0x1   :  { %s5356_s5 = sld [smem:[%s6035_s0]]   ;;  %s5313_s14 = smov 3  }
   0x2   :  { %s5361_s9 = sld [smem:[%s6035_s0 + %s5311_s6]]   ;;  %s5314_s18 = smov 4  }
   0x3   :  { %s5366_s13 = sld [smem:[%s6035_s0 + %s5312_s10]]   ;;  %s5315_s22 = smov 5  }
   0x4   :  { %s5371_s17 = sld [smem:[%s6035_s0 + %s5313_s14]]   ;;  %s5316_s26 = smov 6  }
   0x5   :  { %s5376_s21 = sld [smem:[%s6035_s0 + %s5314_s18]]   ;;  %s5317_s30 = smov 7  }
   0x6   :  { %s5381_s25 = sld [smem:[%s6035_s0 + %s5315_s22]]   ;;  %s5318_s4 = smov 8  }
   0x7   :  { %s5386_s29 = sld [smem:[%s6035_s0 + %s5316_s26]]   ;;  %s5319_s10 = smov 9  }
   0x8   :  { %s5391_s3 = sld [smem:[%s6035_s0 + %s5317_s30]]   ;;  %s5320_s15 = smov 10  }
   0x9   :  { %s5396_s8 = sld [smem:[%s6035_s0 + %s5318_s4]]   ;;  %s5321_s20 = smov 11  }
   0xa   :  { %s5401_s14 = sld [smem:[%s6035_s0 + %s5319_s10]]   ;;  %s5322_s26 = smov 12  }
   0xb   :  { %s5406_s19 = sld [smem:[%s6035_s0 + %s5320_s15]]   ;;  %s5323_s1 = smov 13  }
   0xc   :  { %s5411_s24 = sld [smem:[%s6035_s0 + %s5321_s20]]   ;;  %s5324_s7 = smov 14  }
   0xd   :  { %s5416_s30 = sld [smem:[%s6035_s0 + %s5322_s26]]   ;;  %s5325_s15 = smov 15  }
   0xe   :  { %s5421_s6 = sld [smem:[%s6035_s0 + %s5323_s1]]   ;;  %s5326_s22 = smov 16  }
   0xf   :  { %s5426_s12 = sld [smem:[%s6035_s0 + %s5324_s7]]   ;;  %s5327_s28 = smov 17  }
  0x10   :  { %s5431_s20 = sld [smem:[%s6035_s0 + %s5325_s15]]   ;;  %s5328_s7 = smov 18  }
  0x11   :  { %s5436_s27 = sld [smem:[%s6035_s0 + %s5326_s22]]   ;;  %s5329_s15 = smov 19  }
  0x12   :  { %s5441_s4 = sld [smem:[%s6035_s0 + %s5327_s28]]   ;;  %s5330_s22 = smov 20  }
  0x13   :  { %s5331_s28 = smov 21   ;;  %s5339_s1 = smov 29  }
  0x14   :  { %s5340_s10 = smov 30  }
  0x15   :  { %6044 = sst [smem:[#allocation3_spill]] %s5426_s12 }
  0x16   :  { %6045 = sst [smem:[#allocation4_spill]] %s5431_s20 }
  0x17   :  { %6046 = sst [smem:[#allocation5_spill]] %s5436_s27 }
  0x18   :  { %6047 = sst [smem:[#allocation6_spill]] %s5441_s4 }
  0x19   :  { %s5446_s12 = sld [smem:[%s6035_s0 + %s5328_s7]]   ;;  %s5332_s7 = smov 22  }
  0x1a   :  { %s5451_s20 = sld [smem:[%s6035_s0 + %s5329_s15]]   ;;  %s5333_s15 = smov 23  }
  0x1b   :  { %s5456_s27 = sld [smem:[%s6035_s0 + %s5330_s22]]   ;;  %s5334_s22 = smov 24  }
  0x1c   :  { %s5461_s4 = sld [smem:[%s6035_s0 + %s5331_s28]]   ;;  %s5335_s28 = smov 25  }
  0x1f   :  { %6048 = sst [smem:[#allocation7_spill]] %s5446_s12 }
  0x20   :  { %6049 = sst [smem:[#allocation8_spill]] %s5451_s20 }
  0x21   :  { %6050 = sst [smem:[#allocation9_spill]] %s5456_s27 }
  0x22   :  { %6051 = sst [smem:[#allocation10_spill]] %s5461_s4 }
  0x23   :  { %s5466_s12 = sld [smem:[%s6035_s0 + %s5332_s7]]   ;;  %s5336_s7 = smov 26  }
  0x24   :  { %s5471_s20 = sld [smem:[%s6035_s0 + %s5333_s15]]   ;;  %s5337_s15 = smov 27  }
  0x25   :  { %s5476_s27 = sld [smem:[%s6035_s0 + %s5334_s22]]   ;;  %s5338_s22 = smov 28  }
  0x26   :  { %s5481_s4 = sld [smem:[%s6035_s0 + %s5335_s28]]  }
  0x29   :  { %6052 = sst [smem:[#allocation11_spill]] %s5466_s12 }
  0x2a   :  { %6053 = sst [smem:[#allocation12_spill]] %s5471_s20 }
  0x2b   :  { %6054 = sst [smem:[#allocation13_spill]] %s5476_s27 }
  0x2c   :  { %6055 = sst [smem:[#allocation14_spill]] %s5481_s4 }
  0x2d   :  { %s5486_s12 = sld [smem:[%s6035_s0 + %s5336_s7]]  }
  0x2e   :  { %s5491_s20 = sld [smem:[%s6035_s0 + %s5337_s15]]   ;;  %s5506_s15 = smov 0  }
  0x2f   :  { %s4245_s27 = sld [smem:[%s6035_s0 + %s5338_s22]]  }
  0x30   :  { %s5499_s4 = sld [smem:[%s6035_s0 + %s5339_s1]]  }
  0x33   :  { %6056 = sst [smem:[#allocation15_spill]] %s5486_s12 }
  0x34   :  { %s5504_s12 = sld [smem:[%s6035_s0 + %s5340_s10]]  }
  0x35   :  { %v67_v0 = vstv %s4245_s27 }
  0x36   :  { %68 = vst [vmem:[#allocation2] sm:$0x1] %v67_v0 }
  0x37 LB: > { %s4248_s16 = sadd.s32 4294967295, %s5309_s15   ;;  %p4252_p0 = scmp.ge.s32.totalorder %s5309_s15, 1  ;;  %s5309_s15 = sphi %s5506_s15, %s74_s15  }
  0x38   : > { %p864_p1 = scmp.lt.s32.totalorder %s5309_s15, 3 }
  0x3a   : > { %p865_p2 = pnand %p4252_p0, %p864_p1 }
  0x3b   : > { %v1058_v1 = vld [vmem:[%s5381_s25] sm:$0xff] (!%p865_p2)  ;;  %v1059_v2 = vld [vmem:[%s5381_s25 + $0x8] sm:$0xff] (!%p865_p2)  ;;  %v5341_v4 = vmov (!%p865_p2), 0.0|0.0   ;;  %v1060_v7 = vld [vmem:[%s5381_s25 + $0x10] sm:$0xff] (!%p865_p2)  ;;  %p951_p3 = scmp.lt.s32.totalorder (!%p865_p2), %s4248_s16, 1  ;;  %vm5342_vm0 = vmmov (!%p865_p2), 0  }
  0x3c   : > { %868 = sbr.rel (%p865_p2) target bundleno = 7848 (0x1ea8), region = 136  ;;  %v973_v3 = vld [vmem:[%s5371_s17] sm:$0xff] (!%p865_p2)  ;;  %4978 = vmatprep.subr.bf16.mxu1 (!%p865_p2), %v5341_v4  ;;  %v4979_v5 = vpack.c.bf16 (!%p865_p2), %v1059_v2, %v1058_v1  ;;  %4972 = vmatprep.subr.bf16.mxu0 (!%p865_p2), %v5341_v4  ;;  %v974_v6 = vld [vmem:[%s5371_s17 + $0x8] sm:$0xff] (!%p865_p2)  ;;  %v1061_v8 = vld [vmem:[%s5381_s25 + $0x18] sm:$0xff] (!%p865_p2)  ;;  %v5343_v12 = vmov (!%p865_p2), 0.0   ;;  %vm984_vm1 = vcmask (!%p865_p2), 261120  }
  0x3d   : > { %v4973_v9 = vpack.c.bf16 (!%p865_p2), %v974_v6, %v973_v3  ;;  %v975_v10 = vld [vmem:[%s5371_s17 + $0x10] sm:$0xff] (!%p865_p2)  ;;  %v976_v11 = vld [vmem:[%s5371_s17 + $0x18] sm:$0xff] (!%p865_p2)  ;;  %4666 = vmatprep.mubr.msk.f32.mxu1 (!%p865_p2), %vm5342_vm0, %v5343_v12  ;;  %4655 = vmatprep.mubr.msk.f32.mxu0 (!%p865_p2), %vm5342_vm0, %v5343_v12  ;;  %v4982_v13 = vpack.c.bf16 (!%p865_p2), %v1061_v8, %v1060_v7  ;;  %v4259_v16 = vld [vmem:[%s5386_s29] ss:$0 sm:$0xff] (!%p865_p2)  ;;  %vm1226_vm2 = vcmask (!%p865_p2), 130048   ;;  %vm1303_vm3 = vcmask (!%p865_p2), 64512  }
  0x3e   : > { %4980 = vmatpush3.bf16.msra.mxu1 (!%p865_p2), %v4979_v5  ;;  %v4976_v14 = vpack.c.bf16 (!%p865_p2), %v976_v11, %v975_v10  ;;  %v4257_v17 = vld [vmem:[%s5376_s21] ss:$0 sm:$0xff] (!%p865_p2)  ;;  %v1140_v25 = vld [vmem:[%s5391_s3 + $0x8] sm:$0xff] (!%p865_p2)  ;;  %v1141_v26 = vld [vmem:[%s5391_s3 + $0x10] sm:$0xff] (!%p865_p2)  ;;  %vm2033_vm4 = vcmask (!%p865_p2), 1043456   ;;  %vm2038_vm5 = vcmask (!%p865_p2), 1046528  }
  0x3f   : > { %4974 = vmatpush3.bf16.msra.mxu0 (!%p865_p2), %v4973_v9  ;;  %4981 = vmatprep.subr.bf16.mxu1 (!%p865_p2), %v5341_v4  ;;  %v1139_v24 = vld [vmem:[%s5391_s3] sm:$0xff] (!%p865_p2)  ;;  %v1142_v28 = vld [vmem:[%s5391_s3 + $0x18] sm:$0xff] (!%p865_p2)  ;;  %v4268_v45 = vld [vmem:[%s5371_s17 + $0x28] sm:$0xff] (!%p865_p2)  ;;  %vm2063_vm6 = vcmask (!%p865_p2), 1042432   ;;  %vm2045_vm7 = vcmask (!%p865_p2), 1045504   ;;  %vm2070_vm8 = vcmask (!%p865_p2), 1041408  }
  0x40   : > { %4975 = vmatprep.subr.bf16.mxu0 (!%p865_p2), %v5341_v4  ;;  %v4985_v27 = vpack.c.bf16 (!%p865_p2), %v1140_v25, %v1139_v24  ;;  %v4988_v29 = vpack.c.bf16 (!%p865_p2), %v1142_v28, %v1141_v26  ;;  %v4261_v41 = vld [vmem:[%s5396_s8] ss:$0 sm:$0xff] (!%p865_p2)  ;;  %v4269_v47 = vld [vmem:[%s5371_s17 + $0x30] sm:$0xff] (!%p865_p2)  ;;  %v4270_v48 = vld [vmem:[%s5371_s17 + $0x38] sm:$0xff] (!%p865_p2)  ;;  %s6043_s23 = smov (!%p865_p2), 32   ;;  %s6057_s26 = sld [smem:[#allocation4_spill]] (!%p865_p2) }
  0x41   : > { %v4267_v44 = vld [vmem:[%s5371_s17 + $0x20] sm:$0xff] (!%p865_p2)  ;;  %v4994_v49 = vpack.c.bf16 (!%p865_p2), %v4270_v48, %v4269_v47  ;;  %v4275_v52 = vld [vmem:[%s5381_s25 + $0x28] sm:$0xff] (!%p865_p2)  ;;  %v4276_v56 = vld [vmem:[%s5381_s25 + $0x30] sm:$0xff] (!%p865_p2)  ;;  %v5344_v48 = vmov (!%p865_p2), 0   ;;  %vm2052_vm9 = vcmask (!%p865_p2), 1044480   ;;  %vm2077_vm10 = vcmask (!%p865_p2), 1040384  }
  0x42   : > { %4983 = vmatpush3.bf16.msra.mxu1 (!%p865_p2), %v4982_v13  ;;  %v4991_v46 = vpack.c.bf16 (!%p865_p2), %v4268_v45, %v4267_v44  ;;  %v4274_v51 = vld [vmem:[%s5381_s25 + $0x20] sm:$0xff] (!%p865_p2)  ;;  %v4277_v57 = vld [vmem:[%s5381_s25 + $0x38] sm:$0xff] (!%p865_p2)  ;;  %v4282_v7 = vld [vmem:[%s5391_s3 + $0x28] sm:$0xff] (!%p865_p2)  ;;  %5243 = vset.pattern.permute.xlu0 (!%p865_p2), %v5344_v48  ;;  %s5346_s1 = smov (!%p865_p2), 64   ;;  %s5347_s28 = smov (!%p865_p2), 96   ;;  %vm2085_vm11 = vcmask (!%p865_p2), 523264  }
  0x43   : > { %s6072_s16 = smov (!%p951_p3, %s4248_s16), 1  ;;  %4977 = vmatpush3.bf16.msra.mxu0 %v4976_v14  ;;  %4680 = vmatprep.subr.mxu1 %v5343_v12  ;;  %v4997_v54 = vpack.c.bf16 %v4275_v52, %v4274_v51  ;;  %v5000_v58 = vpack.c.bf16 %v4277_v57, %v4276_v56  ;;  %v4279_v63 = vld [vmem:[%s5386_s29 + $0x1] ss:$0 sm:$0xff]  ;;  %v4283_v8 = vld [vmem:[%s5391_s3 + $0x30] sm:$0xff]  ;;  %v4284_v10 = vld [vmem:[%s5391_s3 + $0x38] sm:$0xff]  ;;  %vm2087_vm12 = vcmask 785408  }
  0x44   : > { %s5533_s0 = sshll.u32 %s6072_s16, 3  ;;  %4984 = vmatprep.subr.bf16.mxu0 %v5341_v4  ;;  %s957_s18 = scalar_lea.vmem %s5361_s9, %s6072_s16  ;;  %v4272_v0 = vld [vmem:[%s5376_s21 + $0x1] ss:$0 sm:$0xff]  ;;  %v5006_v11 = vpack.c.bf16 %v4284_v10, %v4283_v8  ;;  %v4292_v28 = vld [vmem:[%s5401_s14 + $0x18] sm:$0xff]  ;;  %v2027_v57 = vld [vmem:[%s5421_s6 + $0x110] sm:$0xff]  ;;  %vm4111_vm13 = vcmask 7168  }
  0x45   : > { %s954_s27 = scalar_lea.vmem %s5356_s5, %s5533_s0  ;;  %v5568_v30 = vld [vmem:[%s957_s18] ss:$0 sm:$0xff]  ;;  %v4286_v24 = vld [vmem:[%s5396_s8 + $0x1] ss:$0 sm:$0xff]  ;;  %s5637_s22 = scalar_lea.vmem %s5366_s13, %s5533_s0  ;;  %v2022_v48 = vld [vmem:[%s5421_s6 + $0xe8] sm:$0xff] }
  0x46   : > { %v5537_v15 = vld [vmem:[%s954_s27] sm:$0xff]  ;;  %s6058_s2 = sld [smem:[#allocation3_spill]]  ;;  %s6059_s10 = sld [smem:[#allocation5_spill]] }
  0x47   : > { %4667 = vmatmul.mubr.msk.f32.vlgmr.msra.gmra.mrb[0].mxu1 %vm984_vm1, %v5537_v15  ;;  %4656 = vmatmul.mubr.msk.f32.vlgmr.msra.gmra.mrb[0].mxu0 %vm984_vm1, %v5537_v15  ;;  %v4281_v6 = vld [vmem:[%s5391_s3 + $0x20] sm:$0xff]  ;;  %s6060_s7 = sld [smem:[#allocation6_spill]]  ;;  %s6061_s11 = sld [smem:[#allocation7_spill]] }
  0x48   : > { %4682 = vmatprep.mubr.msk.f32.mxu1 %vm5342_vm0, %v5343_v12  ;;  %4677 = vmatprep.mubr.msk.f32.mxu0 %vm5342_vm0, %v5343_v12  ;;  %v5003_v9 = vpack.c.bf16 %v4282_v7, %v4281_v6  ;;  %v1995_v6 = vld [vmem:[%s5421_s6 + $0x10] sm:$0xff]  ;;  %v1996_v7 = vld [vmem:[%s5421_s6 + $0x18] sm:$0xff]  ;;  %v2013_v8 = vld [vmem:[%s5421_s6 + $0xa0] sm:$0xff]  ;;  %s6062_s16 = sld [smem:[#allocation8_spill]]  ;;  %s965_s27 = scalar_lea.vmem %s5499_s4, %s5533_s0 }
  0x49   : > { %4986 = vmatpush3.bf16.msra.mxu0 %v4985_v27  ;;  %v4291_v27 = vld [vmem:[%s5401_s14 + $0x10] sm:$0xff]  ;;  %v5020_v10 = vpack.c.bf16 %v1996_v7, %v1995_v6  ;;  %s6063_s18 = sld [smem:[#allocation9_spill]] }
  0x4a   : > { %4987 = vmatprep.subr.bf16.mxu0 %v5341_v4 }
  0x4d   : > { %4989 = vmatpush3.bf16.msra.mxu0 %v4988_v29  ;;  %v5009_v29 = vpack.c.bf16 %v4292_v28, %v4291_v27  ;;  %v2002_v27 = vld [vmem:[%s5421_s6 + $0x48] sm:$0xff] }
  0x4e   : > { %4990 = vmatprep.subr.bf16.mxu0 %v5341_v4 }
  0x50   : > { %4678 = vmatmul.mubr.msk.f32.vlgmr.msra.gmra.mrb[2].mxu0 %vm984_vm1, %v5537_v15 }
  0x51   : > { %4698 = vmatprep.mubr.msk.f32.mxu0 %vm5342_vm0, %v5343_v12  ;;  %4992 = vmatpush3.bf16.msra.mxu0 %v4991_v46 }
  0x52   : > { %4993 = vmatprep.subr.bf16.mxu0 %v5341_v4 }
  0x55   : > { %4995 = vmatpush3.bf16.msra.mxu0 %v4994_v49  ;;  %v972_v49 = vld [vmem:[%s5637_s22] sm:$0xff] }
  0x56   : > { %5002 = vmatprep.subr.bf16.mxu0 %v5341_v4 }
  0x58   : > { %4699 = vmatmul.mubr.msk.f32.vlgmr.msra.gmra.mrb[4].mxu0 %vm984_vm1, %v5537_v15 }
  0x59   : > { %4720 = vmatprep.mubr.msk.f32.mxu0 %vm5342_vm0, %v5343_v12  ;;  %5004 = vmatpush3.bf16.msra.mxu0 %v5003_v9  ;;  %v2014_v9 = vld [vmem:[%s5421_s6 + $0xa8] sm:$0xff] }
  0x5a   : > { %5005 = vmatprep.subr.bf16.mxu0 %v5341_v4 }
  0x5d   : > { %5007 = vmatpush3.bf16.msra.mxu0 %v5006_v11  ;;  %v5022_v11 = vpack.c.bf16 %v2014_v9, %v2013_v8 }
  0x5e   : > { %5008 = vmatprep.subr.bf16.mxu0 %v5341_v4 }
  0x60   : > { %4721 = vmatmul.mubr.msk.f32.vlgmr.msra.gmra.mrb[6].mxu0 %vm984_vm1, %v5537_v15 }
  0x61   : > { %4737 = vmatprep.mubr.msk.f32.mxu0 %vm5342_vm0, %v5343_v12  ;;  %5010 = vmatpush3.bf16.msra.mxu0 %v5009_v29 }
 0x11a   : > { %v1135_v18 = vpop.f32.mrb[0].mxu1  ;;  %v1054_v21 = vpop.f32.mrb[0].mxu0 }
 0x11b   : > { %v1136_v19 = vadd.f32 %v4259_v16, %v1135_v18  ;;  %v4668_v20 = vpop.f32.mrb[1].mxu1  ;;  %v1055_v22 = vadd.f32 %v4257_v17, %v1054_v21  ;;  %v4657_v23 = vpop.f32.mrb[1].mxu0 }
 0x11d   : > { %4681 = vmatpush3.xpose.msk.msra.mxu1 %vm1226_vm2, %v1136_v19 }
 0x11e   : > { %4685 = vmatprep.subr.mxu1 %v5343_v12 }
 0x120   : > { %4683 = vmatmul.mubr.msk.f32.vlgmr.msra.gmra.mrb[2].mxu1 %vm1226_vm2, %v1055_v22 }
 0x121   : > { %4687 = vmatprep.mubr.msk.f32.mxu1 %vm5342_vm0, %v5343_v12 }
 0x123   : > { %v1216_v40 = vpop.f32.mrb[2].mxu0 }
 0x124   : > { %v4679_v42 = vpop.f32.mrb[3].mxu0  ;;  %v1217_v43 = vadd.f32 %v4261_v41, %v1216_v40 }
 0x125   : > { %v4295_v42 = vld [vmem:[%s5406_s19] ss:$0 sm:$0xff] }
 0x126   : > { %4686 = vmatpush3.msra.mxu1 %v1217_v43 }
 0x127   : > { %4996 = vmatprep.subr.bf16.mxu1 %v5341_v4 }
 0x12b   : > { %v1469_v59 = vpop.f32.mrb[4].mxu0 }
 0x12c   : > { %v4700_v60 = vpop.f32.mrb[5].mxu0  ;;  %v1470_v5 = vadd.f32 %v4272_v0, %v1469_v59  ;;  %v1994_v0 = vld [vmem:[%s5421_s6 + $0x8] sm:$0xff] }
 0x12d   : > { %v2009_v60 = vld [vmem:[%s5421_s6 + $0x80] sm:$0xff] }
 0x133   : > { %v1635_v23 = vpop.f32.mrb[6].mxu0 }
 0x134   : > { %v4722_v25 = vpop.f32.mrb[7].mxu0  ;;  %v1636_v26 = vadd.f32 %v4286_v24, %v1635_v23  ;;  %v2018_v23 = vld [vmem:[%s5421_s6 + $0xc8] sm:$0xff] }
 0x1f3   : > { %v1299_v31 = vpop.f32.mrb[2].mxu1 }
 0x1f4   : > { %v1300_v32 = vadd.f32 %v5568_v30, %v1299_v31  ;;  %v4684_v33 = vpop.f32.mrb[3].mxu1 }
 0x1f5   : > { %v1389_v33 = vld [vmem:[%s5401_s14 + $0x8] sm:$0xff] }
 0x1f6   : > { %v1304_v34 = vsel %vm1303_vm3, %v1300_v32, -inf }
 0x1f7   : > { %1305 = vmax.xlane.f32.xlu0 %v1304_v34 }
 0x284   : > { %v1306_v35 = vpop.xlane.xlu0 %1305 }
 0x285   : > { %v1307_v36 = vsub.f32 %v1300_v32, %v1306_v35  ;;  %v1388_v32 = vld [vmem:[%s5401_s14] sm:$0xff] }
 0x286   : > { %v5012_v35 = vpack.c.bf16 %v1389_v33, %v1388_v32 }
 0x287   : > { %v1308_v37 = vmul.f32 1.442695, %v1307_v36 }
 0x289   : > { %5274 = vpow2.f32 %v1308_v37 }
 0x293   : > { %v5275_v38 = vpop.eup %5274 }
 0x294   : > { %v1310_v39 = vsel %vm1303_vm3, %v5275_v38, 0.0 }
 0x295   : > { %1311 = vadd.xlane.f32.xlu0 %v1310_v39 }
 0x322   : > { %v1312_v50 = vpop.xlane.xlu0 %1311 }
 0x323   : > { %5276 = vrcp.f32 %v1312_v50 }
 0x32d   : > { %v5277_v53 = vpop.eup %5276 }
 0x32e   : > { %v1314_v55 = vmul.f32 %v5277_v53, %v5275_v38 }
 0x330   : > { %4688 = vmatmul.mubr.msk.f32.vlgmr.msra.gmra.mrb[4].mxu1 %vm1303_vm3, %v1314_v55  ;;  %v2026_v55 = vld [vmem:[%s5421_s6 + $0x108] sm:$0xff] }
 0x331   : > { %4998 = vmatpush3.bf16.msra.mxu1 %v4997_v54  ;;  %4709 = vmatprep.mubr.msk.f32.mxu1 %vm5342_vm0, %v5343_v12  ;;  %v2025_v54 = vld [vmem:[%s5421_s6 + $0x100] sm:$0xff] }
 0x332   : > { %4999 = vmatprep.subr.bf16.mxu1 %v5341_v4  ;;  %v5047_v56 = vpack.c.bf16 %v2026_v55, %v2025_v54 }
 0x335   : > { %5001 = vmatpush3.bf16.msra.mxu1 %v5000_v58  ;;  %v2028_v58 = vld [vmem:[%s5421_s6 + $0x118] sm:$0xff] }
 0x336   : > { %4723 = vmatprep.subr.mxu1 %v5343_v12  ;;  %v5050_v59 = vpack.c.bf16 %v2028_v58, %v2027_v57 }
 0x338   : > { %4710 = vmatmul.mubr.msk.f32.vlgmr.msra.gmra.mrb[6].mxu1 %vm984_vm1, %v5537_v15 }
 0x339   : > { %4725 = vmatprep.mubr.msk.f32.mxu1 %vm5342_vm0, %v5343_v12 }
 0x403   : > { %v1384_v61 = vpop.f32.mrb[4].mxu1 }
 0x404   : > { %v4689_v62 = vpop.f32.mrb[5].mxu1 }
 0x405   : > { %v1993_v62 = vld [vmem:[%s5421_s6] sm:$0xff] }
 0x40b   : > { %v1552_v1 = vpop.f32.mrb[6].mxu1 }
 0x40c   : > { %v1553_v2 = vadd.f32 %v4279_v63, %v1552_v1  ;;  %v4711_v3 = vpop.f32.mrb[7].mxu1  ;;  %v2011_v1 = vld [vmem:[%s5421_s6 + $0x90] sm:$0xff] }
 0x40d   : > { %v5016_v3 = vpack.c.bf16 %v1994_v0, %v1993_v62  ;;  %v2024_v0 = vld [vmem:[%s5421_s6 + $0xf8] sm:$0xff] }
 0x40e   : > { %4724 = vmatpush3.xpose.msk.msra.mxu1 %vm1226_vm2, %v1553_v2  ;;  %v2012_v2 = vld [vmem:[%s5421_s6 + $0x98] sm:$0xff] }
 0x40f   : > { %4728 = vmatprep.subr.mxu1 %v5343_v12 }
 0x411   : > { %4726 = vmatmul.mubr.msk.f32.vlgmr.msra.gmra.mrb[8].mxu1 %vm1226_vm2, %v1470_v5  ;;  %v5018_v5 = vpack.c.bf16 %v2012_v2, %v2011_v1 }
 0x412   : > { %4730 = vmatprep.mubr.msk.f32.mxu1 %vm5342_vm0, %v5343_v12  ;;  %4729 = vmatpush3.msra.mxu1 %v1636_v26  ;;  %v2001_v26 = vld [vmem:[%s5421_s6 + $0x40] sm:$0xff] }
 0x413   : > { %5011 = vmatprep.subr.bf16.mxu1 %v5341_v4  ;;  %v5032_v28 = vpack.c.bf16 %v2002_v27, %v2001_v26 }
 0x4e4   : > { %v1711_v13 = vpop.f32.mrb[8].mxu1 }
 0x4e5   : > { %v1712_v14 = vadd.f32 %v5568_v30, %v1711_v13  ;;  %v4727_v16 = vpop.f32.mrb[9].mxu1  ;;  %v1997_v13 = vld [vmem:[%s5421_s6 + $0x20] sm:$0xff] }
 0x4e6   : > { %v2015_v16 = vld [vmem:[%s5421_s6 + $0xb0] sm:$0xff] }
 0x4e7   : > { %v1715_v17 = vsel %vm1303_vm3, %v1712_v14, -inf }
 0x4e8   : > { %1716 = vmax.xlane.f32.xlu1 %v1715_v17  ;;  %v2016_v17 = vld [vmem:[%s5421_s6 + $0xb8] sm:$0xff] }
 0x575   : > { %v1717_v18 = vpop.xlane.xlu1 %1716 }
 0x576   : > { %v1718_v19 = vsub.f32 %v1712_v14, %v1717_v18  ;;  %v1998_v14 = vld [vmem:[%s5421_s6 + $0x28] sm:$0xff] }
 0x577   : > { %v5024_v18 = vpack.c.bf16 %v1998_v14, %v1997_v13 }
 0x578   : > { %v1719_v20 = vmul.f32 1.442695, %v1718_v19  ;;  %v5026_v19 = vpack.c.bf16 %v2016_v17, %v2015_v16 }
 0x57a   : > { %5278 = vpow2.f32 %v1719_v20  ;;  %v1999_v20 = vld [vmem:[%s5421_s6 + $0x30] sm:$0xff] }
 0x584   : > { %v5279_v21 = vpop.eup %5278 }
 0x585   : > { %v1721_v22 = vsel %vm1303_vm3, %v5279_v21, 0.0 }
 0x586   : > { %1722 = vadd.xlane.f32.xlu1 %v1721_v22  ;;  %v2017_v22 = vld [vmem:[%s5421_s6 + $0xc0] sm:$0xff] }
 0x587   : > { %v5030_v25 = vpack.c.bf16 %v2018_v23, %v2017_v22  ;;  %v2242_v22 = vld [vmem:[%s6057_s26 + $0x8] sm:$0xff]  ;;  %v2243_v23 = vld [vmem:[%s6057_s26 + $0x10] sm:$0xff] }
 0x613   : > { %v1723_v31 = vpop.xlane.xlu1 %1722 }
 0x614   : > { %5280 = vrcp.f32 %v1723_v31 }
 0x61e   : > { %v5281_v34 = vpop.eup %5280 }
 0x61f   : > { %v1725_v36 = vmul.f32 %v5281_v34, %v5279_v21  ;;  %v2000_v21 = vld [vmem:[%s5421_s6 + $0x38] sm:$0xff]  ;;  %v4296_v34 = vld [vmem:[%s5411_s24] ss:$0 sm:$0xff] }
 0x620   : > { %v5028_v24 = vpack.c.bf16 %v2000_v21, %v1999_v20  ;;  %v2241_v21 = vld [vmem:[%s6057_s26] sm:$0xff] }
 0x621   : > { %4731 = vmatmul.mubr.msk.f32.vlgmr.msra.gmra.mrb[10].mxu1 %vm1303_vm3, %v1725_v36  ;;  %v4297_v36 = vld [vmem:[%s5416_s30] ss:$0 sm:$0xff] }
 0x622   : > { %5013 = vmatpush3.bf16.msra.mxu1 %v5012_v35  ;;  %4744 = vmatprep.mubr.msk.f32.mxu1 %vm5342_vm0, %v5343_v12 }
 0x623   : > { %5046 = vmatprep.subr.bf16.mxu1 %v5341_v4 }
 0x625   : > { %4745 = vmatmul.mubr.msk.f32.vlgmr.msra.gmra.mrb[12].mxu1 %vm1226_vm2, %v1384_v61  ;;  %v2010_v61 = vld [vmem:[%s5421_s6 + $0x88] sm:$0xff] }
 0x626   : > { %4755 = vmatprep.mubr.msk.f32.mxu1 %vm5342_vm0, %v5343_v12  ;;  %5048 = vmatpush3.bf16.msra.mxu1 %v5047_v56  ;;  %v5014_v63 = vpack.c.bf16 %v2010_v61, %v2009_v60 }
 0x627   : > { %5049 = vmatprep.subr.bf16.mxu1 %v5341_v4 }
 0x628   : > { %5015 = vmatprep.subr.bf16.mxu0 %v5014_v63  ;;  %v2023_v63 = vld [vmem:[%s5421_s6 + $0xf0] sm:$0xff] }
 0x629   : > { %v5042_v14 = vpack.c.bf16 %v2024_v0, %v2023_v63 }
 0x62a   : > { %5051 = vmatpush3.bf16.msra.mxu1 %v5050_v59 }
 0x62b   : > { %5052 = vmatprep.subr.bf16.mxu1 %v5341_v4 }
 0x6f4   : > { %v1795_v37 = vpop.f32.mrb[10].mxu1 }
 0x6f5   : > { %v4732_v38 = vpop.f32.mrb[11].mxu1  ;;  %4738 = vmatmul.mubr.msk.f32.vlgmr.msra.gmra.mrb[8].mxu0 %vm1226_vm2, %v1795_v37 }
 0x6f6   : > { %5017 = vmatpush3.bf16.msra.mxu0 %v5016_v3  ;;  %v2007_v3 = vld [vmem:[%s5421_s6 + $0x70] sm:$0xff] }
 0x6f7   : > { %5019 = vmatprep.subr.bf16.mxu0 %v5018_v5  ;;  %v2008_v5 = vld [vmem:[%s5421_s6 + $0x78] sm:$0xff] }
 0x6f8   : > { %v1944_v39 = vpop.f32.mrb[12].mxu1  ;;  %v5044_v16 = vpack.c.bf16 %v2008_v5, %v2007_v3 }
 0x6f9   : > { %v4746_v40 = vpop.f32.mrb[13].mxu1 }
 0x6fa   : > { %5021 = vmatpush3.bf16.msra.mxu0 %v5020_v10  ;;  %v2019_v40 = vld [vmem:[%s5421_s6 + $0xd0] sm:$0xff] }
 0x6fb   : > { %5023 = vmatprep.subr.bf16.mxu0 %v5022_v11 }
 0x6fe   : > { %5025 = vmatpush3.bf16.msra.mxu0 %v5024_v18 }
 0x6ff   : > { %5027 = vmatprep.subr.bf16.mxu0 %v5026_v19 }
 0x702   : > { %5029 = vmatpush3.bf16.msra.mxu0 %v5028_v24  ;;  %v5053_v24 = vpack.c.bf16 %v2242_v22, %v2241_v21  ;;  %v4314_v21 = vld [vmem:[%s5381_s25 + $0x58] sm:$0xff] }
 0x703   : > { %5031 = vmatprep.subr.bf16.mxu0 %v5030_v25  ;;  %v2244_v25 = vld [vmem:[%s6057_s26 + $0x18] sm:$0xff] }
 0x704   : > { %v5056_v26 = vpack.c.bf16 %v2244_v25, %v2243_v23 }
 0x706   : > { %5033 = vmatpush3.bf16.msra.mxu0 %v5032_v28 }
 0x7c8   : > { %v1871_v41 = vpop.f32.mrb[8].mxu0 }
 0x7c9   : > { %v1945_v43 = vadd.f32 %v1944_v39, %v1871_v41  ;;  %v4739_v44 = vpop.f32.mrb[9].mxu0  ;;  %v2020_v41 = vld [vmem:[%s5421_s6 + $0xd8] sm:$0xff] }
 0x7ca   : > { %v2004_v44 = vld [vmem:[%s5421_s6 + $0x58] sm:$0xff] }
 0x7cb   : > { %v1955_v45 = vadd.f32 %v4295_v42, %v1945_v43  ;;  %v5034_v42 = vpack.c.bf16 %v2020_v41, %v2019_v40  ;;  %v2003_v43 = vld [vmem:[%s5421_s6 + $0x50] sm:$0xff] }
 0x7cd   : > { %v1956_v46 = vadd.f32 %v1955_v45, %v5537_v15  ;;  %5035 = vmatprep.subr.bf16.mxu0 %v5034_v42 }
 0x7cf   : > { %v1959_v47 = vsel %vm984_vm1, %v1956_v46, 0.0 }
 0x7d0   : > { %1960 = vadd.xlane.f32.xlu0 %v1959_v47  ;;  %v2021_v47 = vld [vmem:[%s5421_s6 + $0xe0] sm:$0xff] }
 0x7e6   : > { %1989 = vperm.xlu0 %5243, %v972_v49   ;;  %v2005_v49 = vld [vmem:[%s5421_s6 + $0x60] sm:$0xff] }
 0x85d   : > { %v1961_v50 = vpop.xlane.xlu0 %1960 }
 0x85e   : > { %v1963_v51 = vmul.f32 0.03125, %v1961_v50 }
 0x860   : > { %v1964_v52 = vsub.f32 %v1956_v46, %v1963_v51  ;;  %v5036_v46 = vpack.c.bf16 %v2004_v44, %v2003_v43  ;;  %v5038_v51 = vpack.c.bf16 %v2022_v48, %v2021_v47 }
 0x862   : > { %v1965_v53 = vmul.f32 %v1964_v52, %v1964_v52  ;;  %5037 = vmatpush3.bf16.msra.mxu0 %v5036_v46 }
 0x863   : > { %5039 = vmatprep.subr.bf16.mxu0 %v5038_v51  ;;  %v2246_v51 = vld [vmem:[%s6057_s26 + $0x28] sm:$0xff] }
 0x864   : > { %v1966_v15 = vsel %vm984_vm1, %v1965_v53, 0.0 }
 0x865   : > { %1967 = vadd.xlane.f32.xlu1 %v1966_v15  ;;  %v5669_v38 = vpop.permute.xlu0 %1989 }
 0x8f2   : > { %v1968_v29 = vpop.xlane.xlu1 %1967 }
 0x8f3   : > { %v1969_v31 = vmul.f32 0.03125, %v1968_v29 }
 0x8f5   : > { %v1970_v32 = vadd.f32 1e-05, %v1969_v31 }
 0x8f7   : > { %5282 = vrsqrt.f32 %v1970_v32 }
 0x901   : > { %v5283_v33 = vpop.eup %5282 }
 0x902   : > { %v1972_v35 = vmul.f32 %v5283_v33, %v1964_v52  ;;  %v2006_v52 = vld [vmem:[%s5421_s6 + $0x68] sm:$0xff] }
 0x903   : > { %v5040_v53 = vpack.c.bf16 %v2006_v52, %v2005_v49 }
 0x904   : > { %v1979_v37 = vmul.f32 %v4296_v34, %v1972_v35 }
 0x905   : > { %5041 = vmatpush3.bf16.msra.mxu0 %v5040_v53  ;;  %v2247_v53 = vld [vmem:[%s6057_s26 + $0x30] sm:$0xff] }
 0x906   : > { %v1986_v39 = vadd.f32 %v4297_v36, %v1979_v37  ;;  %5043 = vmatprep.subr.bf16.mxu0 %v5042_v14  ;;  %v4311_v14 = vld [vmem:[%s5381_s25 + $0x40] sm:$0xff] }
 0x908   : > { %v5676_v45 = vmul.f32 %v5669_v38, %v1986_v39 }
 0x909   : > { %5045 = vmatpush3.bf16.msra.mxu0 %v5044_v16  ;;  %v4312_v16 = vld [vmem:[%s5381_s25 + $0x48] sm:$0xff] }
 0x90a   : > { %v2031_v50 = vrot.slane %v5676_v45, 4  ;;  %5070 = vmatprep.subr.bf16.mxu0 %v5341_v4 }
 0x90c   : > { %v5684_v15 = vsel %vm2033_vm4, 0.0, %v2031_v50  ;;  %v5687_v54 = vsel %vm2033_vm4, %v2031_v50, 0.0  ;;  %v2245_v50 = vld [vmem:[%s6057_s26 + $0x20] sm:$0xff] }
 0x90d   : > { %4756 = vmatmul.mubr.msk.f32.vlgmr.msra.gmra.mrb[14].mxu1 %vm984_vm1, %v5687_v54  ;;  %v2039_v55 = vrot.slane %v5684_v15, 1  ;;  %v2040_v56 = vrot.slane %v5687_v54, 1  ;;  %v2064_v57 = vrot.slane %v5684_v15, 5  ;;  %v2065_v58 = vrot.slane %v5687_v54, 5 }
 0x90e   : > { %v2046_v59 = vrot.slane %v5684_v15, 2  ;;  %v2047_v60 = vrot.slane %v5687_v54, 2  ;;  %v2071_v61 = vrot.slane %v5684_v15, 6  ;;  %v2072_v62 = vrot.slane %v5687_v54, 6  ;;  %4774 = vmatprep.mubr.msk.f32.mxu1 %vm5342_vm0, %v5343_v12  ;;  %5054 = vmatpush3.bf16.msra.mxu1 %v5053_v24 }
 0x90f   : > { %v2041_v1 = vsel %vm2038_vm5, %v2039_v55, %v2040_v56  ;;  %v2066_v2 = vsel %vm2063_vm6, %v2064_v57, %v2065_v58  ;;  %v2053_v8 = vrot.slane %v5684_v15, 3  ;;  %v2054_v9 = vrot.slane %v5687_v54, 3  ;;  %5055 = vmatprep.subr.bf16.mxu1 %v5341_v4  ;;  %v4298_v56 = vld [vmem:[%s6058_s2] ss:$0 sm:$0xff] }
 0x910   : > { %v5244_v6 = vpack.i.bf16 %v2041_v1, %v2066_v2  ;;  %v2048_v7 = vsel %vm2045_vm7, %v2046_v59, %v2047_v60  ;;  %v2073_v10 = vsel %vm2070_vm8, %v2071_v61, %v2072_v62  ;;  %v2078_v11 = vrot.slane %v5684_v15, 7  ;;  %v4300_v62 = vld [vmem:[%s6059_s10] ss:$0 sm:$0xff] }
 0x911   : > { %v2079_v13 = vrot.slane %v5687_v54, 7  ;;  %v5249_v17 = vpack.i.bf16 %v2048_v7, %v2073_v10  ;;  %v2055_v18 = vsel %vm2052_vm9, %v2053_v8, %v2054_v9  ;;  %v2059_v29 = vrot.slane %v5684_v15, 4  ;;  %v4304_v10 = vld [vmem:[%s5371_s17 + $0x40] sm:$0xff] }
 0x912   : > { %5245 = vrot.lane.b32.xlu1 %v5244_v6, %s6043_s23  ;;  %5057 = vmatpush3.bf16.msra.mxu1 %v5056_v26  ;;  %v2060_v31 = vrot.slane %v5687_v54, 4  ;;  %v5059_v52 = vpack.c.bf16 %v2246_v51, %v2245_v50 }
 0x913   : > { %v2080_v19 = vsel %vm2077_vm10, %v2078_v11, %v2079_v13  ;;  %5058 = vmatprep.subr.bf16.mxu1 %v5341_v4  ;;  %v4305_v11 = vld [vmem:[%s5371_s17 + $0x48] sm:$0xff] }
 0x914   : > { %v5254_v20 = vpack.i.bf16 %v2055_v18, %v2080_v19  ;;  %v2061_v37 = vsel %vm2033_vm4, %v2059_v29, %v2060_v31  ;;  %v5065_v13 = vpack.c.bf16 %v4305_v11, %v4304_v10  ;;  %v4307_v18 = vld [vmem:[%s5371_s17 + $0x58] sm:$0xff]  ;;  %v4313_v19 = vld [vmem:[%s5381_s25 + $0x50] sm:$0xff]  ;;  %v4303_v29 = vld [vmem:[%s6061_s11] ss:$0 sm:$0xff] }
 0x915   : > { %v5074_v22 = vpack.c.bf16 %v4314_v21, %v4313_v19 }
 0x916   : > { %5250 = vrot.lane.b32.xlu1 %v5249_v17, %s5346_s1  ;;  %5060 = vmatpush3.bf16.msra.mxu1 %v5059_v52  ;;  %v4306_v17 = vld [vmem:[%s5371_s17 + $0x50] sm:$0xff] }
 0x917   : > { %5061 = vmatprep.subr.bf16.mxu1 %v5341_v4 }
 0x91a   : > { %5255 = vrot.lane.b32.xlu1 %v5254_v20, %s5347_s28  ;;  %v5068_v20 = vpack.c.bf16 %v4307_v18, %v4306_v17  ;;  %v4337_v17 = vld [vmem:[%s5381_s25 + $0x60] sm:$0xff]  ;;  %v4338_v18 = vld [vmem:[%s5381_s25 + $0x68] sm:$0xff] }
 0x984   : > { %v5246_v27 = vpop.permute.xlu1 %5245 }
 0x985   : > { %v5248_v32 = vunpack.i.h.bf16 %v5246_v27  ;;  %v5247_v33 = vunpack.i.l.bf16 %v5246_v27  ;;  %v4302_v27 = vld [vmem:[%s6060_s7] ss:$0 sm:$0xff] }
 0x987   : > { %v2084_v39 = vsel %vm984_vm1, %v5684_v15, %v5248_v32  ;;  %v2089_v42 = vsel %vm984_vm1, %v2061_v37, %v5247_v33  ;;  %v2248_v15 = vld [vmem:[%s6057_s26 + $0x38] sm:$0xff]  ;;  %v4318_v32 = vld [vmem:[%s5391_s3 + $0x40] sm:$0xff]  ;;  %v4319_v33 = vld [vmem:[%s5391_s3 + $0x48] sm:$0xff] }
 0x988   : > { %v5251_v28 = vpop.permute.xlu1 %5250  ;;  %v5062_v54 = vpack.c.bf16 %v2248_v15, %v2247_v53  ;;  %v4320_v37 = vld [vmem:[%s5391_s3 + $0x50] sm:$0xff]  ;;  %v4333_v15 = vld [vmem:[%s5371_s17 + $0x78] sm:$0xff] }
 0x989   : > { %v5253_v34 = vunpack.i.h.bf16 %v5251_v28  ;;  %v5252_v35 = vunpack.i.l.bf16 %v5251_v28  ;;  %v4332_v53 = vld [vmem:[%s5371_s17 + $0x70] sm:$0xff] }
 0x98a   : > { %5063 = vmatpush3.bf16.msra.mxu1 %v5062_v54  ;;  %v4323_v54 = vld [vmem:[%s5396_s8 + $0x2] ss:$0 sm:$0xff] }
 0x98b   : > { %v2090_v43 = vsel %vm2085_vm11, %v2089_v42, %v5252_v35  ;;  %v2086_v44 = vsel %vm2085_vm11, %v2084_v39, %v5253_v34  ;;  %5064 = vmatprep.subr.bf16.mxu1 %v5341_v4  ;;  %v5077_v35 = vpack.c.bf16 %v4319_v33, %v4318_v32  ;;  %v4321_v39 = vld [vmem:[%s5391_s3 + $0x58] sm:$0xff]  ;;  %v4349_v33 = vld [vmem:[%s5396_s8 + $0x3] ss:$0 sm:$0xff] }
 0x98c   : > { %v5256_v36 = vpop.permute.xlu1 %5255 }
 0x98d   : > { %v5258_v40 = vunpack.i.h.bf16 %v5256_v36  ;;  %v5257_v41 = vunpack.i.l.bf16 %v5256_v36 }
 0x98f   : > { %v2091_v46 = vsel %vm2087_vm12, %v2090_v43, %v5257_v41  ;;  %v2088_v47 = vsel %vm2087_vm12, %v2086_v44, %v5258_v40  ;;  %v5080_v40 = vpack.c.bf16 %v4321_v39, %v4320_v37  ;;  %v4316_v41 = vld [vmem:[%s5386_s29 + $0x2] ss:$0 sm:$0xff] }
 0x990   : > { %2164 = vmatprep.mubr.f32.mxu0 %v2091_v46  ;;  %v4330_v44 = vld [vmem:[%s5371_s17 + $0x60] sm:$0xff]  ;;  %v4331_v46 = vld [vmem:[%s5371_s17 + $0x68] sm:$0xff] }
 0x991   : > { %2165 = vmatmul.mubr.f32.vlgmr.msra.gmra.mrb[10].mxu0 %v2088_v47  ;;  %v4309_v47 = vld [vmem:[%s5376_s21 + $0x2] ss:$0 sm:$0xff]  ;;  %v5083_v51 = vpack.c.bf16 %v4331_v46, %v4330_v44 }
 0x992   : > { %4796 = vmatprep.mubr.msk.f32.mxu0 %vm5342_vm0, %v5343_v12 }
 0x9e0   : > { %v2236_v48 = vpop.f32.mrb[14].mxu1 }
 0x9e1   : > { %v4757_v49 = vpop.f32.mrb[15].mxu1 }
 0xa64   : > { %v4506_v55 = vpop.f32.mrb[10].mxu0 }
 0xa65   : > { %v4507_v57 = vpop.f32.mrb[11].mxu0 }
 0xa66   : > { %v4508_v58 = vadd.f32 %v4507_v57, %v4506_v55  ;;  %v5086_v55 = vpack.c.bf16 %v4333_v15, %v4332_v53  ;;  %v4344_v57 = vld [vmem:[%s5391_s3 + $0x60] sm:$0xff] }
 0xa68   : > { %v2167_v59 = vadd.f32 %v4508_v58, %v4298_v56  ;;  %v4345_v58 = vld [vmem:[%s5391_s3 + $0x68] sm:$0xff] }
 0xa6a   : > { %v2237_v60 = vadd.f32 %v2236_v48, %v2167_v59 }
 0xa6c   : > { %v2240_v61 = vmax.f32 %v2237_v60, 0.0 }
 0xa6e   : > { %4775 = vmatmul.mubr.msk.f32.vlgmr.msra.gmra.mrb[16].mxu1 %vm2085_vm11, %v2240_v61  ;;  %v5095_v61 = vpack.c.bf16 %v4345_v58, %v4344_v57 }
 0xa6f   : > { %4785 = vmatprep.mubr.msk.f32.mxu1 %vm5342_vm0, %v5343_v12  ;;  %5066 = vmatpush3.bf16.msra.mxu1 %v5065_v13 }
 0xa70   : > { %5067 = vmatprep.subr.bf16.mxu1 %v5341_v4 }
 0xa73   : > { %5069 = vmatpush3.bf16.msra.mxu1 %v5068_v20  ;;  %v5089_v20 = vpack.c.bf16 %v4338_v18, %v4337_v17  ;;  %v4365_v18 = vld [vmem:[%s5421_s6 + $0x128] sm:$0xff] }
 0xa74   : > { %5076 = vmatprep.subr.bf16.mxu1 %v5341_v4 }
 0xb41   : > { %v2325_v63 = vpop.f32.mrb[16].mxu1 }
 0xb42   : > { %v2326_v0 = vadd.f32 %v4300_v62, %v2325_v63  ;;  %v4776_v1 = vpop.f32.mrb[17].mxu1  ;;  %v4346_v62 = vld [vmem:[%s5391_s3 + $0x70] sm:$0xff]  ;;  %v4347_v63 = vld [vmem:[%s5391_s3 + $0x78] sm:$0xff] }
 0xb44   : > { %v2329_v2 = vadd.f32 %v2326_v0, %v5676_v45  ;;  %v5071_v45 = vpack.c.bf16 %v4312_v16, %v4311_v14  ;;  %v5098_v0 = vpack.c.bf16 %v4347_v63, %v4346_v62 }
 0xb46   : > { %v2332_v3 = vsel %vm984_vm1, %v2329_v2, 0.0  ;;  %5072 = vmatpush3.bf16.msra.mxu0 %v5071_v45 }
 0xb47   : > { %2333 = vadd.xlane.f32.xlu1 %v2332_v3  ;;  %5073 = vmatprep.subr.bf16.mxu0 %v5341_v4 }
 0xb4a   : > { %5075 = vmatpush3.bf16.msra.mxu0 %v5074_v22  ;;  %v4339_v22 = vld [vmem:[%s5381_s25 + $0x70] sm:$0xff] }
 0xb4b   : > { %4810 = vmatprep.subr.mxu0 %v5343_v12 }
 0xbd4   : > { %v2334_v5 = vpop.xlane.xlu1 %2333 }
 0xbd5   : > { %v2335_v6 = vmul.f32 0.03125, %v2334_v5 }
 0xbd7   : > { %v2336_v7 = vsub.f32 %v2329_v2, %v2335_v6 }
 0xbd9   : > { %v2337_v8 = vmul.f32 %v2336_v7, %v2336_v7 }
 0xbdb   : > { %v2338_v9 = vsel %vm984_vm1, %v2337_v8, 0.0 }
 0xbdc   : > { %2339 = vadd.xlane.f32.xlu0 %v2338_v9 }
 0xc69   : > { %v2340_v23 = vpop.xlane.xlu0 %2339 }
 0xc6a   : > { %v2341_v24 = vmul.f32 0.03125, %v2340_v23  ;;  %v4340_v23 = vld [vmem:[%s5381_s25 + $0x78] sm:$0xff] }
 0xc6c   : > { %v2342_v25 = vadd.f32 1e-05, %v2341_v24  ;;  %v5092_v24 = vpack.c.bf16 %v4340_v23, %v4339_v22  ;;  %v4366_v23 = vld [vmem:[%s5421_s6 + $0x130] sm:$0xff] }
 0xc6e   : > { %5284 = vrsqrt.f32 %v2342_v25 }
 0xc78   : > { %v5285_v26 = vpop.eup %5284 }
 0xc79   : > { %v2344_v28 = vmul.f32 %v5285_v26, %v2336_v7 }
 0xc7b   : > { %v2351_v31 = vmul.f32 %v4302_v27, %v2344_v28  ;;  %v4342_v27 = vld [vmem:[%s5386_s29 + $0x3] ss:$0 sm:$0xff] }
 0xc7d   : > { %v2358_v34 = vadd.f32 %v4303_v29, %v2351_v31  ;;  %v4335_v29 = vld [vmem:[%s5376_s21 + $0x3] ss:$0 sm:$0xff] }
 0xc7f   : > { %v5768_v36 = vmul.f32 %v2358_v34, %v5669_v38 }
 0xc81   : > { %4786 = vmatmul.mubr.msk.f32.vlgmr.msra.gmra.mrb[18].mxu1 %vm984_vm1, %v5768_v36  ;;  %4797 = vmatmul.mubr.msk.f32.vlgmr.msra.gmra.mrb[12].mxu0 %vm984_vm1, %v5768_v36 }
 0xc82   : > { %5078 = vmatpush3.bf16.msra.mxu1 %v5077_v35  ;;  %4807 = vmatprep.mubr.msk.f32.mxu1 %vm5342_vm0, %v5343_v12 }
 0xc83   : > { %5079 = vmatprep.subr.bf16.mxu1 %v5341_v4  ;;  %4812 = vmatprep.mubr.msk.f32.mxu0 %vm5342_vm0, %v5343_v12 }
 0xc86   : > { %5081 = vmatpush3.bf16.msra.mxu1 %v5080_v40 }
 0xc87   : > { %4815 = vmatprep.subr.mxu1 %v5343_v12 }
 0xc89   : > { %4808 = vmatmul.mubr.msk.f32.vlgmr.msra.gmra.mrb[20].mxu1 %vm984_vm1, %v5768_v36 }
 0xc8a   : > { %4817 = vmatprep.mubr.msk.f32.mxu1 %vm5342_vm0, %v5343_v12 }
 0xd54   : > { %v2442_v42 = vpop.f32.mrb[18].mxu1  ;;  %v2525_v43 = vpop.f32.mrb[12].mxu0 }
 0xd55   : > { %v2526_v48 = vadd.f32 %v4316_v41, %v2525_v43  ;;  %v4787_v49 = vpop.f32.mrb[19].mxu1  ;;  %v4798_v50 = vpop.f32.mrb[13].mxu0  ;;  %v2443_v52 = vadd.f32 %v4309_v47, %v2442_v42 }
 0xd56   : > { %v4355_v49 = vld [vmem:[%s5401_s14 + $0x38] sm:$0xff] }
 0xd57   : > { %4811 = vmatpush3.xpose.msk.msra.mxu0 %vm1226_vm2, %v2526_v48  ;;  %v4354_v48 = vld [vmem:[%s5401_s14 + $0x30] sm:$0xff] }
 0xd58   : > { %5082 = vmatprep.subr.bf16.mxu0 %v5341_v4  ;;  %v5101_v50 = vpack.c.bf16 %v4355_v49, %v4354_v48  ;;  %v4391_v48 = vld [vmem:[%s5421_s6 + $0x1f8] sm:$0xff] }
 0xd5a   : > { %4813 = vmatmul.mubr.msk.f32.vlgmr.msra.gmra.mrb[14].mxu0 %vm1226_vm2, %v2443_v52  ;;  %v4329_v52 = vld [vmem:[%s5401_s14 + $0x28] sm:$0xff] }
 0xd5b   : > { %5084 = vmatpush3.bf16.msra.mxu0 %v5083_v51  ;;  %4828 = vmatprep.mubr.msk.f32.mxu0 %vm5342_vm0, %v5343_v12 }
 0xd5c   : > { %v2608_v56 = vpop.f32.mrb[20].mxu1  ;;  %5085 = vmatprep.subr.bf16.mxu0 %v5341_v4 }
 0xd5d   : > { %v2609_v59 = vadd.f32 %v4323_v54, %v2608_v56  ;;  %v4809_v60 = vpop.f32.mrb[21].mxu1 }
 0xd5e   : > { %v4359_v60 = vld [vmem:[%s5406_s19 + $0x1] ss:$0 sm:$0xff] }
 0xd5f   : > { %4816 = vmatpush3.msra.mxu1 %v2609_v59  ;;  %5087 = vmatpush3.bf16.msra.mxu0 %v5086_v55 }
 0xd60   : > { %5094 = vmatprep.subr.bf16.mxu0 %v5341_v4  ;;  %5088 = vmatprep.subr.bf16.mxu1 %v5341_v4 }
 0xd62   : > { %4829 = vmatmul.mubr.msk.f32.vlgmr.msra.gmra.mrb[16].mxu0 %vm984_vm1, %v5768_v36 }
 0xd63   : > { %5096 = vmatpush3.bf16.msra.mxu0 %v5095_v61  ;;  %4850 = vmatprep.mubr.msk.f32.mxu0 %vm5342_vm0, %v5343_v12 }
 0xd64   : > { %5097 = vmatprep.subr.bf16.mxu0 %v5341_v4 }
 0xd67   : > { %5099 = vmatpush3.bf16.msra.mxu0 %v5098_v0 }
 0xd68   : > { %5100 = vmatprep.subr.bf16.mxu0 %v5341_v4 }
 0xd6a   : > { %4851 = vmatmul.mubr.msk.f32.vlgmr.msra.gmra.mrb[18].mxu0 %vm984_vm1, %v5768_v36 }
 0xd6b   : > { %4867 = vmatprep.mubr.msk.f32.mxu0 %vm5342_vm0, %v5343_v12  ;;  %5102 = vmatpush3.bf16.msra.mxu0 %v5101_v50 }
 0xe2d   : > { %v2684_v1 = vpop.f32.mrb[14].mxu0 }
 0xe2e   : > { %v2685_v2 = vadd.f32 %v5568_v30, %v2684_v1  ;;  %v4814_v3 = vpop.f32.mrb[15].mxu0 }
 0xe30   : > { %v2688_v5 = vsel %vm1303_vm3, %v2685_v2, -inf }
 0xe31   : > { %2689 = vmax.xlane.f32.xlu1 %v2688_v5 }
 0xe35   : > { %v2854_v6 = vpop.f32.mrb[16].mxu0 }
 0xe36   : > { %v4830_v7 = vpop.f32.mrb[17].mxu0  ;;  %v2855_v34 = vadd.f32 %v4335_v29, %v2854_v6  ;;  %v4368_v29 = vld [vmem:[%s5421_s6 + $0x140] sm:$0xff] }
 0xe3d   : > { %v3020_v8 = vpop.f32.mrb[18].mxu0 }
 0xe3e   : > { %v4852_v9 = vpop.f32.mrb[19].mxu0  ;;  %v3021_v35 = vadd.f32 %v4349_v33, %v3020_v8  ;;  %v4396_v8 = vld [vmem:[%s5421_s6 + $0x220] sm:$0xff]  ;;  %v4387_v33 = vld [vmem:[%s5421_s6 + $0x1d8] sm:$0xff] }
 0xebe   : > { %v2690_v10 = vpop.xlane.xlu1 %2689 }
 0xebf   : > { %v2691_v11 = vsub.f32 %v2685_v2, %v2690_v10  ;;  %v4398_v10 = vld [vmem:[%s5421_s6 + $0x230] sm:$0xff] }
 0xec1   : > { %v2692_v13 = vmul.f32 1.442695, %v2691_v11  ;;  %v4399_v11 = vld [vmem:[%s5421_s6 + $0x238] sm:$0xff] }
 0xec3   : > { %5286 = vpow2.f32 %v2692_v13  ;;  %v5142_v13 = vpack.c.bf16 %v4399_v11, %v4398_v10 }
 0xecd   : > { %v5287_v14 = vpop.eup %5286 }
 0xece   : > { %v2694_v16 = vsel %vm1303_vm3, %v5287_v14, 0.0 }
 0xecf   : > { %2695 = vadd.xlane.f32.xlu1 %v2694_v16  ;;  %v4381_v16 = vld [vmem:[%s5421_s6 + $0x1a8] sm:$0xff] }
 0xf5c   : > { %v2696_v45 = vpop.xlane.xlu1 %2695 }
 0xf5d   : > { %5288 = vrcp.f32 %v2696_v45  ;;  %v4364_v45 = vld [vmem:[%s5421_s6 + $0x120] sm:$0xff] }
 0xf67   : > { %v5289_v19 = vpop.eup %5288 }
 0xf68   : > { %v2698_v21 = vmul.f32 %v5289_v19, %v5287_v14  ;;  %v4380_v14 = vld [vmem:[%s5421_s6 + $0x1a0] sm:$0xff]  ;;  %v4382_v19 = vld [vmem:[%s5421_s6 + $0x1b0] sm:$0xff] }
 0xf69   : > { %v5106_v17 = vpack.c.bf16 %v4381_v16, %v4380_v14 }
 0xf6a   : > { %4818 = vmatmul.mubr.msk.f32.vlgmr.msra.gmra.mrb[22].mxu1 %vm1303_vm3, %v2698_v21  ;;  %v5108_v21 = vpack.c.bf16 %v4365_v18, %v4364_v45 }
 0xf6b   : > { %5090 = vmatpush3.bf16.msra.mxu1 %v5089_v20  ;;  %4839 = vmatprep.mubr.msk.f32.mxu1 %vm5342_vm0, %v5343_v12  ;;  %v4383_v20 = vld [vmem:[%s5421_s6 + $0x1b8] sm:$0xff] }
 0xf6c   : > { %5091 = vmatprep.subr.bf16.mxu1 %v5341_v4  ;;  %v5110_v22 = vpack.c.bf16 %v4383_v20, %v4382_v19  ;;  %5107 = vmatprep.subr.bf16.mxu0 %v5106_v17 }
 0xf6f   : > { %5093 = vmatpush3.bf16.msra.mxu1 %v5092_v24  ;;  %v4367_v24 = vld [vmem:[%s5421_s6 + $0x138] sm:$0xff] }
 0xf70   : > { %4853 = vmatprep.subr.mxu1 %v5343_v12 }
 0xf72   : > { %4840 = vmatmul.mubr.msk.f32.vlgmr.msra.gmra.mrb[24].mxu1 %vm984_vm1, %v5768_v36 }
 0xf73   : > { %4855 = vmatprep.mubr.msk.f32.mxu1 %vm5342_vm0, %v5343_v12 }
0x103d   : > { %v2768_v25 = vpop.f32.mrb[22].mxu1 }
0x103e   : > { %v4819_v26 = vpop.f32.mrb[23].mxu1 }
0x103f   : > { %v4385_v26 = vld [vmem:[%s5421_s6 + $0x1c8] sm:$0xff] }
0x1045   : > { %v2937_v28 = vpop.f32.mrb[24].mxu1 }
0x1046   : > { %v2938_v31 = vadd.f32 %v4342_v27, %v2937_v28  ;;  %v4841_v32 = vpop.f32.mrb[25].mxu1  ;;  %v5112_v27 = vpack.c.bf16 %v4367_v24, %v4366_v23 }
0x1047   : > { %v4386_v32 = vld [vmem:[%s5421_s6 + $0x1d0] sm:$0xff] }
0x1048   : > { %4854 = vmatpush3.xpose.msk.msra.mxu1 %vm1226_vm2, %v2938_v31  ;;  %v4369_v31 = vld [vmem:[%s5421_s6 + $0x148] sm:$0xff] }
0x1049   : > { %4858 = vmatprep.subr.mxu1 %v5343_v12 }
0x104b   : > { %4856 = vmatmul.mubr.msk.f32.vlgmr.msra.gmra.mrb[26].mxu1 %vm1226_vm2, %v2855_v34  ;;  %v5116_v34 = vpack.c.bf16 %v4369_v31, %v4368_v29 }
0x104c   : > { %4859 = vmatpush3.msra.mxu1 %v3021_v35  ;;  %4860 = vmatprep.mubr.msk.f32.mxu1 %vm5342_vm0, %v5343_v12  ;;  %v5118_v35 = vpack.c.bf16 %v4387_v33, %v4386_v32 }
0x104d   : > { %5103 = vmatprep.subr.bf16.mxu1 %v5341_v4 }
0x111e   : > { %v3096_v37 = vpop.f32.mrb[26].mxu1 }
0x111f   : > { %v3097_v39 = vadd.f32 %v5568_v30, %v3096_v37  ;;  %v4857_v40 = vpop.f32.mrb[27].mxu1  ;;  %v4328_v30 = vld [vmem:[%s5401_s14 + $0x20] sm:$0xff]  ;;  %v4370_v37 = vld [vmem:[%s5421_s6 + $0x150] sm:$0xff] }
0x1120   : > { %v5104_v15 = vpack.c.bf16 %v4329_v52, %v4328_v30  ;;  %v4388_v40 = vld [vmem:[%s5421_s6 + $0x1e0] sm:$0xff]  ;;  %v4375_v30 = vld [vmem:[%s5421_s6 + $0x178] sm:$0xff] }
0x1121   : > { %v3100_v41 = vsel %vm1303_vm3, %v3097_v39, -inf }
0x1122   : > { %3101 = vmax.xlane.f32.xlu1 %v3100_v41  ;;  %v4389_v41 = vld [vmem:[%s5421_s6 + $0x1e8] sm:$0xff] }
0x11af   : > { %v3102_v42 = vpop.xlane.xlu1 %3101 }
0x11b0   : > { %v3103_v43 = vsub.f32 %v3097_v39, %v3102_v42  ;;  %v4371_v39 = vld [vmem:[%s5421_s6 + $0x158] sm:$0xff] }
0x11b1   : > { %v5120_v42 = vpack.c.bf16 %v4371_v39, %v4370_v37  ;;  %v4403_v37 = vld [vmem:[%s6057_s26 + $0x40] sm:$0xff]  ;;  %v4404_v39 = vld [vmem:[%s6057_s26 + $0x48] sm:$0xff] }
0x11b2   : > { %v3104_v44 = vmul.f32 1.442695, %v3103_v43  ;;  %v5122_v43 = vpack.c.bf16 %v4389_v41, %v4388_v40  ;;  %v4405_v40 = vld [vmem:[%s6057_s26 + $0x50] sm:$0xff]  ;;  %v5145_v41 = vpack.c.bf16 %v4404_v39, %v4403_v37  ;;  %v3748_v39 = vld [vmem:[%s6062_s16 + $0x40] sm:$0xff] }
0x11b4   : > { %5290 = vpow2.f32 %v3104_v44  ;;  %v4372_v44 = vld [vmem:[%s5421_s6 + $0x160] sm:$0xff] }
0x11be   : > { %v5291_v46 = vpop.eup %5290 }
0x11bf   : > { %v3106_v47 = vsel %vm1303_vm3, %v5291_v46, 0.0 }
0x11c0   : > { %3107 = vadd.xlane.f32.xlu1 %v3106_v47  ;;  %v4390_v47 = vld [vmem:[%s5421_s6 + $0x1f0] sm:$0xff] }
0x11c1   : > { %v5126_v50 = vpack.c.bf16 %v4391_v48, %v4390_v47 }
0x124d   : > { %v3108_v51 = vpop.xlane.xlu1 %3107 }
0x124e   : > { %5292 = vrcp.f32 %v3108_v51  ;;  %v4374_v51 = vld [vmem:[%s5421_s6 + $0x170] sm:$0xff] }
0x124f   : > { %v5128_v52 = vpack.c.bf16 %v4375_v30, %v4374_v51 }
0x1258   : > { %v5293_v53 = vpop.eup %5292 }
0x1259   : > { %v3110_v54 = vmul.f32 %v5293_v53, %v5291_v46  ;;  %v4373_v46 = vld [vmem:[%s5421_s6 + $0x168] sm:$0xff] }
0x125a   : > { %v5124_v49 = vpack.c.bf16 %v4373_v46, %v4372_v44 }
0x125b   : > { %4861 = vmatmul.mubr.msk.f32.vlgmr.msra.gmra.mrb[28].mxu1 %vm1303_vm3, %v3110_v54 }
0x125c   : > { %5105 = vmatpush3.bf16.msra.mxu1 %v5104_v15  ;;  %4874 = vmatprep.mubr.msk.f32.mxu1 %vm5342_vm0, %v5343_v12 }
0x125d   : > { %5138 = vmatprep.subr.bf16.mxu1 %v5341_v4 }
0x125f   : > { %4875 = vmatmul.mubr.msk.f32.vlgmr.msra.gmra.mrb[30].mxu1 %vm1226_vm2, %v2768_v25  ;;  %v4384_v25 = vld [vmem:[%s5421_s6 + $0x1c0] sm:$0xff] }
0x1260   : > { %4885 = vmatprep.mubr.msk.f32.mxu1 %vm5342_vm0, %v5343_v12  ;;  %v5114_v28 = vpack.c.bf16 %v4385_v26, %v4384_v25 }
0x132e   : > { %v3180_v55 = vpop.f32.mrb[28].mxu1 }
0x132f   : > { %v4862_v56 = vpop.f32.mrb[29].mxu1  ;;  %4868 = vmatmul.mubr.msk.f32.vlgmr.msra.gmra.mrb[20].mxu0 %vm1226_vm2, %v3180_v55 }
0x1330   : > { %5109 = vmatpush3.bf16.msra.mxu0 %v5108_v21  ;;  %v4362_v56 = vld [vmem:[%s5411_s24 + $0x1] ss:$0 sm:$0xff] }
0x1331   : > { %5111 = vmatprep.subr.bf16.mxu0 %v5110_v22 }
0x1332   : > { %v3329_v57 = vpop.f32.mrb[30].mxu1 }
0x1333   : > { %v4876_v58 = vpop.f32.mrb[31].mxu1 }
0x1334   : > { %5113 = vmatpush3.bf16.msra.mxu0 %v5112_v27  ;;  %v4363_v58 = vld [vmem:[%s5416_s30 + $0x1] ss:$0 sm:$0xff] }
0x1335   : > { %5115 = vmatprep.subr.bf16.mxu0 %v5114_v28 }
0x1338   : > { %5117 = vmatpush3.bf16.msra.mxu0 %v5116_v34 }
0x1339   : > { %5119 = vmatprep.subr.bf16.mxu0 %v5118_v35 }
0x133c   : > { %5121 = vmatpush3.bf16.msra.mxu0 %v5120_v42  ;;  %v4406_v42 = vld [vmem:[%s6057_s26 + $0x58] sm:$0xff] }
0x133d   : > { %5123 = vmatprep.subr.bf16.mxu0 %v5122_v43  ;;  %v5148_v43 = vpack.c.bf16 %v4406_v42, %v4405_v40  ;;  %v3749_v40 = vld [vmem:[%s6062_s16 + $0x48] sm:$0xff]  ;;  %v3750_v42 = vld [vmem:[%s6062_s16 + $0x50] sm:$0xff] }
0x1340   : > { %5125 = vmatpush3.bf16.msra.mxu0 %v5124_v49 }
0x1341   : > { %5127 = vmatprep.subr.bf16.mxu0 %v5126_v50 }
0x1344   : > { %5129 = vmatpush3.bf16.msra.mxu0 %v5128_v52 }
0x1402   : > { %v3256_v59 = vpop.f32.mrb[20].mxu0 }
0x1403   : > { %v3330_v61 = vadd.f32 %v3329_v57, %v3256_v59  ;;  %v4869_v62 = vpop.f32.mrb[21].mxu0 }
0x1404   : > { %v4393_v62 = vld [vmem:[%s5421_s6 + $0x208] sm:$0xff] }
0x1405   : > { %v3341_v63 = vadd.f32 %v4359_v60, %v3330_v61  ;;  %v4392_v61 = vld [vmem:[%s5421_s6 + $0x200] sm:$0xff] }
0x1407   : > { %v3342_v0 = vadd.f32 %v3341_v63, %v5768_v36  ;;  %v4397_v36 = vld [vmem:[%s5421_s6 + $0x228] sm:$0xff]  ;;  %v5130_v63 = vpack.c.bf16 %v4393_v62, %v4392_v61 }
0x1408   : > { %v5139_v9 = vpack.c.bf16 %v4397_v36, %v4396_v8  ;;  %v4378_v8 = vld [vmem:[%s5421_s6 + $0x190] sm:$0xff] }
0x1409   : > { %v3347_v1 = vsel %vm984_vm1, %v3342_v0, 0.0  ;;  %5131 = vmatprep.subr.bf16.mxu0 %v5130_v63  ;;  %v4407_v63 = vld [vmem:[%s6057_s26 + $0x60] sm:$0xff] }
0x140a   : > { %3348 = vadd.xlane.f32.xlu0 %v3347_v1  ;;  %5140 = vmatpush3.bf16.msra.mxu1 %v5139_v9  ;;  %v4377_v1 = vld [vmem:[%s5421_s6 + $0x188] sm:$0xff]  ;;  %v4379_v9 = vld [vmem:[%s5421_s6 + $0x198] sm:$0xff] }
0x140b   : > { %5141 = vmatprep.subr.bf16.mxu1 %v5341_v4  ;;  %v5136_v10 = vpack.c.bf16 %v4379_v9, %v4378_v8 }
0x140e   : > { %5143 = vmatpush3.bf16.msra.mxu1 %v5142_v13 }
0x140f   : > { %5144 = vmatprep.subr.bf16.mxu1 %v5341_v4 }
0x1497   : > { %v3349_v2 = vpop.xlane.xlu0 %3348 }
0x1498   : > { %v3350_v3 = vmul.f32 0.03125, %v3349_v2 }
0x149a   : > { %v5858_v5 = vsub.f32 %v3342_v0, %v3350_v3  ;;  %v4376_v0 = vld [vmem:[%s5421_s6 + $0x180] sm:$0xff] }
0x149b   : > { %v5132_v3 = vpack.c.bf16 %v4377_v1, %v4376_v0  ;;  %v4408_v0 = vld [vmem:[%s6057_s26 + $0x68] sm:$0xff] }
0x149c   : > { %v3352_v6 = vmul.f32 %v5858_v5, %v5858_v5  ;;  %v5151_v1 = vpack.c.bf16 %v4408_v0, %v4407_v63 }
0x149d   : > { %5133 = vmatpush3.bf16.msra.mxu0 %v5132_v3  ;;  %v4409_v3 = vld [vmem:[%s6057_s26 + $0x70] sm:$0xff] }
0x149e   : > { %v3353_v7 = vsel %vm984_vm1, %v3352_v6, 0.0  ;;  %v4394_v6 = vld [vmem:[%s5421_s6 + $0x210] sm:$0xff] }
0x149f   : > { %3354 = vadd.xlane.f32.xlu1 %v3353_v7  ;;  %v4395_v7 = vld [vmem:[%s5421_s6 + $0x218] sm:$0xff] }
0x152c   : > { %v3355_v53 = vpop.xlane.xlu1 %3354 }
0x152d   : > { %v3356_v15 = vmul.f32 0.03125, %v3355_v53 }
0x152f   : > { %v3357_v54 = vadd.f32 1e-05, %v3356_v15 }
0x1531   : > { %5294 = vrsqrt.f32 %v3357_v54 }
0x153b   : > { %v5295_v55 = vpop.eup %5294 }
0x153c   : > { %v3359_v57 = vmul.f32 %v5295_v55, %v5858_v5  ;;  %v5134_v5 = vpack.c.bf16 %v4395_v7, %v4394_v6  ;;  %v4410_v6 = vld [vmem:[%s6057_s26 + $0x78] sm:$0xff] }
0x153d   : > { %v5154_v7 = vpack.c.bf16 %v4410_v6, %v4409_v3  ;;  %v4418_v3 = vld [vmem:[%s6063_s18] ss:$0 sm:$0xff]  ;;  %s6066_s18 = sld [smem:[#allocation11_spill]] }
0x153e   : > { %v3366_v59 = vmul.f32 %v4362_v56, %v3359_v57  ;;  %5135 = vmatprep.subr.bf16.mxu0 %v5134_v5 }
0x153f   : > { %5137 = vmatpush3.bf16.msra.mxu0 %v5136_v10 }
0x1540   : > { %v3373_v60 = vadd.f32 %v4363_v58, %v3366_v59  ;;  %5174 = vmatprep.subr.bf16.mxu0 %v5341_v4 }
0x1542   : > { %v5901_v2 = vmul.f32 %v3373_v60, %v5669_v38 }
0x1544   : > { %v3415_v36 = vrot.slane %v5901_v2, 4 }
0x1546   : > { %v3417_v11 = vsel %vm2033_vm4, 0.0, %v3415_v36  ;;  %v3418_v13 = vsel %vm2033_vm4, %v3415_v36, 0.0  ;;  %v4401_v36 = vld [vmem:[%s6058_s2 + $0x1] ss:$0 sm:$0xff] }
0x1547   : > { %4886 = vmatmul.mubr.msk.f32.vlgmr.msra.gmra.mrb[32].mxu1 %vm984_vm1, %v3418_v13  ;;  %v3427_v14 = vrot.slane %v3417_v11, 2  ;;  %v3428_v16 = vrot.slane %v3418_v13, 2  ;;  %v3449_v45 = vrot.slane %v3417_v11, 6  ;;  %v3450_v17 = vrot.slane %v3418_v13, 6 }
0x1548   : > { %v3421_v18 = vrot.slane %v3417_v11, 1  ;;  %v3422_v19 = vrot.slane %v3418_v13, 1  ;;  %v3443_v20 = vrot.slane %v3417_v11, 5  ;;  %v3444_v21 = vrot.slane %v3418_v13, 5  ;;  %4904 = vmatprep.mubr.msk.f32.mxu1 %vm5342_vm0, %v5343_v12  ;;  %5146 = vmatpush3.bf16.msra.mxu1 %v5145_v41 }
0x1549   : > { %v3429_v22 = vsel %vm2045_vm7, %v3427_v14, %v3428_v16  ;;  %v3451_v23 = vsel %vm2070_vm8, %v3449_v45, %v3450_v17  ;;  %v3433_v24 = vrot.slane %v3417_v11, 3  ;;  %v3434_v25 = vrot.slane %v3418_v13, 3  ;;  %5147 = vmatprep.subr.bf16.mxu1 %v5341_v4  ;;  %v4412_v14 = vld [vmem:[%s6059_s10 + $0x1] ss:$0 sm:$0xff] }
0x154a   : > { %v5264_v26 = vpack.i.bf16 %v3429_v22, %v3451_v23  ;;  %v3423_v27 = vsel %vm2038_vm5, %v3421_v18, %v3422_v19  ;;  %v3445_v28 = vsel %vm2063_vm6, %v3443_v20, %v3444_v21  ;;  %v3455_v29 = vrot.slane %v3417_v11, 7 }
0x154b   : > { %v5259_v31 = vpack.i.bf16 %v3423_v27, %v3445_v28  ;;  %v3435_v32 = vsel %vm2052_vm9, %v3433_v24, %v3434_v25  ;;  %v3456_v33 = vrot.slane %v3418_v13, 7  ;;  %v3439_v44 = vrot.slane %v3417_v11, 4  ;;  %v3740_v25 = vld [vmem:[%s6062_s16] sm:$0xff]  ;;  %v3742_v27 = vld [vmem:[%s6062_s16 + $0x10] sm:$0xff] }
0x154c   : > { %5265 = vrot.lane.b32.xlu1 %v5264_v26, %s5346_s1  ;;  %5149 = vmatpush3.bf16.msra.mxu1 %v5148_v43  ;;  %v3440_v46 = vrot.slane %v3418_v13, 4  ;;  %v3741_v26 = vld [vmem:[%s6062_s16 + $0x8] sm:$0xff]  ;;  %v5169_v41 = vpack.c.bf16 %v3749_v40, %v3748_v39  ;;  %v3751_v43 = vld [vmem:[%s6062_s16 + $0x58] sm:$0xff]  ;;  %v4421_v40 = vld [vmem:[%s6066_s18] ss:$0 sm:$0xff]  ;;  %s6070_s18 = sld [smem:[#allocation15_spill]] }
0x154d   : > { %5260 = vrot.lane.b32.xlu0 %v5259_v31, %s6043_s23  ;;  %v3457_v34 = vsel %vm2077_vm10, %v3455_v29, %v3456_v33  ;;  %5150 = vmatprep.subr.bf16.mxu1 %v5341_v4  ;;  %v5157_v28 = vpack.c.bf16 %v3741_v26, %v3740_v25  ;;  %v3744_v31 = vld [vmem:[%s6062_s16 + $0x20] sm:$0xff] }
0x154e   : > { %v5269_v35 = vpack.i.bf16 %v3435_v32, %v3457_v34  ;;  %v3441_v52 = vsel %vm2033_vm4, %v3439_v44, %v3440_v46  ;;  %v3745_v32 = vld [vmem:[%s6062_s16 + $0x28] sm:$0xff]  ;;  %v3746_v34 = vld [vmem:[%s6062_s16 + $0x30] sm:$0xff]  ;;  %v5172_v44 = vpack.c.bf16 %v3751_v43, %v3750_v42 }
0x154f   : > { %v5163_v33 = vpack.c.bf16 %v3745_v32, %v3744_v31 }
0x1550   : > { %5270 = vrot.lane.b32.xlu1 %v5269_v35, %s5347_s28  ;;  %5152 = vmatpush3.bf16.msra.mxu1 %v5151_v1  ;;  %v3747_v35 = vld [vmem:[%s6062_s16 + $0x38] sm:$0xff]  ;;  %s6064_s28 = sld [smem:[#allocation12_spill]] }
0x1551   : > { %5153 = vmatprep.subr.bf16.mxu1 %v5341_v4  ;;  %v5166_v37 = vpack.c.bf16 %v3747_v35, %v3746_v34 }
0x1554   : > { %5155 = vmatpush3.bf16.msra.mxu1 %v5154_v7 }
0x1555   : > { %5156 = vmatprep.subr.bf16.mxu1 %v5341_v4 }
0x1556   : > { %v3763_v26 = vld [vmem:[%s6064_s28 + $0x40] sm:$0xff] }
0x15be   : > { %v5266_v47 = vpop.permute.xlu1 %5265 }
0x15bf   : > { %v5261_v48 = vpop.permute.xlu0 %5260  ;;  %v5268_v49 = vunpack.i.h.bf16 %v5266_v47  ;;  %v5267_v50 = vunpack.i.l.bf16 %v5266_v47 }
0x15c0   : > { %v5263_v51 = vunpack.i.h.bf16 %v5261_v48  ;;  %v5262_v30 = vunpack.i.l.bf16 %v5261_v48 }
0x15c2   : > { %v3461_v53 = vsel %vm984_vm1, %v3417_v11, %v5263_v51  ;;  %v5271_v15 = vpop.permute.xlu1 %5270  ;;  %v3464_v54 = vsel %vm984_vm1, %v3441_v52, %v5262_v30  ;;  %v4417_v30 = vld [vmem:[%s6061_s11 + $0x1] ss:$0 sm:$0xff] }
0x15c3   : > { %v5273_v55 = vunpack.i.h.bf16 %v5271_v15  ;;  %v5272_v56 = vunpack.i.l.bf16 %v5271_v15  ;;  %v3465_v57 = vsel %vm2085_vm11, %v3464_v54, %v5267_v50  ;;  %v3462_v58 = vsel %vm2085_vm11, %v3461_v53, %v5268_v49  ;;  %v4416_v50 = vld [vmem:[%s6060_s7 + $0x1] ss:$0 sm:$0xff] }
0x15c5   : > { %v3466_v59 = vsel %vm2087_vm12, %v3465_v57, %v5272_v56  ;;  %v3463_v60 = vsel %vm2087_vm12, %v3462_v58, %v5273_v55 }
0x15c6   : > { %3539 = vmatprep.mubr.f32.mxu0 %v3466_v59 }
0x15c7   : > { %3540 = vmatmul.mubr.f32.vlgmr.msra.gmra.mrb[22].mxu0 %v3463_v60 }
0x15c8   : > { %4958 = vmatprep.mubr.msk.f32.mxu0 %vm5342_vm0, %v5343_v12 }
0x161a   : > { %v3611_v61 = vpop.f32.mrb[32].mxu1 }
0x161b   : > { %v4887_v62 = vpop.f32.mrb[33].mxu1 }
0x169a   : > { %v4599_v8 = vpop.f32.mrb[22].mxu0 }
0x169b   : > { %v4600_v5 = vpop.f32.mrb[23].mxu0 }
0x169c   : > { %v4601_v9 = vadd.f32 %v4600_v5, %v4599_v8 }
0x169e   : > { %v3542_v10 = vadd.f32 %v4601_v9, %v4401_v36 }
0x16a0   : > { %v3612_v11 = vadd.f32 %v3611_v61, %v3542_v10 }
0x16a2   : > { %v3615_v13 = vmax.f32 %v3612_v11, 0.0 }
0x16a4   : > { %4905 = vmatmul.mubr.msk.f32.vlgmr.msra.gmra.mrb[34].mxu1 %vm2085_vm11, %v3615_v13 }
0x16a5   : > { %4931 = vmatprep.mubr.msk.f32.mxu1 %vm5342_vm0, %v5343_v12  ;;  %5158 = vmatpush3.bf16.msra.mxu1 %v5157_v28 }
0x16a6   : > { %5159 = vmatprep.subr.bf16.mxu1 %v5341_v4 }
0x1777   : > { %v3702_v16 = vpop.f32.mrb[34].mxu1 }
0x1778   : > { %v3703_v45 = vadd.f32 %v4412_v14, %v3702_v16  ;;  %v4906_v17 = vpop.f32.mrb[35].mxu1  ;;  %v3756_v16 = vld [vmem:[%s6064_s28 + $0x8] sm:$0xff] }
0x177a   : > { %v3706_v18 = vadd.f32 %v3703_v45, %v5901_v2  ;;  %v3743_v2 = vld [vmem:[%s6062_s16 + $0x18] sm:$0xff]  ;;  %v3757_v45 = vld [vmem:[%s6064_s28 + $0x10] sm:$0xff] }
0x177b   : > { %v5160_v29 = vpack.c.bf16 %v3743_v2, %v3742_v27  ;;  %v3764_v27 = vld [vmem:[%s6064_s28 + $0x48] sm:$0xff]  ;;  %v3765_v2 = vld [vmem:[%s6064_s28 + $0x50] sm:$0xff] }
0x177c   : > { %v3711_v19 = vsel %vm984_vm1, %v3706_v18, 0.0  ;;  %v5187_v28 = vpack.c.bf16 %v3764_v27, %v3763_v26 }
0x177d   : > { %3712 = vadd.xlane.f32.xlu0 %v3711_v19  ;;  %5161 = vmatpush3.bf16.msra.mxu1 %v5160_v29  ;;  %v3766_v29 = vld [vmem:[%s6064_s28 + $0x58] sm:$0xff] }
0x177e   : > { %5162 = vmatprep.subr.bf16.mxu1 %v5341_v4  ;;  %v5190_v31 = vpack.c.bf16 %v3766_v29, %v3765_v2 }
0x1781   : > { %5164 = vmatpush3.bf16.msra.mxu1 %v5163_v33 }
0x1782   : > { %5165 = vmatprep.subr.bf16.mxu1 %v5341_v4 }
0x1785   : > { %5167 = vmatpush3.bf16.msra.mxu1 %v5166_v37 }
0x1786   : > { %5168 = vmatprep.subr.bf16.mxu1 %v5341_v4 }
0x1789   : > { %5170 = vmatpush3.bf16.msra.mxu1 %v5169_v41 }
0x178a   : > { %5171 = vmatprep.subr.bf16.mxu1 %v5341_v4 }
0x178d   : > { %5173 = vmatpush3.bf16.msra.mxu1 %v5172_v44 }
0x178e   : > { %5192 = vmatprep.subr.bf16.mxu1 %v5341_v4 }
0x180a   : > { %v3713_v20 = vpop.xlane.xlu0 %3712 }
0x180b   : > { %v3714_v21 = vmul.f32 0.03125, %v3713_v20  ;;  %v3759_v20 = vld [vmem:[%s6064_s28 + $0x20] sm:$0xff] }
0x180d   : > { %v3715_v22 = vsub.f32 %v3706_v18, %v3714_v21  ;;  %v3758_v18 = vld [vmem:[%s6064_s28 + $0x18] sm:$0xff]  ;;  %v3760_v21 = vld [vmem:[%s6064_s28 + $0x28] sm:$0xff] }
0x180e   : > { %v5178_v19 = vpack.c.bf16 %v3758_v18, %v3757_v45 }
0x180f   : > { %v3716_v23 = vmul.f32 %v3715_v22, %v3715_v22 }
0x1811   : > { %v3717_v24 = vsel %vm984_vm1, %v3716_v23, 0.0  ;;  %v3761_v23 = vld [vmem:[%s6064_s28 + $0x30] sm:$0xff] }
0x1812   : > { %3718 = vadd.xlane.f32.xlu1 %v3717_v24  ;;  %v3762_v24 = vld [vmem:[%s6064_s28 + $0x38] sm:$0xff] }
0x1813   : > { %v5184_v25 = vpack.c.bf16 %v3762_v24, %v3761_v23 }
0x189f   : > { %v3719_v46 = vpop.xlane.xlu1 %3718 }
0x18a0   : > { %v3720_v47 = vmul.f32 0.03125, %v3719_v46 }
0x18a2   : > { %v3721_v48 = vadd.f32 1e-05, %v3720_v47 }
0x18a4   : > { %5296 = vrsqrt.f32 %v3721_v48 }
0x18ae   : > { %v5297_v49 = vpop.eup %5296 }
0x18af   : > { %v3723_v51 = vmul.f32 %v5297_v49, %v3715_v22  ;;  %v5181_v22 = vpack.c.bf16 %v3760_v21, %v3759_v20  ;;  %v5302_v20 = vld [vmem:[%s5637_s22] sm:$0xff] }
0x18b1   : > { %v3730_v52 = vmul.f32 %v4416_v50, %v3723_v51 }
0x18b3   : > { %v3737_v53 = vadd.f32 %v4417_v30, %v3730_v52 }
0x18b5   : > { %v3738_v15 = vmul.f32 %v3737_v53, %v5669_v38 }
0x18b7   : > { %v3776_v54 = vrot.slane %v3738_v15, 7  ;;  %3739 = vst.msk [vmem:[%s965_s27] sm:$0xff] %vm984_vm1, %v3738_v15  ;;  %s6065_s27 = sld [smem:[#allocation10_spill]] }
0x18b9   : > { %v3778_v55 = vsel %vm2077_vm10, 0.0, %v3776_v54  ;;  %v3779_v56 = vsel %vm2077_vm10, %v3776_v54, 0.0 }
0x18ba   : > { %v3788_v57 = vrot.slane %v3778_v55, 2  ;;  %v3789_v58 = vrot.slane %v3779_v56, 2  ;;  %v3782_v59 = vrot.slane %v3778_v55, 1  ;;  %v3783_v60 = vrot.slane %v3779_v56, 1 }
0x18bc   : > { %v3790_v61 = vsel %vm2045_vm7, %v3788_v57, %v3789_v58  ;;  %v3784_v62 = vsel %vm2038_vm5, %v3782_v59, %v3783_v60 }
0x18bd   : > { %3791 = vrot.lane.b32.xlu1 %v3790_v61, %s5346_s1  ;;  %3785 = vrot.lane.b32.xlu0 %v3784_v62, %s6043_s23  ;;  %v4420_v37 = vld [vmem:[%s6065_s27] ss:$0 sm:$0xff]  ;;  %s6067_s23 = sld [smem:[#allocation13_spill]]  ;;  %s6068_s27 = smov 32  }
0x192f   : > { %v3792_v38 = vpop.permute.xlu1 %3791  ;;  %v3786_v63 = vpop.permute.xlu0 %3785 }
0x1930   : > { %v3794_v0 = vsel %vm984_vm1, %v3778_v55, %v3786_v63  ;;  %v4422_v55 = vld [vmem:[%s6067_s23] ss:$0 sm:$0xff]  ;;  %s969_s23 = scalar_lea.vmem %s5504_s12, %s5533_s0 }
0x1931   : > { %v3795_v1 = vsel %vm2085_vm11, %v3794_v0, %v3792_v38 }
0x1932   : > { %4932 = vmatmul.mubr.msk.f32.vlgmr.msra.gmra.mrb[36].mxu1 %vm2087_vm12, %v3795_v1  ;;  %v3770_v1 = vld [vmem:[%s5491_s20] sm:$0xff] }
0x1933   : > { %4969 = vmatprep.mubr.msk.f32.mxu1 %vm5342_vm0, %v5343_v12  ;;  %v3755_v12 = vld [vmem:[%s6064_s28] sm:$0xff] }
0x1934   : > { %v5175_v17 = vpack.c.bf16 %v3756_v16, %v3755_v12  ;;  %v4425_v12 = vld [vmem:[%s6070_s18] ss:$0 sm:$0xff] }
0x1936   : > { %5176 = vmatpush3.bf16.msra.mxu0 %v5175_v17  ;;  %v4426_v17 = vld [vmem:[#allocation2] ss:$0 sm:$0xff] }
0x1937   : > { %5177 = vmatprep.subr.bf16.mxu0 %v5341_v4 }
0x193a   : > { %5179 = vmatpush3.bf16.msra.mxu0 %v5178_v19 }
0x193b   : > { %5180 = vmatprep.subr.bf16.mxu0 %v5341_v4 }
0x193e   : > { %5182 = vmatpush3.bf16.msra.mxu0 %v5181_v22 }
0x193f   : > { %5183 = vmatprep.subr.bf16.mxu0 %v5341_v4 }
0x1942   : > { %5185 = vmatpush3.bf16.msra.mxu0 %v5184_v25 }
0x1943   : > { %5186 = vmatprep.subr.bf16.mxu0 %v5341_v4 }
0x1946   : > { %5188 = vmatpush3.bf16.msra.mxu0 %v5187_v28 }
0x1947   : > { %5189 = vmatprep.subr.bf16.mxu0 %v5341_v4 }
0x194a   : > { %5191 = vmatpush3.bf16.msra.mxu0 %v5190_v31 }
0x1a05   : > { %v3871_v6 = vpop.f32.mrb[36].mxu1 }
0x1a06   : > { %v3872_v7 = vadd.f32 %v4418_v3, %v3871_v6  ;;  %v4933_v8 = vpop.f32.mrb[37].mxu1  ;;  %v3771_v3 = vld [vmem:[%s5491_s20 + $0x8] sm:$0xff] }
0x1a07   : > { %v5193_v6 = vpack.c.bf16 %v3771_v3, %v3770_v1  ;;  %v3773_v8 = vld [vmem:[%s5491_s20 + $0x18] sm:$0xff] }
0x1a08   : > { %v3875_v36 = vmax.f32 %v3872_v7, 0.0  ;;  %v3772_v7 = vld [vmem:[%s5491_s20 + $0x10] sm:$0xff] }
0x1a09   : > { %5194 = vmatpush3.bf16.msra.mxu1 %v5193_v6 }
0x1a0a   : > { %v3876_v5 = vsel %vm984_vm1, %v3875_v36, 0.0  ;;  %5195 = vmatprep.subr.bf16.mxu1 %v5341_v4 }
0x1a0b   : > { %3877 = vadd.xlane.f32.xlu0 %v3876_v5 }
0x1a98   : > { %v3878_v9 = vpop.xlane.xlu0 %3877 }
0x1a99   : > { %v3879_v10 = vmul.f32 0.03125, %v3878_v9 }
0x1a9b   : > { %v3880_v11 = vsub.f32 %v3875_v36, %v3879_v10  ;;  %v5196_v36 = vpack.c.bf16 %v3773_v8, %v3772_v7 }
0x1a9d   : > { %v3881_v13 = vmul.f32 %v3880_v11, %v3880_v11  ;;  %5197 = vmatpush3.bf16.msra.mxu1 %v5196_v36 }
0x1a9f   : > { %v3882_v14 = vsel %vm984_vm1, %v3881_v13, 0.0 }
0x1aa0   : > { %3883 = vadd.xlane.f32.xlu1 %v3882_v14 }
0x1b2d   : > { %v3884_v32 = vpop.xlane.xlu1 %3883 }
0x1b2e   : > { %v3885_v33 = vmul.f32 0.03125, %v3884_v32 }
0x1b30   : > { %v3886_v34 = vadd.f32 1e-05, %v3885_v33 }
0x1b32   : > { %5298 = vrsqrt.f32 %v3886_v34 }
0x1b3c   : > { %v5299_v35 = vpop.eup %5298 }
0x1b3d   : > { %v3888_v39 = vmul.f32 %v5299_v35, %v3880_v11 }
0x1b3f   : > { %v3895_v41 = vmul.f32 %v4420_v37, %v3888_v39 }
0x1b41   : > { %v3902_v42 = vadd.f32 %v4421_v40, %v3895_v41 }
0x1b43   : > { %v3904_v43 = vrot.slane %v3902_v42, 7 }
0x1b45   : > { %v3906_v44 = vsel %vm2077_vm10, 0.0, %v3904_v43  ;;  %v3907_v46 = vsel %vm2077_vm10, %v3904_v43, 0.0 }
0x1b46   : > { %v3916_v47 = vrot.slane %v3906_v44, 2  ;;  %v3917_v48 = vrot.slane %v3907_v46, 2  ;;  %v3910_v49 = vrot.slane %v3906_v44, 1  ;;  %v3911_v50 = vrot.slane %v3907_v46, 1 }
0x1b48   : > { %v3918_v51 = vsel %vm2045_vm7, %v3916_v47, %v3917_v48  ;;  %v3912_v30 = vsel %vm2038_vm5, %v3910_v49, %v3911_v50 }
0x1b49   : > { %3919 = vrot.lane.b32.xlu1 %v3918_v51, %s5346_s1  ;;  %3913 = vrot.lane.b32.xlu0 %v3912_v30, %s6068_s27  ;;  %s6069_s1 = sld [smem:[#allocation14_spill]] }
0x1b4f   : > { %v4424_v13 = vld [vmem:[%s6069_s1] ss:$0 sm:$0xff] }
0x1bbb   : > { %v3920_v52 = vpop.permute.xlu1 %3919  ;;  %v3914_v53 = vpop.permute.xlu0 %3913 }
0x1bbc   : > { %v3922_v15 = vsel %vm984_vm1, %v3906_v44, %v3914_v53 }
0x1bbd   : > { %v3923_v54 = vsel %vm2085_vm11, %v3922_v15, %v3920_v52 }
0x1bbe   : > { %4959 = vmatmul.mubr.msk.f32.vlgmr.msra.gmra.mrb[24].mxu0 %vm2087_vm12, %v3923_v54 }
0x1c91   : > { %v3999_v56 = vpop.f32.mrb[24].mxu0 }
0x1c92   : > { %v4000_v57 = vadd.f32 %v4422_v55, %v3999_v56  ;;  %v4960_v58 = vpop.f32.mrb[25].mxu0 }
0x1c94   : > { %v4003_v59 = vmax.f32 %v4000_v57, 0.0 }
0x1c96   : > { %v4004_v60 = vsel %vm984_vm1, %v4003_v59, 0.0 }
0x1c97   : > { %4005 = vadd.xlane.f32.xlu0 %v4004_v60 }
0x1d24   : > { %v4006_v61 = vpop.xlane.xlu0 %4005 }
0x1d25   : > { %v4007_v62 = vmul.f32 0.03125, %v4006_v61 }
0x1d27   : > { %v4008_v38 = vsub.f32 %v4003_v59, %v4007_v62 }
0x1d29   : > { %v4009_v63 = vmul.f32 %v4008_v38, %v4008_v38 }
0x1d2b   : > { %v4010_v0 = vsel %vm984_vm1, %v4009_v63, 0.0 }
0x1d2c   : > { %4011 = vadd.xlane.f32.xlu1 %v4010_v0 }
0x1db9   : > { %v4012_v5 = vpop.xlane.xlu1 %4011 }
0x1dba   : > { %v4013_v9 = vmul.f32 0.03125, %v4012_v5 }
0x1dbc   : > { %v4014_v10 = vadd.f32 1e-05, %v4013_v9 }
0x1dbe   : > { %5300 = vrsqrt.f32 %v4014_v10 }
0x1dc8   : > { %v5301_v11 = vpop.eup %5300 }
0x1dc9   : > { %v4016_v14 = vmul.f32 %v5301_v11, %v4008_v38 }
0x1dcb   : > { %v4023_v16 = vmul.f32 %v4424_v13, %v4016_v14 }
0x1dcd   : > { %v4030_v45 = vadd.f32 %v4425_v12, %v4023_v16 }
0x1dcf   : > { %4970 = vmatmul.mubr.msk.f32.vlgmr.msra.gmra.mrb[38].mxu1 %vm984_vm1, %v4030_v45 }
0x1ea2   : > { %v4106_v18 = vpop.f32.mrb[38].mxu1 }
0x1ea3   : > { %v4107_v19 = vadd.f32 %v4426_v17, %v4106_v18  ;;  %v4971_v4 = vpop.f32.mrb[39].mxu1 }
0x1ea5   : > { %v4110_v21 = vmul.f32 %v5302_v20, %v4107_v19 }
0x1ea7   : > { %4112 = vst.msk [vmem:[%s969_s23] sm:$0xff] %vm4111_vm13, %v4110_v21 }
0x1ea8 PF: > { %s74_s15 = sadd.s32 1, %s5309_s15  }
0x1ea9   : > { %p71_p4 = scmp.ge.s32.totalorder %s74_s15, 4  }
0x1eab   :  { %73 = sbr.rel (!%p71_p4) target bundleno = 55 (0x37), region = 244 }

// kernel: fastspeech2_forward.5
= control target key start
LH: loop header
LB: loop body
LE: loop exit
PB: predicated region body
PF: predicated region fallthrough
CT: control target
= control target key end

     0   :  { %s8460_s27 = smov 0   ;;  %s10539_s0 = inlined_call_operand.vmem [shape: f32[2,32,32], index: 0, kind: input, shape index: {}]   ;;  %s10540_s1 = inlined_call_operand.vmem [shape: f32[2,1,32], index: 1, kind: input, shape index: {}]   ;;  %s10541_s2 = inlined_call_operand.vmem [shape: f32[2,32,1], index: 2, kind: input, shape index: {}]   ;;  %s10542_s3 = inlined_call_operand.vmem [shape: f32[2,2,32,16], index: 3, kind: input, shape index: {}]   ;;  %s10543_s4 = inlined_call_operand.vmem [shape: f32[2,2,1,16], index: 4, kind: input, shape index: {}]   ;;  %s10544_s5 = inlined_call_operand.vmem [shape: f32[2,2,32,16], index: 5, kind: input, shape index: {}]   ;;  %s10545_s6 = inlined_call_operand.vmem [shape: f32[2,2,1,16], index: 6, kind: input, shape index: {}]   ;;  %s10546_s7 = inlined_call_operand.vmem [shape: f32[2,2,32,16], index: 7, kind: input, shape index: {}]   ;;  %s10547_s8 = inlined_call_operand.vmem [shape: f32[2,2,1,16], index: 8, kind: input, shape index: {}]   ;;  %s10548_s9 = inlined_call_operand.vmem [shape: f32[2,2,16,32], index: 9, kind: input, shape index: {}]   ;;  %s10549_s10 = inlined_call_operand.vmem [shape: f32[2,1,32], index: 10, kind: input, shape index: {}]   ;;  %s10550_s11 = inlined_call_operand.vmem [shape: f32[2,1,32], index: 11, kind: input, shape index: {}]   ;;  %s10551_s12 = inlined_call_operand.vmem [shape: f32[2,1,32], index: 12, kind: input, shape index: {}]   ;;  %s10552_s13 = inlined_call_operand.vmem [shape: f32[2,288,64], index: 13, kind: input, shape index: {}]   ;;  %s10553_s14 = inlined_call_operand.vmem [shape: f32[2,1,64], index: 14, kind: input, shape index: {}]   ;;  %s10554_s15 = inlined_call_operand.vmem [shape: f32[2,64,32], index: 15, kind: input, shape index: {}]   ;;  %s10555_s16 = inlined_call_operand.vmem [shape: f32[2,1,32], index: 16, kind: input, shape index: {}]   ;;  %s10556_s17 = inlined_call_operand.vmem [shape: f32[2,1,32], index: 17, kind: input, shape index: {}]   ;;  %s10557_s18 = inlined_call_operand.vmem [shape: f32[2,1,32], index: 18, kind: input, shape index: {}]   ;;  %s10558_s19 = inlined_call_operand.vmem [shape: f32[32,32], index: 19, kind: input, shape index: {}]   ;;  %s10559_s20 = inlined_call_operand.vmem [shape: f32[1,32], index: 20, kind: input, shape index: {}]   ;;  %s10560_s21 = inlined_call_operand.vmem [shape: f32[5,160,32], index: 21, kind: input, shape index: {}]   ;;  %s10561_s22 = inlined_call_operand.vmem [shape: f32[5,1,32], index: 22, kind: input, shape index: {}]   ;;  %s10562_s23 = inlined_call_operand.vmem [shape: f32[5,1,32], index: 23, kind: input, shape index: {}]   ;;  %s10563_s24 = inlined_call_operand.vmem [shape: f32[5,1,32], index: 24, kind: input, shape index: {}]   ;;  %s10564_s25 = inlined_call_operand.vmem [shape: f32[2,32,16], index: 25, kind: output, shape index: {0}]   ;;  %s10565_s26 = inlined_call_operand.vmem [shape: f32[2,32,16], index: 26, kind: output, shape index: {1}]  }
   0x1   :  { %10587 = sst [smem:[#allocation3_spill]] %s10539_s0 }
   0x2   :  { %10588 = sst [smem:[#allocation4_spill]] %s10540_s1 }
   0x3   :  { %10589 = sst [smem:[#allocation5_spill]] %s10541_s2 }
   0x4   :  { %10590 = sst [smem:[#allocation6_spill]] %s10542_s3 }
   0x5   :  { %10591 = sst [smem:[#allocation7_spill]] %s10543_s4 }
   0x6   :  { %10592 = sst [smem:[#allocation8_spill]] %s10544_s5 }
   0x7   :  { %10593 = sst [smem:[#allocation9_spill]] %s10545_s6 }
   0x8   :  { %10594 = sst [smem:[#allocation10_spill]] %s10546_s7 }
   0x9   :  { %10595 = sst [smem:[#allocation11_spill]] %s10547_s8 }
   0xa   :  { %10596 = sst [smem:[#allocation12_spill]] %s10548_s9 }
   0xb   :  { %10597 = sst [smem:[#allocation13_spill]] %s10549_s10 }
   0xc   :  { %10598 = sst [smem:[#allocation14_spill]] %s10559_s20 }
   0xd   :  { %10599 = sst [smem:[#allocation15_spill]] %s10561_s22 }
   0xe   :  { %10600 = sst [smem:[#allocation16_spill]] %s10562_s23 }
   0xf   :  { %10601 = sst [smem:[#allocation17_spill]] %s10563_s24 }
  0x10   :  { %10602 = sst [smem:[#allocation18_spill]] %s10564_s25 }
  0x11   :  { %10603 = sst [smem:[#allocation19_spill]] %s10565_s26 }
  0x12 LB: > { %10604 = sst [smem:[#allocation2_spill]] %s8318_s27  ;;  %s6374_s3 = sadd.s32 4294967295, %s8318_s27   ;;  %s8318_s27 = sphi %s8460_s27, %s37_s27  }
  0x13   : > { %p6378_p0 = scmp.ge.s32.totalorder %s8318_s27, 1  ;;  %p733_p1 = scmp.lt.s32.totalorder %s8318_s27, 3 }
  0x15   : > { %p734_p2 = pnand %p6378_p0, %p733_p1 }
  0x16   : > { %s10605_s8 = sld [smem:[#allocation8_spill]] (!%p734_p2)  ;;  %p816_p3 = scmp.lt.s32.totalorder (!%p734_p2), %s6374_s3, 1  ;;  %vm859_vm0 = vcmask (!%p734_p2), 261120   ;;  %vm1155_vm1 = vcmask (!%p734_p2), 130048   ;;  %vm2304_vm3 = vcmask (!%p734_p2), 1043456   ;;  %vm2321_vm4 = vcmask (!%p734_p2), 1046528  }
  0x17   : > { %737 = sbr.rel (%p734_p2) target bundleno = 8449 (0x2101), region = 120  ;;  %s10606_s6 = sld [smem:[#allocation6_spill]] (!%p734_p2)  ;;  %vm8535_vm2 = vmpackc.low (!%p734_p2), %vm1155_vm1, %vm1155_vm1  ;;  %vm2400_vm5 = vcmask (!%p734_p2), 1042432   ;;  %vm2365_vm6 = vcmask (!%p734_p2), 1044480   ;;  %vm2444_vm7 = vcmask (!%p734_p2), 1040384   ;;  %vm2343_vm8 = vcmask (!%p734_p2), 1045504  }
  0x18   : > { %s10607_s5 = sld [smem:[#allocation3_spill]] (!%p734_p2)  ;;  %s10608_s28 = sld [smem:[#allocation9_spill]] (!%p734_p2)  ;;  %vm2422_vm9 = vcmask (!%p734_p2), 1041408   ;;  %vm2470_vm10 = vcmask (!%p734_p2), 523264   ;;  %vm2475_vm11 = vcmask (!%p734_p2), 785408  }
  0x19   : > { %s10609_s0 = sld [smem:[#allocation7_spill]] (!%p734_p2)  ;;  %s10614_s2 = sld [smem:[#allocation11_spill]] (!%p734_p2) }
  0x1a   : > { %s10615_s29 = sld [smem:[#allocation12_spill]] (!%p734_p2)  ;;  %s10580_s30 = smov (!%p734_p2), 32  }
  0x1b   : > { %s10578_s27 = smov (!%p734_p2), 96   ;;  %s10582_s26 = smov (!%p734_p2), 64  }
  0x1c   : > { %v957_v0 = vld [vmem:[%s10605_s8] sm:$0xff] (!%p734_p2)  ;;  %v958_v1 = vld [vmem:[%s10605_s8 + $0x8] sm:$0xff] (!%p734_p2)  ;;  %v959_v2 = vld [vmem:[%s10605_s8 + $0x10] sm:$0xff] (!%p734_p2)  ;;  %s10618_s23 = smov (!%p734_p2), 32   ;;  %s10619_s20 = smov (!%p734_p2), 96  }
  0x1d   : > { %v7511_v3 = vpack.c.bf16 (!%p734_p2), %v958_v1, %v957_v0  ;;  %v960_v4 = vld [vmem:[%s10605_s8 + $0x18] sm:$0xff] (!%p734_p2)  ;;  %v848_v5 = vld [vmem:[%s10606_s6] sm:$0xff] (!%p734_p2)  ;;  %v849_v6 = vld [vmem:[%s10606_s6 + $0x8] sm:$0xff] (!%p734_p2)  ;;  %s10621_s22 = sld [smem:[#allocation18_spill]] (!%p734_p2)  ;;  %s10623_s4 = sld [smem:[#allocation16_spill]] (!%p734_p2) }
  0x1e   : > { %v7515_v7 = vpack.c.bf16 %v960_v4, %v959_v2  ;;  %s10629_s3 = smov (!%p816_p3, %s6374_s3), 1  ;;  %v7503_v8 = vpack.c.bf16 %v849_v6, %v848_v5  ;;  %v850_v9 = vld [vmem:[%s10606_s6 + $0x10] sm:$0xff]  ;;  %v851_v10 = vld [vmem:[%s10606_s6 + $0x18] sm:$0xff]  ;;  %v6392_v16 = vld [vmem:[%s10608_s28] ss:$0 sm:$0xff]  ;;  %s10625_s24 = sld [smem:[#allocation17_spill]] }
  0x1f   : > { %7512 = vmatprep.subr.bf16.mxu1 %v7511_v3  ;;  %v7507_v11 = vpack.c.bf16 %v851_v10, %v850_v9  ;;  %s8495_s9 = sshll.u32 %s10629_s3, 5  ;;  %v6387_v18 = vld [vmem:[%s10609_s0] ss:$0 sm:$0xff]  ;;  %v6426_v57 = vld [vmem:[%s10605_s8 + $0x28] sm:$0xff] }
  0x20   : > { %7514 = vmatpush3.bf16.msra.mxu1 %v7511_v3  ;;  %7504 = vmatprep.subr.bf16.mxu0 %v7503_v8  ;;  %s820_s10 = scalar_lea.vmem %s10607_s5, %s8495_s9  ;;  %s10612_s5 = sld [smem:[#allocation10_spill]]  ;;  %v6425_v56 = vld [vmem:[%s10605_s8 + $0x20] sm:$0xff] }
  0x21   : > { %7516 = vmatprep.subr.bf16.mxu1 %v7515_v7  ;;  %7506 = vmatpush3.bf16.msra.mxu0 %v7503_v8  ;;  %v8501_v12 = vld [vmem:[%s820_s10] sm:$0xff]  ;;  %v8507_v13 = vld [vmem:[%s820_s10 + $0x8] sm:$0xff]  ;;  %v8509_v14 = vld [vmem:[%s820_s10 + $0x10] sm:$0xff]  ;;  %v7555_v58 = vpack.c.bf16 %v6426_v57, %v6425_v56 }
  0x22   : > { %7508 = vmatprep.subr.bf16.mxu0 %v7507_v11  ;;  %7119 = vmatprep.mubr.msk.f32.mxu1 %vm859_vm0, %v8501_v12  ;;  %v8515_v15 = vld [vmem:[%s820_s10 + $0x18] sm:$0xff]  ;;  %s10613_s10 = sld [smem:[#allocation4_spill]] }
  0x23   : > { %7105 = vmatprep.mubr.msk.f32.mxu0 %vm859_vm0, %v8501_v12 }
  0x24   : > { %7518 = vmatpush3.bf16.msra.mxu1 %v7515_v7 }
  0x25   : > { %7510 = vmatpush3.bf16.msra.mxu0 %v7507_v11 }
  0x26   : > { %v1053_v37 = vld [vmem:[%s10612_s5] sm:$0xff]  ;;  %v1054_v38 = vld [vmem:[%s10612_s5 + $0x8] sm:$0xff]  ;;  %v1055_v39 = vld [vmem:[%s10612_s5 + $0x10] sm:$0xff] }
  0x27   : > { %7120 = vmatmul.mubr.msk.f32.vlgmr.msra.gmra.mrb[0].mxu1 %vm859_vm0, %v8507_v13  ;;  %v7519_v40 = vpack.c.bf16 %v1054_v38, %v1053_v37  ;;  %v1056_v41 = vld [vmem:[%s10612_s5 + $0x18] sm:$0xff] }
  0x28   : > { %7122 = vmatprep.mubr.msk.f32.mxu1 %vm859_vm0, %v8509_v14  ;;  %7106 = vmatmul.mubr.msk.f32.vlgmr.msra.gmra.mrb[0].mxu0 %vm859_vm0, %v8507_v13  ;;  %v7523_v42 = vpack.c.bf16 %v1056_v41, %v1055_v39  ;;  %s8575_s1 = scalar_lea.vmem %s10613_s10, %s10629_s3  ;;  %s10616_s10 = sld [smem:[#allocation13_spill]] }
  0x29   : > { %7108 = vmatprep.mubr.msk.f32.mxu0 %vm859_vm0, %v8509_v14  ;;  %7520 = vmatprep.subr.bf16.mxu0 %v7519_v40  ;;  %v8578_v43 = vld [vmem:[%s8575_s1] ss:$0 sm:$0xff]  ;;  %s10617_s3 = sld [smem:[#allocation5_spill]] }
  0x2a   : > { %7522 = vmatpush3.bf16.msra.mxu0 %v7519_v40 }
  0x2b   : > { %7123 = vmatmul.mubr.msk.f32.gmra.mrb[2].mxu1 %vm859_vm0, %v8515_v15  ;;  %7524 = vmatprep.subr.bf16.mxu0 %v7523_v42 }
  0x2c   : > { %7109 = vmatmul.mubr.msk.f32.gmra.mrb[2].mxu0 %vm859_vm0, %v8515_v15 }
  0x2d   : > { %7133 = vmatprep.mubr.msk.f32.mxu0 %vm859_vm0, %v8501_v12 }
  0x2e   : > { %7526 = vmatpush3.bf16.msra.mxu0 %v7523_v42 }
  0x2f   : > { %s828_s7 = scalar_lea.vmem %s10617_s3, %s8495_s9  ;;  %s10626_s3 = sld [smem:[#allocation19_spill]] }
  0x31   : > { %7134 = vmatmul.mubr.msk.f32.vlgmr.msra.gmra.mrb[4].mxu0 %vm859_vm0, %v8507_v13 }
  0x32   : > { %7136 = vmatprep.mubr.msk.f32.mxu0 %vm859_vm0, %v8509_v14 }
  0x35   : > { %7137 = vmatmul.mubr.msk.f32.gmra.mrb[6].mxu0 %vm859_vm0, %v8515_v15 }
  0xfa   : > { %v7121_v17 = vpop.f32.mrb[0].mxu1 }
  0xfb   : > { %v1040_v19 = vadd.f32 %v7121_v17, %v6392_v16  ;;  %v1034_v20 = vpop.f32.mrb[1].mxu1  ;;  %v7107_v21 = vpop.f32.mrb[0].mxu0 }
  0xfc   : > { %v1035_v22 = vadd.f32 %v6392_v16, %v1034_v20  ;;  %v938_v23 = vpop.f32.mrb[1].mxu0  ;;  %v944_v35 = vadd.f32 %v7107_v21, %v6387_v18  ;;  %v6397_v20 = vld [vmem:[%s10614_s2] ss:$0 sm:$0xff]  ;;  %v6427_v21 = vld [vmem:[%s10605_s8 + $0x30] sm:$0xff] }
  0xfd   : > { %v939_v25 = vadd.f32 %v6387_v18, %v938_v23 }
  0xfe   : > { %v7527_v26 = vpack.c.bf16 %v1040_v19, %v1035_v22  ;;  %v7124_v27 = vpop.f32.mrb[2].mxu1  ;;  %v6428_v22 = vld [vmem:[%s10605_s8 + $0x38] sm:$0xff] }
  0xff   : > { %v1050_v28 = vadd.f32 %v7124_v27, %v6392_v16  ;;  %v1044_v29 = vpop.f32.mrb[3].mxu1  ;;  %v7110_v30 = vpop.f32.mrb[2].mxu0  ;;  %7147 = vmatprep.mubr.msk.f32.mxu1 %vm1155_vm1, %v939_v25 }
 0x100   : > { %7529 = vmatprep.subr.msk.bf16.mxu1 %vm8535_vm2, %v7527_v26  ;;  %v1045_v31 = vadd.f32 %v6392_v16, %v1044_v29  ;;  %v948_v32 = vpop.f32.mrb[3].mxu0  ;;  %v954_v36 = vadd.f32 %v7110_v30, %v6387_v18 }
 0x101   : > { %7532 = vmatpush3.bf16.xpose.msk.msra.mxu1 %vm8535_vm2, %v7527_v26  ;;  %v949_v34 = vadd.f32 %v6387_v18, %v948_v32  ;;  %v7559_v26 = vpack.c.bf16 %v6428_v22, %v6427_v21  ;;  %v6438_v21 = vld [vmem:[%s10612_s5 + $0x38] sm:$0xff] }
 0x102   : > { %v7533_v33 = vpack.c.bf16 %v1050_v28, %v1045_v31 }
 0x104   : > { %7535 = vmatprep.subr.msk.bf16.mxu1 %vm8535_vm2, %v7533_v33  ;;  %v7135_v19 = vpop.f32.mrb[4].mxu0 }
 0x105   : > { %v1136_v23 = vadd.f32 %v7135_v19, %v6397_v20  ;;  %v1130_v25 = vpop.f32.mrb[5].mxu0  ;;  %v6437_v19 = vld [vmem:[%s10612_s5 + $0x30] sm:$0xff] }
 0x106   : > { %v1131_v27 = vadd.f32 %v6397_v20, %v1130_v25  ;;  %v7567_v22 = vpack.c.bf16 %v6438_v21, %v6437_v19 }
 0x108   : > { %v7539_v28 = vpack.c.bf16 %v1136_v23, %v1131_v27  ;;  %v7138_v29 = vpop.f32.mrb[6].mxu0 }
 0x109   : > { %7538 = vmatpush3.bf16.xpose.msk.msra.mxu1 %vm8535_vm2, %v7533_v33  ;;  %v1140_v30 = vpop.f32.mrb[7].mxu0  ;;  %v1146_v31 = vadd.f32 %v7138_v29, %v6397_v20 }
 0x10a   : > { %7556 = vmatprep.subr.bf16.mxu1 %v7555_v58  ;;  %7540 = vmatprep.subr.bf16.mxu0 %v7539_v28  ;;  %v1141_v32 = vadd.f32 %v6397_v20, %v1140_v30 }
 0x10b   : > { %7542 = vmatpush3.bf16.msra.mxu0 %v7539_v28 }
 0x10c   : > { %v7543_v33 = vpack.c.bf16 %v1146_v31, %v1141_v32 }
 0x10e   : > { %7544 = vmatprep.subr.bf16.mxu0 %v7543_v33 }
 0x10f   : > { %7546 = vmatpush3.bf16.msra.mxu0 %v7543_v33 }
 0x110   : > { %7148 = vmatmul.mubr.msk.f32.vlgmr.msra.gmra.mrb[4].mxu1 %vm1155_vm1, %v944_v35  ;;  %v6416_v35 = vld [vmem:[%s10606_s6 + $0x28] sm:$0xff] }
 0x111   : > { %7150 = vmatprep.mubr.msk.f32.mxu1 %vm1155_vm1, %v949_v34  ;;  %7558 = vmatpush3.bf16.msra.mxu1 %v7555_v58  ;;  %v6415_v34 = vld [vmem:[%s10606_s6 + $0x20] sm:$0xff] }
 0x112   : > { %7560 = vmatprep.subr.bf16.mxu1 %v7559_v26 }
 0x114   : > { %7151 = vmatmul.mubr.msk.f32.gmra.mrb[6].mxu1 %vm1155_vm1, %v954_v36  ;;  %v7547_v36 = vpack.c.bf16 %v6416_v35, %v6415_v34 }
 0x115   : > { %7189 = vmatprep.mubr.msk.f32.mxu1 %vm859_vm0, %v8501_v12  ;;  %7562 = vmatpush3.bf16.msra.mxu1 %v7559_v26 }
 0x116   : > { %7548 = vmatprep.subr.bf16.mxu0 %v7547_v36 }
 0x118   : > { %7190 = vmatmul.mubr.msk.f32.vlgmr.msra.gmra.mrb[8].mxu1 %vm859_vm0, %v8507_v13 }
 0x119   : > { %7192 = vmatprep.mubr.msk.f32.mxu1 %vm859_vm0, %v8509_v14 }
 0x11c   : > { %7193 = vmatmul.mubr.msk.f32.gmra.mrb[10].mxu1 %vm859_vm0, %v8515_v15 }
 0x1e3   : > { %v7149_v44 = vpop.f32.mrb[4].mxu1 }
 0x1e4   : > { %v1246_v45 = vpop.f32.mrb[5].mxu1  ;;  %v1252_v47 = vadd.f32 %v7149_v44, %v8578_v43  ;;  %v6417_v44 = vld [vmem:[%s10606_s6 + $0x30] sm:$0xff] }
 0x1e5   : > { %v1247_v46 = vadd.f32 %v8578_v43, %v1246_v45  ;;  %v6418_v45 = vld [vmem:[%s10606_s6 + $0x38] sm:$0xff] }
 0x1e6   : > { %v1268_v54 = vsel %vm859_vm0, %v1252_v47, -inf }
 0x1e7   : > { %v7152_v48 = vpop.f32.mrb[6].mxu1  ;;  %v1265_v49 = vsel %vm859_vm0, %v1247_v46, -inf }
 0x1e8   : > { %v1256_v50 = vpop.f32.mrb[7].mxu1  ;;  %1266 = vmax.xlane.f32.xlu0 %v1265_v49  ;;  %v1262_v52 = vadd.f32 %v7152_v48, %v8578_v43 }
 0x1e9   : > { %v1257_v51 = vadd.f32 %v8578_v43, %v1256_v50  ;;  %v7551_v50 = vpack.c.bf16 %v6418_v45, %v6417_v44 }
 0x1ea   : > { %v1274_v55 = vsel %vm859_vm0, %v1262_v52, -inf }
 0x1eb   : > { %v1271_v53 = vsel %vm859_vm0, %v1257_v51, -inf }
 0x1ec   : > { %1272 = vmax.xlane.f32.xlu1 %v1271_v53  ;;  %1269 = vmax.xlane.f32.xlu0 %v1268_v54  ;;  %v6430_v53 = vld [vmem:[%s10608_s28 + $0x1] ss:$0 sm:$0xff]  ;;  %v7191_v54 = vpop.f32.mrb[8].mxu1 }
 0x1ed   : > { %v1585_v56 = vpop.f32.mrb[9].mxu1 }
 0x1ee   : > { %v1586_v57 = vadd.f32 %v6430_v53, %v1585_v56 }
 0x1f0   : > { %1275 = vmax.xlane.f32.xlu1 %v1274_v55  ;;  %v1591_v55 = vadd.f32 %v7191_v54, %v6430_v53 }
 0x1f2   : > { %v7571_v58 = vpack.c.bf16 %v1591_v55, %v1586_v57  ;;  %v6440_v57 = vld [vmem:[%s10614_s2 + $0x1] ss:$0 sm:$0xff] }
 0x1f4   : > { %7573 = vmatprep.subr.msk.bf16.mxu1 %vm8535_vm2, %v7571_v58 }
 0x1f5   : > { %7576 = vmatpush3.bf16.xpose.msk.msra.mxu1 %vm8535_vm2, %v7571_v58 }
 0x275   : > { %v1267_v59 = vpop.xlane.xlu0 %1266 }
 0x276   : > { %v1277_v60 = vsub.f32 %v1247_v46, %v1267_v59  ;;  %v7194_v59 = vpop.f32.mrb[10].mxu1 }
 0x278   : > { %v1281_v61 = vmul.f32 1.442695, %v1277_v60  ;;  %v1601_v60 = vadd.f32 %v7194_v59, %v6430_v53 }
 0x279   : > { %v1273_v62 = vpop.xlane.xlu1 %1272  ;;  %v1270_v63 = vpop.xlane.xlu0 %1269 }
 0x27a   : > { %8183 = vpow2.f32 %v1281_v61  ;;  %v1279_v0 = vsub.f32 %v1257_v51, %v1273_v62  ;;  %v1278_v1 = vsub.f32 %v1252_v47, %v1270_v63  ;;  %v1595_v61 = vpop.f32.mrb[11].mxu1 }
 0x27b   : > { %v1596_v62 = vadd.f32 %v6430_v53, %v1595_v61 }
 0x27c   : > { %v1285_v2 = vmul.f32 1.442695, %v1279_v0  ;;  %v1283_v3 = vmul.f32 1.442695, %v1278_v1 }
 0x27d   : > { %v1276_v4 = vpop.xlane.xlu1 %1275  ;;  %v7577_v63 = vpack.c.bf16 %v1601_v60, %v1596_v62 }
 0x27e   : > { %8185 = vpow2.f32 %v1285_v2  ;;  %v1280_v5 = vsub.f32 %v1262_v52, %v1276_v4  ;;  %v6420_v4 = vld [vmem:[%s10609_s0 + $0x1] ss:$0 sm:$0xff] }
 0x27f   : > { %8187 = vpow2.f32 %v1283_v3  ;;  %7579 = vmatprep.subr.msk.bf16.mxu1 %vm8535_vm2, %v7577_v63 }
 0x280   : > { %v1287_v6 = vmul.f32 1.442695, %v1280_v5  ;;  %7582 = vmatpush3.bf16.xpose.msk.msra.mxu1 %vm8535_vm2, %v7577_v63 }
 0x282   : > { %8189 = vpow2.f32 %v1287_v6 }
 0x284   : > { %v8184_v7 = vpop.eup %8183 }
 0x285   : > { %v1289_v8 = vsel %vm859_vm0, %v8184_v7, 0.0 }
 0x286   : > { %1290 = vadd.xlane.f32.xlu0 %v1289_v8 }
 0x288   : > { %v8186_v9 = vpop.eup %8185 }
 0x289   : > { %v8188_v10 = vpop.eup %8187  ;;  %v1295_v11 = vsel %vm859_vm0, %v8186_v9, 0.0 }
 0x28a   : > { %1296 = vadd.xlane.f32.xlu0 %v1295_v11  ;;  %v1292_v16 = vsel %vm859_vm0, %v8188_v10, 0.0 }
 0x28b   : > { %1293 = vadd.xlane.f32.xlu1 %v1292_v16 }
 0x28c   : > { %v8190_v17 = vpop.eup %8189 }
 0x28d   : > { %v1298_v18 = vsel %vm859_vm0, %v8190_v17, 0.0 }
 0x28f   : > { %1299 = vadd.xlane.f32.xlu1 %v1298_v18  ;;  %v6436_v18 = vld [vmem:[%s10612_s5 + $0x28] sm:$0xff] }
 0x313   : > { %v1291_v37 = vpop.xlane.xlu0 %1290 }
 0x314   : > { %8191 = vrcp.f32 %v1291_v37 }
 0x317   : > { %v1297_v38 = vpop.xlane.xlu0 %1296 }
 0x318   : > { %v1294_v39 = vpop.xlane.xlu1 %1293  ;;  %8193 = vrcp.f32 %v1297_v38 }
 0x319   : > { %8195 = vrcp.f32 %v1294_v39 }
 0x31c   : > { %v1300_v40 = vpop.xlane.xlu1 %1299 }
 0x31d   : > { %8197 = vrcp.f32 %v1300_v40 }
 0x31e   : > { %v8192_v41 = vpop.eup %8191 }
 0x31f   : > { %v1305_v42 = vmul.f32 %v8192_v41, %v8184_v7 }
 0x321   : > { %7161 = vmatprep.mubr.msk.f32.mxu0 %vm859_vm0, %v1305_v42 }
 0x322   : > { %v8194_v46 = vpop.eup %8193 }
 0x323   : > { %v8196_v47 = vpop.eup %8195  ;;  %v1307_v48 = vmul.f32 %v8194_v46, %v8186_v9 }
 0x324   : > { %v1306_v49 = vmul.f32 %v8196_v47, %v8188_v10 }
 0x326   : > { %7162 = vmatmul.mubr.msk.f32.vlgmr.msra.gmra.mrb[8].mxu0 %vm859_vm0, %v1306_v49 }
 0x327   : > { %v8198_v51 = vpop.eup %8197  ;;  %7164 = vmatprep.mubr.msk.f32.mxu0 %vm859_vm0, %v1307_v48  ;;  %7550 = vmatpush3.bf16.msra.mxu0 %v7547_v36 }
 0x328   : > { %v1308_v52 = vmul.f32 %v8198_v51, %v8190_v17  ;;  %7552 = vmatprep.subr.bf16.mxu0 %v7551_v50  ;;  %v6435_v17 = vld [vmem:[%s10612_s5 + $0x20] sm:$0xff] }
 0x329   : > { %v7563_v20 = vpack.c.bf16 %v6436_v18, %v6435_v17 }
 0x32a   : > { %7165 = vmatmul.mubr.msk.f32.gmra.mrb[10].mxu0 %vm859_vm0, %v1308_v52 }
 0x32b   : > { %7554 = vmatpush3.bf16.msra.mxu0 %v7551_v50  ;;  %7175 = vmatprep.mubr.msk.f32.mxu0 %vm859_vm0, %v8501_v12 }
 0x32c   : > { %7564 = vmatprep.subr.bf16.mxu0 %v7563_v20 }
 0x32e   : > { %7176 = vmatmul.mubr.msk.f32.vlgmr.msra.gmra.mrb[12].mxu0 %vm859_vm0, %v8507_v13 }
 0x32f   : > { %7178 = vmatprep.mubr.msk.f32.mxu0 %vm859_vm0, %v8509_v14  ;;  %7566 = vmatpush3.bf16.msra.mxu0 %v7563_v20 }
 0x330   : > { %7568 = vmatprep.subr.bf16.mxu0 %v7567_v22 }
 0x332   : > { %7179 = vmatmul.mubr.msk.f32.gmra.mrb[14].mxu0 %vm859_vm0, %v8515_v15 }
 0x333   : > { %7203 = vmatprep.mubr.msk.f32.mxu0 %vm859_vm0, %v8501_v12  ;;  %7570 = vmatpush3.bf16.msra.mxu0 %v7567_v22 }
 0x336   : > { %7204 = vmatmul.mubr.msk.f32.vlgmr.msra.gmra.mrb[16].mxu0 %vm859_vm0, %v8507_v13 }
 0x337   : > { %7206 = vmatprep.mubr.msk.f32.mxu0 %vm859_vm0, %v8509_v14 }
 0x33a   : > { %7207 = vmatmul.mubr.msk.f32.gmra.mrb[18].mxu0 %vm859_vm0, %v8515_v15 }
 0x3f9   : > { %v8650_v0 = vpop.f32.mrb[8].mxu0 }
 0x3fa   : > { %v8652_v1 = vpop.f32.mrb[9].mxu0 }
 0x3fd   : > { %v8654_v2 = vpop.f32.mrb[10].mxu0 }
 0x3fe   : > { %v8656_v3 = vpop.f32.mrb[11].mxu0 }
 0x401   : > { %v7177_v5 = vpop.f32.mrb[12].mxu0 }
 0x402   : > { %v1487_v6 = vpop.f32.mrb[13].mxu0  ;;  %v1493_v8 = vadd.f32 %v7177_v5, %v6420_v4 }
 0x403   : > { %v1488_v7 = vadd.f32 %v6420_v4, %v1487_v6 }
 0x405   : > { %v7180_v9 = vpop.f32.mrb[14].mxu0  ;;  %7217 = vmatprep.mubr.msk.f32.mxu1 %vm1155_vm1, %v1488_v7  ;;  %v6457_v7 = vld [vmem:[%s10615_s29 + $0x10] sm:$0xff] }
 0x406   : > { %v1497_v10 = vpop.f32.mrb[15].mxu0  ;;  %7218 = vmatmul.mubr.msk.f32.vlgmr.msra.gmra.mrb[12].mxu1 %vm1155_vm1, %v1493_v8  ;;  %v1503_v16 = vadd.f32 %v7180_v9, %v6420_v4  ;;  %v6458_v8 = vld [vmem:[%s10615_s29 + $0x18] sm:$0xff] }
 0x407   : > { %v1498_v11 = vadd.f32 %v6420_v4, %v1497_v10  ;;  %v7591_v9 = vpack.c.bf16 %v6458_v8, %v6457_v7  ;;  %v847_v7 = vld [vmem:[%s828_s7 + $0x18] sm:$0xff]  ;;  %v2295_v8 = vld [vmem:[%s10552_s13 + $0x100] sm:$0xff] }
 0x409   : > { %7220 = vmatprep.mubr.msk.f32.mxu1 %vm1155_vm1, %v1498_v11  ;;  %v7205_v36 = vpop.f32.mrb[16].mxu0 }
 0x40a   : > { %7221 = vmatmul.mubr.msk.f32.gmra.mrb[14].mxu1 %vm1155_vm1, %v1503_v16  ;;  %v1689_v58 = vadd.f32 %v7205_v36, %v6440_v57  ;;  %v1683_v59 = vpop.f32.mrb[17].mxu0 }
 0x40b   : > { %v1684_v60 = vadd.f32 %v6440_v57, %v1683_v59 }
 0x40d   : > { %v7583_v61 = vpack.c.bf16 %v1689_v58, %v1684_v60  ;;  %v7208_v62 = vpop.f32.mrb[18].mxu0 }
 0x40e   : > { %v1693_v63 = vpop.f32.mrb[19].mxu0  ;;  %v1699_v4 = vadd.f32 %v7208_v62, %v6440_v57 }
 0x40f   : > { %v1694_v5 = vadd.f32 %v6440_v57, %v1693_v63  ;;  %7584 = vmatprep.subr.bf16.mxu0 %v7583_v61 }
 0x410   : > { %7586 = vmatpush3.bf16.msra.mxu0 %v7583_v61 }
 0x411   : > { %v7587_v6 = vpack.c.bf16 %v1699_v4, %v1694_v5  ;;  %v845_v4 = vld [vmem:[%s828_s7 + $0x8] sm:$0xff]  ;;  %v846_v5 = vld [vmem:[%s828_s7 + $0x10] sm:$0xff] }
 0x413   : > { %7588 = vmatprep.subr.bf16.mxu0 %v7587_v6 }
 0x414   : > { %7590 = vmatpush3.bf16.msra.mxu0 %v7587_v6  ;;  %v844_v6 = vld [vmem:[%s828_s7] sm:$0xff]  ;;  %s10620_s7 = sld [smem:[#allocation14_spill]] }
 0x415   : > { %7592 = vmatprep.subr.bf16.mxu0 %v7591_v9 }
 0x4d9   : > { %v7219_v23 = vpop.f32.mrb[12].mxu1 }
 0x4da   : > { %v1798_v25 = vadd.f32 %v7219_v23, %v8578_v43  ;;  %v1792_v26 = vpop.f32.mrb[13].mxu1 }
 0x4db   : > { %v1793_v27 = vadd.f32 %v8578_v43, %v1792_v26 }
 0x4dc   : > { %v1814_v28 = vsel %vm859_vm0, %v1798_v25, -inf }
 0x4dd   : > { %1815 = vmax.xlane.f32.xlu1 %v1814_v28  ;;  %v7222_v29 = vpop.f32.mrb[14].mxu1  ;;  %v1811_v30 = vsel %vm859_vm0, %v1793_v27, -inf  ;;  %v1407_v28 = vld [vmem:[%s10615_s29 + $0x8] sm:$0xff] }
 0x4de   : > { %v1808_v31 = vadd.f32 %v7222_v29, %v8578_v43  ;;  %v1802_v32 = vpop.f32.mrb[15].mxu1  ;;  %1812 = vmax.xlane.f32.xlu0 %v1811_v30 }
 0x4df   : > { %v1803_v33 = vadd.f32 %v8578_v43, %v1802_v32 }
 0x4e0   : > { %v1820_v34 = vsel %vm859_vm0, %v1808_v31, -inf }
 0x4e1   : > { %1821 = vmax.xlane.f32.xlu1 %v1820_v34  ;;  %v1817_v35 = vsel %vm859_vm0, %v1803_v33, -inf  ;;  %v6467_v34 = vld [vmem:[%s10616_s10] ss:$0 sm:$0xff] }
 0x4e2   : > { %1818 = vmax.xlane.f32.xlu0 %v1817_v35 }
 0x56a   : > { %v1816_v37 = vpop.xlane.xlu1 %1815 }
 0x56b   : > { %v1824_v38 = vsub.f32 %v1798_v25, %v1816_v37  ;;  %v1813_v39 = vpop.xlane.xlu0 %1812 }
 0x56c   : > { %v1823_v40 = vsub.f32 %v1793_v27, %v1813_v39  ;;  %v1406_v27 = vld [vmem:[%s10615_s29] sm:$0xff] }
 0x56d   : > { %v1829_v41 = vmul.f32 1.442695, %v1824_v38  ;;  %v7595_v29 = vpack.c.bf16 %v1407_v28, %v1406_v27  ;;  %v2265_v28 = vld [vmem:[%s10552_s13 + $0x10] sm:$0xff] }
 0x56e   : > { %v1827_v42 = vmul.f32 1.442695, %v1823_v40  ;;  %v1822_v44 = vpop.xlane.xlu1 %1821 }
 0x56f   : > { %8199 = vpow2.f32 %v1829_v41  ;;  %v1826_v45 = vsub.f32 %v1808_v31, %v1822_v44  ;;  %v1819_v46 = vpop.xlane.xlu0 %1818 }
 0x570   : > { %8201 = vpow2.f32 %v1827_v42  ;;  %v1825_v47 = vsub.f32 %v1803_v33, %v1819_v46 }
 0x571   : > { %v1833_v43 = vmul.f32 1.442695, %v1826_v45 }
 0x572   : > { %v1831_v48 = vmul.f32 1.442695, %v1825_v47 }
 0x573   : > { %8203 = vpow2.f32 %v1833_v43 }
 0x574   : > { %8205 = vpow2.f32 %v1831_v48 }
 0x579   : > { %v8200_v49 = vpop.eup %8199 }
 0x57a   : > { %v8202_v50 = vpop.eup %8201  ;;  %v1838_v51 = vsel %vm859_vm0, %v8200_v49, 0.0 }
 0x57b   : > { %1839 = vadd.xlane.f32.xlu1 %v1838_v51  ;;  %v1835_v52 = vsel %vm859_vm0, %v8202_v50, 0.0 }
 0x57c   : > { %1836 = vadd.xlane.f32.xlu0 %v1835_v52 }
 0x57d   : > { %v8204_v53 = vpop.eup %8203 }
 0x57e   : > { %v8206_v54 = vpop.eup %8205  ;;  %v1844_v55 = vsel %vm859_vm0, %v8204_v53, 0.0 }
 0x57f   : > { %1845 = vadd.xlane.f32.xlu1 %v1844_v55  ;;  %v1841_v56 = vsel %vm859_vm0, %v8206_v54, 0.0 }
 0x580   : > { %1842 = vadd.xlane.f32.xlu0 %v1841_v56 }
 0x608   : > { %v1840_v10 = vpop.xlane.xlu1 %1839 }
 0x609   : > { %8207 = vrcp.f32 %v1840_v10  ;;  %v1837_v11 = vpop.xlane.xlu0 %1836 }
 0x60a   : > { %8209 = vrcp.f32 %v1837_v11  ;;  %v2297_v11 = vld [vmem:[%s10552_s13 + $0x110] sm:$0xff] }
 0x60c   : > { %v1846_v16 = vpop.xlane.xlu1 %1845 }
 0x60d   : > { %8211 = vrcp.f32 %v1846_v16  ;;  %v1843_v17 = vpop.xlane.xlu0 %1842  ;;  %v2298_v16 = vld [vmem:[%s10552_s13 + $0x118] sm:$0xff] }
 0x60e   : > { %8213 = vrcp.f32 %v1843_v17  ;;  %v7635_v17 = vpack.c.bf16 %v2298_v16, %v2297_v11 }
 0x613   : > { %v8208_v18 = vpop.eup %8207 }
 0x614   : > { %v8210_v19 = vpop.eup %8209  ;;  %v1852_v21 = vmul.f32 %v8208_v18, %v8200_v49  ;;  %v2279_v18 = vld [vmem:[%s10552_s13 + $0x80] sm:$0xff] }
 0x615   : > { %v1851_v20 = vmul.f32 %v8210_v19, %v8202_v50  ;;  %v2280_v19 = vld [vmem:[%s10552_s13 + $0x88] sm:$0xff] }
 0x617   : > { %v8212_v22 = vpop.eup %8211  ;;  %7231 = vmatprep.mubr.msk.f32.mxu0 %vm859_vm0, %v1851_v20  ;;  %v2263_v20 = vld [vmem:[%s10552_s13] sm:$0xff] }
 0x618   : > { %v8214_v23 = vpop.eup %8213  ;;  %7232 = vmatmul.mubr.msk.f32.vlgmr.msra.gmra.mrb[20].mxu0 %vm859_vm0, %v1852_v21  ;;  %v1854_v26 = vmul.f32 %v8212_v22, %v8204_v53  ;;  %v7599_v21 = vpack.c.bf16 %v2280_v19, %v2279_v18  ;;  %v2264_v22 = vld [vmem:[%s10552_s13 + $0x8] sm:$0xff] }
 0x619   : > { %v1853_v25 = vmul.f32 %v8214_v23, %v8206_v54  ;;  %7594 = vmatpush3.bf16.msra.mxu0 %v7591_v9  ;;  %v2296_v9 = vld [vmem:[%s10552_s13 + $0x108] sm:$0xff]  ;;  %v2281_v23 = vld [vmem:[%s10552_s13 + $0x90] sm:$0xff] }
 0x61a   : > { %7596 = vmatprep.subr.bf16.mxu0 %v7595_v29  ;;  %v7631_v10 = vpack.c.bf16 %v2296_v9, %v2295_v8  ;;  %7600 = vmatprep.subr.bf16.mxu1 %v7599_v21 }
 0x61b   : > { %7234 = vmatprep.mubr.msk.f32.mxu0 %vm859_vm0, %v1853_v25  ;;  %v2282_v25 = vld [vmem:[%s10552_s13 + $0x98] sm:$0xff] }
 0x61c   : > { %7235 = vmatmul.mubr.msk.f32.gmra.mrb[22].mxu0 %vm859_vm0, %v1854_v26  ;;  %v7601_v26 = vpack.c.bf16 %v2264_v22, %v2263_v20  ;;  %v7603_v27 = vpack.c.bf16 %v2282_v25, %v2281_v23  ;;  %v2290_v20 = vld [vmem:[%s10552_s13 + $0xd8] sm:$0xff] }
 0x61d   : > { %v2274_v25 = vld [vmem:[%s10552_s13 + $0x58] sm:$0xff] }
 0x61e   : > { %7602 = vmatpush3.bf16.msra.mxu1 %v7601_v26 }
 0x61f   : > { %7604 = vmatprep.subr.bf16.mxu1 %v7603_v27 }
 0x6eb   : > { %v7233_v30 = vpop.f32.mrb[20].mxu0 }
 0x6ec   : > { %v1933_v31 = vpop.f32.mrb[21].mxu0 }
 0x6ed   : > { %7241 = vmatprep.mubr.msk.f32.mxu0 %vm1155_vm1, %v1933_v31  ;;  %v2284_v31 = vld [vmem:[%s10552_s13 + $0xa8] sm:$0xff] }
 0x6ee   : > { %7242 = vmatmul.mubr.msk.f32.vlgmr.msra.gmra.mrb[24].mxu0 %vm1155_vm1, %v7233_v30  ;;  %v2283_v30 = vld [vmem:[%s10552_s13 + $0xa0] sm:$0xff] }
 0x6ef   : > { %v7236_v32 = vpop.f32.mrb[22].mxu0  ;;  %7598 = vmatpush3.bf16.msra.mxu0 %v7595_v29  ;;  %v2266_v29 = vld [vmem:[%s10552_s13 + $0x18] sm:$0xff] }
 0x6f0   : > { %v1943_v33 = vpop.f32.mrb[23].mxu0  ;;  %7632 = vmatprep.subr.bf16.mxu0 %v7631_v10 }
 0x6f1   : > { %7244 = vmatprep.mubr.msk.f32.mxu0 %vm1155_vm1, %v1943_v33  ;;  %v7607_v33 = vpack.c.bf16 %v2284_v31, %v2283_v30  ;;  %v2291_v30 = vld [vmem:[%s10552_s13 + $0xe0] sm:$0xff]  ;;  %v2292_v31 = vld [vmem:[%s10552_s13 + $0xe8] sm:$0xff] }
 0x6f2   : > { %7245 = vmatmul.mubr.msk.f32.gmra.mrb[26].mxu0 %vm1155_vm1, %v7236_v32  ;;  %v7605_v32 = vpack.c.bf16 %v2266_v29, %v2265_v28 }
 0x6f3   : > { %7251 = vmatprep.mubr.msk.f32.mxu0 %vm1155_vm1, %v8652_v1 }
 0x6f4   : > { %7606 = vmatpush3.bf16.msra.mxu1 %v7605_v32  ;;  %v2275_v32 = vld [vmem:[%s10552_s13 + $0x60] sm:$0xff] }
 0x6f5   : > { %7608 = vmatprep.subr.bf16.mxu1 %v7607_v33 }
 0x6f6   : > { %7252 = vmatmul.mubr.msk.f32.vlgmr.msra.gmra.mrb[24].mxu0 %vm1155_vm1, %v8650_v0 }
 0x6f7   : > { %7254 = vmatprep.mubr.msk.f32.mxu0 %vm1155_vm1, %v8656_v3  ;;  %7634 = vmatpush3.bf16.msra.mxu0 %v7631_v10 }
 0x6f8   : > { %7636 = vmatprep.subr.bf16.mxu0 %v7635_v17 }
 0x6fa   : > { %7255 = vmatmul.mubr.msk.f32.gmra.mrb[26].mxu0 %vm1155_vm1, %v8654_v2 }
 0x6fb   : > { %7638 = vmatpush3.bf16.msra.mxu0 %v7635_v17 }
 0x7c9   : > { %v7253_v35 = vpop.f32.mrb[24].mxu0 }
 0x7ca   : > { %v2157_v36 = vadd.f32 %v7253_v35, %v6467_v34  ;;  %v2130_v37 = vpop.f32.mrb[25].mxu0  ;;  %v2268_v35 = vld [vmem:[%s10552_s13 + $0x28] sm:$0xff] }
 0x7cb   : > { %v2156_v38 = vadd.f32 %v6467_v34, %v2130_v37  ;;  %v2286_v37 = vld [vmem:[%s10552_s13 + $0xb8] sm:$0xff] }
 0x7cc   : > { %v2161_v39 = vadd.f32 %v2157_v36, %v8507_v13  ;;  %v2285_v36 = vld [vmem:[%s10552_s13 + $0xb0] sm:$0xff] }
 0x7cd   : > { %v7256_v1 = vpop.f32.mrb[26].mxu0  ;;  %v2160_v40 = vadd.f32 %v2156_v38, %v8501_v12  ;;  %v8320_v12 = vmov 0  }
 0x7ce   : > { %v2159_v0 = vadd.f32 %v7256_v1, %v6467_v34  ;;  %v2140_v41 = vpop.f32.mrb[27].mxu0  ;;  %v2169_v3 = vsel %vm859_vm0, %v2161_v39, 0.0  ;;  %7987 = vset.pattern.permute.xlu1 %v8320_v12  ;;  %7986 = vset.pattern.permute.xlu0 %v8320_v12  ;;  %v2269_v1 = vld [vmem:[%s10552_s13 + $0x30] sm:$0xff] }
 0x7cf   : > { %v2158_v42 = vadd.f32 %v6467_v34, %v2140_v41  ;;  %2170 = vadd.xlane.f32.xlu1 %v2169_v3  ;;  %v2166_v2 = vsel %vm859_vm0, %v2160_v40, 0.0  ;;  %v2267_v34 = vld [vmem:[%s10552_s13 + $0x20] sm:$0xff]  ;;  %v2288_v41 = vld [vmem:[%s10552_s13 + $0xc8] sm:$0xff] }
 0x7d0   : > { %2167 = vadd.xlane.f32.xlu0 %v2166_v2  ;;  %v2163_v44 = vadd.f32 %v2159_v0, %v8515_v15  ;;  %v7609_v38 = vpack.c.bf16 %v2268_v35, %v2267_v34  ;;  %v2287_v0 = vld [vmem:[%s10552_s13 + $0xc0] sm:$0xff]  ;;  %v7623_v34 = vpack.c.bf16 %v2292_v31, %v2291_v30  ;;  %v2276_v35 = vld [vmem:[%s10552_s13 + $0x68] sm:$0xff] }
 0x7d1   : > { %v2162_v45 = vadd.f32 %v2158_v42, %v8509_v14  ;;  %v7615_v42 = vpack.c.bf16 %v2288_v41, %v2287_v0  ;;  %v2271_v2 = vld [vmem:[%s10552_s13 + $0x40] sm:$0xff] }
 0x7d2   : > { %v2175_v46 = vsel %vm859_vm0, %v2163_v44, 0.0  ;;  %7610 = vmatpush3.bf16.msra.mxu1 %v7609_v38 }
 0x7d3   : > { %2176 = vadd.xlane.f32.xlu1 %v2175_v46  ;;  %v2172_v13 = vsel %vm859_vm0, %v2162_v45, 0.0 }
 0x7d4   : > { %2173 = vadd.xlane.f32.xlu0 %v2172_v13 }
 0x85c   : > { %v2171_v47 = vpop.xlane.xlu1 %2170 }
 0x85d   : > { %v2180_v43 = vmul.f32 0.03125, %v2171_v47  ;;  %v2168_v48 = vpop.xlane.xlu0 %2167 }
 0x85e   : > { %v2179_v49 = vmul.f32 0.03125, %v2168_v48 }
 0x85f   : > { %v8737_v50 = vsub.f32 %v2161_v39, %v2180_v43  ;;  %v7611_v39 = vpack.c.bf16 %v2286_v37, %v2285_v36 }
 0x860   : > { %v8739_v51 = vsub.f32 %v2160_v40, %v2179_v49  ;;  %v2177_v15 = vpop.xlane.xlu1 %2176  ;;  %v2270_v40 = vld [vmem:[%s10552_s13 + $0x38] sm:$0xff] }
 0x861   : > { %v2182_v52 = vmul.f32 0.03125, %v2177_v15  ;;  %v2174_v14 = vpop.xlane.xlu0 %2173  ;;  %v2188_v53 = vmul.f32 %v8737_v50, %v8737_v50  ;;  %v7613_v3 = vpack.c.bf16 %v2270_v40, %v2269_v1  ;;  %7612 = vmatprep.subr.bf16.mxu1 %v7611_v39  ;;  %v7625_v39 = vpack.c.bf16 %v2276_v35, %v2275_v32 }
 0x862   : > { %v2181_v54 = vmul.f32 0.03125, %v2174_v14  ;;  %v2187_v55 = vmul.f32 %v8739_v51, %v8739_v51 }
 0x863   : > { %v8745_v56 = vsub.f32 %v2163_v44, %v2182_v52  ;;  %v2194_v57 = vsel %vm859_vm0, %v2188_v53, 0.0  ;;  %v2272_v44 = vld [vmem:[%s10552_s13 + $0x48] sm:$0xff]  ;;  %7614 = vmatpush3.bf16.msra.mxu1 %v7613_v3 }
 0x864   : > { %v8748_v58 = vsub.f32 %v2162_v45, %v2181_v54  ;;  %2195 = vadd.xlane.f32.xlu1 %v2194_v57  ;;  %v2191_v59 = vsel %vm859_vm0, %v2187_v55, 0.0  ;;  %v7617_v45 = vpack.c.bf16 %v2272_v44, %v2271_v2  ;;  %7616 = vmatprep.subr.bf16.mxu1 %v7615_v42 }
 0x865   : > { %2192 = vadd.xlane.f32.xlu0 %v2191_v59  ;;  %v2190_v60 = vmul.f32 %v8745_v56, %v8745_v56  ;;  %v6468_v59 = vld [vmem:[%s10550_s11] ss:$0 sm:$0xff] }
 0x866   : > { %v2189_v61 = vmul.f32 %v8748_v58, %v8748_v58 }
 0x867   : > { %v2200_v62 = vsel %vm859_vm0, %v2190_v60, 0.0  ;;  %7618 = vmatpush3.bf16.msra.mxu1 %v7617_v45 }
 0x868   : > { %2201 = vadd.xlane.f32.xlu1 %v2200_v62  ;;  %v2197_v63 = vsel %vm859_vm0, %v2189_v61, 0.0 }
 0x869   : > { %2198 = vadd.xlane.f32.xlu0 %v2197_v63  ;;  %v6469_v63 = vld [vmem:[%s10551_s12] ss:$0 sm:$0xff] }
 0x879   : > { %2246 = vperm.xlu1 %7987, %v845_v4  }
 0x87d   : > { %2251 = vperm.xlu1 %7987, %v846_v5  }
 0x87f   : > { %2241 = vperm.xlu0 %7986, %v844_v6  }
 0x881   : > { %2256 = vperm.xlu1 %7987, %v847_v7  }
 0x8f1   : > { %v2196_v46 = vpop.xlane.xlu1 %2195 }
 0x8f2   : > { %v2204_v13 = vmul.f32 0.03125, %v2196_v46  ;;  %v2193_v12 = vpop.xlane.xlu0 %2192 }
 0x8f3   : > { %v2203_v47 = vmul.f32 0.03125, %v2193_v12 }
 0x8f4   : > { %v2208_v43 = vadd.f32 1e-05, %v2204_v13 }
 0x8f5   : > { %v2207_v48 = vadd.f32 1e-05, %v2203_v47  ;;  %v2202_v49 = vpop.xlane.xlu1 %2201 }
 0x8f6   : > { %8215 = vrsqrt.f32 %v2208_v43  ;;  %v2206_v15 = vmul.f32 0.03125, %v2202_v49  ;;  %v2199_v52 = vpop.xlane.xlu0 %2198 }
 0x8f7   : > { %8217 = vrsqrt.f32 %v2207_v48  ;;  %v2205_v14 = vmul.f32 0.03125, %v2199_v52 }
 0x8f8   : > { %v2210_v53 = vadd.f32 1e-05, %v2206_v15 }
 0x8f9   : > { %v2209_v54 = vadd.f32 1e-05, %v2205_v14  ;;  %v8833_v55 = vpop.permute.xlu1 %2246 }
 0x8fa   : > { %8219 = vrsqrt.f32 %v2210_v53 }
 0x8fb   : > { %8221 = vrsqrt.f32 %v2209_v54 }
 0x8fd   : > { %v8843_v6 = vpop.permute.xlu1 %2251 }
 0x8fe   : > { %v8846_v11 = vpop.permute.xlu0 %2241 }
 0x900   : > { %v8216_v57 = vpop.eup %8215 }
 0x901   : > { %v8218_v60 = vpop.eup %8217  ;;  %v2216_v61 = vmul.f32 %v8216_v57, %v8737_v50  ;;  %v8868_v27 = vpop.permute.xlu1 %2256 }
 0x902   : > { %v2215_v62 = vmul.f32 %v8218_v60, %v8739_v51 }
 0x903   : > { %v2226_v4 = vmul.f32 %v6468_v59, %v2216_v61 }
 0x904   : > { %v8220_v5 = vpop.eup %8219  ;;  %v2225_v7 = vmul.f32 %v6468_v59, %v2215_v62 }
 0x905   : > { %v8222_v8 = vpop.eup %8221  ;;  %v2218_v9 = vmul.f32 %v8220_v5, %v8745_v56  ;;  %v2236_v10 = vadd.f32 %v6469_v63, %v2226_v4  ;;  %v2289_v56 = vld [vmem:[%s10552_s13 + $0xd0] sm:$0xff] }
 0x906   : > { %v2217_v16 = vmul.f32 %v8222_v8, %v8748_v58  ;;  %v2235_v50 = vadd.f32 %v6469_v63, %v2225_v7  ;;  %v2273_v58 = vld [vmem:[%s10552_s13 + $0x50] sm:$0xff]  ;;  %v7619_v23 = vpack.c.bf16 %v2290_v20, %v2289_v56 }
 0x907   : > { %v8850_v51 = vmul.f32 %v8833_v55, %v2236_v10  ;;  %v2228_v17 = vmul.f32 %v6468_v59, %v2218_v9  ;;  %v7621_v29 = vpack.c.bf16 %v2274_v25, %v2273_v58 }
 0x908   : > { %v2227_v18 = vmul.f32 %v6468_v59, %v2217_v16  ;;  %v8853_v19 = vmul.f32 %v8846_v11, %v2235_v50  ;;  %7620 = vmatprep.subr.bf16.mxu1 %v7619_v23 }
 0x909   : > { %v2306_v21 = vrot.slane %v8850_v51, 4  ;;  %v2238_v22 = vadd.f32 %v6469_v63, %v2228_v17  ;;  %7622 = vmatpush3.bf16.msra.mxu1 %v7621_v29 }
 0x90a   : > { %v2237_v26 = vadd.f32 %v6469_v63, %v2227_v18  ;;  %v2305_v28 = vrot.slane %v8853_v19, 4  ;;  %7624 = vmatprep.subr.bf16.mxu1 %v7623_v34 }
 0x90b   : > { %v8881_v33 = vmul.f32 %v8868_v27, %v2238_v22 }
 0x90c   : > { %v8887_v36 = vmul.f32 %v8843_v6, %v2237_v26  ;;  %v8890_v37 = vsel %vm2304_vm3, %v2305_v28, %v2306_v21  ;;  %v8893_v38 = vsel %vm2304_vm3, 0.0, %v2305_v28 }
 0x90d   : > { %v2310_v1 = vrot.slane %v8881_v33, 4  ;;  %7265 = vmatprep.mubr.msk.f32.mxu0 %vm859_vm0, %v8890_v37  ;;  %v2322_v40 = vrot.slane %v8893_v38, 1  ;;  %v2323_v0 = vrot.slane %v8890_v37, 1  ;;  %v2401_v41 = vrot.slane %v8893_v38, 5  ;;  %7626 = vmatpush3.bf16.msra.mxu1 %v7625_v39  ;;  %v2293_v39 = vld [vmem:[%s10552_s13 + $0xf0] sm:$0xff] }
 0x90e   : > { %v2308_v3 = vrot.slane %v8887_v36, 4  ;;  %v2402_v42 = vrot.slane %v8890_v37, 5  ;;  %v2367_v2 = vrot.slane %v8890_v37, 3  ;;  %v2446_v44 = vrot.slane %v8890_v37, 7 }
 0x90f   : > { %v8906_v45 = vsel %vm2304_vm3, %v2310_v1, 0.0  ;;  %v2324_v46 = vsel %vm2321_vm4, %v2322_v40, %v2323_v0  ;;  %v2344_v13 = vrot.slane %v8893_v38, 2  ;;  %v2345_v12 = vrot.slane %v8890_v37, 2  ;;  %v2277_v40 = vld [vmem:[%s10552_s13 + $0x70] sm:$0xff] }
 0x910   : > { %v8912_v47 = vsel %vm2304_vm3, %v2306_v21, %v2308_v3  ;;  %v8915_v43 = vsel %vm2304_vm3, %v2308_v3, %v2310_v1  ;;  %v2403_v48 = vsel %vm2400_vm5, %v2401_v41, %v2402_v42  ;;  %v2423_v49 = vrot.slane %v8893_v38, 6  ;;  %v2294_v1 = vld [vmem:[%s10552_s13 + $0xf8] sm:$0xff] }
 0x911   : > { %7266 = vmatmul.mubr.msk.f32.vlgmr.msra.gmra.mrb[28].mxu0 %vm859_vm0, %v8912_v47  ;;  %v7988_v15 = vpack.i.bf16 %v2324_v46, %v2403_v48  ;;  %v2369_v52 = vrot.slane %v8912_v47, 3  ;;  %v2448_v14 = vrot.slane %v8912_v47, 7  ;;  %v2346_v53 = vsel %vm2343_vm8, %v2344_v13, %v2345_v12 }
 0x912   : > { %7268 = vmatprep.mubr.msk.f32.mxu0 %vm859_vm0, %v8915_v43  ;;  %v2424_v54 = vrot.slane %v8890_v37, 6  ;;  %v2347_v57 = vrot.slane %v8912_v47, 2  ;;  %v2349_v59 = vrot.slane %v8915_v43, 2  ;;  %v2426_v60 = vrot.slane %v8912_v47, 6 }
 0x913   : > { %7989 = vrot.lane.b32.xlu1 %v7988_v15, %s10580_s30  ;;  %v2370_v61 = vsel %vm2365_vm6, %v2367_v2, %v2369_v52  ;;  %v2449_v62 = vsel %vm2444_vm7, %v2446_v44, %v2448_v14  ;;  %v2428_v63 = vrot.slane %v8915_v43, 6  ;;  %v2366_v4 = vrot.slane %v8893_v38, 3 }
 0x914   : > { %v8013_v5 = vpack.i.bf16 %v2370_v61, %v2449_v62  ;;  %v2425_v7 = vsel %vm2422_vm9, %v2423_v49, %v2424_v54  ;;  %v2350_v8 = vsel %vm2343_vm8, %v2347_v57, %v2349_v59  ;;  %v2445_v9 = vrot.slane %v8893_v38, 7 }
 0x915   : > { %7269 = vmatmul.mubr.msk.f32.gmra.mrb[30].mxu0 %vm859_vm0, %v8906_v45  ;;  %v7993_v10 = vpack.i.bf16 %v2346_v53, %v2425_v7  ;;  %v2429_v16 = vsel %vm2422_vm9, %v2426_v60, %v2428_v63  ;;  %v2368_v50 = vsel %vm2365_vm6, %v2366_v4, %v2367_v2  ;;  %v2327_v17 = vrot.slane %v8915_v43, 1 }
 0x916   : > { %8014 = vrot.lane.b32.xlu0 %v8013_v5, %s10578_s27  ;;  %v2447_v18 = vsel %vm2444_vm7, %v2445_v9, %v2446_v44  ;;  %v2329_v56 = vrot.slane %v8906_v45, 1  ;;  %v2406_v20 = vrot.slane %v8915_v43, 5  ;;  %v2408_v58 = vrot.slane %v8906_v45, 5 }
 0x917   : > { %7994 = vrot.lane.b32.xlu1 %v7993_v10, %s10582_s26  ;;  %v2325_v21 = vrot.slane %v8912_v47, 1  ;;  %v2404_v22 = vrot.slane %v8912_v47, 5  ;;  %v8023_v23 = vpack.i.bf16 %v2350_v8, %v2429_v16  ;;  %v7998_v25 = vpack.i.bf16 %v2368_v50, %v2447_v18 }
 0x918   : > { %v2330_v26 = vsel %vm2321_vm4, %v2327_v17, %v2329_v56  ;;  %v2371_v28 = vrot.slane %v8915_v43, 3  ;;  %v2409_v29 = vsel %vm2400_vm5, %v2406_v20, %v2408_v58  ;;  %v2373_v30 = vrot.slane %v8906_v45, 3 }
 0x919   : > { %v2450_v31 = vrot.slane %v8915_v43, 7  ;;  %v2452_v32 = vrot.slane %v8906_v45, 7  ;;  %v2326_v34 = vsel %vm2321_vm4, %v2323_v0, %v2325_v21  ;;  %v2405_v35 = vsel %vm2400_vm5, %v2402_v42, %v2404_v22  ;;  %v2278_v0 = vld [vmem:[%s10552_s13 + $0x78] sm:$0xff] }
 0x91a   : > { %8024 = vrot.lane.b32.xlu0 %v8023_v23, %s10582_s26  ;;  %v8033_v41 = vpack.i.bf16 %v2330_v26, %v2409_v29  ;;  %v8003_v3 = vpack.i.bf16 %v2326_v34, %v2405_v35  ;;  %v2374_v42 = vsel %vm2365_vm6, %v2371_v28, %v2373_v30  ;;  %v7627_v44 = vpack.c.bf16 %v2294_v1, %v2293_v39 }
 0x91b   : > { %7999 = vrot.lane.b32.xlu1 %v7998_v25, %s10578_s27  ;;  %v2453_v2 = vsel %vm2444_vm7, %v2450_v31, %v2452_v32  ;;  %v2348_v46 = vsel %vm2343_vm8, %v2345_v12, %v2347_v57  ;;  %v2427_v13 = vsel %vm2422_vm9, %v2424_v54, %v2426_v60  ;;  %v7629_v48 = vpack.c.bf16 %v2278_v0, %v2277_v40 }
 0x91c   : > { %7628 = vmatprep.subr.bf16.mxu1 %v7627_v44  ;;  %v8043_v49 = vpack.i.bf16 %v2374_v42, %v2453_v2  ;;  %v8008_v15 = vpack.i.bf16 %v2348_v46, %v2427_v13  ;;  %v2328_v53 = vsel %vm2321_vm4, %v2325_v21, %v2327_v17  ;;  %v2407_v61 = vsel %vm2400_vm5, %v2404_v22, %v2406_v20 }
 0x91d   : > { %7630 = vmatpush3.bf16.msra.mxu1 %v7629_v48  ;;  %v8018_v62 = vpack.i.bf16 %v2328_v53, %v2407_v61  ;;  %v2372_v12 = vsel %vm2365_vm6, %v2369_v52, %v2371_v28  ;;  %v2451_v54 = vsel %vm2444_vm7, %v2448_v14, %v2450_v31  ;;  %v2351_v57 = vrot.slane %v8906_v45, 2 }
 0x91e   : > { %8034 = vrot.lane.b32.xlu0 %v8033_v41, %s10580_s30  ;;  %v2430_v60 = vrot.slane %v8906_v45, 6  ;;  %v8028_v4 = vpack.i.bf16 %v2372_v12, %v2451_v54  ;;  %v2387_v9 = vrot.slane %v8893_v38, 4  ;;  %v2388_v10 = vrot.slane %v8890_v37, 4 }
 0x91f   : > { %8004 = vrot.lane.b32.xlu1 %v8003_v3, %s10580_s30  ;;  %v2352_v5 = vsel %vm2343_vm8, %v2349_v59, %v2351_v57  ;;  %v2390_v30 = vrot.slane %v8912_v47, 4  ;;  %v2392_v40 = vrot.slane %v8915_v43, 4 }
 0x920   : > { %v2431_v7 = vsel %vm2422_vm9, %v2428_v63, %v2430_v60  ;;  %v2389_v56 = vsel %vm2304_vm3, %v2387_v9, %v2388_v10 }
 0x921   : > { %v8038_v52 = vpack.i.bf16 %v2352_v5, %v2431_v7  ;;  %v2391_v1 = vsel %vm2304_vm3, %v2388_v10, %v2390_v30  ;;  %v2393_v61 = vsel %vm2304_vm3, %v2390_v30, %v2392_v40  ;;  %v2394_v5 = vrot.slane %v8906_v45, 4  ;;  %v2682_v30 = vld [vmem:[%s10554_s15 + $0x10] sm:$0xff] }
 0x922   : > { %8044 = vrot.lane.b32.xlu0 %v8043_v49, %s10578_s27 }
 0x923   : > { %8009 = vrot.lane.b32.xlu1 %v8008_v15, %s10582_s26 }
 0x927   : > { %8019 = vrot.lane.b32.xlu1 %v8018_v62, %s10580_s30  ;;  %s833_s30 = scalar_lea.vmem %s10621_s22, %s8495_s9  ;;  %s10622_s22 = smov 64  }
 0x92b   : > { %8029 = vrot.lane.b32.xlu1 %v8028_v4, %s10578_s27 }
 0x92f   : > { %8039 = vrot.lane.b32.xlu1 %v8038_v52, %s10582_s26 }
 0x985   : > { %v7990_v14 = vpop.permute.xlu1 %7989 }
 0x986   : > { %v7992_v16 = vunpack.i.h.bf16 %v7990_v14  ;;  %v7991_v50 = vunpack.i.l.bf16 %v7990_v14 }
 0x988   : > { %v2466_v63 = vsel %vm859_vm0, %v8893_v38, %v7992_v16  ;;  %v8015_v20 = vpop.permute.xlu0 %8014  ;;  %v2480_v22 = vsel %vm859_vm0, %v2389_v56, %v7991_v50 }
 0x989   : > { %v7995_v8 = vpop.permute.xlu1 %7994  ;;  %v8017_v0 = vunpack.i.h.bf16 %v8015_v20  ;;  %v8016_v41 = vunpack.i.l.bf16 %v8015_v20 }
 0x98a   : > { %v7997_v17 = vunpack.i.h.bf16 %v7995_v8  ;;  %v7996_v18 = vunpack.i.l.bf16 %v7995_v8 }
 0x98c   : > { %v2484_v23 = vsel %vm2470_vm10, %v2480_v22, %v7996_v18  ;;  %v2471_v25 = vsel %vm2470_vm10, %v2466_v63, %v7997_v17  ;;  %v8025_v32 = vpop.permute.xlu0 %8024  ;;  %v2395_v18 = vsel %vm2304_vm3, %v2392_v40, %v2394_v5  ;;  %v2687_v40 = vld [vmem:[%s10554_s15 + $0x38] sm:$0xff] }
 0x98d   : > { %v8000_v59 = vpop.permute.xlu1 %7999  ;;  %v8027_v12 = vunpack.i.h.bf16 %v8025_v32  ;;  %v8026_v54 = vunpack.i.l.bf16 %v8025_v32 }
 0x98e   : > { %v8002_v58 = vunpack.i.h.bf16 %v8000_v59  ;;  %v8001_v21 = vunpack.i.l.bf16 %v8000_v59 }
 0x990   : > { %v2488_v26 = vsel %vm2475_vm11, %v2484_v23, %v8001_v21  ;;  %v2476_v28 = vsel %vm2475_vm11, %v2471_v25, %v8002_v58  ;;  %v8035_v49 = vpop.permute.xlu0 %8034 }
 0x991   : > { %v8005_v29 = vpop.permute.xlu1 %8004  ;;  %2570 = vmatprep.mubr.f32.mxu1 %v2488_v26  ;;  %v8037_v7 = vunpack.i.h.bf16 %v8035_v49  ;;  %v8036_v52 = vunpack.i.l.bf16 %v8035_v49 }
 0x992   : > { %2571 = vmatmul.mubr.f32.vlgmr.msra.gmra.mrb[16].mxu1 %v2476_v28  ;;  %v8007_v31 = vunpack.i.h.bf16 %v8005_v29  ;;  %v8006_v38 = vunpack.i.l.bf16 %v8005_v29  ;;  %v2680_v29 = vld [vmem:[%s10554_s15] sm:$0xff] }
 0x993   : > { %v2483_v56 = vsel %vm859_vm0, %v2395_v18, %v8036_v52  ;;  %v2469_v63 = vsel %vm859_vm0, %v8915_v43, %v8037_v7  ;;  %v2681_v43 = vld [vmem:[%s10554_s15 + $0x8] sm:$0xff] }
 0x994   : > { %v2481_v3 = vsel %vm859_vm0, %v2391_v1, %v8006_v38  ;;  %v2467_v42 = vsel %vm859_vm0, %v8890_v37, %v8007_v31  ;;  %v8045_v9 = vpop.permute.xlu0 %8044  ;;  %v7639_v31 = vpack.c.bf16 %v2681_v43, %v2680_v29  ;;  %v2683_v38 = vld [vmem:[%s10554_s15 + $0x18] sm:$0xff] }
 0x995   : > { %v8010_v34 = vpop.permute.xlu1 %8009  ;;  %v8047_v59 = vunpack.i.h.bf16 %v8045_v9  ;;  %v8046_v45 = vunpack.i.l.bf16 %v8045_v9  ;;  %v7643_v32 = vpack.c.bf16 %v2683_v38, %v2682_v30 }
 0x996   : > { %v8012_v35 = vunpack.i.h.bf16 %v8010_v34  ;;  %v8011_v39 = vunpack.i.l.bf16 %v8010_v34  ;;  %7640 = vmatprep.subr.bf16.mxu0 %v7639_v31  ;;  %v2684_v34 = vld [vmem:[%s10554_s15 + $0x20] sm:$0xff] }
 0x997   : > { %7642 = vmatpush3.bf16.msra.mxu0 %v7639_v31 }
 0x998   : > { %v2485_v2 = vsel %vm2470_vm10, %v2481_v3, %v8011_v39  ;;  %v2472_v44 = vsel %vm2470_vm10, %v2467_v42, %v8012_v35  ;;  %7644 = vmatprep.subr.bf16.mxu0 %v7643_v32  ;;  %v2685_v35 = vld [vmem:[%s10554_s15 + $0x28] sm:$0xff]  ;;  %v2686_v39 = vld [vmem:[%s10554_s15 + $0x30] sm:$0xff]  ;;  %v6470_v3 = vld [vmem:[%s10553_s14] ss:$0 sm:$0xff] }
 0x999   : > { %v8020_v46 = vpop.permute.xlu1 %8019  ;;  %v2489_v13 = vsel %vm2475_vm11, %v2485_v2, %v8016_v41  ;;  %v2477_v48 = vsel %vm2475_vm11, %v2472_v44, %v8017_v0  ;;  %v7647_v1 = vpack.c.bf16 %v2685_v35, %v2684_v34  ;;  %v7651_v0 = vpack.c.bf16 %v2687_v40, %v2686_v39 }
 0x99a   : > { %v8022_v15 = vunpack.i.h.bf16 %v8020_v46  ;;  %v8021_v53 = vunpack.i.l.bf16 %v8020_v46  ;;  %2575 = vmatprep.mubr.f32.mxu1 %v2489_v13 }
 0x99b   : > { %2576 = vmatmul.mubr.f32.gmra.mrb[18].mxu1 %v2477_v48  ;;  %7646 = vmatpush3.bf16.msra.mxu0 %v7643_v32 }
 0x99c   : > { %v2482_v62 = vsel %vm859_vm0, %v2393_v61, %v8021_v53  ;;  %v2468_v37 = vsel %vm859_vm0, %v8912_v47, %v8022_v15  ;;  %7648 = vmatprep.subr.bf16.mxu0 %v7647_v1 }
 0x99d   : > { %v8030_v57 = vpop.permute.xlu1 %8029  ;;  %v2486_v14 = vsel %vm2470_vm10, %v2482_v62, %v8026_v54  ;;  %v2473_v8 = vsel %vm2470_vm10, %v2468_v37, %v8027_v12 }
 0x99e   : > { %v8032_v60 = vunpack.i.h.bf16 %v8030_v57  ;;  %v8031_v4 = vunpack.i.l.bf16 %v8030_v57 }
 0x99f   : > { %7650 = vmatpush3.bf16.msra.mxu0 %v7647_v1 }
 0x9a0   : > { %v2490_v10 = vsel %vm2475_vm11, %v2486_v14, %v8031_v4  ;;  %v2478_v16 = vsel %vm2475_vm11, %v2473_v8, %v8032_v60  ;;  %7652 = vmatprep.subr.bf16.mxu0 %v7651_v0 }
 0x9a1   : > { %v8040_v50 = vpop.permute.xlu1 %8039  ;;  %2580 = vmatprep.mubr.f32.mxu1 %v2490_v10  ;;  %v6475_v10 = vld [vmem:[%s10555_s16] ss:$0 sm:$0xff] }
 0x9a2   : > { %v8042_v47 = vunpack.i.h.bf16 %v8040_v50  ;;  %v8041_v17 = vunpack.i.l.bf16 %v8040_v50  ;;  %2581 = vmatmul.mubr.f32.gmra.mrb[20].mxu1 %v2478_v16 }
 0x9a3   : > { %7654 = vmatpush3.bf16.msra.mxu0 %v7651_v0 }
 0x9a4   : > { %v2487_v20 = vsel %vm2470_vm10, %v2483_v56, %v8041_v17  ;;  %v2474_v58 = vsel %vm2470_vm10, %v2469_v63, %v8042_v47 }
 0x9a5   : > { %v2491_v21 = vsel %vm2475_vm11, %v2487_v20, %v8046_v45  ;;  %v2479_v22 = vsel %vm2475_vm11, %v2474_v58, %v8047_v59 }
 0x9a6   : > { %2585 = vmatprep.mubr.f32.mxu1 %v2491_v21 }
 0x9a7   : > { %2586 = vmatmul.mubr.f32.gmra.mrb[22].mxu1 %v2479_v22 }
 0x9e4   : > { %v7267_v23 = vpop.f32.mrb[28].mxu0 }
 0x9e5   : > { %v2657_v25 = vpop.f32.mrb[29].mxu0 }
 0x9e8   : > { %v7270_v26 = vpop.f32.mrb[30].mxu0 }
 0x9e9   : > { %v2667_v28 = vpop.f32.mrb[31].mxu0 }
 0xa65   : > { %v6901_v41 = vpop.f32.mrb[16].mxu1 }
 0xa66   : > { %v6902_v42 = vpop.f32.mrb[17].mxu1 }
 0xa67   : > { %v6903_v2 = vadd.f32 %v6902_v42, %v6901_v41 }
 0xa69   : > { %v2573_v44 = vadd.f32 %v6903_v2, %v6470_v3  ;;  %v6482_v2 = vld [vmem:[%s10606_s6 + $0x40] sm:$0xff] }
 0xa6b   : > { %v2658_v46 = vadd.f32 %v2657_v25, %v2573_v44  ;;  %v6483_v44 = vld [vmem:[%s10606_s6 + $0x48] sm:$0xff] }
 0xa6d   : > { %v2676_v13 = vmax.f32 %v2658_v46, 0.0  ;;  %v7655_v46 = vpack.c.bf16 %v6483_v44, %v6482_v2 }
 0xa6e   : > { %v6904_v48 = vpop.f32.mrb[18].mxu1 }
 0xa6f   : > { %v6905_v49 = vpop.f32.mrb[19].mxu1  ;;  %7287 = vmatprep.mubr.msk.f32.mxu0 %vm2470_vm10, %v2676_v13  ;;  %7656 = vmatprep.subr.bf16.mxu0 %v7655_v46  ;;  %v6484_v13 = vld [vmem:[%s10606_s6 + $0x50] sm:$0xff] }
 0xa70   : > { %v6906_v15 = vadd.f32 %v6905_v49, %v6904_v48  ;;  %v6485_v48 = vld [vmem:[%s10606_s6 + $0x58] sm:$0xff]  ;;  %v6492_v49 = vld [vmem:[%s10605_s8 + $0x40] sm:$0xff] }
 0xa72   : > { %v2578_v53 = vadd.f32 %v6906_v15, %v6470_v3  ;;  %v7659_v15 = vpack.c.bf16 %v6485_v48, %v6484_v13 }
 0xa74   : > { %v2663_v61 = vadd.f32 %v7267_v23, %v2578_v53  ;;  %v6493_v53 = vld [vmem:[%s10605_s8 + $0x48] sm:$0xff] }
 0xa75   : > { %v6907_v62 = vpop.f32.mrb[20].mxu1 }
 0xa76   : > { %v2677_v37 = vmax.f32 %v2663_v61, 0.0  ;;  %v6908_v12 = vpop.f32.mrb[21].mxu1  ;;  %v7663_v61 = vpack.c.bf16 %v6493_v53, %v6492_v49 }
 0xa77   : > { %v6909_v54 = vadd.f32 %v6908_v12, %v6907_v62 }
 0xa78   : > { %7288 = vmatmul.mubr.msk.f32.vlgmr.msra.gmra.mrb[32].mxu0 %vm2470_vm10, %v2677_v37 }
 0xa79   : > { %v2583_v57 = vadd.f32 %v6909_v54, %v6470_v3  ;;  %7658 = vmatpush3.bf16.msra.mxu0 %v7655_v46 }
 0xa7a   : > { %v6910_v60 = vpop.f32.mrb[22].mxu1  ;;  %7660 = vmatprep.subr.bf16.mxu0 %v7659_v15 }
 0xa7b   : > { %v2668_v4 = vadd.f32 %v2667_v28, %v2583_v57  ;;  %v6911_v5 = vpop.f32.mrb[23].mxu1 }
 0xa7c   : > { %v6912_v7 = vadd.f32 %v6911_v5, %v6910_v60 }
 0xa7d   : > { %v2678_v52 = vmax.f32 %v2668_v4, 0.0  ;;  %7662 = vmatpush3.bf16.msra.mxu0 %v7659_v15 }
 0xa7e   : > { %v2588_v14 = vadd.f32 %v6912_v7, %v6470_v3  ;;  %7664 = vmatprep.subr.bf16.mxu0 %v7663_v61 }
 0xa7f   : > { %7290 = vmatprep.mubr.msk.f32.mxu0 %vm2470_vm10, %v2678_v52 }
 0xa80   : > { %v2673_v8 = vadd.f32 %v7270_v26, %v2588_v14 }
 0xa82   : > { %v2679_v9 = vmax.f32 %v2673_v8, 0.0  ;;  %v6480_v8 = vld [vmem:[%s10556_s17] ss:$0 sm:$0xff] }
 0xa84   : > { %7291 = vmatmul.mubr.msk.f32.gmra.mrb[34].mxu0 %vm2470_vm10, %v2679_v9 }
 0xb4b   : > { %v7289_v16 = vpop.f32.mrb[32].mxu0 }
 0xb4c   : > { %v2779_v50 = vadd.f32 %v7289_v16, %v6475_v10  ;;  %v2773_v47 = vpop.f32.mrb[33].mxu0 }
 0xb4d   : > { %v2774_v17 = vadd.f32 %v6475_v10, %v2773_v47  ;;  %v6481_v47 = vld [vmem:[%s10557_s18] ss:$0 sm:$0xff] }
 0xb4e   : > { %v2793_v18 = vadd.f32 %v2779_v50, %v8850_v51 }
 0xb4f   : > { %v2792_v59 = vadd.f32 %v2774_v17, %v8853_v19 }
 0xb50   : > { %v2801_v45 = vsel %vm859_vm0, %v2793_v18, 0.0 }
 0xb51   : > { %2802 = vadd.xlane.f32.xlu0 %v2801_v45  ;;  %v2798_v56 = vsel %vm859_vm0, %v2792_v59, 0.0 }
 0xb52   : > { %2799 = vadd.xlane.f32.xlu1 %v2798_v56 }
 0xb57   : > { %v7292_v63 = vpop.f32.mrb[34].mxu0 }
 0xb58   : > { %v2789_v20 = vadd.f32 %v7292_v63, %v6475_v10  ;;  %v2783_v58 = vpop.f32.mrb[35].mxu0  ;;  %v6494_v63 = vld [vmem:[%s10605_s8 + $0x50] sm:$0xff] }
 0xb59   : > { %v2784_v21 = vadd.f32 %v6475_v10, %v2783_v58 }
 0xb5a   : > { %v2795_v22 = vadd.f32 %v2789_v20, %v8881_v33  ;;  %v6495_v20 = vld [vmem:[%s10605_s8 + $0x58] sm:$0xff] }
 0xb5b   : > { %v2794_v23 = vadd.f32 %v2784_v21, %v8887_v36 }
 0xb5c   : > { %v2807_v25 = vsel %vm859_vm0, %v2795_v22, 0.0 }
 0xb5d   : > { %2808 = vadd.xlane.f32.xlu1 %v2807_v25  ;;  %v2804_v51 = vsel %vm859_vm0, %v2794_v23, 0.0  ;;  %v6503_v25 = vld [vmem:[%s10612_s5 + $0x48] sm:$0xff] }
 0xb5e   : > { %2805 = vadd.xlane.f32.xlu0 %v2804_v51 }
 0xbde   : > { %v2803_v19 = vpop.xlane.xlu0 %2802 }
 0xbdf   : > { %v2811_v26 = vmul.f32 0.03125, %v2803_v19  ;;  %v2800_v28 = vpop.xlane.xlu1 %2799 }
 0xbe0   : > { %v2810_v29 = vmul.f32 0.03125, %v2800_v28 }
 0xbe1   : > { %v2815_v43 = vsub.f32 %v2793_v18, %v2811_v26 }
 0xbe2   : > { %v2814_v30 = vsub.f32 %v2792_v59, %v2810_v29 }
 0xbe3   : > { %v2819_v31 = vmul.f32 %v2815_v43, %v2815_v43 }
 0xbe4   : > { %v2818_v38 = vmul.f32 %v2814_v30, %v2814_v30 }
 0xbe5   : > { %v2825_v32 = vsel %vm859_vm0, %v2819_v31, 0.0 }
 0xbe6   : > { %2826 = vadd.xlane.f32.xlu1 %v2825_v32  ;;  %v2822_v33 = vsel %vm859_vm0, %v2818_v38, 0.0 }
 0xbe7   : > { %2823 = vadd.xlane.f32.xlu0 %v2822_v33 }
 0xbea   : > { %v2809_v36 = vpop.xlane.xlu1 %2808 }
 0xbeb   : > { %v2813_v34 = vmul.f32 0.03125, %v2809_v36  ;;  %v2806_v35 = vpop.xlane.xlu0 %2805  ;;  %v6504_v36 = vld [vmem:[%s10612_s5 + $0x50] sm:$0xff] }
 0xbec   : > { %v2812_v39 = vmul.f32 0.03125, %v2806_v35 }
 0xbed   : > { %v2817_v1 = vsub.f32 %v2795_v22, %v2813_v34  ;;  %v7667_v22 = vpack.c.bf16 %v6495_v20, %v6494_v63  ;;  %v6505_v34 = vld [vmem:[%s10612_s5 + $0x58] sm:$0xff]  ;;  %v9215_v63 = vld [vmem:[%s8575_s1] ss:$0 sm:$0xff]  ;;  %s10624_s1 = sld [smem:[#allocation15_spill]] }
 0xbee   : > { %v2816_v40 = vsub.f32 %v2794_v23, %v2812_v39  ;;  %v6502_v23 = vld [vmem:[%s10612_s5 + $0x40] sm:$0xff]  ;;  %v7675_v35 = vpack.c.bf16 %v6505_v34, %v6504_v36 }
 0xbef   : > { %v2821_v0 = vmul.f32 %v2817_v1, %v2817_v1  ;;  %v7671_v28 = vpack.c.bf16 %v6503_v25, %v6502_v23  ;;  %v6487_v39 = vld [vmem:[%s10609_s0 + $0x2] ss:$0 sm:$0xff] }
 0xbf0   : > { %v2820_v41 = vmul.f32 %v2816_v40, %v2816_v40 }
 0xbf1   : > { %v2831_v3 = vsel %vm859_vm0, %v2821_v0, 0.0 }
 0xbf2   : > { %2832 = vadd.xlane.f32.xlu1 %v2831_v3  ;;  %v2828_v42 = vsel %vm859_vm0, %v2820_v41, 0.0 }
 0xbf3   : > { %2829 = vadd.xlane.f32.xlu0 %v2828_v42  ;;  %v6497_v42 = vld [vmem:[%s10608_s28 + $0x2] ss:$0 sm:$0xff] }
 0xc73   : > { %v2827_v62 = vpop.xlane.xlu1 %2826 }
 0xc74   : > { %v2835_v37 = vmul.f32 0.03125, %v2827_v62  ;;  %v2824_v12 = vpop.xlane.xlu0 %2823  ;;  %v6507_v62 = vld [vmem:[%s10614_s2 + $0x2] ss:$0 sm:$0xff] }
 0xc75   : > { %v2834_v54 = vmul.f32 0.03125, %v2824_v12 }
 0xc76   : > { %v2839_v57 = vadd.f32 1e-05, %v2835_v37 }
 0xc77   : > { %v2838_v60 = vadd.f32 1e-05, %v2834_v54 }
 0xc78   : > { %8223 = vrsqrt.f32 %v2839_v57 }
 0xc79   : > { %8225 = vrsqrt.f32 %v2838_v60  ;;  %v6536_v60 = vld [vmem:[%s10605_s8 + $0x60] sm:$0xff] }
 0xc7f   : > { %v2833_v4 = vpop.xlane.xlu1 %2832 }
 0xc80   : > { %v2837_v5 = vmul.f32 0.03125, %v2833_v4  ;;  %v2830_v7 = vpop.xlane.xlu0 %2829  ;;  %v6537_v4 = vld [vmem:[%s10605_s8 + $0x68] sm:$0xff] }
 0xc81   : > { %v2836_v52 = vmul.f32 0.03125, %v2830_v7 }
 0xc82   : > { %v8224_v14 = vpop.eup %8223  ;;  %v2841_v9 = vadd.f32 1e-05, %v2837_v5 }
 0xc83   : > { %v8226_v10 = vpop.eup %8225  ;;  %v2847_v16 = vmul.f32 %v8224_v14, %v2815_v43  ;;  %v2840_v50 = vadd.f32 1e-05, %v2836_v52  ;;  %v7707_v14 = vpack.c.bf16 %v6537_v4, %v6536_v60 }
 0xc84   : > { %v2846_v17 = vmul.f32 %v8226_v10, %v2814_v30  ;;  %8227 = vrsqrt.f32 %v2841_v9 }
 0xc85   : > { %v2857_v18 = vmul.f32 %v6480_v8, %v2847_v16  ;;  %8229 = vrsqrt.f32 %v2840_v50  ;;  %v6538_v50 = vld [vmem:[%s10605_s8 + $0x70] sm:$0xff] }
 0xc86   : > { %v2856_v59 = vmul.f32 %v6480_v8, %v2846_v17 }
 0xc87   : > { %v2867_v45 = vadd.f32 %v6481_v47, %v2857_v18 }
 0xc88   : > { %v2866_v56 = vadd.f32 %v6481_v47, %v2856_v59 }
 0xc89   : > { %v9129_v21 = vmul.f32 %v2867_v45, %v8833_v55 }
 0xc8a   : > { %v9126_v58 = vmul.f32 %v2866_v56, %v8846_v11 }
 0xc8c   : > { %7301 = vmatprep.mubr.msk.f32.mxu0 %vm859_vm0, %v9126_v58 }
 0xc8d   : > { %7302 = vmatmul.mubr.msk.f32.vlgmr.msra.gmra.mrb[36].mxu0 %vm859_vm0, %v9129_v21 }
 0xc8e   : > { %v8228_v51 = vpop.eup %8227  ;;  %7666 = vmatpush3.bf16.msra.mxu0 %v7663_v61 }
 0xc8f   : > { %v8230_v19 = vpop.eup %8229  ;;  %v2849_v26 = vmul.f32 %v8228_v51, %v2817_v1  ;;  %7668 = vmatprep.subr.bf16.mxu0 %v7667_v22 }
 0xc90   : > { %v2848_v29 = vmul.f32 %v8230_v19, %v2816_v40 }
 0xc91   : > { %v2859_v43 = vmul.f32 %v6480_v8, %v2849_v26 }
 0xc92   : > { %v2858_v30 = vmul.f32 %v6480_v8, %v2848_v29  ;;  %7670 = vmatpush3.bf16.msra.mxu0 %v7667_v22 }
 0xc93   : > { %v2869_v31 = vadd.f32 %v6481_v47, %v2859_v43  ;;  %7672 = vmatprep.subr.bf16.mxu0 %v7671_v28  ;;  %v6541_v43 = vld [vmem:[%s10608_s28 + $0x3] ss:$0 sm:$0xff] }
 0xc94   : > { %v2868_v38 = vadd.f32 %v6481_v47, %v2858_v30  ;;  %v6539_v47 = vld [vmem:[%s10605_s8 + $0x78] sm:$0xff] }
 0xc95   : > { %v9145_v33 = vmul.f32 %v2869_v31, %v8868_v27  ;;  %v7711_v18 = vpack.c.bf16 %v6539_v47, %v6538_v50 }
 0xc96   : > { %v9142_v32 = vmul.f32 %v2868_v38, %v8843_v6 }
 0xc98   : > { %7304 = vmatprep.mubr.msk.f32.mxu0 %vm859_vm0, %v9142_v32 }
 0xc99   : > { %7305 = vmatmul.mubr.msk.f32.gmra.mrb[38].mxu0 %vm859_vm0, %v9145_v33 }
 0xc9a   : > { %7315 = vmatprep.mubr.msk.f32.mxu0 %vm859_vm0, %v9126_v58 }
 0xc9d   : > { %7316 = vmatmul.mubr.msk.f32.vlgmr.msra.gmra.mrb[40].mxu0 %vm859_vm0, %v9129_v21 }
 0xc9e   : > { %7318 = vmatprep.mubr.msk.f32.mxu0 %vm859_vm0, %v9142_v32  ;;  %7674 = vmatpush3.bf16.msra.mxu0 %v7671_v28 }
 0xc9f   : > { %7676 = vmatprep.subr.bf16.mxu0 %v7675_v35 }
 0xca1   : > { %7319 = vmatmul.mubr.msk.f32.gmra.mrb[42].mxu0 %vm859_vm0, %v9145_v33 }
 0xca2   : > { %7678 = vmatpush3.bf16.msra.mxu0 %v7675_v35  ;;  %7329 = vmatprep.mubr.msk.f32.mxu0 %vm859_vm0, %v9126_v58 }
 0xca5   : > { %7330 = vmatmul.mubr.msk.f32.vlgmr.msra.gmra.mrb[44].mxu0 %vm859_vm0, %v9129_v21 }
 0xca6   : > { %7332 = vmatprep.mubr.msk.f32.mxu0 %vm859_vm0, %v9142_v32 }
 0xca9   : > { %7333 = vmatmul.mubr.msk.f32.gmra.mrb[46].mxu0 %vm859_vm0, %v9145_v33 }
 0xd60   : > { %v7303_v1 = vpop.f32.mrb[36].mxu0 }
 0xd61   : > { %v2965_v40 = vpop.f32.mrb[37].mxu0  ;;  %v2971_v17 = vadd.f32 %v7303_v1, %v6487_v39 }
 0xd62   : > { %v2966_v0 = vadd.f32 %v6487_v39, %v2965_v40 }
 0xd64   : > { %7343 = vmatprep.mubr.msk.f32.mxu1 %vm1155_vm1, %v2966_v0 }
 0xd6c   : > { %v7306_v41 = vpop.f32.mrb[38].mxu0 }
 0xd6d   : > { %v2975_v3 = vpop.f32.mrb[39].mxu0  ;;  %v2981_v45 = vadd.f32 %v7306_v41, %v6487_v39 }
 0xd6e   : > { %v2976_v59 = vadd.f32 %v6487_v39, %v2975_v3 }
 0xd70   : > { %v7317_v2 = vpop.f32.mrb[40].mxu0 }
 0xd71   : > { %v3069_v44 = vadd.f32 %v7317_v2, %v6497_v42  ;;  %v3063_v46 = vpop.f32.mrb[41].mxu0 }
 0xd72   : > { %v3064_v13 = vadd.f32 %v6497_v42, %v3063_v46 }
 0xd74   : > { %v7679_v48 = vpack.c.bf16 %v3069_v44, %v3064_v13  ;;  %v7320_v49 = vpop.f32.mrb[42].mxu0 }
 0xd75   : > { %v3079_v15 = vadd.f32 %v7320_v49, %v6497_v42  ;;  %v3073_v53 = vpop.f32.mrb[43].mxu0 }
 0xd76   : > { %v3074_v61 = vadd.f32 %v6497_v42, %v3073_v53  ;;  %7681 = vmatprep.subr.msk.bf16.mxu1 %vm8535_vm2, %v7679_v48 }
 0xd77   : > { %7684 = vmatpush3.bf16.xpose.msk.msra.mxu1 %vm8535_vm2, %v7679_v48 }
 0xd78   : > { %v7685_v37 = vpack.c.bf16 %v3079_v15, %v3074_v61  ;;  %v7331_v12 = vpop.f32.mrb[44].mxu0 }
 0xd79   : > { %v3167_v54 = vadd.f32 %v7331_v12, %v6507_v62  ;;  %v3161_v57 = vpop.f32.mrb[45].mxu0 }
 0xd7a   : > { %v3162_v5 = vadd.f32 %v6507_v62, %v3161_v57  ;;  %7687 = vmatprep.subr.msk.bf16.mxu1 %vm8535_vm2, %v7685_v37 }
 0xd7c   : > { %v7691_v7 = vpack.c.bf16 %v3167_v54, %v3162_v5  ;;  %v7334_v52 = vpop.f32.mrb[46].mxu0 }
 0xd7d   : > { %v3177_v8 = vadd.f32 %v7334_v52, %v6507_v62  ;;  %v3171_v9 = vpop.f32.mrb[47].mxu0  ;;  %v6526_v52 = vld [vmem:[%s10606_s6 + $0x60] sm:$0xff] }
 0xd7e   : > { %v3172_v10 = vadd.f32 %v6507_v62, %v3171_v9  ;;  %7692 = vmatprep.subr.bf16.mxu0 %v7691_v7 }
 0xd7f   : > { %7690 = vmatpush3.bf16.xpose.msk.msra.mxu1 %vm8535_vm2, %v7685_v37  ;;  %7694 = vmatpush3.bf16.msra.mxu0 %v7691_v7 }
 0xd80   : > { %v7695_v16 = vpack.c.bf16 %v3177_v8, %v3172_v10  ;;  %7708 = vmatprep.subr.bf16.mxu1 %v7707_v14 }
 0xd82   : > { %7696 = vmatprep.subr.bf16.mxu0 %v7695_v16 }
 0xd83   : > { %7698 = vmatpush3.bf16.msra.mxu0 %v7695_v16 }
 0xd86   : > { %7344 = vmatmul.mubr.msk.f32.vlgmr.msra.gmra.mrb[24].mxu1 %vm1155_vm1, %v2971_v17  ;;  %v6528_v17 = vld [vmem:[%s10606_s6 + $0x70] sm:$0xff] }
 0xd87   : > { %7346 = vmatprep.mubr.msk.f32.mxu1 %vm1155_vm1, %v2976_v59  ;;  %7710 = vmatpush3.bf16.msra.mxu1 %v7707_v14  ;;  %v6527_v14 = vld [vmem:[%s10606_s6 + $0x68] sm:$0xff] }
 0xd88   : > { %7712 = vmatprep.subr.bf16.mxu1 %v7711_v18  ;;  %v7699_v8 = vpack.c.bf16 %v6527_v14, %v6526_v52 }
 0xd8a   : > { %7347 = vmatmul.mubr.msk.f32.gmra.mrb[26].mxu1 %vm1155_vm1, %v2981_v45  ;;  %7700 = vmatprep.subr.bf16.mxu0 %v7699_v8 }
 0xd8b   : > { %7714 = vmatpush3.bf16.msra.mxu1 %v7711_v18  ;;  %7385 = vmatprep.mubr.msk.f32.mxu1 %vm859_vm0, %v9126_v58  ;;  %v6529_v18 = vld [vmem:[%s10606_s6 + $0x78] sm:$0xff] }
 0xd8e   : > { %7386 = vmatmul.mubr.msk.f32.vlgmr.msra.gmra.mrb[28].mxu1 %vm859_vm0, %v9129_v21 }
 0xd8f   : > { %7388 = vmatprep.mubr.msk.f32.mxu1 %vm859_vm0, %v9142_v32 }
 0xd92   : > { %7389 = vmatmul.mubr.msk.f32.gmra.mrb[30].mxu1 %vm859_vm0, %v9145_v33 }
 0xe59   : > { %v7345_v56 = vpop.f32.mrb[24].mxu1 }
 0xe5a   : > { %v3276_v20 = vadd.f32 %v9215_v63, %v7345_v56  ;;  %v3270_v22 = vpop.f32.mrb[25].mxu1 }
 0xe5b   : > { %v3271_v23 = vadd.f32 %v9215_v63, %v3270_v22 }
 0xe5c   : > { %v3292_v25 = vsel %vm859_vm0, %v3276_v20, -inf }
 0xe5d   : > { %3293 = vmax.xlane.f32.xlu1 %v3292_v25  ;;  %v7348_v51 = vpop.f32.mrb[26].mxu1  ;;  %v3289_v19 = vsel %vm859_vm0, %v3271_v23, -inf  ;;  %v6547_v25 = vld [vmem:[%s10612_s5 + $0x68] sm:$0xff] }
 0xe5e   : > { %v3286_v26 = vadd.f32 %v9215_v63, %v7348_v51  ;;  %3290 = vmax.xlane.f32.xlu0 %v3289_v19  ;;  %v3280_v28 = vpop.f32.mrb[27].mxu1 }
 0xe5f   : > { %v3281_v29 = vadd.f32 %v9215_v63, %v3280_v28 }
 0xe60   : > { %v3298_v30 = vsel %vm859_vm0, %v3286_v26, -inf }
 0xe61   : > { %3299 = vmax.xlane.f32.xlu1 %v3298_v30  ;;  %v7387_v31 = vpop.f32.mrb[28].mxu1  ;;  %v3295_v38 = vsel %vm859_vm0, %v3281_v29, -inf }
 0xe62   : > { %v3616_v36 = vadd.f32 %v7387_v31, %v6541_v43  ;;  %v3610_v34 = vpop.f32.mrb[29].mxu1  ;;  %3296 = vmax.xlane.f32.xlu0 %v3295_v38 }
 0xe63   : > { %v3611_v35 = vadd.f32 %v6541_v43, %v3610_v34 }
 0xe65   : > { %v7723_v39 = vpack.c.bf16 %v3616_v36, %v3611_v35  ;;  %v7390_v1 = vpop.f32.mrb[30].mxu1  ;;  %v6531_v35 = vld [vmem:[%s10609_s0 + $0x3] ss:$0 sm:$0xff]  ;;  %s838_s0 = scalar_lea.vmem %s10626_s3, %s8495_s9 }
 0xe66   : > { %v3626_v40 = vadd.f32 %v7390_v1, %v6541_v43  ;;  %v3620_v0 = vpop.f32.mrb[31].mxu1 }
 0xe67   : > { %v3621_v41 = vadd.f32 %v6541_v43, %v3620_v0  ;;  %7725 = vmatprep.subr.msk.bf16.mxu1 %vm8535_vm2, %v7723_v39  ;;  %v6549_v43 = vld [vmem:[%s10612_s5 + $0x78] sm:$0xff] }
 0xe68   : > { %7728 = vmatpush3.bf16.xpose.msk.msra.mxu1 %vm8535_vm2, %v7723_v39 }
 0xe69   : > { %v7729_v3 = vpack.c.bf16 %v3626_v40, %v3621_v41 }
 0xe6b   : > { %7731 = vmatprep.subr.msk.bf16.mxu1 %vm8535_vm2, %v7729_v3 }
 0xe70   : > { %7734 = vmatpush3.bf16.xpose.msk.msra.mxu1 %vm8535_vm2, %v7729_v3 }
 0xeea   : > { %v3294_v42 = vpop.xlane.xlu1 %3293 }
 0xeeb   : > { %v3302_v2 = vsub.f32 %v3276_v20, %v3294_v42  ;;  %v3291_v44 = vpop.xlane.xlu0 %3290  ;;  %v7703_v20 = vpack.c.bf16 %v6529_v18, %v6528_v17 }
 0xeec   : > { %v3301_v46 = vsub.f32 %v3271_v23, %v3291_v44  ;;  %v6546_v23 = vld [vmem:[%s10612_s5 + $0x60] sm:$0xff] }
 0xeed   : > { %v3307_v13 = vmul.f32 1.442695, %v3302_v2  ;;  %v7715_v28 = vpack.c.bf16 %v6547_v25, %v6546_v23  ;;  %v6551_v2 = vld [vmem:[%s10614_s2 + $0x3] ss:$0 sm:$0xff] }
 0xeee   : > { %v3305_v48 = vmul.f32 1.442695, %v3301_v46  ;;  %v3300_v49 = vpop.xlane.xlu1 %3299 }
 0xeef   : > { %8231 = vpow2.f32 %v3307_v13  ;;  %v3304_v15 = vsub.f32 %v3286_v26, %v3300_v49  ;;  %v3297_v53 = vpop.xlane.xlu0 %3296 }
 0xef0   : > { %8233 = vpow2.f32 %v3305_v48  ;;  %v3303_v61 = vsub.f32 %v3281_v29, %v3297_v53  ;;  %v6548_v29 = vld [vmem:[%s10612_s5 + $0x70] sm:$0xff] }
 0xef1   : > { %v3311_v62 = vmul.f32 1.442695, %v3304_v15  ;;  %v7719_v30 = vpack.c.bf16 %v6549_v43, %v6548_v29 }
 0xef2   : > { %v3309_v37 = vmul.f32 1.442695, %v3303_v61 }
 0xef3   : > { %8235 = vpow2.f32 %v3311_v62 }
 0xef4   : > { %8237 = vpow2.f32 %v3309_v37 }
 0xef9   : > { %v8232_v12 = vpop.eup %8231 }
 0xefa   : > { %v8234_v54 = vpop.eup %8233  ;;  %v3316_v24 = vsel %vm859_vm0, %v8232_v12, 0.0 }
 0xefb   : > { %3317 = vadd.xlane.f32.xlu1 %v3316_v24  ;;  %v3313_v57 = vsel %vm859_vm0, %v8234_v54, 0.0 }
 0xefc   : > { %3314 = vadd.xlane.f32.xlu0 %v3313_v57 }
 0xefd   : > { %v8236_v60 = vpop.eup %8235 }
 0xefe   : > { %v8238_v4 = vpop.eup %8237  ;;  %v3322_v5 = vsel %vm859_vm0, %v8236_v60, 0.0 }
 0xeff   : > { %3323 = vadd.xlane.f32.xlu1 %v3322_v5  ;;  %v3319_v7 = vsel %vm859_vm0, %v8238_v4, 0.0 }
 0xf00   : > { %3320 = vadd.xlane.f32.xlu0 %v3319_v7 }
 0xf88   : > { %v3318_v9 = vpop.xlane.xlu1 %3317 }
 0xf89   : > { %8239 = vrcp.f32 %v3318_v9  ;;  %v3315_v10 = vpop.xlane.xlu0 %3314 }
 0xf8a   : > { %8241 = vrcp.f32 %v3315_v10 }
 0xf8c   : > { %v3324_v16 = vpop.xlane.xlu1 %3323 }
 0xf8d   : > { %8243 = vrcp.f32 %v3324_v16  ;;  %v3321_v50 = vpop.xlane.xlu0 %3320 }
 0xf8e   : > { %8245 = vrcp.f32 %v3321_v50 }
 0xf93   : > { %v8240_v47 = vpop.eup %8239 }
 0xf94   : > { %v8242_v59 = vpop.eup %8241  ;;  %v3330_v56 = vmul.f32 %v8240_v47, %v8232_v12 }
 0xf95   : > { %v3329_v45 = vmul.f32 %v8242_v59, %v8234_v54 }
 0xf97   : > { %v8244_v22 = vpop.eup %8243  ;;  %7357 = vmatprep.mubr.msk.f32.mxu0 %vm859_vm0, %v3329_v45 }
 0xf98   : > { %v8246_v51 = vpop.eup %8245  ;;  %7358 = vmatmul.mubr.msk.f32.vlgmr.msra.gmra.mrb[48].mxu0 %vm859_vm0, %v3330_v56  ;;  %v3332_v26 = vmul.f32 %v8244_v22, %v8236_v60 }
 0xf99   : > { %7702 = vmatpush3.bf16.msra.mxu0 %v7699_v8  ;;  %v3331_v19 = vmul.f32 %v8246_v51, %v8238_v4 }
 0xf9a   : > { %7704 = vmatprep.subr.bf16.mxu0 %v7703_v20 }
 0xf9b   : > { %7360 = vmatprep.mubr.msk.f32.mxu0 %vm859_vm0, %v3331_v19 }
 0xf9c   : > { %7361 = vmatmul.mubr.msk.f32.gmra.mrb[50].mxu0 %vm859_vm0, %v3332_v26 }
 0xf9d   : > { %7706 = vmatpush3.bf16.msra.mxu0 %v7703_v20  ;;  %7371 = vmatprep.mubr.msk.f32.mxu0 %vm859_vm0, %v9126_v58 }
 0xf9e   : > { %7716 = vmatprep.subr.bf16.mxu0 %v7715_v28 }
 0xfa0   : > { %7372 = vmatmul.mubr.msk.f32.vlgmr.msra.gmra.mrb[52].mxu0 %vm859_vm0, %v9129_v21 }
 0xfa1   : > { %7374 = vmatprep.mubr.msk.f32.mxu0 %vm859_vm0, %v9142_v32  ;;  %7718 = vmatpush3.bf16.msra.mxu0 %v7715_v28 }
 0xfa2   : > { %7720 = vmatprep.subr.bf16.mxu0 %v7719_v30 }
 0xfa4   : > { %7375 = vmatmul.mubr.msk.f32.gmra.mrb[54].mxu0 %vm859_vm0, %v9145_v33 }
 0xfa5   : > { %7722 = vmatpush3.bf16.msra.mxu0 %v7719_v30  ;;  %7399 = vmatprep.mubr.msk.f32.mxu0 %vm859_vm0, %v9126_v58 }
 0xfa8   : > { %7400 = vmatmul.mubr.msk.f32.vlgmr.msra.gmra.mrb[56].mxu0 %vm859_vm0, %v9129_v21 }
 0xfa9   : > { %7402 = vmatprep.mubr.msk.f32.mxu0 %vm859_vm0, %v9142_v32 }
 0xfac   : > { %7403 = vmatmul.mubr.msk.f32.gmra.mrb[58].mxu0 %vm859_vm0, %v9145_v33 }
0x106b   : > { %v9284_v31 = vpop.f32.mrb[48].mxu0 }
0x106c   : > { %v9286_v38 = vpop.f32.mrb[49].mxu0 }
0x106f   : > { %v9288_v36 = vpop.f32.mrb[50].mxu0 }
0x1070   : > { %v9290_v34 = vpop.f32.mrb[51].mxu0 }
0x1073   : > { %v7373_v39 = vpop.f32.mrb[52].mxu0 }
0x1074   : > { %v3512_v1 = vpop.f32.mrb[53].mxu0  ;;  %v3518_v0 = vadd.f32 %v7373_v39, %v6531_v35  ;;  %v6569_v39 = vld [vmem:[%s10615_s29 + $0x38] sm:$0xff] }
0x1075   : > { %v3513_v40 = vadd.f32 %v6531_v35, %v3512_v1 }
0x1077   : > { %v7376_v41 = vpop.f32.mrb[54].mxu0  ;;  %7413 = vmatprep.mubr.msk.f32.mxu1 %vm1155_vm1, %v3513_v40 }
0x1078   : > { %v3522_v3 = vpop.f32.mrb[55].mxu0  ;;  %7414 = vmatmul.mubr.msk.f32.vlgmr.msra.gmra.mrb[32].mxu1 %vm1155_vm1, %v3518_v0  ;;  %v3528_v44 = vadd.f32 %v7376_v41, %v6531_v35 }
0x1079   : > { %v3523_v42 = vadd.f32 %v6531_v35, %v3522_v3  ;;  %v6568_v35 = vld [vmem:[%s10615_s29 + $0x30] sm:$0xff] }
0x107a   : > { %v7743_v1 = vpack.c.bf16 %v6569_v39, %v6568_v35  ;;  %v6617_v35 = vld [vmem:[%s10552_s13 + $0x228] sm:$0xff]  ;;  %v6618_v39 = vld [vmem:[%s10552_s13 + $0x230] sm:$0xff] }
0x107b   : > { %v7401_v46 = vpop.f32.mrb[56].mxu0  ;;  %7416 = vmatprep.mubr.msk.f32.mxu1 %vm1155_vm1, %v3523_v42 }
0x107c   : > { %v3714_v13 = vadd.f32 %v7401_v46, %v6551_v2  ;;  %v3708_v48 = vpop.f32.mrb[57].mxu0  ;;  %7417 = vmatmul.mubr.msk.f32.gmra.mrb[34].mxu1 %vm1155_vm1, %v3528_v44 }
0x107d   : > { %v3709_v49 = vadd.f32 %v6551_v2, %v3708_v48 }
0x107f   : > { %v7735_v15 = vpack.c.bf16 %v3714_v13, %v3709_v49  ;;  %v7404_v53 = vpop.f32.mrb[58].mxu0 }
0x1080   : > { %v3724_v61 = vadd.f32 %v7404_v53, %v6551_v2  ;;  %v3718_v62 = vpop.f32.mrb[59].mxu0  ;;  %v6524_v53 = vld [vmem:[%s10615_s29 + $0x20] sm:$0xff] }
0x1081   : > { %v3719_v37 = vadd.f32 %v6551_v2, %v3718_v62  ;;  %7736 = vmatprep.subr.bf16.mxu0 %v7735_v15 }
0x1082   : > { %7738 = vmatpush3.bf16.msra.mxu0 %v7735_v15 }
0x1083   : > { %v7739_v12 = vpack.c.bf16 %v3724_v61, %v3719_v37  ;;  %v6525_v61 = vld [vmem:[%s10615_s29 + $0x28] sm:$0xff] }
0x1084   : > { %v7747_v62 = vpack.c.bf16 %v6525_v61, %v6524_v53  ;;  %v6587_v53 = vld [vmem:[%s10552_s13 + $0x138] sm:$0xff]  ;;  %v6604_v61 = vld [vmem:[%s10552_s13 + $0x1c0] sm:$0xff] }
0x1085   : > { %7740 = vmatprep.subr.bf16.mxu0 %v7739_v12 }
0x1086   : > { %7742 = vmatpush3.bf16.msra.mxu0 %v7739_v12 }
0x1087   : > { %7744 = vmatprep.subr.bf16.mxu0 %v7743_v1 }
0x114b   : > { %v7415_v54 = vpop.f32.mrb[32].mxu1 }
0x114c   : > { %v3823_v24 = vadd.f32 %v9215_v63, %v7415_v54  ;;  %v3817_v57 = vpop.f32.mrb[33].mxu1 }
0x114d   : > { %v3818_v60 = vadd.f32 %v9215_v63, %v3817_v57  ;;  %v6579_v57 = vld [vmem:[%s10616_s10 + $0x1] ss:$0 sm:$0xff] }
0x114e   : > { %v3839_v4 = vsel %vm859_vm0, %v3823_v24, -inf }
0x114f   : > { %3840 = vmax.xlane.f32.xlu1 %v3839_v4  ;;  %v7418_v5 = vpop.f32.mrb[34].mxu1  ;;  %v3836_v7 = vsel %vm859_vm0, %v3818_v60, -inf }
0x1150   : > { %v3833_v52 = vadd.f32 %v9215_v63, %v7418_v5  ;;  %v3827_v14 = vpop.f32.mrb[35].mxu1  ;;  %3837 = vmax.xlane.f32.xlu0 %v3836_v7 }
0x1151   : > { %v3828_v8 = vadd.f32 %v9215_v63, %v3827_v14 }
0x1152   : > { %v3845_v9 = vsel %vm859_vm0, %v3833_v52, -inf }
0x1153   : > { %3846 = vmax.xlane.f32.xlu1 %v3845_v9  ;;  %v3842_v10 = vsel %vm859_vm0, %v3828_v8, -inf }
0x1154   : > { %3843 = vmax.xlane.f32.xlu0 %v3842_v10 }
0x11dc   : > { %v3841_v16 = vpop.xlane.xlu1 %3840 }
0x11dd   : > { %v3849_v50 = vsub.f32 %v3823_v24, %v3841_v16  ;;  %v3838_v47 = vpop.xlane.xlu0 %3837 }
0x11de   : > { %v3848_v17 = vsub.f32 %v3818_v60, %v3838_v47 }
0x11df   : > { %v3854_v18 = vmul.f32 1.442695, %v3849_v50 }
0x11e0   : > { %v3852_v59 = vmul.f32 1.442695, %v3848_v17  ;;  %v3847_v45 = vpop.xlane.xlu1 %3846 }
0x11e1   : > { %8247 = vpow2.f32 %v3854_v18  ;;  %v3851_v56 = vsub.f32 %v3833_v52, %v3847_v45  ;;  %v3844_v20 = vpop.xlane.xlu0 %3843 }
0x11e2   : > { %8249 = vpow2.f32 %v3852_v59  ;;  %v3850_v22 = vsub.f32 %v3828_v8, %v3844_v20 }
0x11e3   : > { %v3858_v23 = vmul.f32 1.442695, %v3851_v56 }
0x11e4   : > { %v3856_v63 = vmul.f32 1.442695, %v3850_v22 }
0x11e5   : > { %8251 = vpow2.f32 %v3858_v23 }
0x11e6   : > { %8253 = vpow2.f32 %v3856_v63 }
0x11eb   : > { %v8248_v25 = vpop.eup %8247 }
0x11ec   : > { %v8250_v51 = vpop.eup %8249  ;;  %v3863_v19 = vsel %vm859_vm0, %v8248_v25, 0.0 }
0x11ed   : > { %3864 = vadd.xlane.f32.xlu1 %v3863_v19  ;;  %v3860_v26 = vsel %vm859_vm0, %v8250_v51, 0.0 }
0x11ee   : > { %3861 = vadd.xlane.f32.xlu0 %v3860_v26 }
0x11ef   : > { %v8252_v28 = vpop.eup %8251 }
0x11f0   : > { %v8254_v29 = vpop.eup %8253  ;;  %v3869_v43 = vsel %vm859_vm0, %v8252_v28, 0.0 }
0x11f1   : > { %3870 = vadd.xlane.f32.xlu1 %v3869_v43  ;;  %v3866_v30 = vsel %vm859_vm0, %v8254_v29, 0.0 }
0x11f2   : > { %3867 = vadd.xlane.f32.xlu0 %v3866_v30  ;;  %v6616_v30 = vld [vmem:[%s10552_s13 + $0x220] sm:$0xff] }
0x127a   : > { %v3865_v40 = vpop.xlane.xlu1 %3864 }
0x127b   : > { %8255 = vrcp.f32 %v3865_v40  ;;  %v3862_v0 = vpop.xlane.xlu0 %3861  ;;  %v6619_v40 = vld [vmem:[%s10552_s13 + $0x238] sm:$0xff] }
0x127c   : > { %8257 = vrcp.f32 %v3862_v0  ;;  %v7787_v0 = vpack.c.bf16 %v6619_v40, %v6618_v39  ;;  %v6583_v39 = vld [vmem:[%s10551_s12 + $0x1] ss:$0 sm:$0xff] }
0x127e   : > { %v3871_v41 = vpop.xlane.xlu1 %3870 }
0x127f   : > { %8259 = vrcp.f32 %v3871_v41  ;;  %v3868_v3 = vpop.xlane.xlu0 %3867  ;;  %v6600_v41 = vld [vmem:[%s10552_s13 + $0x1a0] sm:$0xff] }
0x1280   : > { %8261 = vrcp.f32 %v3868_v3  ;;  %v6601_v3 = vld [vmem:[%s10552_s13 + $0x1a8] sm:$0xff] }
0x1285   : > { %v8256_v42 = vpop.eup %8255 }
0x1286   : > { %v8258_v2 = vpop.eup %8257  ;;  %v3877_v46 = vmul.f32 %v8256_v42, %v8248_v25  ;;  %v6584_v42 = vld [vmem:[%s10552_s13 + $0x120] sm:$0xff] }
0x1287   : > { %v3876_v44 = vmul.f32 %v8258_v2, %v8250_v51  ;;  %v7751_v2 = vpack.c.bf16 %v6601_v3, %v6600_v41 }
0x1289   : > { %v8260_v13 = vpop.eup %8259  ;;  %7427 = vmatprep.mubr.msk.f32.mxu0 %vm859_vm0, %v3876_v44  ;;  %v6585_v44 = vld [vmem:[%s10552_s13 + $0x128] sm:$0xff]  ;;  %7752 = vmatprep.subr.bf16.mxu1 %v7751_v2 }
0x128a   : > { %v8262_v48 = vpop.eup %8261  ;;  %7428 = vmatmul.mubr.msk.f32.vlgmr.msra.gmra.mrb[60].mxu0 %vm859_vm0, %v3877_v46  ;;  %v3879_v15 = vmul.f32 %v8260_v13, %v8252_v28  ;;  %v6602_v46 = vld [vmem:[%s10552_s13 + $0x1b0] sm:$0xff]  ;;  %v6603_v13 = vld [vmem:[%s10552_s13 + $0x1b8] sm:$0xff] }
0x128b   : > { %v3878_v49 = vmul.f32 %v8262_v48, %v8254_v29  ;;  %7746 = vmatpush3.bf16.msra.mxu0 %v7743_v1  ;;  %v7783_v1 = vpack.c.bf16 %v6617_v35, %v6616_v30  ;;  %v7753_v48 = vpack.c.bf16 %v6585_v44, %v6584_v42 }
0x128c   : > { %7748 = vmatprep.subr.bf16.mxu0 %v7747_v62 }
0x128d   : > { %7430 = vmatprep.mubr.msk.f32.mxu0 %vm859_vm0, %v3878_v49  ;;  %v7755_v49 = vpack.c.bf16 %v6603_v13, %v6602_v46  ;;  %7754 = vmatpush3.bf16.msra.mxu1 %v7753_v48 }
0x128e   : > { %7431 = vmatmul.mubr.msk.f32.gmra.mrb[62].mxu0 %vm859_vm0, %v3879_v15  ;;  %v6586_v15 = vld [vmem:[%s10552_s13 + $0x130] sm:$0xff] }
0x128f   : > { %7756 = vmatprep.subr.bf16.mxu1 %v7755_v49 }
0x135d   : > { %v7429_v37 = vpop.f32.mrb[60].mxu0 }
0x135e   : > { %v3958_v12 = vpop.f32.mrb[61].mxu0 }
0x135f   : > { %7437 = vmatprep.mubr.msk.f32.mxu0 %vm1155_vm1, %v3958_v12 }
0x1360   : > { %7438 = vmatmul.mubr.msk.f32.vlgmr.msra.gmra.mrb[64].mxu0 %vm1155_vm1, %v7429_v37  ;;  %v7757_v37 = vpack.c.bf16 %v6587_v53, %v6586_v15  ;;  %v6612_v53 = vld [vmem:[%s10552_s13 + $0x200] sm:$0xff] }
0x1361   : > { %v7432_v54 = vpop.f32.mrb[62].mxu0  ;;  %7750 = vmatpush3.bf16.msra.mxu0 %v7747_v62  ;;  %v6605_v62 = vld [vmem:[%s10552_s13 + $0x1c8] sm:$0xff] }
0x1362   : > { %v3968_v24 = vpop.f32.mrb[63].mxu0  ;;  %7784 = vmatprep.subr.bf16.mxu0 %v7783_v1  ;;  %v7759_v12 = vpack.c.bf16 %v6605_v62, %v6604_v61  ;;  %7758 = vmatpush3.bf16.msra.mxu1 %v7757_v37 }
0x1363   : > { %7440 = vmatprep.mubr.msk.f32.mxu0 %vm1155_vm1, %v3968_v24  ;;  %v6589_v24 = vld [vmem:[%s10552_s13 + $0x148] sm:$0xff] }
0x1364   : > { %7441 = vmatmul.mubr.msk.f32.gmra.mrb[66].mxu0 %vm1155_vm1, %v7432_v54  ;;  %v6588_v54 = vld [vmem:[%s10552_s13 + $0x140] sm:$0xff]  ;;  %7760 = vmatprep.subr.bf16.mxu1 %v7759_v12  ;;  %v6597_v12 = vld [vmem:[%s10552_s13 + $0x188] sm:$0xff] }
0x1365   : > { %7447 = vmatprep.mubr.msk.f32.mxu0 %vm1155_vm1, %v9286_v38 }
0x1368   : > { %7448 = vmatmul.mubr.msk.f32.vlgmr.msra.gmra.mrb[64].mxu0 %vm1155_vm1, %v9284_v31 }
0x1369   : > { %7450 = vmatprep.mubr.msk.f32.mxu0 %vm1155_vm1, %v9290_v34  ;;  %7786 = vmatpush3.bf16.msra.mxu0 %v7783_v1 }
0x136a   : > { %7788 = vmatprep.subr.bf16.mxu0 %v7787_v0 }
0x136c   : > { %7451 = vmatmul.mubr.msk.f32.gmra.mrb[66].mxu0 %vm1155_vm1, %v9288_v36 }
0x136d   : > { %7790 = vmatpush3.bf16.msra.mxu0 %v7787_v0 }
0x143b   : > { %v7449_v60 = vpop.f32.mrb[64].mxu0 }
0x143c   : > { %v4183_v4 = vadd.f32 %v7449_v60, %v6579_v57  ;;  %v4155_v5 = vpop.f32.mrb[65].mxu0  ;;  %v6607_v60 = vld [vmem:[%s10552_s13 + $0x1d8] sm:$0xff] }
0x143d   : > { %v4182_v7 = vadd.f32 %v6579_v57, %v4155_v5 }
0x143e   : > { %v4187_v52 = vadd.f32 %v4183_v4, %v9129_v21  ;;  %v7761_v4 = vpack.c.bf16 %v6589_v24, %v6588_v54 }
0x143f   : > { %v7452_v38 = vpop.f32.mrb[66].mxu0  ;;  %v4186_v14 = vadd.f32 %v4182_v7, %v9126_v58  ;;  %v6590_v7 = vld [vmem:[%s10552_s13 + $0x150] sm:$0xff] }
0x1440   : > { %v4185_v31 = vadd.f32 %v7452_v38, %v6579_v57  ;;  %v4165_v8 = vpop.f32.mrb[67].mxu0  ;;  %v4197_v34 = vsel %vm859_vm0, %v4187_v52, 0.0  ;;  %v6608_v38 = vld [vmem:[%s10552_s13 + $0x1e0] sm:$0xff]  ;;  %7762 = vmatpush3.bf16.msra.mxu1 %v7761_v4 }
0x1441   : > { %v4184_v9 = vadd.f32 %v6579_v57, %v4165_v8  ;;  %4198 = vadd.xlane.f32.xlu1 %v4197_v34  ;;  %v4194_v36 = vsel %vm859_vm0, %v4186_v14, 0.0  ;;  %v6606_v57 = vld [vmem:[%s10552_s13 + $0x1d0] sm:$0xff]  ;;  %v6592_v34 = vld [vmem:[%s10552_s13 + $0x160] sm:$0xff] }
0x1442   : > { %4195 = vadd.xlane.f32.xlu0 %v4194_v36  ;;  %v4189_v10 = vadd.f32 %v4185_v31, %v9145_v33  ;;  %v7763_v5 = vpack.c.bf16 %v6607_v60, %v6606_v57  ;;  %v6610_v36 = vld [vmem:[%s10552_s13 + $0x1f0] sm:$0xff]  ;;  %v6615_v60 = vld [vmem:[%s10552_s13 + $0x218] sm:$0xff] }
0x1443   : > { %v4188_v16 = vadd.f32 %v4184_v9, %v9142_v32  ;;  %v6593_v9 = vld [vmem:[%s10552_s13 + $0x168] sm:$0xff]  ;;  %v6614_v57 = vld [vmem:[%s10552_s13 + $0x210] sm:$0xff] }
0x1444   : > { %v4203_v50 = vsel %vm859_vm0, %v4189_v10, 0.0  ;;  %7764 = vmatprep.subr.bf16.mxu1 %v7763_v5 }
0x1445   : > { %4204 = vadd.xlane.f32.xlu1 %v4203_v50  ;;  %v4200_v21 = vsel %vm859_vm0, %v4188_v16, 0.0 }
0x1446   : > { %4201 = vadd.xlane.f32.xlu0 %v4200_v21  ;;  %v6594_v21 = vld [vmem:[%s10552_s13 + $0x170] sm:$0xff] }
0x14ce   : > { %v4199_v58 = vpop.xlane.xlu1 %4198 }
0x14cf   : > { %v4207_v47 = vmul.f32 0.03125, %v4199_v58  ;;  %v4196_v17 = vpop.xlane.xlu0 %4195  ;;  %v6595_v58 = vld [vmem:[%s10552_s13 + $0x178] sm:$0xff] }
0x14d0   : > { %v4206_v18 = vmul.f32 0.03125, %v4196_v17 }
0x14d1   : > { %v9353_v59 = vsub.f32 %v4187_v52, %v4207_v47  ;;  %v6591_v52 = vld [vmem:[%s10552_s13 + $0x158] sm:$0xff]  ;;  %v7773_v47 = vpack.c.bf16 %v6595_v58, %v6594_v21 }
0x14d2   : > { %v9355_v45 = vsub.f32 %v4186_v14, %v4206_v18  ;;  %v4205_v56 = vpop.xlane.xlu1 %4204  ;;  %v6609_v14 = vld [vmem:[%s10552_s13 + $0x1e8] sm:$0xff]  ;;  %v7765_v31 = vpack.c.bf16 %v6591_v52, %v6590_v7  ;;  %v7779_v52 = vpack.c.bf16 %v6615_v60, %v6614_v57 }
0x14d3   : > { %v4209_v20 = vmul.f32 0.03125, %v4205_v56  ;;  %v4202_v22 = vpop.xlane.xlu0 %4201  ;;  %v4215_v32 = vmul.f32 %v9353_v59, %v9353_v59  ;;  %v7767_v8 = vpack.c.bf16 %v6609_v14, %v6608_v38 }
0x14d4   : > { %v4208_v33 = vmul.f32 0.03125, %v4202_v22  ;;  %v4214_v23 = vmul.f32 %v9355_v45, %v9355_v45  ;;  %7766 = vmatpush3.bf16.msra.mxu1 %v7765_v31 }
0x14d5   : > { %v9361_v63 = vsub.f32 %v4189_v10, %v4209_v20  ;;  %v4221_v25 = vsel %vm859_vm0, %v4215_v32, 0.0  ;;  %v6611_v10 = vld [vmem:[%s10552_s13 + $0x1f8] sm:$0xff]  ;;  %7768 = vmatprep.subr.bf16.mxu1 %v7767_v8 }
0x14d6   : > { %v9364_v51 = vsub.f32 %v4188_v16, %v4208_v33  ;;  %4222 = vadd.xlane.f32.xlu1 %v4221_v25  ;;  %v4218_v19 = vsel %vm859_vm0, %v4214_v23, 0.0  ;;  %v7769_v16 = vpack.c.bf16 %v6593_v9, %v6592_v34  ;;  %v7771_v50 = vpack.c.bf16 %v6611_v10, %v6610_v36 }
0x14d7   : > { %4219 = vadd.xlane.f32.xlu0 %v4218_v19  ;;  %v4217_v26 = vmul.f32 %v9361_v63, %v9361_v63 }
0x14d8   : > { %v4216_v28 = vmul.f32 %v9364_v51, %v9364_v51  ;;  %7770 = vmatpush3.bf16.msra.mxu1 %v7769_v16 }
0x14d9   : > { %v4227_v29 = vsel %vm859_vm0, %v4217_v26, 0.0  ;;  %7772 = vmatprep.subr.bf16.mxu1 %v7771_v50 }
0x14da   : > { %4228 = vadd.xlane.f32.xlu1 %v4227_v29  ;;  %v4224_v43 = vsel %vm859_vm0, %v4216_v28, 0.0 }
0x14db   : > { %4225 = vadd.xlane.f32.xlu0 %v4224_v43  ;;  %v6582_v43 = vld [vmem:[%s10550_s11 + $0x1] ss:$0 sm:$0xff] }
0x14dc   : > { %7774 = vmatpush3.bf16.msra.mxu1 %v7773_v47 }
0x1563   : > { %v4223_v17 = vpop.xlane.xlu1 %4222 }
0x1564   : > { %v4231_v18 = vmul.f32 0.03125, %v4223_v17  ;;  %v4220_v56 = vpop.xlane.xlu0 %4219 }
0x1565   : > { %v4230_v20 = vmul.f32 0.03125, %v4220_v56 }
0x1566   : > { %v4235_v22 = vadd.f32 1e-05, %v4231_v18 }
0x1567   : > { %v4234_v32 = vadd.f32 1e-05, %v4230_v20  ;;  %v4229_v33 = vpop.xlane.xlu1 %4228 }
0x1568   : > { %8263 = vrsqrt.f32 %v4235_v22  ;;  %v4233_v23 = vmul.f32 0.03125, %v4229_v33  ;;  %v4226_v25 = vpop.xlane.xlu0 %4225 }
0x1569   : > { %8265 = vrsqrt.f32 %v4234_v32  ;;  %v4232_v19 = vmul.f32 0.03125, %v4226_v25 }
0x156a   : > { %v4237_v26 = vadd.f32 1e-05, %v4233_v23 }
0x156b   : > { %v4236_v28 = vadd.f32 1e-05, %v4232_v19 }
0x156c   : > { %8267 = vrsqrt.f32 %v4237_v26 }
0x156d   : > { %8269 = vrsqrt.f32 %v4236_v28 }
0x1572   : > { %v8264_v29 = vpop.eup %8263 }
0x1573   : > { %v8266_v30 = vpop.eup %8265  ;;  %v4243_v35 = vmul.f32 %v8264_v29, %v9353_v59 }
0x1574   : > { %v4242_v1 = vmul.f32 %v8266_v30, %v9355_v45 }
0x1575   : > { %v4253_v40 = vmul.f32 %v6582_v43, %v4243_v35 }
0x1576   : > { %v8268_v0 = vpop.eup %8267  ;;  %v4252_v41 = vmul.f32 %v6582_v43, %v4242_v1 }
0x1577   : > { %v8270_v3 = vpop.eup %8269  ;;  %v4263_v42 = vadd.f32 %v6583_v39, %v4253_v40  ;;  %v4245_v2 = vmul.f32 %v8268_v0, %v9361_v63  ;;  %v6613_v63 = vld [vmem:[%s10552_s13 + $0x208] sm:$0xff] }
0x1578   : > { %v4262_v44 = vadd.f32 %v6583_v39, %v4252_v41  ;;  %v4244_v46 = vmul.f32 %v8270_v3, %v9364_v51  ;;  %v6596_v51 = vld [vmem:[%s10552_s13 + $0x180] sm:$0xff]  ;;  %v7775_v37 = vpack.c.bf16 %v6613_v63, %v6612_v53 }
0x1579   : > { %v9468_v13 = vmul.f32 %v4263_v42, %v8833_v55  ;;  %v4255_v59 = vmul.f32 %v6582_v43, %v4245_v2  ;;  %v7777_v24 = vpack.c.bf16 %v6597_v12, %v6596_v51  ;;  %v6598_v12 = vld [vmem:[%s10552_s13 + $0x190] sm:$0xff] }
0x157a   : > { %v9471_v48 = vmul.f32 %v4262_v44, %v8846_v11  ;;  %v4254_v49 = vmul.f32 %v6582_v43, %v4244_v46  ;;  %7776 = vmatprep.subr.bf16.mxu1 %v7775_v37 }
0x157b   : > { %v4314_v45 = vrot.slane %v9468_v13, 4  ;;  %v4265_v15 = vadd.f32 %v6583_v39, %v4255_v59  ;;  %7778 = vmatpush3.bf16.msra.mxu1 %v7777_v24  ;;  %v6599_v24 = vld [vmem:[%s10552_s13 + $0x198] sm:$0xff] }
0x157c   : > { %v4313_v61 = vrot.slane %v9471_v48, 4  ;;  %v4264_v62 = vadd.f32 %v6583_v39, %v4254_v49  ;;  %7780 = vmatprep.subr.bf16.mxu1 %v7779_v52 }
0x157d   : > { %v9488_v54 = vmul.f32 %v4265_v15, %v8868_v27 }
0x157e   : > { %v9497_v4 = vsel %vm2304_vm3, 0.0, %v4313_v61  ;;  %v9500_v5 = vmul.f32 %v4264_v62, %v8843_v6  ;;  %v9503_v7 = vsel %vm2304_vm3, %v4313_v61, %v4314_v45 }
0x157f   : > { %v4318_v38 = vrot.slane %v9488_v54, 4  ;;  %7461 = vmatprep.mubr.msk.f32.mxu0 %vm859_vm0, %v9503_v7  ;;  %v4350_v14 = vrot.slane %v9497_v4, 2  ;;  %v4351_v31 = vrot.slane %v9503_v7, 2  ;;  %v4426_v8 = vrot.slane %v9497_v4, 6 }
0x1580   : > { %v4316_v34 = vrot.slane %v9500_v5, 4  ;;  %v4427_v9 = vrot.slane %v9503_v7, 6  ;;  %v4329_v36 = vrot.slane %v9497_v4, 1  ;;  %v4330_v10 = vrot.slane %v9503_v7, 1 }
0x1581   : > { %v4352_v16 = vsel %vm2343_vm8, %v4350_v14, %v4351_v31  ;;  %v4405_v50 = vrot.slane %v9497_v4, 5  ;;  %v4406_v21 = vrot.slane %v9503_v7, 5  ;;  %v9519_v58 = vsel %vm2304_vm3, %v4318_v38, 0.0 }
0x1582   : > { %v9522_v47 = vsel %vm2304_vm3, %v4314_v45, %v4316_v34  ;;  %v4428_v17 = vsel %vm2422_vm9, %v4426_v8, %v4427_v9  ;;  %v4331_v18 = vsel %vm2321_vm4, %v4329_v36, %v4330_v10  ;;  %v9527_v56 = vsel %vm2304_vm3, %v4316_v34, %v4318_v38 }
0x1583   : > { %7462 = vmatmul.mubr.msk.f32.vlgmr.msra.gmra.mrb[68].mxu0 %vm859_vm0, %v9522_v47  ;;  %v8053_v20 = vpack.i.bf16 %v4352_v16, %v4428_v17  ;;  %v4407_v22 = vsel %vm2400_vm5, %v4405_v50, %v4406_v21  ;;  %v4371_v32 = vrot.slane %v9497_v4, 3  ;;  %v4372_v33 = vrot.slane %v9503_v7, 3 }
0x1584   : > { %v8048_v23 = vpack.i.bf16 %v4331_v18, %v4407_v22  ;;  %7464 = vmatprep.mubr.msk.f32.mxu0 %vm859_vm0, %v9527_v56  ;;  %v4447_v25 = vrot.slane %v9497_v4, 7  ;;  %v4448_v19 = vrot.slane %v9503_v7, 7  ;;  %v4332_v26 = vrot.slane %v9522_v47, 1 }
0x1585   : > { %8054 = vrot.lane.b32.xlu1 %v8053_v20, %s10582_s26  ;;  %v4373_v28 = vsel %vm2365_vm6, %v4371_v32, %v4372_v33  ;;  %v4408_v29 = vrot.slane %v9522_v47, 5  ;;  %v4353_v43 = vrot.slane %v9522_v47, 2  ;;  %v4429_v30 = vrot.slane %v9522_v47, 6 }
0x1586   : > { %8049 = vrot.lane.b32.xlu0 %v8048_v23, %s10618_s23  ;;  %v4449_v35 = vsel %vm2444_vm7, %v4447_v25, %v4448_v19  ;;  %v4333_v39 = vsel %vm2321_vm4, %v4330_v10, %v4332_v26  ;;  %v4374_v1 = vrot.slane %v9522_v47, 3  ;;  %v4450_v40 = vrot.slane %v9522_v47, 7 }
0x1587   : > { %7465 = vmatmul.mubr.msk.f32.gmra.mrb[70].mxu0 %vm859_vm0, %v9519_v58  ;;  %v8058_v0 = vpack.i.bf16 %v4373_v28, %v4449_v35  ;;  %v4409_v41 = vsel %vm2400_vm5, %v4406_v21, %v4408_v29  ;;  %v4354_v42 = vsel %vm2343_vm8, %v4351_v31, %v4353_v43  ;;  %v4430_v2 = vsel %vm2422_vm9, %v4427_v9, %v4429_v30  ;;  %v6627_v28 = vld [vmem:[%s10554_s15 + $0x48] sm:$0xff] }
0x1588   : > { %v8063_v3 = vpack.i.bf16 %v4333_v39, %v4409_v41  ;;  %v4375_v44 = vsel %vm2365_vm6, %v4372_v33, %v4374_v1  ;;  %v4451_v46 = vsel %vm2444_vm7, %v4448_v19, %v4450_v40  ;;  %v4334_v59 = vrot.slane %v9527_v56, 1 }
0x1589   : > { %8059 = vrot.lane.b32.xlu1 %v8058_v0, %s10619_s20  ;;  %v4410_v49 = vrot.slane %v9527_v56, 5  ;;  %v4355_v45 = vrot.slane %v9527_v56, 2  ;;  %v4431_v15 = vrot.slane %v9527_v56, 6  ;;  %v8068_v53 = vpack.i.bf16 %v4354_v42, %v4430_v2 }
0x158a   : > { %8064 = vrot.lane.b32.xlu0 %v8063_v3, %s10618_s23  ;;  %v4376_v63 = vrot.slane %v9527_v56, 3  ;;  %v8073_v51 = vpack.i.bf16 %v4375_v44, %v4451_v46  ;;  %v4335_v61 = vsel %vm2321_vm4, %v4332_v26, %v4334_v59  ;;  %v4452_v37 = vrot.slane %v9527_v56, 7  ;;  %v6626_v26 = vld [vmem:[%s10554_s15 + $0x40] sm:$0xff] }
0x158b   : > { %v4411_v62 = vsel %vm2400_vm5, %v4408_v29, %v4410_v49  ;;  %v4356_v57 = vsel %vm2343_vm8, %v4353_v43, %v4355_v45  ;;  %v4432_v60 = vsel %vm2422_vm9, %v4429_v30, %v4431_v15  ;;  %v4336_v52 = vrot.slane %v9519_v58, 1 }
0x158c   : > { %v4412_v38 = vrot.slane %v9519_v58, 5  ;;  %v8078_v14 = vpack.i.bf16 %v4335_v61, %v4411_v62  ;;  %v4377_v31 = vsel %vm2365_vm6, %v4374_v1, %v4376_v63  ;;  %v7781_v8 = vpack.c.bf16 %v6599_v24, %v6598_v12 }
0x158d   : > { %8069 = vrot.lane.b32.xlu1 %v8068_v53, %s10582_s26  ;;  %v8083_v34 = vpack.i.bf16 %v4356_v57, %v4432_v60  ;;  %v4453_v9 = vsel %vm2444_vm7, %v4450_v40, %v4452_v37  ;;  %v4357_v36 = vrot.slane %v9519_v58, 2  ;;  %v4433_v10 = vrot.slane %v9519_v58, 6 }
0x158e   : > { %8074 = vrot.lane.b32.xlu0 %v8073_v51, %s10619_s20  ;;  %v4337_v16 = vsel %vm2321_vm4, %v4334_v59, %v4336_v52  ;;  %v4413_v50 = vsel %vm2400_vm5, %v4410_v49, %v4412_v38  ;;  %v4378_v21 = vrot.slane %v9519_v58, 3  ;;  %v4454_v17 = vrot.slane %v9519_v58, 7  ;;  %7782 = vmatpush3.bf16.msra.mxu1 %v7781_v8 }
0x158f   : > { %v8088_v18 = vpack.i.bf16 %v4377_v31, %v4453_v9  ;;  %v8093_v20 = vpack.i.bf16 %v4337_v16, %v4413_v50  ;;  %v4358_v22 = vsel %vm2343_vm8, %v4355_v45, %v4357_v36  ;;  %v4434_v32 = vsel %vm2422_vm9, %v4431_v15, %v4433_v10 }
0x1590   : > { %v4379_v33 = vsel %vm2365_vm6, %v4376_v63, %v4378_v21  ;;  %v4455_v23 = vsel %vm2444_vm7, %v4452_v37, %v4454_v17  ;;  %v8098_v25 = vpack.i.bf16 %v4358_v22, %v4434_v32  ;;  %v7791_v29 = vpack.c.bf16 %v6627_v28, %v6626_v26 }
0x1591   : > { %8079 = vrot.lane.b32.xlu1 %v8078_v14, %s10618_s23  ;;  %v8103_v19 = vpack.i.bf16 %v4379_v33, %v4455_v23  ;;  %v4392_v43 = vrot.slane %v9497_v4, 4  ;;  %v4393_v30 = vrot.slane %v9503_v7, 4  ;;  %v4395_v45 = vrot.slane %v9522_v47, 4 }
0x1592   : > { %8084 = vrot.lane.b32.xlu0 %v8083_v34, %s10582_s26  ;;  %7792 = vmatprep.subr.bf16.mxu0 %v7791_v29  ;;  %v4397_v60 = vrot.slane %v9527_v56, 4 }
0x1593   : > { %7794 = vmatpush3.bf16.msra.mxu0 %v7791_v29  ;;  %v4394_v3 = vsel %vm2304_vm3, %v4392_v43, %v4393_v30  ;;  %v4396_v57 = vsel %vm2304_vm3, %v4393_v30, %v4395_v45 }
0x1595   : > { %8089 = vrot.lane.b32.xlu1 %v8088_v18, %s10619_s20 }
0x1596   : > { %8094 = vrot.lane.b32.xlu0 %v8093_v20, %s10618_s23  ;;  %v4398_v20 = vsel %vm2304_vm3, %v4395_v45, %v4397_v60 }
0x1599   : > { %8099 = vrot.lane.b32.xlu1 %v8098_v25, %s10582_s26 }
0x159a   : > { %8104 = vrot.lane.b32.xlu0 %v8103_v19, %s10619_s20  ;;  %v4399_v19 = vrot.slane %v9519_v58, 4 }
0x15f7   : > { %v8055_v35 = vpop.permute.xlu1 %8054 }
0x15f8   : > { %v8050_v39 = vpop.permute.xlu0 %8049  ;;  %v8057_v1 = vunpack.i.h.bf16 %v8055_v35  ;;  %v8056_v40 = vunpack.i.l.bf16 %v8055_v35 }
0x15f9   : > { %v8052_v0 = vunpack.i.h.bf16 %v8050_v39  ;;  %v8051_v41 = vunpack.i.l.bf16 %v8050_v39 }
0x15fb   : > { %v4468_v42 = vsel %vm859_vm0, %v9497_v4, %v8052_v0  ;;  %v8060_v2 = vpop.permute.xlu1 %8059  ;;  %v4480_v44 = vsel %vm859_vm0, %v4394_v3, %v8051_v41  ;;  %v4400_v0 = vsel %vm2304_vm3, %v4397_v60, %v4399_v19  ;;  %v6621_v60 = vld [vmem:[%s10553_s14 + $0x1] ss:$0 sm:$0xff] }
0x15fc   : > { %v8062_v46 = vunpack.i.h.bf16 %v8060_v2  ;;  %v8061_v59 = vunpack.i.l.bf16 %v8060_v2  ;;  %v8065_v49 = vpop.permute.xlu0 %8064  ;;  %v4484_v63 = vsel %vm2470_vm10, %v4480_v44, %v8056_v40  ;;  %v4472_v51 = vsel %vm2470_vm10, %v4468_v42, %v8057_v1 }
0x15fd   : > { %v8067_v15 = vunpack.i.h.bf16 %v8065_v49  ;;  %v8066_v53 = vunpack.i.l.bf16 %v8065_v49 }
0x15fe   : > { %v4488_v61 = vsel %vm2475_vm11, %v4484_v63, %v8061_v59  ;;  %v4476_v62 = vsel %vm2475_vm11, %v4472_v51, %v8062_v46  ;;  %v6628_v63 = vld [vmem:[%s10554_s15 + $0x50] sm:$0xff] }
0x15ff   : > { %v8070_v37 = vpop.permute.xlu1 %8069  ;;  %4570 = vmatprep.mubr.f32.mxu1 %v4488_v61  ;;  %v4481_v14 = vsel %vm859_vm0, %v4396_v57, %v8066_v53  ;;  %v4469_v31 = vsel %vm859_vm0, %v9503_v7, %v8067_v15  ;;  %v6630_v61 = vld [vmem:[%s10554_s15 + $0x60] sm:$0xff] }
0x1600   : > { %v8072_v4 = vunpack.i.h.bf16 %v8070_v37  ;;  %v8071_v12 = vunpack.i.l.bf16 %v8070_v37  ;;  %v8075_v24 = vpop.permute.xlu0 %8074  ;;  %4571 = vmatmul.mubr.f32.vlgmr.msra.gmra.mrb[36].mxu1 %v4476_v62  ;;  %v6631_v62 = vld [vmem:[%s10554_s15 + $0x68] sm:$0xff]  ;;  %v6632_v37 = vld [vmem:[%s10554_s15 + $0x70] sm:$0xff] }
0x1601   : > { %v8077_v52 = vunpack.i.h.bf16 %v8075_v24  ;;  %v8076_v38 = vunpack.i.l.bf16 %v8075_v24 }
0x1602   : > { %v4485_v8 = vsel %vm2470_vm10, %v4481_v14, %v8071_v12  ;;  %v4473_v34 = vsel %vm2470_vm10, %v4469_v31, %v8072_v4  ;;  %v7799_v4 = vpack.c.bf16 %v6631_v62, %v6630_v61  ;;  %v6633_v12 = vld [vmem:[%s10554_s15 + $0x78] sm:$0xff] }
0x1603   : > { %v8080_v9 = vpop.permute.xlu1 %8079  ;;  %v4489_v36 = vsel %vm2475_vm11, %v4485_v8, %v8076_v38  ;;  %v4477_v10 = vsel %vm2475_vm11, %v4473_v34, %v8077_v52  ;;  %v7803_v24 = vpack.c.bf16 %v6633_v12, %v6632_v37 }
0x1604   : > { %v8082_v16 = vunpack.i.h.bf16 %v8080_v9  ;;  %v8081_v50 = vunpack.i.l.bf16 %v8080_v9  ;;  %v8085_v21 = vpop.permute.xlu0 %8084  ;;  %4575 = vmatprep.mubr.f32.mxu1 %v4489_v36 }
0x1605   : > { %v8087_v17 = vunpack.i.h.bf16 %v8085_v21  ;;  %v8086_v18 = vunpack.i.l.bf16 %v8085_v21  ;;  %4576 = vmatmul.mubr.f32.gmra.mrb[38].mxu1 %v4477_v10 }
0x1606   : > { %v4482_v7 = vsel %vm859_vm0, %v4398_v20, %v8081_v50  ;;  %v4470_v22 = vsel %vm859_vm0, %v9522_v47, %v8082_v16 }
0x1607   : > { %v8090_v32 = vpop.permute.xlu1 %8089  ;;  %v4486_v29 = vsel %vm2470_vm10, %v4482_v7, %v8086_v18  ;;  %v4474_v43 = vsel %vm2470_vm10, %v4470_v22, %v8087_v17 }
0x1608   : > { %v8092_v33 = vunpack.i.h.bf16 %v8090_v32  ;;  %v8091_v23 = vunpack.i.l.bf16 %v8090_v32  ;;  %v8095_v25 = vpop.permute.xlu0 %8094 }
0x1609   : > { %v8097_v26 = vunpack.i.h.bf16 %v8095_v25  ;;  %v8096_v28 = vunpack.i.l.bf16 %v8095_v25 }
0x160a   : > { %v4490_v30 = vsel %vm2475_vm11, %v4486_v29, %v8091_v23  ;;  %v4478_v35 = vsel %vm2475_vm11, %v4474_v43, %v8092_v33 }
0x160b   : > { %v8100_v39 = vpop.permute.xlu1 %8099  ;;  %4580 = vmatprep.mubr.f32.mxu1 %v4490_v30  ;;  %v4483_v3 = vsel %vm859_vm0, %v4400_v0, %v8096_v28  ;;  %v4471_v42 = vsel %vm859_vm0, %v9527_v56, %v8097_v26  ;;  %v6629_v56 = vld [vmem:[%s10554_s15 + $0x58] sm:$0xff]  ;;  %v6635_v28 = vld [vmem:[%s10555_s16 + $0x1] ss:$0 sm:$0xff] }
0x160c   : > { %v8102_v1 = vunpack.i.h.bf16 %v8100_v39  ;;  %v8101_v47 = vunpack.i.l.bf16 %v8100_v39  ;;  %v8105_v40 = vpop.permute.xlu0 %8104  ;;  %4581 = vmatmul.mubr.f32.gmra.mrb[40].mxu1 %v4478_v35  ;;  %v7795_v51 = vpack.c.bf16 %v6629_v56, %v6628_v63 }
0x160d   : > { %v8107_v41 = vunpack.i.h.bf16 %v8105_v40  ;;  %v8106_v58 = vunpack.i.l.bf16 %v8105_v40 }
0x160e   : > { %v4487_v2 = vsel %vm2470_vm10, %v4483_v3, %v8101_v47  ;;  %v4475_v44 = vsel %vm2470_vm10, %v4471_v42, %v8102_v1  ;;  %7796 = vmatprep.subr.bf16.mxu0 %v7795_v51 }
0x160f   : > { %v4491_v46 = vsel %vm2475_vm11, %v4487_v2, %v8106_v58  ;;  %v4479_v59 = vsel %vm2475_vm11, %v4475_v44, %v8107_v41  ;;  %7798 = vmatpush3.bf16.msra.mxu0 %v7795_v51 }
0x1610   : > { %4585 = vmatprep.mubr.f32.mxu1 %v4491_v46  ;;  %7800 = vmatprep.subr.bf16.mxu0 %v7799_v4 }
0x1611   : > { %4586 = vmatmul.mubr.f32.gmra.mrb[42].mxu1 %v4479_v59 }
0x1613   : > { %7802 = vmatpush3.bf16.msra.mxu0 %v7799_v4 }
0x1614   : > { %7804 = vmatprep.subr.bf16.mxu0 %v7803_v24 }
0x1617   : > { %7806 = vmatpush3.bf16.msra.mxu0 %v7803_v24 }
0x1656   : > { %v7463_v49 = vpop.f32.mrb[68].mxu0 }
0x1657   : > { %v4657_v45 = vpop.f32.mrb[69].mxu0 }
0x165a   : > { %v7466_v15 = vpop.f32.mrb[70].mxu0 }
0x165b   : > { %v4667_v53 = vpop.f32.mrb[71].mxu0 }
0x16d3   : > { %v7057_v57 = vpop.f32.mrb[36].mxu1 }
0x16d4   : > { %v7058_v52 = vpop.f32.mrb[37].mxu1 }
0x16d5   : > { %v7059_v38 = vadd.f32 %v7058_v52, %v7057_v57  ;;  %v4878_v52 = vld [vmem:[%s10558_s19] sm:$0xff] }
0x16d7   : > { %v4573_v14 = vadd.f32 %v7059_v38, %v6621_v60  ;;  %v4879_v38 = vld [vmem:[%s10558_s19 + $0x8] sm:$0xff] }
0x16d8   : > { %v7060_v31 = vpop.f32.mrb[38].mxu1 }
0x16d9   : > { %v4658_v8 = vadd.f32 %v4657_v45, %v4573_v14  ;;  %v7061_v34 = vpop.f32.mrb[39].mxu1  ;;  %v4880_v14 = vld [vmem:[%s10558_s19 + $0x10] sm:$0xff] }
0x16da   : > { %v7062_v9 = vadd.f32 %v7061_v34, %v7060_v31  ;;  %v7807_v31 = vpack.c.bf16 %v4879_v38, %v4878_v52  ;;  %v6644_v38 = vld [vmem:[%s10620_s7] ss:$0 sm:$0xff] }
0x16db   : > { %v4676_v36 = vmax.f32 %v4658_v8, 0.0  ;;  %v4881_v8 = vld [vmem:[%s10558_s19 + $0x18] sm:$0xff] }
0x16dc   : > { %v4578_v10 = vadd.f32 %v7062_v9, %v6621_v60  ;;  %v7811_v34 = vpack.c.bf16 %v4881_v8, %v4880_v14  ;;  %7808 = vmatprep.subr.bf16.mxu0 %v7807_v31 }
0x16dd   : > { %7483 = vmatprep.mubr.msk.f32.mxu0 %vm2470_vm10, %v4676_v36 }
0x16de   : > { %v4663_v16 = vadd.f32 %v7463_v49, %v4578_v10 }
0x16df   : > { %v7063_v50 = vpop.f32.mrb[40].mxu1 }
0x16e0   : > { %v4677_v21 = vmax.f32 %v4663_v16, 0.0  ;;  %v7064_v17 = vpop.f32.mrb[41].mxu1 }
0x16e1   : > { %v7065_v18 = vadd.f32 %v7064_v17, %v7063_v50 }
0x16e2   : > { %7484 = vmatmul.mubr.msk.f32.vlgmr.msra.gmra.mrb[72].mxu0 %vm2470_vm10, %v4677_v21 }
0x16e3   : > { %v4583_v20 = vadd.f32 %v7065_v18, %v6621_v60  ;;  %7810 = vmatpush3.bf16.msra.mxu0 %v7807_v31 }
0x16e4   : > { %v7066_v7 = vpop.f32.mrb[42].mxu1  ;;  %7812 = vmatprep.subr.bf16.mxu0 %v7811_v34 }
0x16e5   : > { %v4668_v22 = vadd.f32 %v4667_v53, %v4583_v20  ;;  %v7067_v32 = vpop.f32.mrb[43].mxu1 }
0x16e6   : > { %v7068_v33 = vadd.f32 %v7067_v32, %v7066_v7  ;;  %v6642_v32 = vld [vmem:[%s10556_s17 + $0x1] ss:$0 sm:$0xff] }
0x16e7   : > { %v4678_v23 = vmax.f32 %v4668_v22, 0.0  ;;  %7814 = vmatpush3.bf16.msra.mxu0 %v7811_v34 }
0x16e8   : > { %v4588_v25 = vadd.f32 %v7068_v33, %v6621_v60 }
0x16e9   : > { %7486 = vmatprep.mubr.msk.f32.mxu0 %vm2470_vm10, %v4678_v23 }
0x16ea   : > { %v4673_v19 = vadd.f32 %v7466_v15, %v4588_v25 }
0x16ec   : > { %v4679_v26 = vmax.f32 %v4673_v19, 0.0 }
0x16ee   : > { %7487 = vmatmul.mubr.msk.f32.gmra.mrb[74].mxu0 %vm2470_vm10, %v4679_v26 }
0x17b5   : > { %v7485_v29 = vpop.f32.mrb[72].mxu0 }
0x17b6   : > { %v4781_v43 = vadd.f32 %v7485_v29, %v6635_v28  ;;  %v4775_v30 = vpop.f32.mrb[73].mxu0 }
0x17b7   : > { %v4776_v35 = vadd.f32 %v6635_v28, %v4775_v30 }
0x17b8   : > { %v4795_v39 = vadd.f32 %v4781_v43, %v9468_v13 }
0x17b9   : > { %v4794_v1 = vadd.f32 %v4776_v35, %v9471_v48 }
0x17ba   : > { %v4805_v47 = vsel %vm859_vm0, %v4795_v39, 0.0 }
0x17bb   : > { %4806 = vadd.xlane.f32.xlu0 %v4805_v47  ;;  %v4802_v40 = vsel %vm859_vm0, %v4794_v1, 0.0 }
0x17bc   : > { %4803 = vadd.xlane.f32.xlu1 %v4802_v40 }
0x17c1   : > { %v7488_v0 = vpop.f32.mrb[74].mxu0 }
0x17c2   : > { %v4791_v41 = vadd.f32 %v7488_v0, %v6635_v28  ;;  %v4785_v58 = vpop.f32.mrb[75].mxu0 }
0x17c3   : > { %v4786_v3 = vadd.f32 %v6635_v28, %v4785_v58  ;;  %v6643_v28 = vld [vmem:[%s10557_s18 + $0x1] ss:$0 sm:$0xff] }
0x17c4   : > { %v4797_v42 = vadd.f32 %v4791_v41, %v9488_v54 }
0x17c5   : > { %v4796_v2 = vadd.f32 %v4786_v3, %v9500_v5 }
0x17c6   : > { %v4811_v44 = vsel %vm859_vm0, %v4797_v42, 0.0 }
0x17c7   : > { %4812 = vadd.xlane.f32.xlu1 %v4811_v44  ;;  %v4808_v13 = vsel %vm859_vm0, %v4796_v2, 0.0 }
0x17c8   : > { %4809 = vadd.xlane.f32.xlu0 %v4808_v13 }
0x1848   : > { %v4807_v48 = vpop.xlane.xlu0 %4806 }
0x1849   : > { %v4815_v46 = vmul.f32 0.03125, %v4807_v48  ;;  %v4804_v59 = vpop.xlane.xlu1 %4803  ;;  %v4992_v48 = vld [vmem:[%s10560_s21 + $0x10] sm:$0xff] }
0x184a   : > { %v4814_v49 = vmul.f32 0.03125, %v4804_v59 }
0x184b   : > { %v4819_v45 = vsub.f32 %v4795_v39, %v4815_v46  ;;  %v8324_v46 = vmov 0.0|0.0  }
0x184c   : > { %v4818_v15 = vsub.f32 %v4794_v1, %v4814_v49  ;;  %7815 = vmatprep.subr.bf16.mxu1 %v8324_v46  ;;  %7845 = vmatprep.subr.bf16.mxu0 %v8324_v46  ;;  %v4994_v49 = vld [vmem:[%s10560_s21 + $0x20] sm:$0xff] }
0x184d   : > { %v4823_v53 = vmul.f32 %v4819_v45, %v4819_v45 }
0x184e   : > { %v4822_v63 = vmul.f32 %v4818_v15, %v4818_v15 }
0x184f   : > { %v4829_v56 = vsel %vm859_vm0, %v4823_v53, 0.0  ;;  %v4996_v53 = vld [vmem:[%s10560_s21 + $0x30] sm:$0xff] }
0x1850   : > { %4830 = vadd.xlane.f32.xlu1 %v4829_v56  ;;  %v4826_v54 = vsel %vm859_vm0, %v4822_v63, 0.0  ;;  %v4997_v63 = vld [vmem:[%s10560_s21 + $0x38] sm:$0xff] }
0x1851   : > { %4827 = vadd.xlane.f32.xlu0 %v4826_v54  ;;  %v7825_v56 = vpack.c.bf16 %v4997_v63, %v4996_v53  ;;  %v4998_v54 = vld [vmem:[%s10560_s21 + $0x40] sm:$0xff] }
0x1854   : > { %v4813_v5 = vpop.xlane.xlu1 %4812 }
0x1855   : > { %v4817_v51 = vmul.f32 0.03125, %v4813_v5  ;;  %v4810_v61 = vpop.xlane.xlu0 %4809  ;;  %v4999_v5 = vld [vmem:[%s10560_s21 + $0x48] sm:$0xff] }
0x1856   : > { %v4816_v62 = vmul.f32 0.03125, %v4810_v61  ;;  %v5000_v61 = vld [vmem:[%s10560_s21 + $0x50] sm:$0xff] }
0x1857   : > { %v4821_v37 = vsub.f32 %v4797_v42, %v4817_v51  ;;  %v7828_v51 = vpack.c.bf16 %v4999_v5, %v4998_v54 }
0x1858   : > { %v4820_v4 = vsub.f32 %v4796_v2, %v4816_v62  ;;  %v5001_v62 = vld [vmem:[%s10560_s21 + $0x58] sm:$0xff] }
0x1859   : > { %v4825_v12 = vmul.f32 %v4821_v37, %v4821_v37 }
0x185a   : > { %v4824_v24 = vmul.f32 %v4820_v4, %v4820_v4 }
0x185b   : > { %v4835_v57 = vsel %vm859_vm0, %v4825_v12, 0.0  ;;  %v5003_v12 = vld [vmem:[%s10560_s21 + $0x68] sm:$0xff] }
0x185c   : > { %4836 = vadd.xlane.f32.xlu1 %v4835_v57  ;;  %v4832_v60 = vsel %vm859_vm0, %v4824_v24, 0.0  ;;  %v5004_v57 = vld [vmem:[%s10560_s21 + $0x70] sm:$0xff] }
0x185d   : > { %4833 = vadd.xlane.f32.xlu0 %v4832_v60  ;;  %v5005_v60 = vld [vmem:[%s10560_s21 + $0x78] sm:$0xff] }
0x185e   : > { %v7837_v52 = vpack.c.bf16 %v5005_v60, %v5004_v57 }
0x18dd   : > { %v4831_v9 = vpop.xlane.xlu1 %4830 }
0x18de   : > { %v4839_v36 = vmul.f32 0.03125, %v4831_v9  ;;  %v4828_v10 = vpop.xlane.xlu0 %4827 }
0x18df   : > { %v4838_v16 = vmul.f32 0.03125, %v4828_v10 }
0x18e0   : > { %v4843_v50 = vadd.f32 1e-05, %v4839_v36 }
0x18e1   : > { %v4842_v21 = vadd.f32 1e-05, %v4838_v16 }
0x18e2   : > { %8271 = vrsqrt.f32 %v4843_v50 }
0x18e3   : > { %8273 = vrsqrt.f32 %v4842_v21 }
0x18e9   : > { %v4837_v17 = vpop.xlane.xlu1 %4836 }
0x18ea   : > { %v4841_v18 = vmul.f32 0.03125, %v4837_v17  ;;  %v4834_v20 = vpop.xlane.xlu0 %4833 }
0x18eb   : > { %v4840_v7 = vmul.f32 0.03125, %v4834_v20 }
0x18ec   : > { %v8272_v22 = vpop.eup %8271  ;;  %v4845_v33 = vadd.f32 1e-05, %v4841_v18 }
0x18ed   : > { %v8274_v23 = vpop.eup %8273  ;;  %v4851_v25 = vmul.f32 %v8272_v22, %v4819_v45  ;;  %v4844_v19 = vadd.f32 1e-05, %v4840_v7  ;;  %v4995_v45 = vld [vmem:[%s10560_s21 + $0x28] sm:$0xff]  ;;  %v5006_v22 = vld [vmem:[%s10560_s21 + $0x80] sm:$0xff] }
0x18ee   : > { %v4850_v26 = vmul.f32 %v8274_v23, %v4818_v15  ;;  %8275 = vrsqrt.f32 %v4845_v33  ;;  %v7822_v15 = vpack.c.bf16 %v4995_v45, %v4994_v49 }
0x18ef   : > { %v4861_v29 = vmul.f32 %v6642_v32, %v4851_v25  ;;  %8277 = vrsqrt.f32 %v4844_v19  ;;  %v5008_v25 = vld [vmem:[%s10560_s21 + $0x90] sm:$0xff]  ;;  %v5009_v19 = vld [vmem:[%s10560_s21 + $0x98] sm:$0xff] }
0x18f0   : > { %v4860_v43 = vmul.f32 %v6642_v32, %v4850_v26 }
0x18f1   : > { %v4871_v30 = vadd.f32 %v6643_v28, %v4861_v29  ;;  %v7843_v29 = vpack.c.bf16 %v5009_v19, %v5008_v25 }
0x18f2   : > { %v4870_v35 = vadd.f32 %v6643_v28, %v4860_v43 }
0x18f3   : > { %v4875_v1 = vmul.f32 %v4871_v30, %v8833_v55  ;;  %v4990_v55 = vld [vmem:[%s10560_s21] sm:$0xff] }
0x18f4   : > { %v4874_v39 = vmul.f32 %v4870_v35, %v8846_v11  ;;  %v4991_v11 = vld [vmem:[%s10560_s21 + $0x8] sm:$0xff] }
0x18f6   : > { %7497 = vmatprep.mubr.msk.f32.mxu0 %vm859_vm0, %v4874_v39 }
0x18f7   : > { %7498 = vmatmul.mubr.msk.f32.vlgmr.msra.gmra.mrb[76].mxu0 %vm859_vm0, %v4875_v1 }
0x18f8   : > { %v8276_v47 = vpop.eup %8275 }
0x18f9   : > { %v8278_v40 = vpop.eup %8277  ;;  %v4853_v0 = vmul.f32 %v8276_v47, %v4821_v37  ;;  %v7831_v37 = vpack.c.bf16 %v5001_v62, %v5000_v61 }
0x18fa   : > { %v4852_v41 = vmul.f32 %v8278_v40, %v4820_v4  ;;  %v5002_v4 = vld [vmem:[%s10560_s21 + $0x60] sm:$0xff] }
0x18fb   : > { %v4863_v58 = vmul.f32 %v6642_v32, %v4853_v0  ;;  %v7834_v24 = vpack.c.bf16 %v5003_v12, %v5002_v4 }
0x18fc   : > { %v4862_v3 = vmul.f32 %v6642_v32, %v4852_v41  ;;  %v5007_v32 = vld [vmem:[%s10560_s21 + $0x88] sm:$0xff] }
0x18fd   : > { %v4873_v42 = vadd.f32 %v6643_v28, %v4863_v58  ;;  %v7840_v23 = vpack.c.bf16 %v5007_v32, %v5006_v22 }
0x18fe   : > { %v4872_v2 = vadd.f32 %v6643_v28, %v4862_v3 }
0x18ff   : > { %v4877_v13 = vmul.f32 %v4873_v42, %v8868_v27  ;;  %v4993_v27 = vld [vmem:[%s10560_s21 + $0x18] sm:$0xff] }
0x1900   : > { %v4876_v44 = vmul.f32 %v4872_v2, %v8843_v6  ;;  %v7816_v6 = vpack.c.bf16 %v4991_v11, %v4990_v55  ;;  %v7819_v59 = vpack.c.bf16 %v4993_v27, %v4992_v48 }
0x1902   : > { %7500 = vmatprep.mubr.msk.f32.mxu0 %vm859_vm0, %v4876_v44  ;;  %7817 = vmatpush1.bf16.msra.mxu1 %v7816_v6 }
0x1903   : > { %7501 = vmatmul.mubr.msk.f32.gmra.mrb[78].mxu0 %vm859_vm0, %v4877_v13  ;;  %7818 = vmatprep.subr.bf16.mxu1 %v8324_v46 }
0x1906   : > { %7820 = vmatpush1.bf16.msra.mxu1 %v7819_v59 }
0x1907   : > { %7821 = vmatprep.subr.bf16.mxu1 %v8324_v46 }
0x190a   : > { %7823 = vmatpush1.bf16.msra.mxu1 %v7822_v15 }
0x190b   : > { %7824 = vmatprep.subr.bf16.mxu1 %v8324_v46 }
0x190e   : > { %7826 = vmatpush1.bf16.msra.mxu1 %v7825_v56 }
0x190f   : > { %7827 = vmatprep.subr.bf16.mxu1 %v8324_v46 }
0x1912   : > { %7829 = vmatpush1.bf16.msra.mxu1 %v7828_v51 }
0x1913   : > { %7830 = vmatprep.subr.bf16.mxu1 %v8324_v46 }
0x1916   : > { %7832 = vmatpush1.bf16.msra.mxu1 %v7831_v37 }
0x1917   : > { %7833 = vmatprep.subr.bf16.mxu1 %v8324_v46 }
0x191a   : > { %7835 = vmatpush1.bf16.msra.mxu1 %v7834_v24 }
0x191b   : > { %7836 = vmatprep.subr.bf16.mxu1 %v8324_v46 }
0x191e   : > { %7838 = vmatpush1.bf16.msra.mxu1 %v7837_v52 }
0x191f   : > { %7839 = vmatprep.subr.bf16.mxu1 %v8324_v46 }
0x1922   : > { %7841 = vmatpush1.bf16.msra.mxu1 %v7840_v23 }
0x1923   : > { %7842 = vmatprep.subr.bf16.mxu1 %v8324_v46 }
0x1926   : > { %7844 = vmatpush1.bf16.msra.mxu1 %v7843_v29 }
0x1927   : > { %7875 = vmatprep.subr.bf16.mxu1 %v8324_v46 }
0x19ca   : > { %v7499_v14 = vpop.f32.mrb[76].mxu0 }
0x19cb   : > { %v9770_v31 = vadd.f32 %v7499_v14, %v6644_v38  ;;  %v4967_v8 = vpop.f32.mrb[77].mxu0 }
0x19cc   : > { %v9772_v34 = vadd.f32 %v6644_v38, %v4967_v8 }
0x19cd   : > { %4987 = vst.msk [vmem:[%s833_s30 + $0x8] sm:$0xff] %vm1155_vm1, %v9770_v31  ;;  %v5016_v9 = vrot.slane %v9770_v31, 6 }
0x19ce   : > { %4986 = vst.msk [vmem:[%s833_s30] sm:$0xff] %vm1155_vm1, %v9772_v34  ;;  %v5015_v36 = vrot.slane %v9772_v34, 6 }
0x19d0   : > { %v9781_v10 = vsel %vm2422_vm9, %v5015_v36, %v5016_v9  ;;  %v9784_v16 = vsel %vm2422_vm9, 0.0, %v5015_v36 }
0x19d1   : > { %v5094_v50 = vrot.slane %v9784_v16, 4  ;;  %v5095_v21 = vrot.slane %v9781_v10, 4  ;;  %v5052_v43 = vrot.slane %v9784_v16, 2  ;;  %v5053_v30 = vrot.slane %v9781_v10, 2 }
0x19d2   : > { %v5031_v35 = vrot.slane %v9784_v16, 1  ;;  %v5032_v39 = vrot.slane %v9781_v10, 1  ;;  %v5073_v58 = vrot.slane %v9784_v16, 3  ;;  %v5074_v3 = vrot.slane %v9781_v10, 3 }
0x19d3   : > { %v5096_v17 = vsel %vm2304_vm3, %v5094_v50, %v5095_v21  ;;  %v5054_v42 = vsel %vm2343_vm8, %v5052_v43, %v5053_v30 }
0x19d4   : > { %6650 = vmatprep.mubr.msk.f32.mxu1 %vm859_vm0, %v5096_v17  ;;  %v5033_v44 = vsel %vm2321_vm4, %v5031_v35, %v5032_v39  ;;  %v5075_v27 = vsel %vm2365_vm6, %v5073_v58, %v5074_v3  ;;  %v6657_v58 = vld [vmem:[%s10560_s21 + $0xb0] sm:$0xff] }
0x19d6   : > { %v7502_v18 = vpop.f32.mrb[78].mxu0 }
0x19d7   : > { %v9792_v20 = vadd.f32 %v7502_v18, %v6644_v38  ;;  %v4977_v7 = vpop.f32.mrb[79].mxu0 }
0x19d8   : > { %v9800_v33 = vadd.f32 %v6644_v38, %v4977_v7 }
0x19d9   : > { %4989 = vst.msk [vmem:[%s833_s30 + $0x18] sm:$0xff] %vm1155_vm1, %v9792_v20  ;;  %v5020_v26 = vrot.slane %v9792_v20, 6 }
0x19da   : > { %4988 = vst.msk [vmem:[%s833_s30 + $0x10] sm:$0xff] %vm1155_vm1, %v9800_v33  ;;  %v5018_v28 = vrot.slane %v9800_v33, 6 }
0x19db   : > { %v5028_v53 = vsel %vm2422_vm9, %v5020_v26, 0.0 }
0x19dc   : > { %v9820_v1 = vsel %vm2422_vm9, %v5016_v9, %v5018_v28  ;;  %v9826_v41 = vsel %vm2422_vm9, %v5018_v28, %v5020_v26  ;;  %v5038_v54 = vrot.slane %v5028_v53, 1  ;;  %v5059_v5 = vrot.slane %v5028_v53, 2 }
0x19dd   : > { %v5055_v47 = vrot.slane %v9820_v1, 2  ;;  %v5034_v40 = vrot.slane %v9820_v1, 1  ;;  %v5076_v0 = vrot.slane %v9820_v1, 3  ;;  %v5036_v6 = vrot.slane %v9826_v41, 1 }
0x19de   : > { %v5057_v45 = vrot.slane %v9826_v41, 2  ;;  %v5078_v15 = vrot.slane %v9826_v41, 3  ;;  %v5080_v62 = vrot.slane %v5028_v53, 3  ;;  %v5097_v8 = vrot.slane %v9820_v1, 4 }
0x19df   : > { %v5056_v2 = vsel %vm2343_vm8, %v5053_v30, %v5055_v47  ;;  %v5035_v13 = vsel %vm2321_vm4, %v5032_v39, %v5034_v40  ;;  %v5077_v48 = vsel %vm2365_vm6, %v5074_v3, %v5076_v0  ;;  %v5037_v49 = vsel %vm2321_vm4, %v5034_v40, %v5036_v6 }
0x19e0   : > { %v8113_v55 = vpack.i.bf16 %v5056_v2, %v5054_v42  ;;  %v8108_v11 = vpack.i.bf16 %v5035_v13, %v5033_v44  ;;  %v8118_v59 = vpack.i.bf16 %v5077_v48, %v5075_v27  ;;  %v5058_v63 = vsel %vm2343_vm8, %v5055_v47, %v5057_v45  ;;  %v6658_v42 = vld [vmem:[%s10560_s21 + $0xb8] sm:$0xff]  ;;  %v6659_v44 = vld [vmem:[%s10560_s21 + $0xc0] sm:$0xff]  ;;  %v6660_v13 = vld [vmem:[%s10560_s21 + $0xc8] sm:$0xff] }
0x19e1   : > { %v5079_v56 = vsel %vm2365_vm6, %v5076_v0, %v5078_v15  ;;  %v5039_v51 = vsel %vm2321_vm4, %v5036_v6, %v5038_v54  ;;  %v5060_v61 = vsel %vm2343_vm8, %v5057_v45, %v5059_v5  ;;  %v5081_v37 = vsel %vm2365_vm6, %v5078_v15, %v5080_v62  ;;  %v6655_v0 = vld [vmem:[%s10560_s21 + $0xa0] sm:$0xff]  ;;  %v6662_v48 = vld [vmem:[%s10560_s21 + $0xd8] sm:$0xff]  ;;  %v6665_v45 = vld [vmem:[%s10560_s21 + $0xf0] sm:$0xff] }
0x19e2   : > { %8114 = vrot.lane.b32.xlu1 %v8113_v55, %s10622_s22  ;;  %8109 = vrot.lane.b32.xlu0 %v8108_v11, %s10618_s23  ;;  %v5099_v32 = vrot.slane %v9826_v41, 4  ;;  %v5101_v43 = vrot.slane %v5028_v53, 4  ;;  %v7849_v2 = vpack.c.bf16 %v6658_v42, %v6657_v58  ;;  %v7852_v55 = vpack.c.bf16 %v6660_v13, %v6659_v44  ;;  %v6661_v11 = vld [vmem:[%s10560_s21 + $0xd0] sm:$0xff]  ;;  %v6663_v27 = vld [vmem:[%s10560_s21 + $0xe0] sm:$0xff] }
0x19e3   : > { %v7855_v6 = vpack.c.bf16 %v6662_v48, %v6661_v11  ;;  %v6666_v15 = vld [vmem:[%s10560_s21 + $0xf8] sm:$0xff]  ;;  %v6669_v5 = vld [vmem:[%s10560_s21 + $0x110] sm:$0xff]  ;;  %v5217_v62 = vlaneseq }
0x19e4   : > { %v7861_v53 = vpack.c.bf16 %v6666_v15, %v6665_v45  ;;  %v6674_v44 = vld [vmem:[%s10560_s21 + $0x138] sm:$0xff] }
0x19e6   : > { %8119 = vrot.lane.b32.xlu1 %v8118_v59, %s10619_s20  ;;  %5044 = vrot.lane.b32.xlu0 %v5037_v49, %s10618_s23  ;;  %v6664_v59 = vld [vmem:[%s10560_s21 + $0xe8] sm:$0xff] }
0x19e7   : > { %v7858_v49 = vpack.c.bf16 %v6664_v59, %v6663_v27 }
0x19ea   : > { %5065 = vrot.lane.b32.xlu1 %v5058_v63, %s10622_s22  ;;  %5086 = vrot.lane.b32.xlu0 %v5079_v56, %s10619_s20  ;;  %v6667_v63 = vld [vmem:[%s10560_s21 + $0x100] sm:$0xff]  ;;  %v6668_v56 = vld [vmem:[%s10560_s21 + $0x108] sm:$0xff] }
0x19eb   : > { %v7864_v54 = vpack.c.bf16 %v6668_v56, %v6667_v63 }
0x19ee   : > { %5046 = vrot.lane.b32.xlu1 %v5039_v51, %s10618_s23  ;;  %5067 = vrot.lane.b32.xlu0 %v5060_v61, %s10622_s22  ;;  %v6670_v51 = vld [vmem:[%s10560_s21 + $0x118] sm:$0xff] }
0x19ef   : > { %v7867_v61 = vpack.c.bf16 %v6670_v51, %v6669_v5 }
0x19f2   : > { %5088 = vrot.lane.b32.xlu1 %v5081_v37, %s10619_s20  ;;  %v5218_v37 = vshrl.u32 %v5217_v62, 7 }
0x1a54   : > { %v8115_v4 = vpop.permute.xlu1 %8114  ;;  %v8110_v12 = vpop.permute.xlu0 %8109 }
0x1a55   : > { %v8111_v24 = vunpack.i.l.bf16 %v8110_v12  ;;  %v8116_v57 = vunpack.i.l.bf16 %v8115_v4  ;;  %v8112_v60 = vunpack.i.h.bf16 %v8110_v12  ;;  %v8117_v36 = vunpack.i.h.bf16 %v8115_v4  ;;  %v5214_v4 = vld [vmem:[%s10623_s4] sm:$0x1] }
0x1a56   : > { %v5215_v12 = vmul.f32 0.999995, %v5214_v4 }
0x1a57   : > { %v5103_v52 = vsel %vm859_vm0, %v9784_v16, %v8111_v24  ;;  %v5104_v7 = vsel %vm859_vm0, %v9781_v10, %v8112_v60  ;;  %v5098_v16 = vsel %vm2304_vm3, %v5095_v21, %v5097_v8  ;;  %v5100_v10 = vsel %vm2304_vm3, %v5097_v8, %v5099_v32  ;;  %v6654_v8 = vld [vmem:[%s10625_s24] ss:$0 sm:$0xff] }
0x1a58   : > { %v8120_v38 = vpop.permute.xlu1 %8119  ;;  %v5045_v14 = vpop.permute.xlu0 %5044  ;;  %v5107_v50 = vsel %vm2470_vm10, %v5103_v52, %v8116_v57  ;;  %v5108_v25 = vsel %vm2470_vm10, %v5104_v7, %v8117_v36  ;;  %v9941_v24 = vsub.s32 0, %v5218_v37  ;;  %v6649_v57 = vld [vmem:[%s10624_s1] ss:$0 sm:$0xff] }
0x1a59   : > { %v8121_v9 = vunpack.i.l.bf16 %v8120_v38  ;;  %v8122_v17 = vunpack.i.h.bf16 %v8120_v38  ;;  %v5105_v19 = vsel %vm859_vm0, %v9820_v1, %v5045_v14  ;;  %v5102_v1 = vsel %vm2304_vm3, %v5099_v32, %v5101_v43 }
0x1a5a   : > { %v5220_v60 = vrot.slane %v5215_v12, %v9941_v24 }
0x1a5b   : > { %v5111_v18 = vsel %vm2475_vm11, %v5107_v50, %v8121_v9  ;;  %v5112_v26 = vsel %vm2475_vm11, %v5108_v25, %v8122_v17 }
0x1a5c   : > { %v5066_v22 = vpop.permute.xlu1 %5065  ;;  %5194 = vmatmul.mubr.f32.vlgmr.msra.gmra.mrb[44].mxu1 %v5111_v18  ;;  %v5087_v23 = vpop.permute.xlu0 %5086 }
0x1a5d   : > { %6651 = vmatprep.mubr.msk.f32.mxu1 %vm859_vm0, %v5098_v16  ;;  %v5109_v28 = vsel %vm2470_vm10, %v5105_v19, %v5066_v22 }
0x1a5e   : > { %v5113_v35 = vsel %vm2475_vm11, %v5109_v28, %v5087_v23 }
0x1a60   : > { %v5047_v29 = vpop.permute.xlu1 %5046  ;;  %5199 = vmatmul.mubr.f32.gmra.mrb[46].mxu1 %v5112_v26  ;;  %v5068_v30 = vpop.permute.xlu0 %5067 }
0x1a61   : > { %6652 = vmatprep.mubr.msk.f32.mxu1 %vm859_vm0, %v5100_v10  ;;  %v5106_v21 = vsel %vm859_vm0, %v9826_v41, %v5047_v29  ;;  %v6656_v41 = vld [vmem:[%s10560_s21 + $0xa8] sm:$0xff] }
0x1a62   : > { %v5110_v47 = vsel %vm2470_vm10, %v5106_v21, %v5068_v30  ;;  %v7846_v3 = vpack.c.bf16 %v6656_v41, %v6655_v0 }
0x1a64   : > { %v5089_v39 = vpop.permute.xlu1 %5088  ;;  %5204 = vmatmul.mubr.f32.gmra.mrb[48].mxu1 %v5113_v35  ;;  %7847 = vmatpush1.bf16.msra.mxu0 %v7846_v3 }
0x1a65   : > { %6653 = vmatprep.mubr.msk.f32.mxu1 %vm859_vm0, %v5102_v1  ;;  %v5114_v40 = vsel %vm2475_vm11, %v5110_v47, %v5089_v39  ;;  %7848 = vmatprep.subr.bf16.mxu0 %v8324_v46  ;;  %v6671_v47 = vld [vmem:[%s10560_s21 + $0x120] sm:$0xff] }
0x1a68   : > { %5209 = vmatmul.mubr.f32.gmra.mrb[50].mxu1 %v5114_v40  ;;  %7850 = vmatpush1.bf16.msra.mxu0 %v7849_v2  ;;  %v6672_v40 = vld [vmem:[%s10560_s21 + $0x128] sm:$0xff]  ;;  %v6673_v2 = vld [vmem:[%s10560_s21 + $0x130] sm:$0xff] }
0x1a69   : > { %7851 = vmatprep.subr.bf16.mxu0 %v8324_v46  ;;  %v7870_v41 = vpack.c.bf16 %v6672_v40, %v6671_v47 }
0x1a6c   : > { %7853 = vmatpush1.bf16.msra.mxu0 %v7852_v55  ;;  %v7873_v55 = vpack.c.bf16 %v6674_v44, %v6673_v2 }
0x1a6d   : > { %7854 = vmatprep.subr.bf16.mxu0 %v8324_v46 }
0x1a70   : > { %7856 = vmatpush1.bf16.msra.mxu0 %v7855_v6 }
0x1a71   : > { %7857 = vmatprep.subr.bf16.mxu0 %v8324_v46 }
0x1a74   : > { %7859 = vmatpush1.bf16.msra.mxu0 %v7858_v49 }
0x1a75   : > { %7860 = vmatprep.subr.bf16.mxu0 %v8324_v46 }
0x1a78   : > { %7862 = vmatpush1.bf16.msra.mxu0 %v7861_v53 }
0x1a79   : > { %7863 = vmatprep.subr.bf16.mxu0 %v8324_v46 }
0x1a7c   : > { %7865 = vmatpush1.bf16.msra.mxu0 %v7864_v54 }
0x1a7d   : > { %7866 = vmatprep.subr.bf16.mxu0 %v8324_v46 }
0x1a80   : > { %7868 = vmatpush1.bf16.msra.mxu0 %v7867_v61 }
0x1a81   : > { %7869 = vmatprep.subr.bf16.mxu0 %v8324_v46 }
0x1a84   : > { %7871 = vmatpush1.bf16.msra.mxu0 %v7870_v41 }
0x1a85   : > { %7872 = vmatprep.subr.bf16.mxu0 %v8324_v46 }
0x1a88   : > { %7874 = vmatpush1.bf16.msra.mxu0 %v7873_v55 }
0x1a89   : > { %7905 = vmatprep.subr.bf16.mxu0 %v8324_v46 }
0x1b2f   : > { %v5195_v52 = vpop.f32.mrb[44].mxu1 }
0x1b30   : > { %v5196_v38 = vadd.f32 %v6649_v57, %v5195_v52  ;;  %v5197_v14 = vpop.f32.mrb[45].mxu1 }
0x1b32   : > { %v5222_v9 = vmul.f32 %v5220_v60, %v5196_v38 }
0x1b33   : > { %v5200_v36 = vpop.f32.mrb[46].mxu1 }
0x1b34   : > { %v5233_v50 = vadd.f32 %v6654_v8, %v5222_v9  ;;  %v5201_v17 = vadd.f32 %v6649_v57, %v5200_v36  ;;  %v5202_v18 = vpop.f32.mrb[47].mxu1 }
0x1b36   : > { %8279 = vtanh.f32 %v5233_v50  ;;  %v5223_v7 = vmul.f32 %v5220_v60, %v5201_v17 }
0x1b37   : > { %v5205_v22 = vpop.f32.mrb[48].mxu1 }
0x1b38   : > { %v5234_v16 = vadd.f32 %v6654_v8, %v5223_v7  ;;  %v5206_v32 = vadd.f32 %v6649_v57, %v5205_v22  ;;  %v5207_v23 = vpop.f32.mrb[49].mxu1 }
0x1b3a   : > { %8281 = vtanh.f32 %v5234_v16  ;;  %v5224_v25 = vmul.f32 %v5220_v60, %v5206_v32 }
0x1b3b   : > { %v5210_v19 = vpop.f32.mrb[50].mxu1 }
0x1b3c   : > { %v5235_v26 = vadd.f32 %v6654_v8, %v5224_v25  ;;  %v5211_v28 = vadd.f32 %v6649_v57, %v5210_v19  ;;  %v5212_v29 = vpop.f32.mrb[51].mxu1 }
0x1b3e   : > { %8283 = vtanh.f32 %v5235_v26  ;;  %v5225_v10 = vmul.f32 %v5220_v60, %v5211_v28 }
0x1b40   : > { %v8280_v43 = vpop.eup %8279  ;;  %v5236_v21 = vadd.f32 %v6654_v8, %v5225_v10 }
0x1b41   : > { %v5268_v30 = vrot.slane %v8280_v43, 6 }
0x1b42   : > { %8285 = vtanh.f32 %v5236_v21 }
0x1b43   : > { %v9951_v39 = vsel %vm2422_vm9, 0.0, %v5268_v30 }
0x1b44   : > { %v8282_v35 = vpop.eup %8281  ;;  %v5347_v3 = vrot.slane %v9951_v39, 4  ;;  %v5305_v59 = vrot.slane %v9951_v39, 2  ;;  %v5284_v15 = vrot.slane %v9951_v39, 1  ;;  %v5326_v60 = vrot.slane %v9951_v39, 3 }
0x1b45   : > { %v5269_v1 = vrot.slane %v8282_v35, 6 }
0x1b47   : > { %v9960_v0 = vsel %vm2422_vm9, %v5268_v30, %v5269_v1 }
0x1b48   : > { %v8284_v58 = vpop.eup %8283  ;;  %v5348_v42 = vrot.slane %v9960_v0, 4  ;;  %v5306_v48 = vrot.slane %v9960_v0, 2  ;;  %v5285_v6 = vrot.slane %v9960_v0, 1  ;;  %v5327_v54 = vrot.slane %v9960_v0, 3 }
0x1b49   : > { %v5271_v13 = vrot.slane %v8284_v58, 6 }
0x1b4a   : > { %v5349_v11 = vsel %vm2304_vm3, %v5347_v3, %v5348_v42  ;;  %v5307_v5 = vsel %vm2343_vm8, %v5305_v59, %v5306_v48  ;;  %v5286_v61 = vsel %vm2321_vm4, %v5284_v15, %v5285_v6  ;;  %v5328_v38 = vsel %vm2365_vm6, %v5326_v60, %v5327_v54  ;;  %v6690_v60 = vld [vmem:[%s10560_s21 + $0x170] sm:$0xff] }
0x1b4b   : > { %v9977_v27 = vsel %vm2422_vm9, %v5269_v1, %v5271_v13  ;;  %6677 = vmatprep.mubr.msk.f32.mxu0 %vm859_vm0, %v5349_v11 }
0x1b4c   : > { %v8286_v49 = vpop.eup %8285  ;;  %v5308_v45 = vrot.slane %v9977_v27, 2  ;;  %v5287_v53 = vrot.slane %v9977_v27, 1  ;;  %v5329_v63 = vrot.slane %v9977_v27, 3  ;;  %v5350_v35 = vrot.slane %v9977_v27, 4 }
0x1b4d   : > { %v5273_v56 = vrot.slane %v8286_v49, 6 }
0x1b4e   : > { %v5309_v51 = vsel %vm2343_vm8, %v5306_v48, %v5308_v45  ;;  %v5288_v62 = vsel %vm2321_vm4, %v5285_v6, %v5287_v53  ;;  %v5330_v52 = vsel %vm2365_vm6, %v5327_v54, %v5329_v63  ;;  %v6684_v54 = vld [vmem:[%s10560_s21 + $0x140] sm:$0xff] }
0x1b4f   : > { %v9992_v37 = vsel %vm2422_vm9, %v5271_v13, %v5273_v56  ;;  %v8128_v4 = vpack.i.bf16 %v5309_v51, %v5307_v5  ;;  %v8123_v12 = vpack.i.bf16 %v5288_v62, %v5286_v61  ;;  %v8133_v14 = vpack.i.bf16 %v5330_v52, %v5328_v38  ;;  %v6685_v5 = vld [vmem:[%s10560_s21 + $0x148] sm:$0xff]  ;;  %v6686_v51 = vld [vmem:[%s10560_s21 + $0x150] sm:$0xff]  ;;  %v6687_v62 = vld [vmem:[%s10560_s21 + $0x158] sm:$0xff] }
0x1b50   : > { %v5289_v57 = vrot.slane %v9992_v37, 1  ;;  %v5331_v9 = vrot.slane %v9992_v37, 3  ;;  %v5310_v36 = vrot.slane %v9992_v37, 2  ;;  %v5281_v50 = vsel %vm2422_vm9, %v5273_v56, 0.0  ;;  %v6691_v52 = vld [vmem:[%s10560_s21 + $0x178] sm:$0xff] }
0x1b51   : > { %8129 = vrot.lane.b32.xlu1 %v8128_v4, %s10622_s22  ;;  %8124 = vrot.lane.b32.xlu0 %v8123_v12, %s10618_s23  ;;  %v5312_v7 = vrot.slane %v5281_v50, 2  ;;  %v5291_v22 = vrot.slane %v5281_v50, 1  ;;  %v5333_v23 = vrot.slane %v5281_v50, 3  ;;  %v5352_v44 = vrot.slane %v9992_v37, 4  ;;  %v6688_v4 = vld [vmem:[%s10560_s21 + $0x160] sm:$0xff]  ;;  %v6689_v12 = vld [vmem:[%s10560_s21 + $0x168] sm:$0xff] }
0x1b52   : > { %v5290_v8 = vsel %vm2321_vm4, %v5287_v53, %v5289_v57  ;;  %v5332_v17 = vsel %vm2365_vm6, %v5329_v63, %v5331_v9  ;;  %v5311_v18 = vsel %vm2343_vm8, %v5308_v45, %v5310_v36  ;;  %v5354_v49 = vrot.slane %v5281_v50, 4  ;;  %v6695_v50 = vld [vmem:[%s10560_s21 + $0x198] sm:$0xff] }
0x1b53   : > { %v5313_v16 = vsel %vm2343_vm8, %v5310_v36, %v5312_v7  ;;  %v5292_v32 = vsel %vm2321_vm4, %v5289_v57, %v5291_v22  ;;  %v5334_v25 = vsel %vm2365_vm6, %v5331_v9, %v5333_v23  ;;  %v7876_v61 = vpack.c.bf16 %v6685_v5, %v6684_v54  ;;  %v6694_v36 = vld [vmem:[%s10560_s21 + $0x190] sm:$0xff]  ;;  %v6697_v7 = vld [vmem:[%s10560_s21 + $0x1a8] sm:$0xff] }
0x1b54   : > { %v7882_v57 = vpack.c.bf16 %v6689_v12, %v6688_v4  ;;  %v7885_v38 = vpack.c.bf16 %v6691_v52, %v6690_v60 }
0x1b55   : > { %5297 = vrot.lane.b32.xlu1 %v5290_v8, %s10618_s23  ;;  %8134 = vrot.lane.b32.xlu0 %v8133_v14, %s10619_s20  ;;  %v6692_v14 = vld [vmem:[%s10560_s21 + $0x180] sm:$0xff]  ;;  %v6693_v8 = vld [vmem:[%s10560_s21 + $0x188] sm:$0xff] }
0x1b56   : > { %7877 = vmatpush1.bf16.msra.mxu1 %v7876_v61  ;;  %v7888_v9 = vpack.c.bf16 %v6693_v8, %v6692_v14  ;;  %v6702_v61 = vld [vmem:[%s10560_s21 + $0x1d0] sm:$0xff] }
0x1b57   : > { %7878 = vmatprep.subr.bf16.mxu1 %v8324_v46 }
0x1b59   : > { %5339 = vrot.lane.b32.xlu1 %v5332_v17, %s10619_s20  ;;  %5318 = vrot.lane.b32.xlu0 %v5311_v18, %s10622_s22  ;;  %v7891_v17 = vpack.c.bf16 %v6695_v50, %v6694_v36  ;;  %v6696_v18 = vld [vmem:[%s10560_s21 + $0x1a0] sm:$0xff] }
0x1b5a   : > { %v7894_v22 = vpack.c.bf16 %v6697_v7, %v6696_v18 }
0x1b5d   : > { %5320 = vrot.lane.b32.xlu1 %v5313_v16, %s10622_s22  ;;  %5299 = vrot.lane.b32.xlu0 %v5292_v32, %s10618_s23  ;;  %v6698_v16 = vld [vmem:[%s10560_s21 + $0x1b0] sm:$0xff]  ;;  %v6699_v32 = vld [vmem:[%s10560_s21 + $0x1b8] sm:$0xff] }
0x1b5e   : > { %v7897_v23 = vpack.c.bf16 %v6699_v32, %v6698_v16 }
0x1b61   : > { %5341 = vrot.lane.b32.xlu0 %v5334_v25, %s10619_s20  ;;  %v6681_v25 = vld [vmem:[%s10623_s4 + $0x1] sm:$0x1] }
0x1bc3   : > { %v8130_v19 = vpop.permute.xlu1 %8129  ;;  %v8125_v26 = vpop.permute.xlu0 %8124 }
0x1bc4   : > { %v8126_v28 = vunpack.i.l.bf16 %v8125_v26  ;;  %v8131_v29 = vunpack.i.l.bf16 %v8130_v19  ;;  %v8127_v10 = vunpack.i.h.bf16 %v8125_v26  ;;  %v8132_v47 = vunpack.i.h.bf16 %v8130_v19  ;;  %v6676_v26 = vld [vmem:[%s10624_s1 + $0x1] ss:$0 sm:$0xff] }
0x1bc5   : > { %v5469_v19 = vmul.f32 0.999995, %v6681_v25 }
0x1bc6   : > { %v5356_v43 = vsel %vm859_vm0, %v9951_v39, %v8126_v28  ;;  %v5357_v3 = vsel %vm859_vm0, %v9960_v0, %v8127_v10  ;;  %v5351_v39 = vsel %vm2304_vm3, %v5348_v42, %v5350_v35  ;;  %v5353_v0 = vsel %vm2304_vm3, %v5350_v35, %v5352_v44 }
0x1bc7   : > { %v5298_v21 = vpop.permute.xlu1 %5297  ;;  %v8135_v30 = vpop.permute.xlu0 %8134  ;;  %v5360_v40 = vsel %vm2470_vm10, %v5356_v43, %v8131_v29  ;;  %v5361_v55 = vsel %vm2470_vm10, %v5357_v3, %v8132_v47  ;;  %v5474_v28 = vrot.slane %v5469_v19, %v9941_v24 }
0x1bc8   : > { %v8136_v1 = vunpack.i.l.bf16 %v8135_v30  ;;  %v8137_v41 = vunpack.i.h.bf16 %v8135_v30  ;;  %v5358_v11 = vsel %vm859_vm0, %v9977_v27, %v5298_v21  ;;  %v5355_v27 = vsel %vm2304_vm3, %v5352_v44, %v5354_v49  ;;  %v6683_v21 = vld [vmem:[%s10625_s24 + $0x1] ss:$0 sm:$0xff] }
0x1bca   : > { %v5364_v58 = vsel %vm2475_vm11, %v5360_v40, %v8136_v1  ;;  %v5365_v48 = vsel %vm2475_vm11, %v5361_v55, %v8137_v41 }
0x1bcb   : > { %v5319_v2 = vpop.permute.xlu0 %5318  ;;  %5447 = vmatmul.mubr.f32.vlgmr.msra.gmra.mrb[80].mxu0 %v5364_v58  ;;  %v5340_v13 = vpop.permute.xlu1 %5339 }
0x1bcc   : > { %6678 = vmatprep.mubr.msk.f32.mxu0 %vm859_vm0, %v5351_v39  ;;  %v5362_v6 = vsel %vm2470_vm10, %v5358_v11, %v5319_v2 }
0x1bcd   : > { %v5366_v15 = vsel %vm2475_vm11, %v5362_v6, %v5340_v13 }
0x1bcf   : > { %v5300_v59 = vpop.permute.xlu0 %5299  ;;  %5452 = vmatmul.mubr.f32.gmra.mrb[82].mxu0 %v5365_v48  ;;  %v5321_v42 = vpop.permute.xlu1 %5320 }
0x1bd0   : > { %6679 = vmatprep.mubr.msk.f32.mxu0 %vm859_vm0, %v5353_v0  ;;  %v5359_v45 = vsel %vm859_vm0, %v9992_v37, %v5300_v59  ;;  %v7879_v37 = vpack.c.bf16 %v6687_v62, %v6686_v51  ;;  %v6703_v62 = vld [vmem:[%s10560_s21 + $0x1d8] sm:$0xff] }
0x1bd1   : > { %v5363_v63 = vsel %vm2470_vm10, %v5359_v45, %v5321_v42  ;;  %v7903_v4 = vpack.c.bf16 %v6703_v62, %v6702_v61 }
0x1bd2   : > { %7880 = vmatpush1.bf16.msra.mxu1 %v7879_v37 }
0x1bd3   : > { %v5342_v53 = vpop.permute.xlu0 %5341  ;;  %5457 = vmatmul.mubr.f32.gmra.mrb[84].mxu0 %v5366_v15  ;;  %7881 = vmatprep.subr.bf16.mxu1 %v8324_v46 }
0x1bd4   : > { %6680 = vmatprep.mubr.msk.f32.mxu0 %vm859_vm0, %v5355_v27  ;;  %v5367_v56 = vsel %vm2475_vm11, %v5363_v63, %v5342_v53  ;;  %v6700_v53 = vld [vmem:[%s10560_s21 + $0x1c0] sm:$0xff]  ;;  %v6701_v27 = vld [vmem:[%s10560_s21 + $0x1c8] sm:$0xff] }
0x1bd6   : > { %7883 = vmatpush1.bf16.msra.mxu1 %v7882_v57 }
0x1bd7   : > { %5462 = vmatmul.mubr.f32.gmra.mrb[86].mxu0 %v5367_v56  ;;  %7884 = vmatprep.subr.bf16.mxu1 %v8324_v46  ;;  %v7900_v56 = vpack.c.bf16 %v6701_v27, %v6700_v53 }
0x1bda   : > { %7886 = vmatpush1.bf16.msra.mxu1 %v7885_v38 }
0x1bdb   : > { %7887 = vmatprep.subr.bf16.mxu1 %v8324_v46 }
0x1bde   : > { %7889 = vmatpush1.bf16.msra.mxu1 %v7888_v9 }
0x1bdf   : > { %7890 = vmatprep.subr.bf16.mxu1 %v8324_v46 }
0x1be2   : > { %7892 = vmatpush1.bf16.msra.mxu1 %v7891_v17 }
0x1be3   : > { %7893 = vmatprep.subr.bf16.mxu1 %v8324_v46 }
0x1be6   : > { %7895 = vmatpush1.bf16.msra.mxu1 %v7894_v22 }
0x1be7   : > { %7896 = vmatprep.subr.bf16.mxu1 %v8324_v46 }
0x1bea   : > { %7898 = vmatpush1.bf16.msra.mxu1 %v7897_v23 }
0x1beb   : > { %7899 = vmatprep.subr.bf16.mxu1 %v8324_v46 }
0x1bee   : > { %7901 = vmatpush1.bf16.msra.mxu1 %v7900_v56 }
0x1bef   : > { %7902 = vmatprep.subr.bf16.mxu1 %v8324_v46 }
0x1bf2   : > { %7904 = vmatpush1.bf16.msra.mxu1 %v7903_v4 }
0x1bf3   : > { %7935 = vmatprep.subr.bf16.mxu1 %v8324_v46 }
0x1c9e   : > { %v5448_v29 = vpop.f32.mrb[80].mxu0 }
0x1c9f   : > { %v5449_v10 = vadd.f32 %v6676_v26, %v5448_v29  ;;  %v5450_v43 = vpop.f32.mrb[81].mxu0 }
0x1ca1   : > { %v5476_v30 = vmul.f32 %v5474_v28, %v5449_v10 }
0x1ca2   : > { %v5453_v35 = vpop.f32.mrb[82].mxu0 }
0x1ca3   : > { %v5488_v1 = vadd.f32 %v6683_v21, %v5476_v30  ;;  %v5454_v47 = vadd.f32 %v6676_v26, %v5453_v35  ;;  %v5455_v40 = vpop.f32.mrb[83].mxu0 }
0x1ca5   : > { %8287 = vtanh.f32 %v5488_v1  ;;  %v5477_v41 = vmul.f32 %v5474_v28, %v5454_v47 }
0x1ca6   : > { %v5458_v58 = vpop.f32.mrb[84].mxu0 }
0x1ca7   : > { %v5489_v3 = vadd.f32 %v6683_v21, %v5477_v41  ;;  %v5459_v2 = vadd.f32 %v6676_v26, %v5458_v58  ;;  %v5460_v39 = vpop.f32.mrb[85].mxu0 }
0x1ca9   : > { %8289 = vtanh.f32 %v5489_v3  ;;  %v5478_v44 = vmul.f32 %v5474_v28, %v5459_v2 }
0x1caa   : > { %v5463_v13 = vpop.f32.mrb[86].mxu0 }
0x1cab   : > { %v5490_v55 = vadd.f32 %v6683_v21, %v5478_v44  ;;  %v5464_v11 = vadd.f32 %v6676_v26, %v5463_v13  ;;  %v5465_v48 = vpop.f32.mrb[87].mxu0 }
0x1cad   : > { %8291 = vtanh.f32 %v5490_v55  ;;  %v5479_v6 = vmul.f32 %v5474_v28, %v5464_v11 }
0x1caf   : > { %v8288_v59 = vpop.eup %8287  ;;  %v5491_v0 = vadd.f32 %v6683_v21, %v5479_v6 }
0x1cb0   : > { %v5523_v49 = vrot.slane %v8288_v59, 6 }
0x1cb1   : > { %8293 = vtanh.f32 %v5491_v0 }
0x1cb2   : > { %v10109_v45 = vsel %vm2422_vm9, 0.0, %v5523_v49 }
0x1cb3   : > { %v8290_v42 = vpop.eup %8289  ;;  %v5602_v5 = vrot.slane %v10109_v45, 4  ;;  %v5560_v38 = vrot.slane %v10109_v45, 2  ;;  %v5539_v9 = vrot.slane %v10109_v45, 1  ;;  %v5581_v28 = vrot.slane %v10109_v45, 3 }
0x1cb4   : > { %v5524_v15 = vrot.slane %v8290_v42, 6 }
0x1cb6   : > { %v10118_v63 = vsel %vm2422_vm9, %v5523_v49, %v5524_v15 }
0x1cb7   : > { %v8292_v54 = vpop.eup %8291  ;;  %v5603_v51 = vrot.slane %v10118_v63, 4  ;;  %v5561_v57 = vrot.slane %v10118_v63, 2  ;;  %v5540_v60 = vrot.slane %v10118_v63, 1  ;;  %v5582_v18 = vrot.slane %v10118_v63, 3 }
0x1cb8   : > { %v5526_v37 = vrot.slane %v8292_v54, 6 }
0x1cb9   : > { %v5604_v12 = vsel %vm2304_vm3, %v5602_v5, %v5603_v51  ;;  %v5562_v7 = vsel %vm2343_vm8, %v5560_v38, %v5561_v57  ;;  %v5541_v16 = vsel %vm2321_vm4, %v5539_v9, %v5540_v60  ;;  %v5583_v10 = vsel %vm2365_vm6, %v5581_v28, %v5582_v18  ;;  %v6719_v28 = vld [vmem:[%s10560_s21 + $0x210] sm:$0xff] }
0x1cba   : > { %v10135_v52 = vsel %vm2422_vm9, %v5524_v15, %v5526_v37  ;;  %6706 = vmatprep.mubr.msk.f32.mxu1 %vm859_vm0, %v5604_v12 }
0x1cbb   : > { %v8294_v14 = vpop.eup %8293  ;;  %v5563_v8 = vrot.slane %v10135_v52, 2  ;;  %v5542_v36 = vrot.slane %v10135_v52, 1  ;;  %v5584_v50 = vrot.slane %v10135_v52, 3  ;;  %v5605_v42 = vrot.slane %v10135_v52, 4 }
0x1cbc   : > { %v5528_v17 = vrot.slane %v8294_v14, 6 }
0x1cbd   : > { %v5564_v22 = vsel %vm2343_vm8, %v5561_v57, %v5563_v8  ;;  %v5543_v32 = vsel %vm2321_vm4, %v5540_v60, %v5542_v36  ;;  %v5585_v29 = vsel %vm2365_vm6, %v5582_v18, %v5584_v50  ;;  %v6713_v18 = vld [vmem:[%s10560_s21 + $0x1e0] sm:$0xff] }
0x1cbe   : > { %v10150_v23 = vsel %vm2422_vm9, %v5526_v37, %v5528_v17  ;;  %v8143_v25 = vpack.i.bf16 %v5564_v22, %v5562_v7  ;;  %v8138_v19 = vpack.i.bf16 %v5543_v32, %v5541_v16  ;;  %v8148_v43 = vpack.i.bf16 %v5585_v29, %v5583_v10  ;;  %v6714_v7 = vld [vmem:[%s10560_s21 + $0x1e8] sm:$0xff]  ;;  %v6715_v22 = vld [vmem:[%s10560_s21 + $0x1f0] sm:$0xff]  ;;  %v6716_v32 = vld [vmem:[%s10560_s21 + $0x1f8] sm:$0xff] }
0x1cbf   : > { %v5544_v26 = vrot.slane %v10150_v23, 1  ;;  %v5586_v30 = vrot.slane %v10150_v23, 3  ;;  %v5565_v35 = vrot.slane %v10150_v23, 2  ;;  %v5536_v1 = vsel %vm2422_vm9, %v5528_v17, 0.0  ;;  %v6720_v29 = vld [vmem:[%s10560_s21 + $0x218] sm:$0xff] }
0x1cc0   : > { %8144 = vrot.lane.b32.xlu0 %v8143_v25, %s10622_s22  ;;  %8139 = vrot.lane.b32.xlu1 %v8138_v19, %s10618_s23  ;;  %v5567_v41 = vrot.slane %v5536_v1, 2  ;;  %v5546_v58 = vrot.slane %v5536_v1, 1  ;;  %v5588_v39 = vrot.slane %v5536_v1, 3  ;;  %v5607_v62 = vrot.slane %v10150_v23, 4  ;;  %v6717_v25 = vld [vmem:[%s10560_s21 + $0x200] sm:$0xff]  ;;  %v6718_v19 = vld [vmem:[%s10560_s21 + $0x208] sm:$0xff] }
0x1cc1   : > { %v5545_v21 = vsel %vm2321_vm4, %v5542_v36, %v5544_v26  ;;  %v5587_v47 = vsel %vm2365_vm6, %v5584_v50, %v5586_v30  ;;  %v5566_v40 = vsel %vm2343_vm8, %v5563_v8, %v5565_v35  ;;  %v5609_v14 = vrot.slane %v5536_v1, 4  ;;  %v6724_v1 = vld [vmem:[%s10560_s21 + $0x238] sm:$0xff] }
0x1cc2   : > { %v5568_v3 = vsel %vm2343_vm8, %v5565_v35, %v5567_v41  ;;  %v5547_v2 = vsel %vm2321_vm4, %v5544_v26, %v5546_v58  ;;  %v5589_v44 = vsel %vm2365_vm6, %v5586_v30, %v5588_v39  ;;  %v7906_v16 = vpack.c.bf16 %v6714_v7, %v6713_v18  ;;  %v6723_v35 = vld [vmem:[%s10560_s21 + $0x230] sm:$0xff]  ;;  %v6726_v41 = vld [vmem:[%s10560_s21 + $0x248] sm:$0xff] }
0x1cc3   : > { %v7912_v26 = vpack.c.bf16 %v6718_v19, %v6717_v25  ;;  %v7915_v10 = vpack.c.bf16 %v6720_v29, %v6719_v28 }
0x1cc4   : > { %5552 = vrot.lane.b32.xlu0 %v5545_v21, %s10618_s23  ;;  %8149 = vrot.lane.b32.xlu1 %v8148_v43, %s10619_s20  ;;  %v6721_v43 = vld [vmem:[%s10560_s21 + $0x220] sm:$0xff]  ;;  %v6722_v21 = vld [vmem:[%s10560_s21 + $0x228] sm:$0xff] }
0x1cc5   : > { %7907 = vmatpush1.bf16.msra.mxu0 %v7906_v16  ;;  %v7918_v30 = vpack.c.bf16 %v6722_v21, %v6721_v43  ;;  %v6731_v16 = vld [vmem:[%s10560_s21 + $0x270] sm:$0xff] }
0x1cc6   : > { %7908 = vmatprep.subr.bf16.mxu0 %v8324_v46 }
0x1cc8   : > { %5594 = vrot.lane.b32.xlu0 %v5587_v47, %s10619_s20  ;;  %5573 = vrot.lane.b32.xlu1 %v5566_v40, %s10622_s22  ;;  %v7921_v47 = vpack.c.bf16 %v6724_v1, %v6723_v35  ;;  %v6725_v40 = vld [vmem:[%s10560_s21 + $0x240] sm:$0xff] }
0x1cc9   : > { %v7924_v58 = vpack.c.bf16 %v6726_v41, %v6725_v40 }
0x1ccc   : > { %5575 = vrot.lane.b32.xlu0 %v5568_v3, %s10622_s22  ;;  %5554 = vrot.lane.b32.xlu1 %v5547_v2, %s10618_s23  ;;  %v6727_v3 = vld [vmem:[%s10560_s21 + $0x250] sm:$0xff]  ;;  %v6728_v2 = vld [vmem:[%s10560_s21 + $0x258] sm:$0xff] }
0x1ccd   : > { %v7927_v39 = vpack.c.bf16 %v6728_v2, %v6727_v3 }
0x1cd0   : > { %5596 = vrot.lane.b32.xlu1 %v5589_v44, %s10619_s20  ;;  %v6710_v44 = vld [vmem:[%s10623_s4 + $0x2] sm:$0x1] }
0x1d32   : > { %v8145_v13 = vpop.permute.xlu0 %8144  ;;  %v8140_v55 = vpop.permute.xlu1 %8139 }
0x1d33   : > { %v8141_v11 = vunpack.i.l.bf16 %v8140_v55  ;;  %v8146_v48 = vunpack.i.l.bf16 %v8145_v13  ;;  %v8142_v6 = vunpack.i.h.bf16 %v8140_v55  ;;  %v8147_v53 = vunpack.i.h.bf16 %v8145_v13  ;;  %v6705_v55 = vld [vmem:[%s10624_s1 + $0x2] ss:$0 sm:$0xff] }
0x1d34   : > { %v5724_v13 = vmul.f32 0.999995, %v6710_v44 }
0x1d35   : > { %v5611_v59 = vsel %vm859_vm0, %v10109_v45, %v8141_v11  ;;  %v5612_v5 = vsel %vm859_vm0, %v10118_v63, %v8142_v6  ;;  %v5606_v45 = vsel %vm2304_vm3, %v5603_v51, %v5605_v42  ;;  %v5608_v63 = vsel %vm2304_vm3, %v5605_v42, %v5607_v62 }
0x1d36   : > { %v5553_v0 = vpop.permute.xlu0 %5552  ;;  %v8150_v49 = vpop.permute.xlu1 %8149  ;;  %v5615_v27 = vsel %vm2470_vm10, %v5611_v59, %v8146_v48  ;;  %v5616_v4 = vsel %vm2470_vm10, %v5612_v5, %v8147_v53  ;;  %v5729_v11 = vrot.slane %v5724_v13, %v9941_v24 }
0x1d37   : > { %v8151_v15 = vunpack.i.l.bf16 %v8150_v49  ;;  %v8152_v56 = vunpack.i.h.bf16 %v8150_v49  ;;  %v5613_v12 = vsel %vm859_vm0, %v10135_v52, %v5553_v0  ;;  %v5610_v52 = vsel %vm2304_vm3, %v5607_v62, %v5609_v14  ;;  %v6712_v0 = vld [vmem:[%s10625_s24 + $0x2] ss:$0 sm:$0xff] }
0x1d39   : > { %v5619_v54 = vsel %vm2475_vm11, %v5615_v27, %v8151_v15  ;;  %v5620_v57 = vsel %vm2475_vm11, %v5616_v4, %v8152_v56 }
0x1d3a   : > { %v5574_v61 = vpop.permute.xlu1 %5573  ;;  %5702 = vmatmul.mubr.f32.vlgmr.msra.gmra.mrb[52].mxu1 %v5619_v54  ;;  %v5595_v37 = vpop.permute.xlu0 %5594 }
0x1d3b   : > { %6707 = vmatprep.mubr.msk.f32.mxu1 %vm859_vm0, %v5606_v45  ;;  %v5617_v60 = vsel %vm2470_vm10, %v5613_v12, %v5574_v61 }
0x1d3c   : > { %v5621_v9 = vsel %vm2475_vm11, %v5617_v60, %v5595_v37 }
0x1d3e   : > { %v5555_v38 = vpop.permute.xlu1 %5554  ;;  %5707 = vmatmul.mubr.f32.gmra.mrb[54].mxu1 %v5620_v57  ;;  %v5576_v51 = vpop.permute.xlu0 %5575 }
0x1d3f   : > { %6708 = vmatprep.mubr.msk.f32.mxu1 %vm859_vm0, %v5608_v63  ;;  %v5614_v8 = vsel %vm859_vm0, %v10150_v23, %v5555_v38  ;;  %v7909_v23 = vpack.c.bf16 %v6716_v32, %v6715_v22  ;;  %v6732_v32 = vld [vmem:[%s10560_s21 + $0x278] sm:$0xff] }
0x1d40   : > { %v5618_v50 = vsel %vm2470_vm10, %v5614_v8, %v5576_v51  ;;  %v7933_v25 = vpack.c.bf16 %v6732_v32, %v6731_v16 }
0x1d41   : > { %7910 = vmatpush1.bf16.msra.mxu0 %v7909_v23 }
0x1d42   : > { %v5597_v36 = vpop.permute.xlu1 %5596  ;;  %5712 = vmatmul.mubr.f32.gmra.mrb[56].mxu1 %v5621_v9  ;;  %7911 = vmatprep.subr.bf16.mxu0 %v8324_v46 }
0x1d43   : > { %6709 = vmatprep.mubr.msk.f32.mxu1 %vm859_vm0, %v5610_v52  ;;  %v5622_v17 = vsel %vm2475_vm11, %v5618_v50, %v5597_v36  ;;  %v6729_v36 = vld [vmem:[%s10560_s21 + $0x260] sm:$0xff]  ;;  %v6730_v52 = vld [vmem:[%s10560_s21 + $0x268] sm:$0xff] }
0x1d45   : > { %7913 = vmatpush1.bf16.msra.mxu0 %v7912_v26 }
0x1d46   : > { %5717 = vmatmul.mubr.f32.gmra.mrb[58].mxu1 %v5622_v17  ;;  %7914 = vmatprep.subr.bf16.mxu0 %v8324_v46  ;;  %v7930_v17 = vpack.c.bf16 %v6730_v52, %v6729_v36 }
0x1d49   : > { %7916 = vmatpush1.bf16.msra.mxu0 %v7915_v10 }
0x1d4a   : > { %7917 = vmatprep.subr.bf16.mxu0 %v8324_v46 }
0x1d4d   : > { %7919 = vmatpush1.bf16.msra.mxu0 %v7918_v30 }
0x1d4e   : > { %7920 = vmatprep.subr.bf16.mxu0 %v8324_v46 }
0x1d51   : > { %7922 = vmatpush1.bf16.msra.mxu0 %v7921_v47 }
0x1d52   : > { %7923 = vmatprep.subr.bf16.mxu0 %v8324_v46 }
0x1d55   : > { %7925 = vmatpush1.bf16.msra.mxu0 %v7924_v58 }
0x1d56   : > { %7926 = vmatprep.subr.bf16.mxu0 %v8324_v46 }
0x1d59   : > { %7928 = vmatpush1.bf16.msra.mxu0 %v7927_v39 }
0x1d5a   : > { %7929 = vmatprep.subr.bf16.mxu0 %v8324_v46 }
0x1d5d   : > { %7931 = vmatpush1.bf16.msra.mxu0 %v7930_v17 }
0x1d5e   : > { %7932 = vmatprep.subr.bf16.mxu0 %v8324_v46 }
0x1d61   : > { %7934 = vmatpush1.bf16.msra.mxu0 %v7933_v25 }
0x1e0d   : > { %v5703_v48 = vpop.f32.mrb[52].mxu1 }
0x1e0e   : > { %v5704_v6 = vadd.f32 %v6705_v55, %v5703_v48  ;;  %v5705_v59 = vpop.f32.mrb[53].mxu1 }
0x1e10   : > { %v5731_v49 = vmul.f32 %v5729_v11, %v5704_v6 }
0x1e11   : > { %v5708_v42 = vpop.f32.mrb[54].mxu1 }
0x1e12   : > { %v5743_v15 = vadd.f32 %v6712_v0, %v5731_v49  ;;  %v5709_v53 = vadd.f32 %v6705_v55, %v5708_v42  ;;  %v5710_v27 = vpop.f32.mrb[55].mxu1 }
0x1e14   : > { %8295 = vtanh.f32 %v5743_v15  ;;  %v5732_v56 = vmul.f32 %v5729_v11, %v5709_v53 }
0x1e15   : > { %v5713_v54 = vpop.f32.mrb[56].mxu1 }
0x1e16   : > { %v5744_v5 = vadd.f32 %v6712_v0, %v5732_v56  ;;  %v5714_v61 = vadd.f32 %v6705_v55, %v5713_v54  ;;  %v5715_v45 = vpop.f32.mrb[57].mxu1 }
0x1e18   : > { %8297 = vtanh.f32 %v5744_v5  ;;  %v5733_v62 = vmul.f32 %v5729_v11, %v5714_v61 }
0x1e19   : > { %v5718_v37 = vpop.f32.mrb[58].mxu1 }
0x1e1a   : > { %v5745_v4 = vadd.f32 %v6712_v0, %v5733_v62  ;;  %v5719_v12 = vadd.f32 %v6705_v55, %v5718_v37  ;;  %v5720_v57 = vpop.f32.mrb[59].mxu1 }
0x1e1c   : > { %8299 = vtanh.f32 %v5745_v4  ;;  %v5734_v60 = vmul.f32 %v5729_v11, %v5719_v12 }
0x1e1e   : > { %v8296_v38 = vpop.eup %8295  ;;  %v5746_v63 = vadd.f32 %v6712_v0, %v5734_v60 }
0x1e1f   : > { %v5778_v14 = vrot.slane %v8296_v38, 6 }
0x1e20   : > { %8301 = vtanh.f32 %v5746_v63 }
0x1e21   : > { %v10267_v8 = vsel %vm2422_vm9, 0.0, %v5778_v14 }
0x1e22   : > { %v8298_v51 = vpop.eup %8297  ;;  %v5857_v7 = vrot.slane %v10267_v8, 4  ;;  %v5815_v10 = vrot.slane %v10267_v8, 2  ;;  %v5794_v30 = vrot.slane %v10267_v8, 1  ;;  %v5836_v11 = vrot.slane %v10267_v8, 3 }
0x1e23   : > { %v5779_v9 = vrot.slane %v8298_v51, 6 }
0x1e25   : > { %v10276_v50 = vsel %vm2422_vm9, %v5778_v14, %v5779_v9 }
0x1e26   : > { %v8300_v18 = vpop.eup %8299  ;;  %v5858_v22 = vrot.slane %v10276_v50, 4  ;;  %v5816_v26 = vrot.slane %v10276_v50, 2  ;;  %v5795_v28 = vrot.slane %v10276_v50, 1  ;;  %v5837_v40 = vrot.slane %v10276_v50, 3 }
0x1e27   : > { %v5781_v23 = vrot.slane %v8300_v18, 6 }
0x1e28   : > { %v5859_v19 = vsel %vm2304_vm3, %v5857_v7, %v5858_v22  ;;  %v5817_v41 = vsel %vm2343_vm8, %v5815_v10, %v5816_v26  ;;  %v5796_v3 = vsel %vm2321_vm4, %v5794_v30, %v5795_v28  ;;  %v5838_v6 = vsel %vm2365_vm6, %v5836_v11, %v5837_v40  ;;  %v6748_v11 = vld [vmem:[%s10560_s21 + $0x2b0] sm:$0xff] }
0x1e29   : > { %v10293_v29 = vsel %vm2422_vm9, %v5779_v9, %v5781_v23  ;;  %6735 = vmatprep.mubr.msk.f32.mxu0 %vm859_vm0, %v5859_v19 }
0x1e2a   : > { %v8302_v43 = vpop.eup %8301  ;;  %v5818_v21 = vrot.slane %v10293_v29, 2  ;;  %v5797_v35 = vrot.slane %v10293_v29, 1  ;;  %v5839_v1 = vrot.slane %v10293_v29, 3  ;;  %v5860_v51 = vrot.slane %v10293_v29, 4 }
0x1e2b   : > { %v5783_v47 = vrot.slane %v8302_v43, 6 }
0x1e2c   : > { %v5819_v58 = vsel %vm2343_vm8, %v5816_v26, %v5818_v21  ;;  %v5798_v2 = vsel %vm2321_vm4, %v5795_v28, %v5797_v35  ;;  %v5840_v48 = vsel %vm2365_vm6, %v5837_v40, %v5839_v1  ;;  %v6742_v40 = vld [vmem:[%s10560_s21 + $0x280] sm:$0xff] }
0x1e2d   : > { %v10307_v39 = vsel %vm2422_vm9, %v5781_v23, %v5783_v47  ;;  %v8158_v44 = vpack.i.bf16 %v5819_v58, %v5817_v41  ;;  %v8153_v13 = vpack.i.bf16 %v5798_v2, %v5796_v3  ;;  %v8163_v59 = vpack.i.bf16 %v5840_v48, %v5838_v6  ;;  %v6743_v41 = vld [vmem:[%s10560_s21 + $0x288] sm:$0xff]  ;;  %v6744_v58 = vld [vmem:[%s10560_s21 + $0x290] sm:$0xff]  ;;  %v6745_v2 = vld [vmem:[%s10560_s21 + $0x298] sm:$0xff] }
0x1e2e   : > { %v5799_v55 = vrot.slane %v10307_v39, 1  ;;  %v5841_v49 = vrot.slane %v10307_v39, 3  ;;  %v5820_v42 = vrot.slane %v10307_v39, 2  ;;  %v5791_v15 = vsel %vm2422_vm9, %v5783_v47, 0.0  ;;  %v6749_v48 = vld [vmem:[%s10560_s21 + $0x2b8] sm:$0xff] }
0x1e2f   : > { %8159 = vrot.lane.b32.xlu1 %v8158_v44, %s10622_s22  ;;  %8154 = vrot.lane.b32.xlu0 %v8153_v13, %s10618_s23  ;;  %v5822_v56 = vrot.slane %v5791_v15, 2  ;;  %v5801_v54 = vrot.slane %v5791_v15, 1  ;;  %v5843_v45 = vrot.slane %v5791_v15, 3  ;;  %v5862_v32 = vrot.slane %v10307_v39, 4  ;;  %v6746_v44 = vld [vmem:[%s10560_s21 + $0x2a0] sm:$0xff]  ;;  %v6747_v13 = vld [vmem:[%s10560_s21 + $0x2a8] sm:$0xff] }
0x1e30   : > { %v5800_v0 = vsel %vm2321_vm4, %v5797_v35, %v5799_v55  ;;  %v5842_v53 = vsel %vm2365_vm6, %v5839_v1, %v5841_v49  ;;  %v5821_v27 = vsel %vm2343_vm8, %v5818_v21, %v5820_v42  ;;  %v5864_v43 = vrot.slane %v5791_v15, 4  ;;  %v6753_v15 = vld [vmem:[%s10560_s21 + $0x2d8] sm:$0xff] }
0x1e31   : > { %v5823_v5 = vsel %vm2343_vm8, %v5820_v42, %v5822_v56  ;;  %v5802_v61 = vsel %vm2321_vm4, %v5799_v55, %v5801_v54  ;;  %v5844_v62 = vsel %vm2365_vm6, %v5841_v49, %v5843_v45  ;;  %v7936_v3 = vpack.c.bf16 %v6743_v41, %v6742_v40  ;;  %v6752_v42 = vld [vmem:[%s10560_s21 + $0x2d0] sm:$0xff]  ;;  %v6755_v56 = vld [vmem:[%s10560_s21 + $0x2e8] sm:$0xff] }
0x1e32   : > { %v7942_v55 = vpack.c.bf16 %v6747_v13, %v6746_v44  ;;  %v7945_v6 = vpack.c.bf16 %v6749_v48, %v6748_v11 }
0x1e33   : > { %5807 = vrot.lane.b32.xlu1 %v5800_v0, %s10618_s23  ;;  %8164 = vrot.lane.b32.xlu0 %v8163_v59, %s10619_s20  ;;  %v6750_v59 = vld [vmem:[%s10560_s21 + $0x2c0] sm:$0xff]  ;;  %v6751_v0 = vld [vmem:[%s10560_s21 + $0x2c8] sm:$0xff] }
0x1e34   : > { %7937 = vmatpush1.bf16.msra.mxu1 %v7936_v3  ;;  %v7948_v49 = vpack.c.bf16 %v6751_v0, %v6750_v59  ;;  %v6760_v3 = vld [vmem:[%s10560_s21 + $0x310] sm:$0xff] }
0x1e35   : > { %7938 = vmatprep.subr.bf16.mxu1 %v8324_v46 }
0x1e37   : > { %5849 = vrot.lane.b32.xlu1 %v5842_v53, %s10619_s20  ;;  %5828 = vrot.lane.b32.xlu0 %v5821_v27, %s10622_s22  ;;  %v7951_v53 = vpack.c.bf16 %v6753_v15, %v6752_v42  ;;  %v6754_v27 = vld [vmem:[%s10560_s21 + $0x2e0] sm:$0xff] }
0x1e38   : > { %v7954_v54 = vpack.c.bf16 %v6755_v56, %v6754_v27 }
0x1e3b   : > { %5830 = vrot.lane.b32.xlu1 %v5823_v5, %s10622_s22  ;;  %5809 = vrot.lane.b32.xlu0 %v5802_v61, %s10618_s23  ;;  %v6756_v5 = vld [vmem:[%s10560_s21 + $0x2f0] sm:$0xff]  ;;  %v6757_v61 = vld [vmem:[%s10560_s21 + $0x2f8] sm:$0xff] }
0x1e3c   : > { %v7957_v45 = vpack.c.bf16 %v6757_v61, %v6756_v5 }
0x1e3f   : > { %5851 = vrot.lane.b32.xlu0 %v5844_v62, %s10619_s20  ;;  %v6739_v62 = vld [vmem:[%s10623_s4 + $0x3] sm:$0x1] }
0x1ea1   : > { %v8160_v37 = vpop.permute.xlu1 %8159  ;;  %v8155_v4 = vpop.permute.xlu0 %8154 }
0x1ea2   : > { %v8156_v12 = vunpack.i.l.bf16 %v8155_v4  ;;  %v8161_v57 = vunpack.i.l.bf16 %v8160_v37  ;;  %v8157_v60 = vunpack.i.h.bf16 %v8155_v4  ;;  %v8162_v36 = vunpack.i.h.bf16 %v8160_v37  ;;  %v6734_v4 = vld [vmem:[%s10624_s1 + $0x3] ss:$0 sm:$0xff] }
0x1ea3   : > { %v5979_v37 = vmul.f32 0.999995, %v6739_v62 }
0x1ea4   : > { %v5866_v38 = vsel %vm859_vm0, %v10267_v8, %v8156_v12  ;;  %v5867_v7 = vsel %vm859_vm0, %v10276_v50, %v8157_v60  ;;  %v5861_v8 = vsel %vm2304_vm3, %v5858_v22, %v5860_v51  ;;  %v5863_v50 = vsel %vm2304_vm3, %v5860_v51, %v5862_v32 }
0x1ea5   : > { %v5808_v63 = vpop.permute.xlu1 %5807  ;;  %v8165_v14 = vpop.permute.xlu0 %8164  ;;  %v5870_v52 = vsel %vm2470_vm10, %v5866_v38, %v8161_v57  ;;  %v5871_v25 = vsel %vm2470_vm10, %v5867_v7, %v8162_v36  ;;  %v5984_v12 = vrot.slane %v5979_v37, %v9941_v24 }
0x1ea6   : > { %v8166_v9 = vunpack.i.l.bf16 %v8165_v14  ;;  %v8167_v17 = vunpack.i.h.bf16 %v8165_v14  ;;  %v5868_v19 = vsel %vm859_vm0, %v10293_v29, %v5808_v63  ;;  %v5865_v29 = vsel %vm2304_vm3, %v5862_v32, %v5864_v43  ;;  %v6741_v63 = vld [vmem:[%s10625_s24 + $0x3] ss:$0 sm:$0xff] }
0x1ea8   : > { %v5874_v18 = vsel %vm2475_vm11, %v5870_v52, %v8166_v9  ;;  %v5875_v26 = vsel %vm2475_vm11, %v5871_v25, %v8167_v17 }
0x1ea9   : > { %v5829_v16 = vpop.permute.xlu0 %5828  ;;  %5957 = vmatmul.mubr.f32.vlgmr.msra.gmra.mrb[88].mxu0 %v5874_v18  ;;  %v5850_v23 = vpop.permute.xlu1 %5849 }
0x1eaa   : > { %6736 = vmatprep.mubr.msk.f32.mxu0 %vm859_vm0, %v5861_v8  ;;  %v5872_v28 = vsel %vm2470_vm10, %v5868_v19, %v5829_v16 }
0x1eab   : > { %v5876_v30 = vsel %vm2475_vm11, %v5872_v28, %v5850_v23 }
0x1ead   : > { %v5810_v10 = vpop.permute.xlu0 %5809  ;;  %5962 = vmatmul.mubr.f32.gmra.mrb[90].mxu0 %v5875_v26  ;;  %v5831_v22 = vpop.permute.xlu1 %5830 }
0x1eae   : > { %6737 = vmatprep.mubr.msk.f32.mxu0 %vm859_vm0, %v5863_v50  ;;  %v5869_v21 = vsel %vm859_vm0, %v10307_v39, %v5810_v10  ;;  %v7939_v39 = vpack.c.bf16 %v6745_v2, %v6744_v58  ;;  %v6761_v2 = vld [vmem:[%s10560_s21 + $0x318] sm:$0xff] }
0x1eaf   : > { %v5873_v1 = vsel %vm2470_vm10, %v5869_v21, %v5831_v22  ;;  %v7963_v44 = vpack.c.bf16 %v6761_v2, %v6760_v3 }
0x1eb0   : > { %7940 = vmatpush1.bf16.msra.mxu1 %v7939_v39 }
0x1eb1   : > { %v5852_v35 = vpop.permute.xlu0 %5851  ;;  %5967 = vmatmul.mubr.f32.gmra.mrb[92].mxu0 %v5876_v30  ;;  %7941 = vmatprep.subr.bf16.mxu1 %v8324_v46 }
0x1eb2   : > { %6738 = vmatprep.mubr.msk.f32.mxu0 %vm859_vm0, %v5865_v29  ;;  %v5877_v47 = vsel %vm2475_vm11, %v5873_v1, %v5852_v35  ;;  %v6758_v35 = vld [vmem:[%s10560_s21 + $0x300] sm:$0xff]  ;;  %v6759_v29 = vld [vmem:[%s10560_s21 + $0x308] sm:$0xff] }
0x1eb4   : > { %7943 = vmatpush1.bf16.msra.mxu1 %v7942_v55 }
0x1eb5   : > { %5972 = vmatmul.mubr.f32.gmra.mrb[94].mxu0 %v5877_v47  ;;  %7944 = vmatprep.subr.bf16.mxu1 %v8324_v46  ;;  %v7960_v47 = vpack.c.bf16 %v6759_v29, %v6758_v35 }
0x1eb8   : > { %7946 = vmatpush1.bf16.msra.mxu1 %v7945_v6 }
0x1eb9   : > { %7947 = vmatprep.subr.bf16.mxu1 %v8324_v46 }
0x1ebc   : > { %7949 = vmatpush1.bf16.msra.mxu1 %v7948_v49 }
0x1ebd   : > { %7950 = vmatprep.subr.bf16.mxu1 %v8324_v46 }
0x1ec0   : > { %7952 = vmatpush1.bf16.msra.mxu1 %v7951_v53 }
0x1ec1   : > { %7953 = vmatprep.subr.bf16.mxu1 %v8324_v46 }
0x1ec4   : > { %7955 = vmatpush1.bf16.msra.mxu1 %v7954_v54 }
0x1ec5   : > { %7956 = vmatprep.subr.bf16.mxu1 %v8324_v46 }
0x1ec8   : > { %7958 = vmatpush1.bf16.msra.mxu1 %v7957_v45 }
0x1ec9   : > { %7959 = vmatprep.subr.bf16.mxu1 %v8324_v46 }
0x1ecc   : > { %7961 = vmatpush1.bf16.msra.mxu1 %v7960_v47 }
0x1ecd   : > { %7962 = vmatprep.subr.bf16.mxu1 %v8324_v46 }
0x1ed0   : > { %7964 = vmatpush1.bf16.msra.mxu1 %v7963_v44 }
0x1f7c   : > { %v5958_v57 = vpop.f32.mrb[88].mxu0 }
0x1f7d   : > { %v5959_v60 = vadd.f32 %v6734_v4, %v5958_v57  ;;  %v5960_v38 = vpop.f32.mrb[89].mxu0 }
0x1f7f   : > { %v5986_v14 = vmul.f32 %v5984_v12, %v5959_v60 }
0x1f80   : > { %v5963_v51 = vpop.f32.mrb[90].mxu0 }
0x1f81   : > { %v5998_v9 = vadd.f32 %v6741_v63, %v5986_v14  ;;  %v5964_v36 = vadd.f32 %v6734_v4, %v5963_v51  ;;  %v5965_v52 = vpop.f32.mrb[91].mxu0 }
0x1f83   : > { %8303 = vtanh.f32 %v5998_v9  ;;  %v5987_v17 = vmul.f32 %v5984_v12, %v5964_v36 }
0x1f84   : > { %v5968_v18 = vpop.f32.mrb[92].mxu0 }
0x1f85   : > { %v5999_v7 = vadd.f32 %v6741_v63, %v5987_v17  ;;  %v5969_v16 = vadd.f32 %v6734_v4, %v5968_v18  ;;  %v5970_v8 = vpop.f32.mrb[93].mxu0 }
0x1f87   : > { %8305 = vtanh.f32 %v5999_v7  ;;  %v5988_v32 = vmul.f32 %v5984_v12, %v5969_v16 }
0x1f88   : > { %v5973_v23 = vpop.f32.mrb[94].mxu0 }
0x1f89   : > { %v6000_v25 = vadd.f32 %v6741_v63, %v5988_v32  ;;  %v5974_v19 = vadd.f32 %v6734_v4, %v5973_v23  ;;  %v5975_v26 = vpop.f32.mrb[95].mxu0 }
0x1f8b   : > { %8307 = vtanh.f32 %v6000_v25  ;;  %v5989_v28 = vmul.f32 %v5984_v12, %v5974_v19 }
0x1f8d   : > { %v8304_v10 = vpop.eup %8303  ;;  %v6001_v50 = vadd.f32 %v6741_v63, %v5989_v28 }
0x1f8e   : > { %v6033_v43 = vrot.slane %v8304_v10, 6 }
0x1f8f   : > { %8309 = vtanh.f32 %v6001_v50 }
0x1f90   : > { %v10424_v21 = vsel %vm2422_vm9, 0.0, %v6033_v43 }
0x1f91   : > { %v8306_v22 = vpop.eup %8305  ;;  %v6112_v41 = vrot.slane %v10424_v21, 4  ;;  %v6070_v6 = vrot.slane %v10424_v21, 2  ;;  %v6049_v49 = vrot.slane %v10424_v21, 1  ;;  %v6091_v4 = vrot.slane %v10424_v21, 3 }
0x1f92   : > { %v6034_v30 = vrot.slane %v8306_v22, 6 }
0x1f94   : > { %v10433_v1 = vsel %vm2422_vm9, %v6033_v43, %v6034_v30 }
0x1f95   : > { %v8308_v40 = vpop.eup %8307  ;;  %v6113_v58 = vrot.slane %v10433_v1, 4  ;;  %v6071_v55 = vrot.slane %v10433_v1, 2  ;;  %v6050_v11 = vrot.slane %v10433_v1, 1  ;;  %v6092_v27 = vrot.slane %v10433_v1, 3 }
0x1f96   : > { %v6036_v39 = vrot.slane %v8308_v40, 6 }
0x1f97   : > { %v6114_v13 = vsel %vm2304_vm3, %v6112_v41, %v6113_v58  ;;  %v6072_v46 = vsel %vm2343_vm8, %v6070_v6, %v6071_v55  ;;  %v6051_v54 = vsel %vm2321_vm4, %v6049_v49, %v6050_v11  ;;  %v6093_v57 = vsel %vm2365_vm6, %v6091_v4, %v6092_v27 }
0x1f98   : > { %v10450_v48 = vsel %vm2422_vm9, %v6034_v30, %v6036_v39  ;;  %6764 = vmatprep.mubr.msk.f32.mxu1 %vm859_vm0, %v6114_v13 }
0x1f99   : > { %v8310_v59 = vpop.eup %8309  ;;  %v6073_v0 = vrot.slane %v10450_v48, 2  ;;  %v6052_v42 = vrot.slane %v10450_v48, 1  ;;  %v6094_v15 = vrot.slane %v10450_v48, 3  ;;  %v6115_v43 = vrot.slane %v10450_v48, 4 }
0x1f9a   : > { %v6038_v53 = vrot.slane %v8310_v59, 6 }
0x1f9b   : > { %v6074_v56 = vsel %vm2343_vm8, %v6071_v55, %v6073_v0  ;;  %v6053_v5 = vsel %vm2321_vm4, %v6050_v11, %v6052_v42  ;;  %v6095_v12 = vsel %vm2365_vm6, %v6092_v27, %v6094_v15 }
0x1f9c   : > { %v10464_v61 = vsel %vm2422_vm9, %v6036_v39, %v6038_v53  ;;  %v8173_v45 = vpack.i.bf16 %v6074_v56, %v6072_v46  ;;  %v8168_v62 = vpack.i.bf16 %v6053_v5, %v6051_v54  ;;  %v8178_v60 = vpack.i.bf16 %v6095_v12, %v6093_v57  ;;  %v6763_v46 = vld [vmem:[%s10624_s1 + $0x4] ss:$0 sm:$0xff] }
0x1f9d   : > { %v6054_v37 = vrot.slane %v10464_v61, 1  ;;  %v6096_v63 = vrot.slane %v10464_v61, 3  ;;  %v6075_v14 = vrot.slane %v10464_v61, 2  ;;  %v6046_v51 = vsel %vm2422_vm9, %v6038_v53, 0.0  ;;  %v6768_v53 = vld [vmem:[%s10623_s4 + $0x4] sm:$0x1] }
0x1f9e   : > { %8174 = vrot.lane.b32.xlu0 %v8173_v45, %s10622_s22  ;;  %8169 = vrot.lane.b32.xlu1 %v8168_v62, %s10618_s23  ;;  %v6077_v52 = vrot.slane %v6046_v51, 2  ;;  %v6056_v17 = vrot.slane %v6046_v51, 1  ;;  %v6098_v16 = vrot.slane %v6046_v51, 3  ;;  %v6117_v3 = vrot.slane %v10464_v61, 4  ;;  %v6770_v45 = vld [vmem:[%s10625_s24 + $0x4] ss:$0 sm:$0xff] }
0x1f9f   : > { %v6055_v38 = vsel %vm2321_vm4, %v6052_v42, %v6054_v37  ;;  %v6097_v9 = vsel %vm2365_vm6, %v6094_v15, %v6096_v63  ;;  %v6076_v36 = vsel %vm2343_vm8, %v6073_v0, %v6075_v14  ;;  %v6119_v6 = vrot.slane %v6046_v51, 4 }
0x1fa0   : > { %v6078_v18 = vsel %vm2343_vm8, %v6075_v14, %v6077_v52  ;;  %v6057_v7 = vsel %vm2321_vm4, %v6054_v37, %v6056_v17  ;;  %v6099_v8 = vsel %vm2365_vm6, %v6096_v63, %v6098_v16  ;;  %v6234_v27 = vmul.f32 0.999995, %v6768_v53 }
0x1fa2   : > { %6062 = vrot.lane.b32.xlu0 %v6055_v38, %s10618_s23  ;;  %8179 = vrot.lane.b32.xlu1 %v8178_v60, %s10619_s20  ;;  %v6239_v56 = vrot.slane %v6234_v27, %v9941_v24 }
0x1fa6   : > { %6104 = vrot.lane.b32.xlu0 %v6097_v9, %s10619_s20  ;;  %6083 = vrot.lane.b32.xlu1 %v6076_v36, %s10622_s22 }
0x1faa   : > { %6085 = vrot.lane.b32.xlu0 %v6078_v18, %s10622_s22  ;;  %6064 = vrot.lane.b32.xlu1 %v6057_v7, %s10618_s23 }
0x1fae   : > { %6106 = vrot.lane.b32.xlu1 %v6099_v8, %s10619_s20 }
0x2010   : > { %v8175_v32 = vpop.permute.xlu0 %8174  ;;  %v8170_v23 = vpop.permute.xlu1 %8169 }
0x2011   : > { %v8171_v25 = vunpack.i.l.bf16 %v8170_v23  ;;  %v8176_v19 = vunpack.i.l.bf16 %v8175_v32  ;;  %v8172_v26 = vunpack.i.h.bf16 %v8170_v23  ;;  %v8177_v30 = vunpack.i.h.bf16 %v8175_v32 }
0x2013   : > { %v6121_v28 = vsel %vm859_vm0, %v10424_v21, %v8171_v25  ;;  %v6122_v40 = vsel %vm859_vm0, %v10433_v1, %v8172_v26  ;;  %v6116_v21 = vsel %vm2304_vm3, %v6113_v58, %v6115_v43  ;;  %v6118_v1 = vsel %vm2304_vm3, %v6115_v43, %v6117_v3 }
0x2014   : > { %v6063_v10 = vpop.permute.xlu0 %6062  ;;  %v8180_v50 = vpop.permute.xlu1 %8179  ;;  %v6125_v35 = vsel %vm2470_vm10, %v6121_v28, %v8176_v19  ;;  %v6126_v39 = vsel %vm2470_vm10, %v6122_v40, %v8177_v30 }
0x2015   : > { %v8181_v22 = vunpack.i.l.bf16 %v8180_v50  ;;  %v8182_v29 = vunpack.i.h.bf16 %v8180_v50  ;;  %v6123_v44 = vsel %vm859_vm0, %v10450_v48, %v6063_v10  ;;  %v6120_v48 = vsel %vm2304_vm3, %v6117_v3, %v6119_v6 }
0x2017   : > { %v6129_v47 = vsel %vm2475_vm11, %v6125_v35, %v8181_v22  ;;  %v6130_v13 = vsel %vm2475_vm11, %v6126_v39, %v8182_v29 }
0x2018   : > { %v6084_v41 = vpop.permute.xlu1 %6083  ;;  %6212 = vmatmul.mubr.f32.vlgmr.msra.gmra.mrb[60].mxu1 %v6129_v47  ;;  %v6105_v2 = vpop.permute.xlu0 %6104 }
0x2019   : > { %6765 = vmatprep.mubr.msk.f32.mxu1 %vm859_vm0, %v6116_v21  ;;  %v6127_v55 = vsel %vm2470_vm10, %v6123_v44, %v6084_v41 }
0x201a   : > { %v6131_v0 = vsel %vm2475_vm11, %v6127_v55, %v6105_v2 }
0x201c   : > { %v6065_v11 = vpop.permute.xlu1 %6064  ;;  %6217 = vmatmul.mubr.f32.gmra.mrb[62].mxu1 %v6130_v13  ;;  %v6086_v58 = vpop.permute.xlu0 %6085 }
0x201d   : > { %6766 = vmatprep.mubr.msk.f32.mxu1 %vm859_vm0, %v6118_v1  ;;  %v6124_v59 = vsel %vm859_vm0, %v10464_v61, %v6065_v11 }
0x201e   : > { %v6128_v42 = vsel %vm2470_vm10, %v6124_v59, %v6086_v58 }
0x2020   : > { %v6107_v49 = vpop.permute.xlu1 %6106  ;;  %6222 = vmatmul.mubr.f32.gmra.mrb[64].mxu1 %v6131_v0 }
0x2021   : > { %6767 = vmatprep.mubr.msk.f32.mxu1 %vm859_vm0, %v6120_v48  ;;  %v6132_v15 = vsel %vm2475_vm11, %v6128_v42, %v6107_v49 }
0x2024   : > { %6227 = vmatmul.mubr.f32.gmra.mrb[66].mxu1 %v6132_v15 }
0x20eb   : > { %v6213_v54 = vpop.f32.mrb[60].mxu1 }
0x20ec   : > { %v6214_v5 = vadd.f32 %v6763_v46, %v6213_v54  ;;  %v6215_v61 = vpop.f32.mrb[61].mxu1 }
0x20ee   : > { %v6241_v62 = vmul.f32 %v6239_v56, %v6214_v5 }
0x20ef   : > { %v6218_v37 = vpop.f32.mrb[62].mxu1 }
0x20f0   : > { %v6253_v4 = vadd.f32 %v6770_v45, %v6241_v62  ;;  %v6219_v12 = vadd.f32 %v6763_v46, %v6218_v37  ;;  %v6220_v57 = vpop.f32.mrb[63].mxu1 }
0x20f2   : > { %v6257_v60 = vadd.f32 %v6253_v4, %v9772_v34  ;;  %v6242_v38 = vmul.f32 %v6239_v56, %v6219_v12 }
0x20f3   : > { %v6223_v24 = vpop.f32.mrb[64].mxu1 }
0x20f4   : > { %6261 = vst.msk [vmem:[%s838_s0] sm:$0xff] %vm1155_vm1, %v6257_v60  ;;  %v6254_v63 = vadd.f32 %v6770_v45, %v6242_v38  ;;  %v6224_v14 = vadd.f32 %v6763_v46, %v6223_v24  ;;  %v6225_v51 = vpop.f32.mrb[65].mxu1 }
0x20f6   : > { %v6258_v9 = vadd.f32 %v6254_v63, %v9770_v31  ;;  %v6243_v36 = vmul.f32 %v6239_v56, %v6224_v14 }
0x20f7   : > { %v6228_v52 = vpop.f32.mrb[66].mxu1 }
0x20f8   : > { %6262 = vst.msk [vmem:[%s838_s0 + $0x8] sm:$0xff] %vm1155_vm1, %v6258_v9  ;;  %v6255_v17 = vadd.f32 %v6770_v45, %v6243_v36  ;;  %v6229_v18 = vadd.f32 %v6763_v46, %v6228_v52  ;;  %v6230_v7 = vpop.f32.mrb[67].mxu1 }
0x20fa   : > { %v6259_v16 = vadd.f32 %v6255_v17, %v9800_v33  ;;  %v6244_v8 = vmul.f32 %v6239_v56, %v6229_v18 }
0x20fc   : > { %6263 = vst.msk [vmem:[%s838_s0 + $0x10] sm:$0xff] %vm1155_vm1, %v6259_v16  ;;  %v6256_v34 = vadd.f32 %v6770_v45, %v6244_v8 }
0x20fe   : > { %v6260_v32 = vadd.f32 %v6256_v34, %v9792_v20 }
0x2100   : > { %6264 = vst.msk [vmem:[%s838_s0 + $0x18] sm:$0xff] %vm1155_vm1, %v6260_v32 }
0x2101 PF: > { %s10627_s9 = sld [smem:[#allocation2_spill]] }
0x2107   : > { %s37_s27 = sadd.s32 1, %s10627_s9  }
0x2108   : > { %p34_p4 = scmp.ge.s32.totalorder %s37_s27, 4  }
0x210a   :  { %36 = sbr.rel (!%p34_p4) target bundleno = 18 (0x12), region = 214 }

</bundles_post_ra>
